<compile_context>
chip_gen: v7x
topology: tpu7x:2x2x1
jax: 0.10.0
libtpu: 0.0.40
codegen_flags: <defaults>
</compile_context>

<pallas_src>
import jax
import jax.numpy as jnp
from jax.experimental import pallas as pl
from jax.experimental.pallas import tpu as pltpu

# ---- geometry fixed by the module ------------------------------------------------
_H = _W = 50
_C_IN = 3
_C_PAD = 8            # conv1 input channels zero-padded 3 -> 8 (full sublane tile)
_C1 = 8               # conv1 out channels
_C2 = 16              # conv2 out channels
_OH1 = _OW1 = 48      # conv1 valid output
_OH2 = _OW2 = 22      # conv2 valid output
_PH2 = _PW2 = 11      # after pool2
_FLAT = _C2 * _PH2 * _PW2   # 1936
_FC1, _FC2, _FC3 = 256, 20, 3
_PAD_LANES = 128      # fc2 / fc3 widths padded to one full lane tile


# ---------------------------------------------------------------------------------
# Fused conv stage kernel: conv1 + bias + ReLU + pool -> conv2 + bias + ReLU + pool
# All intermediates stay in VMEM; one image per grid step.
# ---------------------------------------------------------------------------------
def _pool_select(n_in, n_out, parity):
    """(n_in, n_out) 0/1 matrix selecting column 2*j+parity (pooling compaction)."""
    rows = jax.lax.broadcasted_iota(jnp.int32, (n_in, n_out), 0)
    cols = jax.lax.broadcasted_iota(jnp.int32, (n_in, n_out), 1)
    return (rows == 2 * cols + parity).astype(jnp.float32)


def _conv3x3_relu_pool2x2(x, w_ref, b_ref, oh, ow, cout):
    """x: (H, Cin, W) value.  Valid 3x3 conv + bias + ReLU + 2x2 max-pool.

    Returns (oh//2, cout, ow//2) in the same (H, C, W) layout.
    """
    cin = x.shape[1]
    # In-VMEM im2col: 9 shifted slabs, concatenated on the (tile-aligned) sublane
    # axis -> (oh, 9*cin, ow).  W stays on the lane axis throughout.
    slabs = [x[kh:kh + oh, :, kw:kw + ow] for kh in range(3) for kw in range(3)]
    patches = jnp.concatenate(slabs, axis=1)                       # (oh, 9*cin, ow)

    # Single batched MXU contraction over K = 9*cin (replaces 4 small matmuls).
    wb = jnp.broadcast_to(w_ref[...], (oh, cout, 9 * cin))         # hoisted once
    y = jnp.einsum("hok,hkw->how", wb, patches,
                   preferred_element_type=jnp.float32)             # (oh, cout, ow)
    y = jnp.maximum(y + b_ref[...], 0.0)                           # bias + ReLU

    # 2x2 max-pool.  H (leading dim): free reshape split + max.
    ph, pw = oh // 2, ow // 2
    y = y.reshape(ph, 2, cout, ow)
    y = jnp.maximum(y[:, 0], y[:, 1])                              # (ph, cout, ow)

    # W (lane dim): 0/1 selection matmuls -> lane-dense, no strided lane access.
    s_even = jnp.broadcast_to(_pool_select(ow, pw, 0), (ph, ow, pw))
    s_odd = jnp.broadcast_to(_pool_select(ow, pw, 1), (ph, ow, pw))
    even = jnp.einsum("how,hwj->hoj", y, s_even, preferred_element_type=jnp.float32)
    odd = jnp.einsum("how,hwj->hoj", y, s_odd, preferred_element_type=jnp.float32)
    return jnp.maximum(even, odd)                                  # (ph, cout, pw)


def _conv_stage_kernel(x_ref, w1_ref, b1_ref, w2_ref, b2_ref, out_ref):
    # x_ref: (50, 8, 50) one zero-channel-padded image in (H, C, W) layout.
    x = x_ref[...]
    p1 = _conv3x3_relu_pool2x2(x, w1_ref, b1_ref, _OH1, _OW1, _C1)    # (24, 8, 24)
    p2 = _conv3x3_relu_pool2x2(p1, w2_ref, b2_ref, _OH2, _OW2, _C2)   # (11, 16, 11)
    out_ref[...] = p2


def _conv_stage(x_hcw, w1, b1, w2, b2):
    n = x_hcw.shape[0]
    return pl.pallas_call(
        _conv_stage_kernel,
        out_shape=jax.ShapeDtypeStruct((n, _PH2, _C2, _PW2), jnp.float32),
        grid=(n,),
        in_specs=[
            pl.BlockSpec((None, _H, _C_PAD, _W), lambda i: (i, 0, 0, 0)),
            pl.BlockSpec((_C1, 9 * _C_PAD), lambda i: (0, 0)),
            pl.BlockSpec((_C1, 1), lambda i: (0, 0)),
            pl.BlockSpec((_C2, 9 * _C1), lambda i: (0, 0)),
            pl.BlockSpec((_C2, 1), lambda i: (0, 0)),
        ],
        out_specs=pl.BlockSpec((None, _PH2, _C2, _PW2), lambda i: (i, 0, 0, 0)),
        compiler_params=pltpu.CompilerParams(dimension_semantics=("parallel",)),
    )(x_hcw, w1, b1, w2, b2)


# ---------------------------------------------------------------------------------
# Fused 3-layer MLP kernel (fc1+ReLU -> fc2+ReLU -> fc3), gridded over batch tiles.
# fc2 / fc3 are pre-padded to 128 output columns -> lane-dense stores.
# ---------------------------------------------------------------------------------
def _mlp_kernel(x_ref, w1_ref, b1_ref, w2_ref, b2_ref, w3_ref, b3_ref, out_ref):
    h = jnp.dot(x_ref[...], w1_ref[...], preferred_element_type=jnp.float32)
    h = jnp.maximum(h + b1_ref[...], 0.0)
    h = jnp.dot(h, w2_ref[...], preferred_element_type=jnp.float32)
    h = jnp.maximum(h + b2_ref[...], 0.0)
    out_ref[...] = jnp.dot(h, w3_ref[...], preferred_element_type=jnp.float32) + b3_ref[...]


def _mlp(flat, wf1, bf1, wf2, bf2, wf3, bf3):
    n = flat.shape[0]
    bm = min(n, 128)
    return pl.pallas_call(
        _mlp_kernel,
        out_shape=jax.ShapeDtypeStruct((n, _PAD_LANES), jnp.float32),
        grid=(pl.cdiv(n, bm),),
        in_specs=[
            pl.BlockSpec((bm, _FLAT), lambda i: (i, 0)),
            pl.BlockSpec((_FLAT, _FC1), lambda i: (0, 0)),
            pl.BlockSpec((1, _FC1), lambda i: (0, 0)),
            pl.BlockSpec((_FC1, _PAD_LANES), lambda i: (0, 0)),
            pl.BlockSpec((1, _PAD_LANES), lambda i: (0, 0)),
            pl.BlockSpec((_PAD_LANES, _PAD_LANES), lambda i: (0, 0)),
            pl.BlockSpec((1, _PAD_LANES), lambda i: (0, 0)),
        ],
        out_specs=pl.BlockSpec((bm, _PAD_LANES), lambda i: (i, 0)),
        compiler_params=pltpu.CompilerParams(dimension_semantics=("parallel",)),
    )(flat, wf1, bf1, wf2, bf2, wf3, bf3)


# ---------------------------------------------------------------------------------
# One-time parameter preparation (kernel-friendly layouts; pure layout work, done
# outside the jitted forward).
# ---------------------------------------------------------------------------------
def prepare_params(params):
    # conv weights -> (Cout, 9*Cin) with K ordered (kh, kw, ci); conv1 ci padded 3->8.
    w1 = jnp.transpose(params["conv1_w"], (0, 2, 3, 1))                 # (co,kh,kw,ci)
    w1 = jnp.pad(w1, ((0, 0), (0, 0), (0, 0), (0, _C_PAD - _C_IN)))
    w2 = jnp.transpose(params["conv2_w"], (0, 2, 3, 1))
    # fc1 weight: permute its 1936 input columns from PyTorch (c,h,w) flatten order
    # to the kernel's (h,c,w) flatten order, then transpose to (in, out).
    wf1 = params["fc1_w"].reshape(_FC1, _C2, _PH2, _PW2)                # (j,c,h,w)
    wf1 = jnp.transpose(wf1, (0, 2, 1, 3)).reshape(_FC1, _FLAT).T       # (1936,256)
    # fc2 / fc3: transpose to (in, out) and zero-pad outputs (and fc3 inputs) to 128.
    wf2 = jnp.pad(params["fc2_w"].T, ((0, 0), (0, _PAD_LANES - _FC2)))  # (256,128)
    wf3 = jnp.pad(params["fc3_w"].T, ((0, _PAD_LANES - _FC2), (0, _PAD_LANES - _FC3)))
    return {
        "w1": w1.reshape(_C1, 9 * _C_PAD),
        "b1": params["conv1_b"].reshape(_C1, 1),
        "w2": w2.reshape(_C2, 9 * _C1),
        "b2": params["conv2_b"].reshape(_C2, 1),
        "wf1": wf1,
        "bf1": params["fc1_b"].reshape(1, _FC1),
        "wf2": wf2,
        "bf2": jnp.pad(params["fc2_b"], (0, _PAD_LANES - _FC2)).reshape(1, _PAD_LANES),
        "wf3": wf3,
        "bf3": jnp.pad(params["fc3_b"], (0, _PAD_LANES - _FC3)).reshape(1, _PAD_LANES),
    }


def init_params(key):
    ks = jax.random.split(key, 10)

    def u(k, shape, scale):
        return jax.random.uniform(k, shape, jnp.float32, -scale, scale)

    # Shapes follow the PyTorch module (Conv2d: (Cout, Cin, kh, kw); Linear: (out, in)).
    return {
        "conv1_w": u(ks[0], (8, 3, 3, 3), 0.2),
        "conv1_b": u(ks[1], (8,), 0.2),
        "conv2_w": u(ks[2], (16, 8, 3, 3), 0.1),
        "conv2_b": u(ks[3], (16,), 0.1),
        "fc1_w": u(ks[4], (256, 1936), 0.02),
        "fc1_b": u(ks[5], (256,), 0.02),
        "fc2_w": u(ks[6], (20, 256), 0.06),
        "fc2_b": u(ks[7], (20,), 0.06),
        "fc3_w": u(ks[8], (3, 20), 0.2),
        "fc3_b": u(ks[9], (3,), 0.2),
    }


@jax.jit
def net_forward(x_nchw, prep):
    n = x_nchw.shape[0]
    # NCHW -> (N, H, C, W) and zero-pad channels to a full sublane tile (cheap glue).
    x = jnp.transpose(x_nchw.astype(jnp.float32), (0, 2, 1, 3))
    x = jnp.pad(x, ((0, 0), (0, 0), (0, _C_PAD - _C_IN), (0, 0)))       # (N,50,8,50)

    feat = _conv_stage(x, prep["w1"], prep["b1"], prep["w2"], prep["b2"])
    # (N, 11, 16, 11) -> (N, 1936): free row-major reshape in HBM; fc1 weights were
    # permuted at prep time to this (h, c, w) order, preserving PyTorch semantics.
    flat = feat.reshape(n, _FLAT)

    out = _mlp(flat, prep["wf1"], prep["bf1"], prep["wf2"], prep["bf2"],
               prep["wf3"], prep["bf3"])
    return out[:, :_FC3]


# Pure-JAX reference (PyTorch semantics) for a sanity check.
def reference_forward(x_nchw, params):
    x = jnp.transpose(x_nchw, (0, 2, 3, 1)).astype(jnp.float32)

    def conv(x, w, b):
        y = jax.lax.conv_general_dilated(
            x, jnp.transpose(w, (2, 3, 1, 0)), (1, 1), "VALID",
            dimension_numbers=("NHWC", "HWIO", "NHWC"))
        return jnp.maximum(y + b, 0.0)

    def pool(x):
        return jax.lax.reduce_window(x, -jnp.inf, jax.lax.max,
                                     (1, 2, 2, 1), (1, 2, 2, 1), "VALID")

    y = pool(conv(x, params["conv1_w"], params["conv1_b"]))
    y = pool(conv(y, params["conv2_w"], params["conv2_b"]))
    flat = jnp.transpose(y, (0, 3, 1, 2)).reshape(x.shape[0], -1)
    h = jnp.maximum(flat @ params["fc1_w"].T + params["fc1_b"], 0.0)
    h = jnp.maximum(h @ params["fc2_w"].T + params["fc2_b"], 0.0)
    return h @ params["fc3_w"].T + params["fc3_b"]


if __name__ == "__main__":
    key = jax.random.PRNGKey(0)
    pkey, xkey = jax.random.split(key)
    params = init_params(pkey)
    prep = prepare_params(params)
    x = jax.random.normal(xkey, (2, 3, 50, 50), dtype=jnp.float32)  # NCHW like PyTorch

    out = jax.block_until_ready(net_forward(x, prep))
    assert out.shape == (2, 3), out.shape

    ref = reference_forward(x, params)
    assert jnp.allclose(out, ref, atol=2e-2, rtol=2e-2), (out, ref)

    print("KERNEL_OK")
</pallas_src>

<mosaic_0001>
module attributes {stable_mosaic.version = 11 : i64} {
  func.func @_conv_stage_kernel(%arg0: i32, %arg1: memref<1x50x8x50xf32, #tpu.memory_space<vmem>>, %arg2: memref<8x72xf32, #tpu.memory_space<vmem>>, %arg3: memref<8x1xf32, #tpu.memory_space<vmem>>, %arg4: memref<16x72xf32, #tpu.memory_space<vmem>>, %arg5: memref<16x1xf32, #tpu.memory_space<vmem>>, %arg6: memref<1x11x16x11xf32, #tpu.memory_space<vmem>>) attributes {dimension_semantics = [#tpu.dimension_semantics<parallel>], iteration_bounds = array<i64: 2>, scalar_prefetch = 0 : i64, scratch_operands = 0 : i64, tpu.core_type = #tpu.core_type<tc>, window_params = [{transform_indices = @transform_0, window_bounds = array<i64: 1, 50, 8, 50>}, {pipeline_mode = #tpu.pipeline_mode<synchronous>, transform_indices = @transform_1, window_bounds = array<i64: 8, 72>}, {pipeline_mode = #tpu.pipeline_mode<synchronous>, transform_indices = @transform_2, window_bounds = array<i64: 8, 1>}, {pipeline_mode = #tpu.pipeline_mode<synchronous>, transform_indices = @transform_3, window_bounds = array<i64: 16, 72>}, {pipeline_mode = #tpu.pipeline_mode<synchronous>, transform_indices = @transform_4, window_bounds = array<i64: 16, 1>}, {transform_indices = @transform_5, window_bounds = array<i64: 1, 11, 16, 11>}]} {
    %c0 = arith.constant 0 : index
    %c0_0 = arith.constant 0 : index
    %c0_1 = arith.constant 0 : index
    %c0_2 = arith.constant 0 : index
    %0 = vector.load %arg1[%c0, %c0_0, %c0_1, %c0_2] : memref<1x50x8x50xf32, #tpu.memory_space<vmem>>, vector<1x50x8x50xf32>
    %1 = vector.shape_cast %0 : vector<1x50x8x50xf32> to vector<50x8x50xf32>
    %2 = vector.extract_strided_slice %1 {offsets = [0, 0, 0], sizes = [48, 8, 48], strides = [1, 1, 1]} : vector<50x8x50xf32> to vector<48x8x48xf32>
    %3 = vector.extract_strided_slice %1 {offsets = [0, 0, 1], sizes = [48, 8, 48], strides = [1, 1, 1]} : vector<50x8x50xf32> to vector<48x8x48xf32>
    %4 = vector.extract_strided_slice %1 {offsets = [0, 0, 2], sizes = [48, 8, 48], strides = [1, 1, 1]} : vector<50x8x50xf32> to vector<48x8x48xf32>
    %5 = vector.extract_strided_slice %1 {offsets = [1, 0, 0], sizes = [48, 8, 48], strides = [1, 1, 1]} : vector<50x8x50xf32> to vector<48x8x48xf32>
    %6 = vector.extract_strided_slice %1 {offsets = [1, 0, 1], sizes = [48, 8, 48], strides = [1, 1, 1]} : vector<50x8x50xf32> to vector<48x8x48xf32>
    %7 = vector.extract_strided_slice %1 {offsets = [1, 0, 2], sizes = [48, 8, 48], strides = [1, 1, 1]} : vector<50x8x50xf32> to vector<48x8x48xf32>
    %8 = vector.extract_strided_slice %1 {offsets = [2, 0, 0], sizes = [48, 8, 48], strides = [1, 1, 1]} : vector<50x8x50xf32> to vector<48x8x48xf32>
    %9 = vector.extract_strided_slice %1 {offsets = [2, 0, 1], sizes = [48, 8, 48], strides = [1, 1, 1]} : vector<50x8x50xf32> to vector<48x8x48xf32>
    %10 = vector.extract_strided_slice %1 {offsets = [2, 0, 2], sizes = [48, 8, 48], strides = [1, 1, 1]} : vector<50x8x50xf32> to vector<48x8x48xf32>
    %11 = tpu.concatenate %2, %3, %4, %5, %6, %7, %8, %9, %10 in 1 : vector<48x8x48xf32>, vector<48x8x48xf32>, vector<48x8x48xf32>, vector<48x8x48xf32>, vector<48x8x48xf32>, vector<48x8x48xf32>, vector<48x8x48xf32>, vector<48x8x48xf32>, vector<48x8x48xf32> -> vector<48x72x48xf32>
    %c0_3 = arith.constant 0 : index
    %c0_4 = arith.constant 0 : index
    %12 = vector.load %arg2[%c0_3, %c0_4] : memref<8x72xf32, #tpu.memory_space<vmem>>, vector<8x72xf32>
    %13 = vector.shape_cast %12 : vector<8x72xf32> to vector<1x8x72xf32>
    %14 = vector.broadcast %13 : vector<1x8x72xf32> to vector<48x8x72xf32>
    "tpu.trace_start"() <{level = 10 : i32, message = "hok,hkw->how"}> : () -> ()
    %cst = arith.constant dense<0.000000e+00> : vector<48x8x48xf32>
    %15 = tpu.matmul %14, %11, %cst {dimension_numbers = #tpu.dot_dimension_numbers<[2], [1], [1], [2], [0, 0, 0, 1, 1, 2], [0], [0]>} : vector<48x8x72xf32>, vector<48x72x48xf32>, vector<48x8x48xf32> -> vector<48x8x48xf32>
    "tpu.trace_stop"() : () -> ()
    %c0_5 = arith.constant 0 : index
    %c0_6 = arith.constant 0 : index
    %16 = vector.load %arg3[%c0_5, %c0_6] : memref<8x1xf32, #tpu.memory_space<vmem>>, vector<8x1xf32>
    %17 = vector.shape_cast %16 : vector<8x1xf32> to vector<1x8x1xf32>
    %18 = vector.broadcast %17 : vector<1x8x1xf32> to vector<48x8x48xf32>
    %19 = arith.addf %15, %18 : vector<48x8x48xf32>
    %cst_7 = arith.constant 0.000000e+00 : f32
    %20 = vector.broadcast %cst_7 : f32 to vector<48x8x48xf32>
    %21 = arith.maximumf %19, %20 : vector<48x8x48xf32>
    %22 = vector.shape_cast %21 : vector<48x8x48xf32> to vector<24x2x8x48xf32>
    %23 = vector.extract_strided_slice %22 {offsets = [0, 0, 0, 0], sizes = [24, 1, 8, 48], strides = [1, 1, 1, 1]} : vector<24x2x8x48xf32> to vector<24x1x8x48xf32>
    %24 = vector.shape_cast %23 : vector<24x1x8x48xf32> to vector<24x8x48xf32>
    %25 = vector.extract_strided_slice %22 {offsets = [0, 1, 0, 0], sizes = [24, 1, 8, 48], strides = [1, 1, 1, 1]} : vector<24x2x8x48xf32> to vector<24x1x8x48xf32>
    %26 = vector.shape_cast %25 : vector<24x1x8x48xf32> to vector<24x8x48xf32>
    %27 = arith.maximumf %24, %26 : vector<24x8x48xf32>
    %28 = tpu.iota {dimensions = array<i32: 0>} : vector<48x24xi32>
    %29 = tpu.iota {dimensions = array<i32: 1>} : vector<48x24xi32>
    %c2_i32 = arith.constant 2 : i32
    %30 = vector.broadcast %c2_i32 : i32 to vector<48x24xi32>
    %31 = arith.muli %30, %29 : vector<48x24xi32>
    %c0_i32 = arith.constant 0 : i32
    %32 = vector.broadcast %c0_i32 : i32 to vector<48x24xi32>
    %33 = arith.addi %31, %32 : vector<48x24xi32>
    %34 = arith.cmpi eq, %28, %33 : vector<48x24xi32>
    %35 = arith.extui %34 : vector<48x24xi1> to vector<48x24xi32>
    %36 = arith.sitofp %35 : vector<48x24xi32> to vector<48x24xf32>
    %37 = vector.shape_cast %36 : vector<48x24xf32> to vector<1x48x24xf32>
    %38 = vector.broadcast %37 : vector<1x48x24xf32> to vector<24x48x24xf32>
    %39 = tpu.iota {dimensions = array<i32: 0>} : vector<48x24xi32>
    %40 = tpu.iota {dimensions = array<i32: 1>} : vector<48x24xi32>
    %c2_i32_8 = arith.constant 2 : i32
    %41 = vector.broadcast %c2_i32_8 : i32 to vector<48x24xi32>
    %42 = arith.muli %41, %40 : vector<48x24xi32>
    %c1_i32 = arith.constant 1 : i32
    %43 = vector.broadcast %c1_i32 : i32 to vector<48x24xi32>
    %44 = arith.addi %42, %43 : vector<48x24xi32>
    %45 = arith.cmpi eq, %39, %44 : vector<48x24xi32>
    %46 = arith.extui %45 : vector<48x24xi1> to vector<48x24xi32>
    %47 = arith.sitofp %46 : vector<48x24xi32> to vector<48x24xf32>
    %48 = vector.shape_cast %47 : vector<48x24xf32> to vector<1x48x24xf32>
    %49 = vector.broadcast %48 : vector<1x48x24xf32> to vector<24x48x24xf32>
    "tpu.trace_start"() <{level = 10 : i32, message = "how,hwj->hoj"}> : () -> ()
    %cst_9 = arith.constant dense<0.000000e+00> : vector<24x8x24xf32>
    %50 = tpu.matmul %27, %38, %cst_9 {dimension_numbers = #tpu.dot_dimension_numbers<[2], [1], [1], [2], [0, 0, 0, 1, 1, 2], [0], [0]>} : vector<24x8x48xf32>, vector<24x48x24xf32>, vector<24x8x24xf32> -> vector<24x8x24xf32>
    %cst_10 = arith.constant dense<0.000000e+00> : vector<24x8x24xf32>
    %51 = tpu.matmul %27, %49, %cst_10 {dimension_numbers = #tpu.dot_dimension_numbers<[2], [1], [1], [2], [0, 0, 0, 1, 1, 2], [0], [0]>} : vector<24x8x48xf32>, vector<24x48x24xf32>, vector<24x8x24xf32> -> vector<24x8x24xf32>
    "tpu.trace_stop"() : () -> ()
    %52 = arith.maximumf %50, %51 : vector<24x8x24xf32>
    %53 = vector.extract_strided_slice %52 {offsets = [0, 0, 0], sizes = [22, 8, 22], strides = [1, 1, 1]} : vector<24x8x24xf32> to vector<22x8x22xf32>
    %54 = vector.extract_strided_slice %52 {offsets = [0, 0, 1], sizes = [22, 8, 22], strides = [1, 1, 1]} : vector<24x8x24xf32> to vector<22x8x22xf32>
    %55 = vector.extract_strided_slice %52 {offsets = [0, 0, 2], sizes = [22, 8, 22], strides = [1, 1, 1]} : vector<24x8x24xf32> to vector<22x8x22xf32>
    %56 = vector.extract_strided_slice %52 {offsets = [1, 0, 0], sizes = [22, 8, 22], strides = [1, 1, 1]} : vector<24x8x24xf32> to vector<22x8x22xf32>
    %57 = vector.extract_strided_slice %52 {offsets = [1, 0, 1], sizes = [22, 8, 22], strides = [1, 1, 1]} : vector<24x8x24xf32> to vector<22x8x22xf32>
    %58 = vector.extract_strided_slice %52 {offsets = [1, 0, 2], sizes = [22, 8, 22], strides = [1, 1, 1]} : vector<24x8x24xf32> to vector<22x8x22xf32>
    %59 = vector.extract_strided_slice %52 {offsets = [2, 0, 0], sizes = [22, 8, 22], strides = [1, 1, 1]} : vector<24x8x24xf32> to vector<22x8x22xf32>
    %60 = vector.extract_strided_slice %52 {offsets = [2, 0, 1], sizes = [22, 8, 22], strides = [1, 1, 1]} : vector<24x8x24xf32> to vector<22x8x22xf32>
    %61 = vector.extract_strided_slice %52 {offsets = [2, 0, 2], sizes = [22, 8, 22], strides = [1, 1, 1]} : vector<24x8x24xf32> to vector<22x8x22xf32>
    %62 = tpu.concatenate %53, %54, %55, %56, %57, %58, %59, %60, %61 in 1 : vector<22x8x22xf32>, vector<22x8x22xf32>, vector<22x8x22xf32>, vector<22x8x22xf32>, vector<22x8x22xf32>, vector<22x8x22xf32>, vector<22x8x22xf32>, vector<22x8x22xf32>, vector<22x8x22xf32> -> vector<22x72x22xf32>
    %c0_11 = arith.constant 0 : index
    %c0_12 = arith.constant 0 : index
    %63 = vector.load %arg4[%c0_11, %c0_12] : memref<16x72xf32, #tpu.memory_space<vmem>>, vector<16x72xf32>
    %64 = vector.shape_cast %63 : vector<16x72xf32> to vector<1x16x72xf32>
    %65 = vector.broadcast %64 : vector<1x16x72xf32> to vector<22x16x72xf32>
    "tpu.trace_start"() <{level = 10 : i32, message = "hok,hkw->how"}> : () -> ()
    %cst_13 = arith.constant dense<0.000000e+00> : vector<22x16x22xf32>
    %66 = tpu.matmul %65, %62, %cst_13 {dimension_numbers = #tpu.dot_dimension_numbers<[2], [1], [1], [2], [0, 0, 0, 1, 1, 2], [0], [0]>} : vector<22x16x72xf32>, vector<22x72x22xf32>, vector<22x16x22xf32> -> vector<22x16x22xf32>
    "tpu.trace_stop"() : () -> ()
    %c0_14 = arith.constant 0 : index
    %c0_15 = arith.constant 0 : index
    %67 = vector.load %arg5[%c0_14, %c0_15] : memref<16x1xf32, #tpu.memory_space<vmem>>, vector<16x1xf32>
    %68 = vector.shape_cast %67 : vector<16x1xf32> to vector<1x16x1xf32>
    %69 = vector.broadcast %68 : vector<1x16x1xf32> to vector<22x16x22xf32>
    %70 = arith.addf %66, %69 : vector<22x16x22xf32>
    %cst_16 = arith.constant 0.000000e+00 : f32
    %71 = vector.broadcast %cst_16 : f32 to vector<22x16x22xf32>
    %72 = arith.maximumf %70, %71 : vector<22x16x22xf32>
    %73 = vector.shape_cast %72 : vector<22x16x22xf32> to vector<11x2x16x22xf32>
    %74 = vector.extract_strided_slice %73 {offsets = [0, 0, 0, 0], sizes = [11, 1, 16, 22], strides = [1, 1, 1, 1]} : vector<11x2x16x22xf32> to vector<11x1x16x22xf32>
    %75 = vector.shape_cast %74 : vector<11x1x16x22xf32> to vector<11x16x22xf32>
    %76 = vector.extract_strided_slice %73 {offsets = [0, 1, 0, 0], sizes = [11, 1, 16, 22], strides = [1, 1, 1, 1]} : vector<11x2x16x22xf32> to vector<11x1x16x22xf32>
    %77 = vector.shape_cast %76 : vector<11x1x16x22xf32> to vector<11x16x22xf32>
    %78 = arith.maximumf %75, %77 : vector<11x16x22xf32>
    %79 = tpu.iota {dimensions = array<i32: 0>} : vector<22x11xi32>
    %80 = tpu.iota {dimensions = array<i32: 1>} : vector<22x11xi32>
    %c2_i32_17 = arith.constant 2 : i32
    %81 = vector.broadcast %c2_i32_17 : i32 to vector<22x11xi32>
    %82 = arith.muli %81, %80 : vector<22x11xi32>
    %c0_i32_18 = arith.constant 0 : i32
    %83 = vector.broadcast %c0_i32_18 : i32 to vector<22x11xi32>
    %84 = arith.addi %82, %83 : vector<22x11xi32>
    %85 = arith.cmpi eq, %79, %84 : vector<22x11xi32>
    %86 = arith.extui %85 : vector<22x11xi1> to vector<22x11xi32>
    %87 = arith.sitofp %86 : vector<22x11xi32> to vector<22x11xf32>
    %88 = vector.shape_cast %87 : vector<22x11xf32> to vector<1x22x11xf32>
    %89 = vector.broadcast %88 : vector<1x22x11xf32> to vector<11x22x11xf32>
    %90 = tpu.iota {dimensions = array<i32: 0>} : vector<22x11xi32>
    %91 = tpu.iota {dimensions = array<i32: 1>} : vector<22x11xi32>
    %c2_i32_19 = arith.constant 2 : i32
    %92 = vector.broadcast %c2_i32_19 : i32 to vector<22x11xi32>
    %93 = arith.muli %92, %91 : vector<22x11xi32>
    %c1_i32_20 = arith.constant 1 : i32
    %94 = vector.broadcast %c1_i32_20 : i32 to vector<22x11xi32>
    %95 = arith.addi %93, %94 : vector<22x11xi32>
    %96 = arith.cmpi eq, %90, %95 : vector<22x11xi32>
    %97 = arith.extui %96 : vector<22x11xi1> to vector<22x11xi32>
    %98 = arith.sitofp %97 : vector<22x11xi32> to vector<22x11xf32>
    %99 = vector.shape_cast %98 : vector<22x11xf32> to vector<1x22x11xf32>
    %100 = vector.broadcast %99 : vector<1x22x11xf32> to vector<11x22x11xf32>
    "tpu.trace_start"() <{level = 10 : i32, message = "how,hwj->hoj"}> : () -> ()
    %cst_21 = arith.constant dense<0.000000e+00> : vector<11x16x11xf32>
    %101 = tpu.matmul %78, %89, %cst_21 {dimension_numbers = #tpu.dot_dimension_numbers<[2], [1], [1], [2], [0, 0, 0, 1, 1, 2], [0], [0]>} : vector<11x16x22xf32>, vector<11x22x11xf32>, vector<11x16x11xf32> -> vector<11x16x11xf32>
    %cst_22 = arith.constant dense<0.000000e+00> : vector<11x16x11xf32>
    %102 = tpu.matmul %78, %100, %cst_22 {dimension_numbers = #tpu.dot_dimension_numbers<[2], [1], [1], [2], [0, 0, 0, 1, 1, 2], [0], [0]>} : vector<11x16x22xf32>, vector<11x22x11xf32>, vector<11x16x11xf32> -> vector<11x16x11xf32>
    "tpu.trace_stop"() : () -> ()
    %103 = arith.maximumf %101, %102 : vector<11x16x11xf32>
    %c0_23 = arith.constant 0 : index
    %c0_24 = arith.constant 0 : index
    %c0_25 = arith.constant 0 : index
    %c0_26 = arith.constant 0 : index
    %104 = vector.load %arg6[%c0_23, %c0_24, %c0_25, %c0_26] : memref<1x11x16x11xf32, #tpu.memory_space<vmem>>, vector<1x11x16x11xf32>
    %105 = vector.shape_cast %104 : vector<1x11x16x11xf32> to vector<11x16x11xf32>
    %106 = vector.shape_cast %103 : vector<11x16x11xf32> to vector<1x11x16x11xf32>
    tpu.vector_store %arg6[%c0_23, %c0_24, %c0_25, %c0_26], %106 {strides = array<i32>} : memref<1x11x16x11xf32, #tpu.memory_space<vmem>>, vector<1x11x16x11xf32>,
    return
  }
  func.func @transform_0(%arg0: i32) -> (i32, i32, i32, i32) {
    %c0_i32 = arith.constant 0 : i32
    %c0_i32_0 = arith.constant 0 : i32
    %c0_i32_1 = arith.constant 0 : i32
    %c0_i32_2 = arith.constant 0 : i32
    return %arg0, %c0_i32, %c0_i32_0, %c0_i32_1 : i32, i32, i32, i32
  }
  func.func @transform_1(%arg0: i32) -> (i32, i32) {
    %c0_i32 = arith.constant 0 : i32
    %c0_i32_0 = arith.constant 0 : i32
    %c0_i32_1 = arith.constant 0 : i32
    return %c0_i32, %c0_i32_0 : i32, i32
  }
  func.func @transform_2(%arg0: i32) -> (i32, i32) {
    %c0_i32 = arith.constant 0 : i32
    %c0_i32_0 = arith.constant 0 : i32
    %c0_i32_1 = arith.constant 0 : i32
    return %c0_i32, %c0_i32_0 : i32, i32
  }
  func.func @transform_3(%arg0: i32) -> (i32, i32) {
    %c0_i32 = arith.constant 0 : i32
    %c0_i32_0 = arith.constant 0 : i32
    %c0_i32_1 = arith.constant 0 : i32
    return %c0_i32, %c0_i32_0 : i32, i32
  }
  func.func @transform_4(%arg0: i32) -> (i32, i32) {
    %c0_i32 = arith.constant 0 : i32
    %c0_i32_0 = arith.constant 0 : i32
    %c0_i32_1 = arith.constant 0 : i32
    return %c0_i32, %c0_i32_0 : i32, i32
  }
  func.func @transform_5(%arg0: i32) -> (i32, i32, i32, i32) {
    %c0_i32 = arith.constant 0 : i32
    %c0_i32_0 = arith.constant 0 : i32
    %c0_i32_1 = arith.constant 0 : i32
    %c0_i32_2 = arith.constant 0 : i32
    return %arg0, %c0_i32, %c0_i32_0, %c0_i32_1 : i32, i32, i32, i32
  }
}

module attributes {stable_mosaic.version = 11 : i64} {
  func.func @_mlp_kernel(%arg0: i32, %arg1: memref<2x1936xf32, #tpu.memory_space<vmem>>, %arg2: memref<1936x256xf32, #tpu.memory_space<vmem>>, %arg3: memref<1x256xf32, #tpu.memory_space<vmem>>, %arg4: memref<256x128xf32, #tpu.memory_space<vmem>>, %arg5: memref<1x128xf32, #tpu.memory_space<vmem>>, %arg6: memref<128x128xf32, #tpu.memory_space<vmem>>, %arg7: memref<1x128xf32, #tpu.memory_space<vmem>>, %arg8: memref<2x128xf32, #tpu.memory_space<vmem>>) attributes {dimension_semantics = [#tpu.dimension_semantics<parallel>], iteration_bounds = array<i64: 1>, scalar_prefetch = 0 : i64, scratch_operands = 0 : i64, tpu.core_type = #tpu.core_type<tc>, window_params = [{transform_indices = @transform_0, window_bounds = array<i64: 2, 1936>}, {pipeline_mode = #tpu.pipeline_mode<synchronous>, transform_indices = @transform_1, window_bounds = array<i64: 1936, 256>}, {pipeline_mode = #tpu.pipeline_mode<synchronous>, transform_indices = @transform_2, window_bounds = array<i64: 1, 256>}, {pipeline_mode = #tpu.pipeline_mode<synchronous>, transform_indices = @transform_3, window_bounds = array<i64: 256, 128>}, {pipeline_mode = #tpu.pipeline_mode<synchronous>, transform_indices = @transform_4, window_bounds = array<i64: 1, 128>}, {pipeline_mode = #tpu.pipeline_mode<synchronous>, transform_indices = @transform_5, window_bounds = array<i64: 128, 128>}, {pipeline_mode = #tpu.pipeline_mode<synchronous>, transform_indices = @transform_6, window_bounds = array<i64: 1, 128>}, {transform_indices = @transform_7, window_bounds = array<i64: 2, 128>}]} {
    %c0 = arith.constant 0 : index
    %c0_0 = arith.constant 0 : index
    %0 = vector.load %arg1[%c0, %c0_0] : memref<2x1936xf32, #tpu.memory_space<vmem>>, vector<2x1936xf32>
    %c0_1 = arith.constant 0 : index
    %c0_2 = arith.constant 0 : index
    %1 = vector.load %arg2[%c0_1, %c0_2] : memref<1936x256xf32, #tpu.memory_space<vmem>>, vector<1936x256xf32>
    %cst = arith.constant dense<0.000000e+00> : vector<2x256xf32>
    %2 = tpu.matmul %0, %1, %cst {dimension_numbers = #tpu.dot_dimension_numbers<[1], [0], [0], [1], [0, 0, 1, 1], [], []>} : vector<2x1936xf32>, vector<1936x256xf32>, vector<2x256xf32> -> vector<2x256xf32>
    %c0_3 = arith.constant 0 : index
    %c0_4 = arith.constant 0 : index
    %3 = vector.load %arg3[%c0_3, %c0_4] : memref<1x256xf32, #tpu.memory_space<vmem>>, vector<1x256xf32>
    %4 = vector.broadcast %3 : vector<1x256xf32> to vector<2x256xf32>
    %5 = arith.addf %2, %4 : vector<2x256xf32>
    %cst_5 = arith.constant 0.000000e+00 : f32
    %6 = vector.broadcast %cst_5 : f32 to vector<2x256xf32>
    %7 = arith.maximumf %5, %6 : vector<2x256xf32>
    %c0_6 = arith.constant 0 : index
    %c0_7 = arith.constant 0 : index
    %8 = vector.load %arg4[%c0_6, %c0_7] : memref<256x128xf32, #tpu.memory_space<vmem>>, vector<256x128xf32>
    %cst_8 = arith.constant dense<0.000000e+00> : vector<2x128xf32>
    %9 = tpu.matmul %7, %8, %cst_8 {dimension_numbers = #tpu.dot_dimension_numbers<[1], [0], [0], [1], [0, 0, 1, 1], [], []>} : vector<2x256xf32>, vector<256x128xf32>, vector<2x128xf32> -> vector<2x128xf32>
    %c0_9 = arith.constant 0 : index
    %c0_10 = arith.constant 0 : index
    %10 = vector.load %arg5[%c0_9, %c0_10] : memref<1x128xf32, #tpu.memory_space<vmem>>, vector<1x128xf32>
    %11 = vector.broadcast %10 : vector<1x128xf32> to vector<2x128xf32>
    %12 = arith.addf %9, %11 : vector<2x128xf32>
    %cst_11 = arith.constant 0.000000e+00 : f32
    %13 = vector.broadcast %cst_11 : f32 to vector<2x128xf32>
    %14 = arith.maximumf %12, %13 : vector<2x128xf32>
    %c0_12 = arith.constant 0 : index
    %c0_13 = arith.constant 0 : index
    %15 = vector.load %arg6[%c0_12, %c0_13] : memref<128x128xf32, #tpu.memory_space<vmem>>, vector<128x128xf32>
    %cst_14 = arith.constant dense<0.000000e+00> : vector<2x128xf32>
    %16 = tpu.matmul %14, %15, %cst_14 {dimension_numbers = #tpu.dot_dimension_numbers<[1], [0], [0], [1], [0, 0, 1, 1], [], []>} : vector<2x128xf32>, vector<128x128xf32>, vector<2x128xf32> -> vector<2x128xf32>
    %c0_15 = arith.constant 0 : index
    %c0_16 = arith.constant 0 : index
    %17 = vector.load %arg7[%c0_15, %c0_16] : memref<1x128xf32, #tpu.memory_space<vmem>>, vector<1x128xf32>
    %18 = vector.broadcast %17 : vector<1x128xf32> to vector<2x128xf32>
    %19 = arith.addf %16, %18 : vector<2x128xf32>
    %c0_17 = arith.constant 0 : index
    %c0_18 = arith.constant 0 : index
    %20 = vector.load %arg8[%c0_17, %c0_18] : memref<2x128xf32, #tpu.memory_space<vmem>>, vector<2x128xf32>
    tpu.vector_store %arg8[%c0_17, %c0_18], %19 {strides = array<i32>} : memref<2x128xf32, #tpu.memory_space<vmem>>, vector<2x128xf32>,
    return
  }
  func.func @transform_0(%arg0: i32) -> (i32, i32) {
    %c0_i32 = arith.constant 0 : i32
    %c0_i32_0 = arith.constant 0 : i32
    return %arg0, %c0_i32 : i32, i32
  }
  func.func @transform_1(%arg0: i32) -> (i32, i32) {
    %c0_i32 = arith.constant 0 : i32
    %c0_i32_0 = arith.constant 0 : i32
    %c0_i32_1 = arith.constant 0 : i32
    return %c0_i32, %c0_i32_0 : i32, i32
  }
  func.func @transform_2(%arg0: i32) -> (i32, i32) {
    %c0_i32 = arith.constant 0 : i32
    %c0_i32_0 = arith.constant 0 : i32
    %c0_i32_1 = arith.constant 0 : i32
    return %c0_i32, %c0_i32_0 : i32, i32
  }
  func.func @transform_3(%arg0: i32) -> (i32, i32) {
    %c0_i32 = arith.constant 0 : i32
    %c0_i32_0 = arith.constant 0 : i32
    %c0_i32_1 = arith.constant 0 : i32
    return %c0_i32, %c0_i32_0 : i32, i32
  }
  func.func @transform_4(%arg0: i32) -> (i32, i32) {
    %c0_i32 = arith.constant 0 : i32
    %c0_i32_0 = arith.constant 0 : i32
    %c0_i32_1 = arith.constant 0 : i32
    return %c0_i32, %c0_i32_0 : i32, i32
  }
  func.func @transform_5(%arg0: i32) -> (i32, i32) {
    %c0_i32 = arith.constant 0 : i32
    %c0_i32_0 = arith.constant 0 : i32
    %c0_i32_1 = arith.constant 0 : i32
    return %c0_i32, %c0_i32_0 : i32, i32
  }
  func.func @transform_6(%arg0: i32) -> (i32, i32) {
    %c0_i32 = arith.constant 0 : i32
    %c0_i32_0 = arith.constant 0 : i32
    %c0_i32_1 = arith.constant 0 : i32
    return %c0_i32, %c0_i32_0 : i32, i32
  }
  func.func @transform_7(%arg0: i32) -> (i32, i32) {
    %c0_i32 = arith.constant 0 : i32
    %c0_i32_0 = arith.constant 0 : i32
    return %arg0, %c0_i32 : i32, i32
  }
}

</mosaic_0001>

<bundles_post_ra>
// kernel: net_forward.3
= control target key start
LH: loop header
LB: loop body
LE: loop exit
PB: predicated region body
PF: predicated region fallthrough
CT: control target
= control target key end

     0   :  { %12 = vsyncpa [#allocation3], 0  ;;  %s2540_s0 = inlined_call_operand.vmem [shape: f32[2,1936], index: 0, kind: input, shape index: {}]   ;;  %s2541_s1 = inlined_call_operand.hbm [shape: f32[1936,256], index: 1, kind: input, shape index: {}]   ;;  %s2542_s2 = inlined_call_operand.hbm [shape: f32[1,256], index: 2, kind: input, shape index: {}]   ;;  %s2543_s3 = inlined_call_operand.hbm [shape: f32[256,128], index: 3, kind: input, shape index: {}]   ;;  %s2544_s4 = inlined_call_operand.hbm [shape: f32[1,128], index: 4, kind: input, shape index: {}]   ;;  %s2545_s5 = inlined_call_operand.hbm [shape: f32[128,128], index: 5, kind: input, shape index: {}]   ;;  %s2546_s6 = inlined_call_operand.hbm [shape: f32[1,128], index: 6, kind: input, shape index: {}]   ;;  %s2547_s7 = inlined_call_operand.hbm [shape: f32[2,128], index: 7, kind: output, shape index: {}]  }
   0x1   :  { %13 = vsyncpa [#allocation6], 0 }
   0x2   :  { %14 = vsyncpa [#allocation9], 0 }
   0x3   :  { %15 = vsyncpa [#allocation12], 0 }
   0x4   :  { %16 = vsyncpa [#allocation4], 0  ;;  %s2314_s24 = smov [#allocation5]   ;;  %s2315_s26 = smov [#allocation8]  }
   0x5   :  { %s37_s25 = sshll.u32 %s2314_s24, 4  ;;  %s59_s27 = sshll.u32 %s2315_s26, 4  ;;  %s38_s25 = int_to_ptr.vmem [resolvable:$true] %s37_s25  ;;  %s60_s27 = int_to_ptr.vmem [resolvable:$true] %s59_s27 }
   0x6   :  { %s2150_s30 = scalar_lea.hbm %s2542_s2, 32 }
   0x7   :  { %p2151_p0 = scmp.ne.s32.totalorder %s2542_s2, %s2150_s30  ;;  %p2154_p1 = scmp.lt.u32.totalorder %s2150_s30, %s2542_s2 }
   0x9   :  { %p2156_p2 = pnand %p2154_p1, %p2151_p0 }
   0xb   :  { %2159 = shalt.err (!%p2156_p2)
}
   0xc   :  { %s2160_s12 = scalar_lea.vmem %s38_s25, 32  ;;  %p2165_p4 = scmp.lt.s32.totalorder %s38_s25, %s38_s25 }
   0xd   :  { %p2161_p3 = scmp.ne.s32.totalorder %s38_s25, %s2160_s12  ;;  %p2166_p5 = scmp.lt.s32.totalorder %s2160_s12, %s2160_s12 }
   0xf   :  { %p2167_p6 = por %p2166_p5, %p2165_p4 }
  0x11   :  { %p2168_p7 = pnand %p2167_p6, %p2161_p3 }
  0x13   :  { %2171 = shalt.err (!%p2168_p7)
}
  0x14   :  { %40 = dma.hbm_to_vmem [thread:$0]  %s2542_s2, 32, %s38_s25, [#allocation6]  }
  0x15   :  { %s2172_s17 = scalar_lea.hbm %s2544_s4, 16 }
  0x16   :  { %p2173_p8 = scmp.ne.s32.totalorder %s2544_s4, %s2172_s17  ;;  %p2176_p9 = scmp.lt.u32.totalorder %s2172_s17, %s2544_s4 }
  0x18   :  { %p2178_p10 = pnand %p2176_p9, %p2173_p8 }
  0x1a   :  { %2181 = shalt.err (!%p2178_p10)
}
  0x1b   :  { %s2182_s22 = scalar_lea.vmem %s60_s27, 16  ;;  %s2186_s23 = scalar_lea.vmem %s60_s27, 32 }
  0x1c   :  { %p2183_p11 = scmp.ne.s32.totalorder %s60_s27, %s2182_s22  ;;  %p2187_p12 = scmp.lt.s32.totalorder %s60_s27, %s60_s27 }
  0x1d   :  { %p2188_p13 = scmp.lt.s32.totalorder %s2186_s23, %s2182_s22 }
  0x1f   :  { %p2189_p0 = por %p2188_p13, %p2187_p12 }
  0x21   :  { %p2190_p1 = pnand %p2189_p0, %p2183_p11 }
  0x23   :  { %2193 = shalt.err (!%p2190_p1)
}
  0x24   :  { %62 = dma.hbm_to_vmem [thread:$0]  %s2544_s4, 16, %s60_s27, [#allocation9]  }
  0x25   :  { %s2316_s25 = smov [#allocation2]   ;;  %s2194_s30 = scalar_lea.hbm %s2541_s1, 61952 }
  0x26   :  { %s24_s26 = sshll.u32 %s2316_s25, 4  ;;  %p2195_p2 = scmp.ne.s32.totalorder %s2541_s1, %s2194_s30  ;;  %s25_s26 = int_to_ptr.vmem [resolvable:$true] %s24_s26 }
  0x27   :  { %p2198_p3 = scmp.lt.u32.totalorder %s2194_s30, %s2541_s1 }
  0x29   :  { %p2200_p4 = pnand %p2198_p3, %p2195_p2 }
  0x2b   :  { %2203 = shalt.err (!%p2200_p4)
}
  0x2c   :  { %s2204_s12 = scalar_lea.vmem %s25_s26, 61952  ;;  %p2209_p6 = scmp.lt.s32.totalorder %s25_s26, %s25_s26 }
  0x2d   :  { %p2205_p5 = scmp.ne.s32.totalorder %s25_s26, %s2204_s12  ;;  %p2210_p7 = scmp.lt.s32.totalorder %s2204_s12, %s2204_s12 }
  0x2f   :  { %p2211_p8 = por %p2210_p7, %p2209_p6 }
  0x31   :  { %p2212_p9 = pnand %p2211_p8, %p2205_p5 }
  0x33   :  { %2215 = shalt.err (!%p2212_p9)
}
  0x34   :  { %s2317_s4 = smov 256   ;;  %s2318_s27 = smov 16  }
  0x35   :  { %30 = dma.hbm_to_vmem [thread:$0]  %s2541_s1, 61952, %s25_s26, [#allocation3], %s2317_s4, %s2317_s4, %s2318_s27  }
  0x36   :  { %s2319_s15 = smov [#allocation7]   ;;  %s2216_s19 = scalar_lea.hbm %s2543_s3, 4096 }
  0x37   :  { %s46_s16 = sshll.u32 %s2319_s15, 4  ;;  %p2217_p10 = scmp.ne.s32.totalorder %s2543_s3, %s2216_s19  ;;  %s47_s16 = int_to_ptr.vmem [resolvable:$true] %s46_s16 }
  0x38   :  { %p2220_p11 = scmp.lt.u32.totalorder %s2216_s19, %s2543_s3 }
  0x3a   :  { %p2222_p12 = pnand %p2220_p11, %p2217_p10 }
  0x3c   :  { %2225 = shalt.err (!%p2222_p12)
}
  0x3d   :  { %s2226_s2 = scalar_lea.vmem %s47_s16, 4096  ;;  %p2231_p0 = scmp.lt.s32.totalorder %s47_s16, %s47_s16 }
  0x3e   :  { %p2227_p13 = scmp.ne.s32.totalorder %s47_s16, %s2226_s2  ;;  %p2232_p1 = scmp.lt.s32.totalorder %s2226_s2, %s2226_s2 }
  0x40   :  { %p2233_p2 = por %p2232_p1, %p2231_p0 }
  0x42   :  { %p2234_p3 = pnand %p2233_p2, %p2227_p13 }
  0x44   :  { %2237 = shalt.err (!%p2234_p3)
}
  0x45   :  { %s2320_s1 = smov 128   ;;  %s2321_s24 = smov 8  }
  0x46   :  { %52 = dma.hbm_to_vmem [thread:$0]  %s2543_s3, 4096, %s47_s16, [#allocation6], %s2320_s1, %s2320_s1, %s2321_s24  }
  0x47   :  { %s2322_s28 = smov [#allocation10]   ;;  %s2323_s30 = smov [#allocation11]  }
  0x48   :  { %s68_s29 = sshll.u32 %s2322_s28, 4  ;;  %s81_s8 = sshll.u32 %s2323_s30, 4  ;;  %s69_s29 = int_to_ptr.vmem [resolvable:$true] %s68_s29  ;;  %s82_s8 = int_to_ptr.vmem [resolvable:$true] %s81_s8 }
  0x49   :  { %s2238_s11 = scalar_lea.hbm %s2545_s5, 2048 }
  0x4a   :  { %p2239_p4 = scmp.ne.s32.totalorder %s2545_s5, %s2238_s11  ;;  %p2242_p5 = scmp.lt.u32.totalorder %s2238_s11, %s2545_s5 }
  0x4c   :  { %p2244_p6 = pnand %p2242_p5, %p2239_p4 }
  0x4e   :  { %2247 = shalt.err (!%p2244_p6)
}
  0x4f   :  { %s2248_s3 = scalar_lea.vmem %s69_s29, 2048  ;;  %p2253_p8 = scmp.lt.s32.totalorder %s69_s29, %s69_s29 }
  0x50   :  { %p2249_p7 = scmp.ne.s32.totalorder %s69_s29, %s2248_s3  ;;  %p2254_p9 = scmp.lt.s32.totalorder %s2248_s3, %s2248_s3 }
  0x52   :  { %p2255_p10 = por %p2254_p9, %p2253_p8 }
  0x54   :  { %p2256_p11 = pnand %p2255_p10, %p2249_p7 }
  0x56   :  { %2259 = shalt.err (!%p2256_p11)
}
  0x57   :  { %74 = dma.hbm_to_vmem [thread:$0]  %s2545_s5, 2048, %s69_s29, [#allocation9], %s2320_s1, %s2320_s1, %s2321_s24  }
  0x58   :  { %s2260_s18 = scalar_lea.hbm %s2546_s6, 16 }
  0x59   :  { %p2261_p12 = scmp.ne.s32.totalorder %s2546_s6, %s2260_s18  ;;  %p2264_p13 = scmp.lt.u32.totalorder %s2260_s18, %s2546_s6 }
  0x5b   :  { %p2266_p0 = pnand %p2264_p13, %p2261_p12 }
  0x5d   :  { %2269 = shalt.err (!%p2266_p0)
}
  0x5e   :  { %s2270_s23 = scalar_lea.vmem %s82_s8, 16  ;;  %s2274_s2 = scalar_lea.vmem %s82_s8, 32 }
  0x5f   :  { %p2271_p1 = scmp.ne.s32.totalorder %s82_s8, %s2270_s23  ;;  %p2275_p2 = scmp.lt.s32.totalorder %s82_s8, %s82_s8 }
  0x60   :  { %p2276_p3 = scmp.lt.s32.totalorder %s2274_s2, %s2270_s23 }
  0x62   :  { %p2277_p4 = por %p2276_p3, %p2275_p2 }
  0x64   :  { %p2278_p5 = pnand %p2277_p4, %p2271_p1 }
  0x66   :  { %2281 = shalt.err (!%p2278_p5)
}
  0x67   :  { %84 = dma.hbm_to_vmem [thread:$0]  %s2546_s6, 16, %s82_s8, [#allocation12]  }
  0x68   :  { %2304 = dma.done.wait [#allocation3], 61952  }
  0x69   :  { %2305 = vsyncadd [#allocation3], 4294905344 }
  0x6a   :  { %2306 = dma.done.wait [#allocation6], 4128  }
  0x6b   :  { %2307 = vsyncadd [#allocation6], 4294963168 }
  0x6c   :  { %2308 = dma.done.wait [#allocation9], 2064  }
  0x6d   :  { %2309 = vsyncadd [#allocation9], 4294965232 }
  0x6e   :  { %2310 = dma.done.wait [#allocation12], 16  }
  0x6f   :  { %2311 = vsyncadd [#allocation12], 4294967280  ;;  %v108_v0 = vld [vmem:[#allocation2 + $0x8] sm:$0xff]  ;;  %v110_v1 = vld [vmem:[#allocation2 + $0x18] sm:$0xff]  ;;  %vm690_vm0 = vcmask 130048   ;;  %vm2326_vm1 = vmmov 0  }
  0x70   :  { %v300_v2 = vld [vmem:[#allocation2 + $0x608] sm:$0xff]  ;;  %v1575_v3 = vpack.c.bf16 %v110_v1, %v108_v0  ;;  %v302_v4 = vld [vmem:[#allocation2 + $0x618] sm:$0xff]  ;;  %v107_v5 = vld [vmem:[#allocation2] sm:$0xff] }
  0x71   :  { %v109_v6 = vld [vmem:[#allocation2 + $0x10] sm:$0xff]  ;;  %v1767_v7 = vpack.c.bf16 %v302_v4, %v300_v2  ;;  %v299_v9 = vld [vmem:[#allocation2 + $0x600] sm:$0xff]  ;;  %v112_v11 = vld [vmem:[#allocation2 + $0x28] sm:$0xff] }
  0x72   :  { %v1577_v8 = vpack.c.bf16 %v109_v6, %v107_v5  ;;  %v301_v10 = vld [vmem:[#allocation2 + $0x610] sm:$0xff]  ;;  %1576 = vmatprep.subr.bf16.mxu1 %v1575_v3  ;;  %v114_v13 = vld [vmem:[#allocation2 + $0x38] sm:$0xff]  ;;  %v304_v14 = vld [vmem:[#allocation2 + $0x628] sm:$0xff] }
  0x73   :  { %v1769_v12 = vpack.c.bf16 %v301_v10, %v299_v9  ;;  %v306_v15 = vld [vmem:[#allocation2 + $0x638] sm:$0xff]  ;;  %1768 = vmatprep.subr.bf16.mxu0 %v1767_v7  ;;  %v1579_v16 = vpack.c.bf16 %v114_v13, %v112_v11  ;;  %v111_v18 = vld [vmem:[#allocation2 + $0x20] sm:$0xff]  ;;  %v113_v19 = vld [vmem:[#allocation2 + $0x30] sm:$0xff] }
  0x74   :  { %1578 = vmatpush1.bf16.msra.mxu1 %v1577_v8  ;;  %v1771_v17 = vpack.c.bf16 %v306_v15, %v304_v14  ;;  %v303_v20 = vld [vmem:[#allocation2 + $0x620] sm:$0xff]  ;;  %v1581_v21 = vpack.c.bf16 %v113_v19, %v111_v18  ;;  %v305_v22 = vld [vmem:[#allocation2 + $0x630] sm:$0xff]  ;;  %v116_v23 = vld [vmem:[#allocation2 + $0x48] sm:$0xff] }
  0x75   :  { %1770 = vmatpush1.bf16.msra.mxu0 %v1769_v12  ;;  %v118_v24 = vld [vmem:[#allocation2 + $0x58] sm:$0xff]  ;;  %1580 = vmatprep.subr.bf16.mxu1 %v1579_v16  ;;  %v1773_v25 = vpack.c.bf16 %v305_v22, %v303_v20  ;;  %v308_v27 = vld [vmem:[#allocation2 + $0x648] sm:$0xff]  ;;  %v115_v29 = vld [vmem:[#allocation2 + $0x40] sm:$0xff] }
  0x76   :  { %1772 = vmatprep.subr.bf16.mxu0 %v1771_v17  ;;  %v1583_v26 = vpack.c.bf16 %v118_v24, %v116_v23  ;;  %v310_v28 = vld [vmem:[#allocation2 + $0x658] sm:$0xff]  ;;  %v117_v31 = vld [vmem:[#allocation2 + $0x50] sm:$0xff]  ;;  %v307_v32 = vld [vmem:[#allocation2 + $0x640] sm:$0xff] }
  0x77   :  { %v1775_v30 = vpack.c.bf16 %v310_v28, %v308_v27  ;;  %v309_v33 = vld [vmem:[#allocation2 + $0x650] sm:$0xff]  ;;  %v1585_v34 = vpack.c.bf16 %v117_v31, %v115_v29  ;;  %v120_v35 = vld [vmem:[#allocation2 + $0x68] sm:$0xff]  ;;  %v122_v36 = vld [vmem:[#allocation2 + $0x78] sm:$0xff] }
  0x78   :  { %1582 = vmatpush1.bf16.msra.mxu1 %v1581_v21  ;;  %v312_v37 = vld [vmem:[#allocation2 + $0x668] sm:$0xff]  ;;  %v1777_v38 = vpack.c.bf16 %v309_v33, %v307_v32  ;;  %v1587_v39 = vpack.c.bf16 %v122_v36, %v120_v35  ;;  %v314_v40 = vld [vmem:[#allocation2 + $0x678] sm:$0xff]  ;;  %v119_v41 = vld [vmem:[#allocation2 + $0x60] sm:$0xff] }
  0x79   :  { %1774 = vmatpush1.bf16.msra.mxu0 %v1773_v25  ;;  %1584 = vmatprep.subr.bf16.mxu1 %v1583_v26  ;;  %v121_v42 = vld [vmem:[#allocation2 + $0x70] sm:$0xff]  ;;  %v1779_v43 = vpack.c.bf16 %v314_v40, %v312_v37  ;;  %v311_v44 = vld [vmem:[#allocation2 + $0x660] sm:$0xff]  ;;  %v124_v46 = vld [vmem:[#allocation2 + $0x88] sm:$0xff] }
  0x7a   :  { %1776 = vmatprep.subr.bf16.mxu0 %v1775_v30  ;;  %v313_v45 = vld [vmem:[#allocation2 + $0x670] sm:$0xff]  ;;  %v126_v47 = vld [vmem:[#allocation2 + $0x98] sm:$0xff]  ;;  %v316_v48 = vld [vmem:[#allocation2 + $0x688] sm:$0xff]  ;;  %v1589_v50 = vpack.c.bf16 %v121_v42, %v119_v41 }
  0x7b   :  { %v318_v49 = vld [vmem:[#allocation2 + $0x698] sm:$0xff]  ;;  %v1781_v51 = vpack.c.bf16 %v313_v45, %v311_v44  ;;  %v1591_v52 = vpack.c.bf16 %v126_v47, %v124_v46  ;;  %v123_v53 = vld [vmem:[#allocation2 + $0x80] sm:$0xff]  ;;  %v125_v54 = vld [vmem:[#allocation2 + $0x90] sm:$0xff]  ;;  %v593_v46 = vlaneseq  ;;  %v2324_v47 = vmov 1983009808  }
  0x7c   :  { %1586 = vmatpush1.bf16.msra.mxu1 %v1585_v34  ;;  %v315_v55 = vld [vmem:[#allocation2 + $0x680] sm:$0xff]  ;;  %v1783_v56 = vpack.c.bf16 %v318_v49, %v316_v48  ;;  %v317_v57 = vld [vmem:[#allocation2 + $0x690] sm:$0xff]  ;;  %v128_v58 = vld [vmem:[#allocation2 + $0xa8] sm:$0xff]  ;;  %v1593_v62 = vpack.c.bf16 %v125_v54, %v123_v53  ;;  %v609_v48 = vunpack.c.l.s4 %v2324_v47 }
  0x7d   :  { %1778 = vmatpush1.bf16.msra.mxu0 %v1777_v38  ;;  %1588 = vmatprep.subr.bf16.mxu1 %v1587_v39  ;;  %v130_v59 = vld [vmem:[#allocation2 + $0xb8] sm:$0xff]  ;;  %v320_v60 = vld [vmem:[#allocation2 + $0x6a8] sm:$0xff]  ;;  %v1785_v63 = vpack.c.bf16 %v317_v57, %v315_v55  ;;  %v127_v1 = vld [vmem:[#allocation2 + $0xa0] sm:$0xff] }
  0x7e   :  { %1780 = vmatprep.subr.bf16.mxu0 %v1779_v43  ;;  %v322_v61 = vld [vmem:[#allocation2 + $0x6b8] sm:$0xff]  ;;  %v1595_v0 = vpack.c.bf16 %v130_v59, %v128_v58  ;;  %v129_v2 = vld [vmem:[#allocation2 + $0xb0] sm:$0xff]  ;;  %v319_v3 = vld [vmem:[#allocation2 + $0x6a0] sm:$0xff] }
  0x7f   :  { %v1787_v4 = vpack.c.bf16 %v322_v61, %v320_v60  ;;  %v321_v5 = vld [vmem:[#allocation2 + $0x6b0] sm:$0xff]  ;;  %v132_v6 = vld [vmem:[#allocation2 + $0xc8] sm:$0xff]  ;;  %v134_v7 = vld [vmem:[#allocation2 + $0xd8] sm:$0xff]  ;;  %v1597_v10 = vpack.c.bf16 %v129_v2, %v127_v1  ;;  %v2441_v61 = vshrl.u32 %v593_v46, 7 }
  0x80   :  { %1590 = vmatpush1.bf16.msra.mxu1 %v1589_v50  ;;  %v324_v8 = vld [vmem:[#allocation2 + $0x6c8] sm:$0xff]  ;;  %v326_v9 = vld [vmem:[#allocation2 + $0x6d8] sm:$0xff]  ;;  %v1789_v11 = vpack.c.bf16 %v321_v5, %v319_v3  ;;  %v1599_v12 = vpack.c.bf16 %v134_v7, %v132_v6  ;;  %v131_v13 = vld [vmem:[#allocation2 + $0xc0] sm:$0xff] }
  0x81   :  { %1782 = vmatpush1.bf16.msra.mxu0 %v1781_v51  ;;  %1592 = vmatprep.subr.bf16.mxu1 %v1591_v52  ;;  %v133_v14 = vld [vmem:[#allocation2 + $0xd0] sm:$0xff]  ;;  %v323_v15 = vld [vmem:[#allocation2 + $0x6c0] sm:$0xff]  ;;  %v1791_v16 = vpack.c.bf16 %v326_v9, %v324_v8  ;;  %v136_v18 = vld [vmem:[#allocation2 + $0xe8] sm:$0xff] }
  0x82   :  { %1784 = vmatprep.subr.bf16.mxu0 %v1783_v56  ;;  %v325_v17 = vld [vmem:[#allocation2 + $0x6d0] sm:$0xff]  ;;  %v138_v19 = vld [vmem:[#allocation2 + $0xf8] sm:$0xff]  ;;  %v328_v20 = vld [vmem:[#allocation2 + $0x6e8] sm:$0xff]  ;;  %v1601_v22 = vpack.c.bf16 %v133_v14, %v131_v13 }
  0x83   :  { %v330_v21 = vld [vmem:[#allocation2 + $0x6f8] sm:$0xff]  ;;  %v1793_v23 = vpack.c.bf16 %v325_v17, %v323_v15  ;;  %v1603_v24 = vpack.c.bf16 %v138_v19, %v136_v18  ;;  %v135_v25 = vld [vmem:[#allocation2 + $0xe0] sm:$0xff]  ;;  %v137_v26 = vld [vmem:[#allocation2 + $0xf0] sm:$0xff] }
  0x84   :  { %1594 = vmatpush1.bf16.msra.mxu1 %v1593_v62  ;;  %v327_v27 = vld [vmem:[#allocation2 + $0x6e0] sm:$0xff]  ;;  %v1795_v28 = vpack.c.bf16 %v330_v21, %v328_v20  ;;  %v329_v29 = vld [vmem:[#allocation2 + $0x6f0] sm:$0xff]  ;;  %v140_v30 = vld [vmem:[#allocation2 + $0x108] sm:$0xff]  ;;  %v1605_v34 = vpack.c.bf16 %v137_v26, %v135_v25  ;;  %v610_v62 = vunpack.c.0.s8 %v609_v48 }
  0x85   :  { %1786 = vmatpush1.bf16.msra.mxu0 %v1785_v63  ;;  %1596 = vmatprep.subr.bf16.mxu1 %v1595_v0  ;;  %v142_v31 = vld [vmem:[#allocation2 + $0x118] sm:$0xff]  ;;  %v332_v32 = vld [vmem:[#allocation2 + $0x708] sm:$0xff]  ;;  %v1797_v35 = vpack.c.bf16 %v329_v29, %v327_v27  ;;  %v139_v37 = vld [vmem:[#allocation2 + $0x100] sm:$0xff] }
  0x86   :  { %1788 = vmatprep.subr.bf16.mxu0 %v1787_v4  ;;  %v334_v33 = vld [vmem:[#allocation2 + $0x718] sm:$0xff]  ;;  %v1607_v36 = vpack.c.bf16 %v142_v31, %v140_v30  ;;  %v141_v38 = vld [vmem:[#allocation2 + $0x110] sm:$0xff]  ;;  %v331_v39 = vld [vmem:[#allocation2 + $0x700] sm:$0xff] }
  0x87   :  { %v1799_v40 = vpack.c.bf16 %v334_v33, %v332_v32  ;;  %v333_v41 = vld [vmem:[#allocation2 + $0x710] sm:$0xff]  ;;  %v144_v42 = vld [vmem:[#allocation2 + $0x128] sm:$0xff]  ;;  %v146_v43 = vld [vmem:[#allocation2 + $0x138] sm:$0xff]  ;;  %v1609_v49 = vpack.c.bf16 %v141_v38, %v139_v37 }
  0x88   :  { %1598 = vmatpush1.bf16.msra.mxu1 %v1597_v10  ;;  %v336_v44 = vld [vmem:[#allocation2 + $0x728] sm:$0xff]  ;;  %v338_v45 = vld [vmem:[#allocation2 + $0x738] sm:$0xff]  ;;  %v1801_v50 = vpack.c.bf16 %v333_v41, %v331_v39  ;;  %v1611_v51 = vpack.c.bf16 %v146_v43, %v144_v42  ;;  %v143_v52 = vld [vmem:[#allocation2 + $0x120] sm:$0xff] }
  0x89   :  { %1790 = vmatpush1.bf16.msra.mxu0 %v1789_v11  ;;  %1600 = vmatprep.subr.bf16.mxu1 %v1599_v12  ;;  %v145_v53 = vld [vmem:[#allocation2 + $0x130] sm:$0xff]  ;;  %v335_v54 = vld [vmem:[#allocation2 + $0x720] sm:$0xff]  ;;  %v1803_v55 = vpack.c.bf16 %v338_v45, %v336_v44  ;;  %v148_v57 = vld [vmem:[#allocation2 + $0x148] sm:$0xff]  ;;  %v2444_v11 = vsub.s32 %v610_v62, %v2441_v61 }
  0x8a   :  { %1792 = vmatprep.subr.bf16.mxu0 %v1791_v16  ;;  %v337_v56 = vld [vmem:[#allocation2 + $0x730] sm:$0xff]  ;;  %v150_v58 = vld [vmem:[#allocation2 + $0x158] sm:$0xff]  ;;  %v340_v59 = vld [vmem:[#allocation2 + $0x748] sm:$0xff]  ;;  %v1613_v63 = vpack.c.bf16 %v145_v53, %v143_v52 }
  0x8b   :  { %v342_v60 = vld [vmem:[#allocation2 + $0x758] sm:$0xff]  ;;  %v1805_v0 = vpack.c.bf16 %v337_v56, %v335_v54  ;;  %v1615_v1 = vpack.c.bf16 %v150_v58, %v148_v57  ;;  %v147_v2 = vld [vmem:[#allocation2 + $0x140] sm:$0xff]  ;;  %v149_v3 = vld [vmem:[#allocation2 + $0x150] sm:$0xff] }
  0x8c   :  { %1602 = vmatpush1.bf16.msra.mxu1 %v1601_v22  ;;  %v339_v4 = vld [vmem:[#allocation2 + $0x740] sm:$0xff]  ;;  %v1807_v5 = vpack.c.bf16 %v342_v60, %v340_v59  ;;  %v341_v6 = vld [vmem:[#allocation2 + $0x750] sm:$0xff]  ;;  %v152_v7 = vld [vmem:[#allocation2 + $0x168] sm:$0xff]  ;;  %v1617_v12 = vpack.c.bf16 %v149_v3, %v147_v2 }
  0x8d   :  { %1794 = vmatpush1.bf16.msra.mxu0 %v1793_v23  ;;  %1604 = vmatprep.subr.bf16.mxu1 %v1603_v24  ;;  %v154_v8 = vld [vmem:[#allocation2 + $0x178] sm:$0xff]  ;;  %v344_v9 = vld [vmem:[#allocation2 + $0x768] sm:$0xff]  ;;  %v151_v13 = vld [vmem:[#allocation2 + $0x160] sm:$0xff]  ;;  %v1809_v14 = vpack.c.bf16 %v341_v6, %v339_v4 }
  0x8e   :  { %1796 = vmatprep.subr.bf16.mxu0 %v1795_v28  ;;  %v346_v10 = vld [vmem:[#allocation2 + $0x778] sm:$0xff]  ;;  %v1619_v15 = vpack.c.bf16 %v154_v8, %v152_v7  ;;  %v153_v16 = vld [vmem:[#allocation2 + $0x170] sm:$0xff]  ;;  %v343_v17 = vld [vmem:[#allocation2 + $0x760] sm:$0xff] }
  0x8f   :  { %v345_v18 = vld [vmem:[#allocation2 + $0x770] sm:$0xff]  ;;  %v1811_v19 = vpack.c.bf16 %v346_v10, %v344_v9  ;;  %v156_v20 = vld [vmem:[#allocation2 + $0x188] sm:$0xff]  ;;  %v158_v21 = vld [vmem:[#allocation2 + $0x198] sm:$0xff]  ;;  %v1621_v27 = vpack.c.bf16 %v153_v16, %v151_v13 }
  0x90   :  { %1606 = vmatpush1.bf16.msra.mxu1 %v1605_v34  ;;  %v2449_v22 = vld [vmem:[%s2540_s0] sm:$0xff]  ;;  %v348_v23 = vld [vmem:[#allocation2 + $0x788] sm:$0xff]  ;;  %v350_v24 = vld [vmem:[#allocation2 + $0x798] sm:$0xff]  ;;  %v1813_v29 = vpack.c.bf16 %v345_v18, %v343_v17  ;;  %v1623_v30 = vpack.c.bf16 %v158_v21, %v156_v20 }
  0x91   :  { %1798 = vmatpush1.bf16.msra.mxu0 %v1797_v35  ;;  %1608 = vmatprep.subr.bf16.mxu1 %v1607_v36  ;;  %v2453_v25 = vrot.slane %v2449_v22, %v2444_v11  ;;  %v2458_v26 = vld [vmem:[%s2540_s0 + $0x8] sm:$0xff]  ;;  %v155_v31 = vld [vmem:[#allocation2 + $0x180] sm:$0xff]  ;;  %v157_v32 = vld [vmem:[#allocation2 + $0x190] sm:$0xff]  ;;  %v1815_v35 = vpack.c.bf16 %v350_v24, %v348_v23  ;;  %v607_v13 = vcombine.high %v2449_v22, %v2449_v22 }
  0x92   :  { %1800 = vmatprep.subr.bf16.mxu0 %v1799_v40  ;;  %v624_v28 = vcombine.high %v2458_v26, %v2458_v26  ;;  %v347_v33 = vld [vmem:[#allocation2 + $0x780] sm:$0xff]  ;;  %v349_v36 = vld [vmem:[#allocation2 + $0x790] sm:$0xff]  ;;  %v160_v37 = vld [vmem:[#allocation2 + $0x1a8] sm:$0xff]  ;;  %v1625_v42 = vpack.c.bf16 %v157_v32, %v155_v31 }
  0x93   :  { %v622_v34 = vcombine.high %v2453_v25, %v2453_v25  ;;  %v162_v38 = vld [vmem:[#allocation2 + $0x1b8] sm:$0xff]  ;;  %v352_v40 = vld [vmem:[#allocation2 + $0x7a8] sm:$0xff]  ;;  %v1817_v44 = vpack.c.bf16 %v349_v36, %v347_v33  ;;  %v159_v46 = vld [vmem:[#allocation2 + $0x1a0] sm:$0xff]  ;;  %v2472_v22 = vrot.slane %v607_v13, %v2444_v11 }
  0x94   :  { %1610 = vmatpush1.bf16.msra.mxu1 %v1609_v49  ;;  %v2465_v39 = vrot.slane %v624_v28, %v2444_v11  ;;  %v354_v41 = vld [vmem:[#allocation2 + $0x7b8] sm:$0xff]  ;;  %v1627_v45 = vpack.c.bf16 %v162_v38, %v160_v37  ;;  %v161_v47 = vld [vmem:[#allocation2 + $0x1b0] sm:$0xff]  ;;  %v351_v48 = vld [vmem:[#allocation2 + $0x7a0] sm:$0xff] }
  0x95   :  { %1802 = vmatpush1.bf16.msra.mxu0 %v1801_v50  ;;  %1612 = vmatprep.subr.bf16.mxu1 %v1611_v51  ;;  %v1819_v49 = vpack.c.bf16 %v354_v41, %v352_v40  ;;  %v353_v50 = vld [vmem:[#allocation2 + $0x7b0] sm:$0xff]  ;;  %v164_v51 = vld [vmem:[#allocation2 + $0x1c8] sm:$0xff]  ;;  %v166_v52 = vld [vmem:[#allocation2 + $0x1d8] sm:$0xff] }
  0x96   :  { %1804 = vmatprep.subr.bf16.mxu0 %v1803_v55  ;;  %757 = vmatprep.mubr.f32.mxu1 %v622_v34  ;;  %v640_v43 = vcombine.high %v2465_v39, %v2465_v39  ;;  %v356_v53 = vld [vmem:[#allocation2 + $0x7c8] sm:$0xff]  ;;  %v358_v54 = vld [vmem:[#allocation2 + $0x7d8] sm:$0xff]  ;;  %v1629_v55 = vpack.c.bf16 %v161_v47, %v159_v46  ;;  %v1821_v56 = vpack.c.bf16 %v353_v50, %v351_v48  ;;  %v163_v58 = vld [vmem:[#allocation2 + $0x1c0] sm:$0xff] }
  0x97   :  { %v1631_v57 = vpack.c.bf16 %v166_v52, %v164_v51  ;;  %v165_v59 = vld [vmem:[#allocation2 + $0x1d0] sm:$0xff]  ;;  %v355_v60 = vld [vmem:[#allocation2 + $0x7c0] sm:$0xff]  ;;  %v1823_v62 = vpack.c.bf16 %v358_v54, %v356_v53  ;;  %v360_v2 = vld [vmem:[#allocation2 + $0x7e8] sm:$0xff] }
  0x98   :  { %1614 = vmatpush1.bf16.msra.mxu1 %v1613_v63  ;;  %970 = vmatprep.mubr.f32.mxu0 %v640_v43  ;;  %v357_v63 = vld [vmem:[#allocation2 + $0x7d0] sm:$0xff]  ;;  %v362_v3 = vld [vmem:[#allocation2 + $0x7f8] sm:$0xff]  ;;  %v1633_v4 = vpack.c.bf16 %v165_v59, %v163_v58  ;;  %v167_v7 = vld [vmem:[#allocation2 + $0x1e0] sm:$0xff] }
  0x99   :  { %1806 = vmatpush1.bf16.msra.mxu0 %v1805_v0  ;;  %1616 = vmatprep.subr.bf16.mxu1 %v1615_v1  ;;  %v168_v0 = vld [vmem:[#allocation2 + $0x1e8] sm:$0xff]  ;;  %v170_v1 = vld [vmem:[#allocation2 + $0x1f8] sm:$0xff]  ;;  %v169_v8 = vld [vmem:[#allocation2 + $0x1f0] sm:$0xff]  ;;  %v1827_v10 = vpack.c.bf16 %v362_v3, %v360_v2 }
  0x9a   :  { %1808 = vmatprep.subr.bf16.mxu0 %v1807_v5  ;;  %v1825_v5 = vpack.c.bf16 %v357_v63, %v355_v60  ;;  %v1635_v6 = vpack.c.bf16 %v170_v1, %v168_v0  ;;  %v359_v9 = vld [vmem:[#allocation2 + $0x7e0] sm:$0xff]  ;;  %v364_v16 = vld [vmem:[#allocation2 + $0x808] sm:$0xff]  ;;  %v366_v17 = vld [vmem:[#allocation2 + $0x818] sm:$0xff]  ;;  %v1637_v18 = vpack.c.bf16 %v169_v8, %v167_v7 }
  0x9b   :  { %v171_v21 = vld [vmem:[#allocation2 + $0x200] sm:$0xff]  ;;  %v173_v23 = vld [vmem:[#allocation2 + $0x210] sm:$0xff]  ;;  %v368_v31 = vld [vmem:[#allocation2 + $0x828] sm:$0xff] }
  0x9c   :  { %1618 = vmatpush1.bf16.msra.mxu1 %v1617_v12  ;;  %v361_v12 = vld [vmem:[#allocation2 + $0x7f0] sm:$0xff]  ;;  %v363_v24 = vld [vmem:[#allocation2 + $0x800] sm:$0xff]  ;;  %v370_v32 = vld [vmem:[#allocation2 + $0x838] sm:$0xff]  ;;  %v1641_v33 = vpack.c.bf16 %v173_v23, %v171_v21 }
  0x9d   :  { %1810 = vmatpush1.bf16.msra.mxu0 %v1809_v14  ;;  %1620 = vmatprep.subr.bf16.mxu1 %v1619_v15  ;;  %v172_v14 = vld [vmem:[#allocation2 + $0x208] sm:$0xff]  ;;  %v174_v15 = vld [vmem:[#allocation2 + $0x218] sm:$0xff]  ;;  %v365_v28 = vld [vmem:[#allocation2 + $0x810] sm:$0xff]  ;;  %v1835_v40 = vpack.c.bf16 %v370_v32, %v368_v31 }
  0x9e   :  { %1812 = vmatprep.subr.bf16.mxu0 %v1811_v19  ;;  %v1829_v19 = vpack.c.bf16 %v361_v12, %v359_v9  ;;  %v1639_v20 = vpack.c.bf16 %v174_v15, %v172_v14  ;;  %v1833_v34 = vpack.c.bf16 %v365_v28, %v363_v24  ;;  %v175_v36 = vld [vmem:[#allocation2 + $0x220] sm:$0xff]  ;;  %v177_v37 = vld [vmem:[#allocation2 + $0x230] sm:$0xff]  ;;  %v182_v43 = vld [vmem:[#allocation2 + $0x258] sm:$0xff] }
  0x9f   :  { %v367_v38 = vld [vmem:[#allocation2 + $0x820] sm:$0xff]  ;;  %v369_v41 = vld [vmem:[#allocation2 + $0x830] sm:$0xff]  ;;  %v374_v46 = vld [vmem:[#allocation2 + $0x858] sm:$0xff]  ;;  %v1645_v47 = vpack.c.bf16 %v177_v37, %v175_v36 }
  0xa0   :  { %1622 = vmatpush1.bf16.msra.mxu1 %v1621_v27  ;;  %v1831_v27 = vpack.c.bf16 %v366_v17, %v364_v16  ;;  %v1837_v48 = vpack.c.bf16 %v369_v41, %v367_v38  ;;  %v179_v50 = vld [vmem:[#allocation2 + $0x240] sm:$0xff]  ;;  %v181_v51 = vld [vmem:[#allocation2 + $0x250] sm:$0xff]  ;;  %v188_v2 = vld [vmem:[#allocation2 + $0x288] sm:$0xff] }
  0xa1   :  { %1814 = vmatpush1.bf16.msra.mxu0 %v1813_v29  ;;  %1624 = vmatprep.subr.bf16.mxu1 %v1623_v30  ;;  %v176_v29 = vld [vmem:[#allocation2 + $0x228] sm:$0xff]  ;;  %v178_v30 = vld [vmem:[#allocation2 + $0x238] sm:$0xff]  ;;  %v371_v52 = vld [vmem:[#allocation2 + $0x840] sm:$0xff]  ;;  %v1649_v58 = vpack.c.bf16 %v181_v51, %v179_v50 }
  0xa2   :  { %1816 = vmatprep.subr.bf16.mxu0 %v1815_v35  ;;  %v1643_v35 = vpack.c.bf16 %v178_v30, %v176_v29  ;;  %v373_v54 = vld [vmem:[#allocation2 + $0x850] sm:$0xff]  ;;  %v183_v60 = vld [vmem:[#allocation2 + $0x260] sm:$0xff]  ;;  %v190_v3 = vld [vmem:[#allocation2 + $0x298] sm:$0xff] }
  0xa3   :  { %v375_v63 = vld [vmem:[#allocation2 + $0x860] sm:$0xff]  ;;  %v377_v1 = vld [vmem:[#allocation2 + $0x870] sm:$0xff]  ;;  %v1655_v8 = vpack.c.bf16 %v190_v3, %v188_v2  ;;  %v192_v15 = vld [vmem:[#allocation2 + $0x2a8] sm:$0xff] }
  0xa4   :  { %1626 = vmatpush1.bf16.msra.mxu1 %v1625_v42  ;;  %v180_v42 = vld [vmem:[#allocation2 + $0x248] sm:$0xff]  ;;  %v1845_v7 = vpack.c.bf16 %v377_v1, %v375_v63  ;;  %v187_v9 = vld [vmem:[#allocation2 + $0x280] sm:$0xff]  ;;  %v381_v14 = vld [vmem:[#allocation2 + $0x890] sm:$0xff] }
  0xa5   :  { %1818 = vmatpush1.bf16.msra.mxu0 %v1817_v44  ;;  %1628 = vmatprep.subr.bf16.mxu1 %v1627_v45  ;;  %v623_v44 = vcombine.high %v2472_v22, %v2472_v22  ;;  %v372_v45 = vld [vmem:[#allocation2 + $0x848] sm:$0xff]  ;;  %v379_v12 = vld [vmem:[#allocation2 + $0x880] sm:$0xff]  ;;  %v194_v16 = vld [vmem:[#allocation2 + $0x2b8] sm:$0xff] }
  0xa6   :  { %1820 = vmatprep.subr.bf16.mxu0 %v1819_v49  ;;  %v1647_v49 = vpack.c.bf16 %v182_v43, %v180_v42  ;;  %v1839_v53 = vpack.c.bf16 %v374_v46, %v372_v45  ;;  %v384_v17 = vld [vmem:[#allocation2 + $0x8a8] sm:$0xff]  ;;  %v1659_v21 = vpack.c.bf16 %v194_v16, %v192_v15  ;;  %v191_v23 = vld [vmem:[#allocation2 + $0x2a0] sm:$0xff]  ;;  %v193_v24 = vld [vmem:[#allocation2 + $0x2b0] sm:$0xff] }
  0xa7   :  { %v385_v29 = vld [vmem:[#allocation2 + $0x8b0] sm:$0xff]  ;;  %v196_v30 = vld [vmem:[#allocation2 + $0x2c8] sm:$0xff]  ;;  %v198_v31 = vld [vmem:[#allocation2 + $0x2d8] sm:$0xff] }
  0xa8   :  { %1630 = vmatpush1.bf16.msra.mxu1 %v1629_v55  ;;  %v184_v55 = vld [vmem:[#allocation2 + $0x268] sm:$0xff]  ;;  %v1663_v37 = vpack.c.bf16 %v198_v31, %v196_v30  ;;  %v197_v38 = vld [vmem:[#allocation2 + $0x2d0] sm:$0xff]  ;;  %v395_v2 = vld [vmem:[#allocation2 + $0x900] sm:$0xff] }
  0xa9   :  { %1822 = vmatpush1.bf16.msra.mxu0 %v1821_v56  ;;  %1632 = vmatprep.subr.bf16.mxu1 %v1631_v57  ;;  %v186_v56 = vld [vmem:[#allocation2 + $0x278] sm:$0xff]  ;;  %v388_v32 = vld [vmem:[#allocation2 + $0x8c8] sm:$0xff]  ;;  %v389_v41 = vld [vmem:[#allocation2 + $0x8d0] sm:$0xff] }
  0xaa   :  { %1824 = vmatprep.subr.bf16.mxu0 %v1823_v62  ;;  %v378_v57 = vld [vmem:[#allocation2 + $0x878] sm:$0xff]  ;;  %v1651_v59 = vpack.c.bf16 %v186_v56, %v184_v55  ;;  %v185_v62 = vld [vmem:[#allocation2 + $0x270] sm:$0xff]  ;;  %v200_v43 = vld [vmem:[#allocation2 + $0x2e8] sm:$0xff] }
  0xab   :  { %v2481_v45 = vld [vmem:[%s2540_s0 + $0x10] sm:$0xff]  ;;  %v392_v46 = vld [vmem:[#allocation2 + $0x8e8] sm:$0xff]  ;;  %v399_v15 = vld [vmem:[#allocation2 + $0x920] sm:$0xff] }
  0xac   :  { %1634 = vmatpush1.bf16.msra.mxu1 %v1633_v4  ;;  %v380_v4 = vld [vmem:[#allocation2 + $0x888] sm:$0xff]  ;;  %v205_v1 = vld [vmem:[#allocation2 + $0x310] sm:$0xff]  ;;  %v403_v30 = vld [vmem:[#allocation2 + $0x940] sm:$0xff] }
  0xad   :  { %1826 = vmatpush1.bf16.msra.mxu0 %v1825_v5  ;;  %1636 = vmatprep.subr.bf16.mxu1 %v1635_v6  ;;  %v382_v5 = vld [vmem:[#allocation2 + $0x898] sm:$0xff]  ;;  %v1653_v6 = vpack.c.bf16 %v185_v62, %v183_v60 }
  0xae   :  { %1828 = vmatprep.subr.bf16.mxu0 %v1827_v10  ;;  %v189_v10 = vld [vmem:[#allocation2 + $0x290] sm:$0xff]  ;;  %v1847_v13 = vpack.c.bf16 %v382_v5, %v380_v4  ;;  %v208_v5 = vld [vmem:[#allocation2 + $0x328] sm:$0xff] }
  0xaf   :  { %v397_v4 = vld [vmem:[#allocation2 + $0x910] sm:$0xff] }
  0xb0   :  { %1638 = vmatpush1.bf16.msra.mxu1 %v1637_v18  ;;  %v386_v18 = vld [vmem:[#allocation2 + $0x8b8] sm:$0xff] }
  0xb1   :  { %1830 = vmatpush1.bf16.msra.mxu0 %v1829_v19  ;;  %1640 = vmatprep.subr.bf16.mxu1 %v1639_v20  ;;  %v1657_v19 = vpack.c.bf16 %v189_v10, %v187_v9  ;;  %v1849_v20 = vpack.c.bf16 %v381_v14, %v379_v12  ;;  %v1851_v28 = vpack.c.bf16 %v386_v18, %v384_v17  ;;  %v209_v14 = vld [vmem:[#allocation2 + $0x330] sm:$0xff]  ;;  %v212_v18 = vld [vmem:[#allocation2 + $0x348] sm:$0xff] }
  0xb2   :  { %1832 = vmatprep.subr.bf16.mxu0 %v1831_v27  ;;  %v383_v27 = vld [vmem:[#allocation2 + $0x8a0] sm:$0xff]  ;;  %v1865_v10 = vpack.c.bf16 %v397_v4, %v395_v2  ;;  %v401_v17 = vld [vmem:[#allocation2 + $0x930] sm:$0xff] }
  0xb3   :  { %758 = vmatmul.mubr.f32.vlgmr.msra.gmra.mrb[0].mxu1 %v2453_v25  ;;  %v376_v25 = vld [vmem:[#allocation2 + $0x868] sm:$0xff]  ;;  %v1853_v36 = vpack.c.bf16 %v385_v29, %v383_v27  ;;  %v213_v29 = vld [vmem:[#allocation2 + $0x350] sm:$0xff]  ;;  %v223_v2 = vld [vmem:[#allocation2 + $0x3a0] sm:$0xff] }
  0xb4   :  { %1642 = vmatpush1.bf16.msra.mxu1 %v1641_v33  ;;  %971 = vmatmul.mubr.f32.vlgmr.msra.gmra.mrb[0].mxu0 %v2465_v39  ;;  %v1841_v39 = vpack.c.bf16 %v373_v54, %v371_v52  ;;  %v1843_v0 = vpack.c.bf16 %v378_v57, %v376_v25  ;;  %v390_v33 = vld [vmem:[#allocation2 + $0x8d8] sm:$0xff]  ;;  %v199_v52 = vld [vmem:[#allocation2 + $0x2e0] sm:$0xff]  ;;  %v393_v25 = vld [vmem:[#allocation2 + $0x8f0] sm:$0xff] }
  0xb5   :  { %1834 = vmatpush1.bf16.msra.mxu0 %v1833_v34  ;;  %1644 = vmatprep.subr.bf16.mxu1 %v1643_v35  ;;  %v1661_v34 = vpack.c.bf16 %v193_v24, %v191_v23  ;;  %v195_v35 = vld [vmem:[#allocation2 + $0x2c0] sm:$0xff]  ;;  %v1855_v42 = vpack.c.bf16 %v390_v33, %v388_v32  ;;  %v204_v57 = vld [vmem:[#allocation2 + $0x308] sm:$0xff]  ;;  %v1869_v24 = vpack.c.bf16 %v401_v17, %v399_v15  ;;  %v405_v32 = vld [vmem:[#allocation2 + $0x950] sm:$0xff] }
  0xb6   :  { %1836 = vmatprep.subr.bf16.mxu0 %v1835_v40  ;;  %828 = vmatprep.mubr.f32.mxu1 %v623_v44  ;;  %v387_v40 = vld [vmem:[#allocation2 + $0x8c0] sm:$0xff]  ;;  %v202_v44 = vld [vmem:[#allocation2 + $0x2f8] sm:$0xff]  ;;  %v216_v33 = vld [vmem:[#allocation2 + $0x368] sm:$0xff] }
  0xb7   :  { %v1857_v50 = vpack.c.bf16 %v389_v41, %v387_v40  ;;  %v1667_v51 = vpack.c.bf16 %v202_v44, %v200_v43  ;;  %v391_v54 = vld [vmem:[#allocation2 + $0x8e0] sm:$0xff] }
  0xb8   :  { %1646 = vmatpush1.bf16.msra.mxu1 %v1645_v47  ;;  %v394_v47 = vld [vmem:[#allocation2 + $0x8f8] sm:$0xff]  ;;  %v1861_v62 = vpack.c.bf16 %v393_v25, %v391_v54  ;;  %v215_v41 = vld [vmem:[#allocation2 + $0x360] sm:$0xff] }
  0xb9   :  { %1838 = vmatpush1.bf16.msra.mxu0 %v1837_v48  ;;  %1648 = vmatprep.subr.bf16.mxu1 %v1647_v49  ;;  %v2485_v48 = vrot.slane %v2481_v45, %v2444_v11  ;;  %v1665_v49 = vpack.c.bf16 %v197_v38, %v195_v35  ;;  %v1859_v56 = vpack.c.bf16 %v394_v47, %v392_v46  ;;  %v408_v35 = vld [vmem:[#allocation2 + $0x968] sm:$0xff]  ;;  %v407_v43 = vld [vmem:[#allocation2 + $0x960] sm:$0xff]  ;;  %v409_v46 = vld [vmem:[#allocation2 + $0x970] sm:$0xff] }
  0xba   :  { %1840 = vmatprep.subr.bf16.mxu0 %v1839_v53  ;;  %v201_v53 = vld [vmem:[#allocation2 + $0x2f0] sm:$0xff]  ;;  %v1873_v38 = vpack.c.bf16 %v405_v32, %v403_v30  ;;  %v220_v47 = vld [vmem:[#allocation2 + $0x388] sm:$0xff]  ;;  %v411_v25 = vld [vmem:[#allocation2 + $0x980] sm:$0xff] }
  0xbb   :  { %v656_v55 = vcombine.high %v2485_v48, %v2485_v48  ;;  %v1669_v60 = vpack.c.bf16 %v201_v53, %v199_v52  ;;  %v1877_v53 = vpack.c.bf16 %v409_v46, %v407_v43  ;;  %v415_v4 = vld [vmem:[#allocation2 + $0x9a0] sm:$0xff]  ;;  %v237_v46 = vld [vmem:[#allocation2 + $0x410] sm:$0xff] }
  0xbc   :  { %1650 = vmatpush1.bf16.msra.mxu1 %v1649_v58  ;;  %v206_v58 = vld [vmem:[#allocation2 + $0x318] sm:$0xff]  ;;  %v227_v15 = vld [vmem:[#allocation2 + $0x3c0] sm:$0xff] }
  0xbd   :  { %1842 = vmatpush1.bf16.msra.mxu0 %v1841_v39  ;;  %1652 = vmatprep.subr.bf16.mxu1 %v1651_v59  ;;  %v396_v39 = vld [vmem:[#allocation2 + $0x908] sm:$0xff]  ;;  %v398_v59 = vld [vmem:[#allocation2 + $0x918] sm:$0xff]  ;;  %v1671_v63 = vpack.c.bf16 %v206_v58, %v204_v57  ;;  %v413_v58 = vld [vmem:[#allocation2 + $0x990] sm:$0xff] }
  0xbe   :  { %1844 = vmatprep.subr.bf16.mxu0 %v1843_v0  ;;  %1041 = vmatprep.mubr.f32.mxu0 %v656_v55  ;;  %v203_v0 = vld [vmem:[#allocation2 + $0x300] sm:$0xff]  ;;  %v1863_v3 = vpack.c.bf16 %v398_v59, %v396_v39  ;;  %v224_v39 = vld [vmem:[#allocation2 + $0x3a8] sm:$0xff]  ;;  %v226_v59 = vld [vmem:[#allocation2 + $0x3b8] sm:$0xff] }
  0xbf   :  { %v1673_v9 = vpack.c.bf16 %v205_v1, %v203_v0  ;;  %v219_v55 = vld [vmem:[#allocation2 + $0x380] sm:$0xff]  ;;  %v1881_v0 = vpack.c.bf16 %v413_v58, %v411_v25  ;;  %v1691_v1 = vpack.c.bf16 %v226_v59, %v224_v39  ;;  %v241_v39 = vld [vmem:[#allocation2 + $0x430] sm:$0xff] }
  0xc0   :  { %1654 = vmatpush1.bf16.msra.mxu1 %v1653_v6  ;;  %v210_v6 = vld [vmem:[#allocation2 + $0x338] sm:$0xff]  ;;  %v419_v17 = vld [vmem:[#allocation2 + $0x9c0] sm:$0xff] }
  0xc1   :  { %1846 = vmatpush1.bf16.msra.mxu0 %v1845_v7  ;;  %1656 = vmatprep.subr.bf16.mxu1 %v1655_v8  ;;  %v400_v7 = vld [vmem:[#allocation2 + $0x928] sm:$0xff]  ;;  %v402_v8 = vld [vmem:[#allocation2 + $0x938] sm:$0xff]  ;;  %v1675_v12 = vpack.c.bf16 %v210_v6, %v208_v5  ;;  %v417_v6 = vld [vmem:[#allocation2 + $0x9b0] sm:$0xff] }
  0xc2   :  { %1848 = vmatprep.subr.bf16.mxu0 %v1847_v13  ;;  %v207_v13 = vld [vmem:[#allocation2 + $0x320] sm:$0xff]  ;;  %v1867_v16 = vpack.c.bf16 %v402_v8, %v400_v7  ;;  %v228_v7 = vld [vmem:[#allocation2 + $0x3c8] sm:$0xff]  ;;  %v230_v8 = vld [vmem:[#allocation2 + $0x3d8] sm:$0xff] }
  0xc3   :  { %v1677_v23 = vpack.c.bf16 %v209_v14, %v207_v13  ;;  %v1885_v13 = vpack.c.bf16 %v417_v6, %v415_v4  ;;  %v1695_v14 = vpack.c.bf16 %v230_v8, %v228_v7  ;;  %v231_v30 = vld [vmem:[#allocation2 + $0x3e0] sm:$0xff]  ;;  %v245_v8 = vld [vmem:[#allocation2 + $0x450] sm:$0xff] }
  0xc4   :  { %1658 = vmatpush1.bf16.msra.mxu1 %v1657_v19  ;;  %v214_v19 = vld [vmem:[#allocation2 + $0x358] sm:$0xff]  ;;  %v423_v32 = vld [vmem:[#allocation2 + $0x9e0] sm:$0xff] }
  0xc5   :  { %1850 = vmatpush1.bf16.msra.mxu0 %v1849_v20  ;;  %1660 = vmatprep.subr.bf16.mxu1 %v1659_v21  ;;  %v404_v20 = vld [vmem:[#allocation2 + $0x948] sm:$0xff]  ;;  %v406_v21 = vld [vmem:[#allocation2 + $0x958] sm:$0xff]  ;;  %v1679_v27 = vpack.c.bf16 %v214_v19, %v212_v18  ;;  %v421_v19 = vld [vmem:[#allocation2 + $0x9d0] sm:$0xff] }
  0xc6   :  { %1852 = vmatprep.subr.bf16.mxu0 %v1851_v28  ;;  %v211_v28 = vld [vmem:[#allocation2 + $0x340] sm:$0xff]  ;;  %v1871_v31 = vpack.c.bf16 %v406_v21, %v404_v20  ;;  %v232_v20 = vld [vmem:[#allocation2 + $0x3e8] sm:$0xff]  ;;  %v234_v21 = vld [vmem:[#allocation2 + $0x3f8] sm:$0xff] }
  0xc7   :  { %v239_v58 = vld [vmem:[#allocation2 + $0x420] sm:$0xff] }
  0xc8   :  { %1662 = vmatpush1.bf16.msra.mxu1 %v1661_v34  ;;  %v218_v34 = vld [vmem:[#allocation2 + $0x378] sm:$0xff]  ;;  %v431_v59 = vld [vmem:[#allocation2 + $0xa20] sm:$0xff]  ;;  %v1709_v4 = vpack.c.bf16 %v241_v39, %v239_v58 }
  0xc9   :  { %1854 = vmatpush1.bf16.msra.mxu0 %v1853_v36  ;;  %1664 = vmatprep.subr.bf16.mxu1 %v1663_v37  ;;  %v410_v36 = vld [vmem:[#allocation2 + $0x978] sm:$0xff]  ;;  %v1681_v37 = vpack.c.bf16 %v213_v29, %v211_v28  ;;  %v1683_v40 = vpack.c.bf16 %v218_v34, %v216_v33  ;;  %v1889_v28 = vpack.c.bf16 %v421_v19, %v419_v17  ;;  %v425_v34 = vld [vmem:[#allocation2 + $0x9f0] sm:$0xff]  ;;  %v243_v7 = vld [vmem:[#allocation2 + $0x440] sm:$0xff] }
  0xca   :  { %1856 = vmatprep.subr.bf16.mxu0 %v1855_v42  ;;  %v217_v42 = vld [vmem:[#allocation2 + $0x370] sm:$0xff]  ;;  %v1875_v44 = vpack.c.bf16 %v410_v36, %v408_v35  ;;  %v1699_v29 = vpack.c.bf16 %v234_v21, %v232_v20  ;;  %v236_v35 = vld [vmem:[#allocation2 + $0x408] sm:$0xff]  ;;  %v238_v36 = vld [vmem:[#allocation2 + $0x418] sm:$0xff] }
  0xcb   :  { %v1685_v52 = vpack.c.bf16 %v217_v42, %v215_v41  ;;  %v1893_v42 = vpack.c.bf16 %v425_v34, %v423_v32  ;;  %v1703_v43 = vpack.c.bf16 %v238_v36, %v236_v35  ;;  %v249_v19 = vld [vmem:[#allocation2 + $0x470] sm:$0xff]  ;;  %v439_v20 = vld [vmem:[#allocation2 + $0xa60] sm:$0xff] }
  0xcc   :  { %1666 = vmatpush1.bf16.msra.mxu1 %v1665_v49  ;;  %v222_v49 = vld [vmem:[#allocation2 + $0x398] sm:$0xff]  ;;  %v253_v34 = vld [vmem:[#allocation2 + $0x490] sm:$0xff]  ;;  %v443_v35 = vld [vmem:[#allocation2 + $0xa80] sm:$0xff] }
  0xcd   :  { %1858 = vmatpush1.bf16.msra.mxu0 %v1857_v50  ;;  %1668 = vmatprep.subr.bf16.mxu1 %v1667_v51  ;;  %v412_v50 = vld [vmem:[#allocation2 + $0x988] sm:$0xff]  ;;  %v414_v51 = vld [vmem:[#allocation2 + $0x998] sm:$0xff]  ;;  %v1687_v54 = vpack.c.bf16 %v222_v49, %v220_v47  ;;  %v427_v47 = vld [vmem:[#allocation2 + $0xa00] sm:$0xff] }
  0xce   :  { %1860 = vmatprep.subr.bf16.mxu0 %v1859_v56  ;;  %v221_v56 = vld [vmem:[#allocation2 + $0x390] sm:$0xff]  ;;  %v1879_v57 = vpack.c.bf16 %v414_v51, %v412_v50  ;;  %v240_v51 = vld [vmem:[#allocation2 + $0x428] sm:$0xff] }
  0xcf   :  { %v429_v50 = vld [vmem:[#allocation2 + $0xa10] sm:$0xff] }
  0xd0   :  { %1670 = vmatpush1.bf16.msra.mxu1 %v1669_v60  ;;  %v416_v60 = vld [vmem:[#allocation2 + $0x9a8] sm:$0xff]  ;;  %v1897_v25 = vpack.c.bf16 %v429_v50, %v427_v47  ;;  %v255_v47 = vld [vmem:[#allocation2 + $0x4a0] sm:$0xff] }
  0xd1   :  { %1862 = vmatpush1.bf16.msra.mxu0 %v1861_v62  ;;  %1672 = vmatprep.subr.bf16.mxu1 %v1671_v63  ;;  %v418_v62 = vld [vmem:[#allocation2 + $0x9b8] sm:$0xff]  ;;  %v1689_v63 = vpack.c.bf16 %v221_v56, %v219_v55  ;;  %v447_v50 = vld [vmem:[#allocation2 + $0xaa0] sm:$0xff] }
  0xd2   :  { %1864 = vmatprep.subr.bf16.mxu0 %v1863_v3  ;;  %v225_v3 = vld [vmem:[#allocation2 + $0x3b0] sm:$0xff]  ;;  %v1883_v5 = vpack.c.bf16 %v418_v62, %v416_v60 }
  0xd3   :  { %v433_v62 = vld [vmem:[#allocation2 + $0xa30] sm:$0xff] }
  0xd4   :  { %1674 = vmatpush1.bf16.msra.mxu1 %v1673_v9  ;;  %v420_v9 = vld [vmem:[#allocation2 + $0x9c8] sm:$0xff] }
  0xd5   :  { %1866 = vmatpush1.bf16.msra.mxu0 %v1865_v10  ;;  %1676 = vmatprep.subr.bf16.mxu1 %v1675_v12  ;;  %v422_v10 = vld [vmem:[#allocation2 + $0x9d8] sm:$0xff]  ;;  %v1693_v12 = vpack.c.bf16 %v225_v3, %v223_v2 }
  0xd6   :  { %1868 = vmatprep.subr.bf16.mxu0 %v1867_v16  ;;  %v229_v16 = vld [vmem:[#allocation2 + $0x3d0] sm:$0xff]  ;;  %v1887_v18 = vpack.c.bf16 %v422_v10, %v420_v9  ;;  %v438_v2 = vld [vmem:[#allocation2 + $0xa58] sm:$0xff]  ;;  %v435_v9 = vld [vmem:[#allocation2 + $0xa40] sm:$0xff] }
  0xd8   :  { %1678 = vmatpush1.bf16.msra.mxu1 %v1677_v23  ;;  %v424_v23 = vld [vmem:[#allocation2 + $0x9e8] sm:$0xff] }
  0xd9   :  { %1870 = vmatpush1.bf16.msra.mxu0 %v1869_v24  ;;  %1680 = vmatprep.subr.bf16.mxu1 %v1679_v27  ;;  %v426_v24 = vld [vmem:[#allocation2 + $0x9f8] sm:$0xff]  ;;  %v1697_v27 = vpack.c.bf16 %v229_v16, %v227_v15  ;;  %v1713_v16 = vpack.c.bf16 %v245_v8, %v243_v7  ;;  %v263_v7 = vld [vmem:[#allocation2 + $0x4e0] sm:$0xff]  ;;  %v265_v8 = vld [vmem:[#allocation2 + $0x4f0] sm:$0xff] }
  0xda   :  { %1872 = vmatprep.subr.bf16.mxu0 %v1871_v31  ;;  %v233_v31 = vld [vmem:[#allocation2 + $0x3f0] sm:$0xff]  ;;  %v1891_v33 = vpack.c.bf16 %v426_v24, %v424_v23  ;;  %v442_v15 = vld [vmem:[#allocation2 + $0xa78] sm:$0xff]  ;;  %v252_v24 = vld [vmem:[#allocation2 + $0x488] sm:$0xff] }
  0xdb   :  { %v1701_v41 = vpack.c.bf16 %v233_v31, %v231_v30  ;;  %v441_v23 = vld [vmem:[#allocation2 + $0xa70] sm:$0xff] }
  0xdc   :  { %1682 = vmatpush1.bf16.msra.mxu1 %v1681_v37  ;;  %v428_v37 = vld [vmem:[#allocation2 + $0xa08] sm:$0xff]  ;;  %v1909_v31 = vpack.c.bf16 %v441_v23, %v439_v20  ;;  %v459_v20 = vld [vmem:[#allocation2 + $0xb00] sm:$0xff]  ;;  %v461_v23 = vld [vmem:[#allocation2 + $0xb10] sm:$0xff] }
  0xdd   :  { %1874 = vmatpush1.bf16.msra.mxu0 %v1873_v38  ;;  %1684 = vmatprep.subr.bf16.mxu1 %v1683_v40  ;;  %v430_v38 = vld [vmem:[#allocation2 + $0xa18] sm:$0xff]  ;;  %v641_v40 = vcombine.high %v2481_v45, %v2481_v45 }
  0xde   :  { %1876 = vmatprep.subr.bf16.mxu0 %v1875_v44  ;;  %v235_v44 = vld [vmem:[#allocation2 + $0x400] sm:$0xff]  ;;  %v1895_v49 = vpack.c.bf16 %v430_v38, %v428_v37  ;;  %v434_v45 = vld [vmem:[#allocation2 + $0xa38] sm:$0xff]  ;;  %v445_v37 = vld [vmem:[#allocation2 + $0xa90] sm:$0xff] }
  0xdf   :  { %v2496_v55 = vrot.slane %v641_v40, %v2444_v11  ;;  %v1705_v56 = vpack.c.bf16 %v237_v46, %v235_v44  ;;  %v256_v38 = vld [vmem:[#allocation2 + $0x4a8] sm:$0xff]  ;;  %v258_v40 = vld [vmem:[#allocation2 + $0x4b8] sm:$0xff]  ;;  %v1913_v44 = vpack.c.bf16 %v445_v37, %v443_v35  ;;  %v463_v35 = vld [vmem:[#allocation2 + $0xb20] sm:$0xff] }
  0xe0   :  { %1686 = vmatpush1.bf16.msra.mxu1 %v1685_v52  ;;  %v242_v52 = vld [vmem:[#allocation2 + $0x438] sm:$0xff]  ;;  %v1723_v46 = vpack.c.bf16 %v258_v40, %v256_v38  ;;  %v465_v37 = vld [vmem:[#allocation2 + $0xb30] sm:$0xff]  ;;  %v276_v38 = vld [vmem:[#allocation2 + $0x548] sm:$0xff] }
  0xe1   :  { %1878 = vmatpush1.bf16.msra.mxu0 %v1877_v53  ;;  %1688 = vmatprep.subr.bf16.mxu1 %v1687_v54  ;;  %v2493_v53 = vrot.slane %v2458_v26, %v2444_v11  ;;  %v432_v54 = vld [vmem:[#allocation2 + $0xa28] sm:$0xff]  ;;  %v246_v26 = vld [vmem:[#allocation2 + $0x458] sm:$0xff]  ;;  %v657_v3 = vcombine.high %v2496_v55, %v2496_v55 }
  0xe2   :  { %1880 = vmatprep.subr.bf16.mxu0 %v1879_v57  ;;  %v1707_v57 = vpack.c.bf16 %v242_v52, %v240_v51  ;;  %v1899_v60 = vpack.c.bf16 %v434_v45, %v432_v54  ;;  %v449_v52 = vld [vmem:[#allocation2 + $0xab0] sm:$0xff]  ;;  %v260_v54 = vld [vmem:[#allocation2 + $0x4c8] sm:$0xff]  ;;  %v262_v45 = vld [vmem:[#allocation2 + $0x4d8] sm:$0xff] }
  0xe3   :  { %v1917_v58 = vpack.c.bf16 %v449_v52, %v447_v50  ;;  %v1727_v39 = vpack.c.bf16 %v262_v45, %v260_v54  ;;  %v278_v40 = vld [vmem:[#allocation2 + $0x558] sm:$0xff]  ;;  %v467_v50 = vld [vmem:[#allocation2 + $0xb40] sm:$0xff]  ;;  %v469_v52 = vld [vmem:[#allocation2 + $0xb50] sm:$0xff] }
  0xe4   :  { %1690 = vmatpush1.bf16.msra.mxu1 %v1689_v63  ;;  %v244_v63 = vld [vmem:[#allocation2 + $0x448] sm:$0xff]  ;;  %v282_v45 = vld [vmem:[#allocation2 + $0x578] sm:$0xff] }
  0xe5   :  { %1882 = vmatpush1.bf16.msra.mxu0 %v1881_v0  ;;  %1692 = vmatprep.subr.bf16.mxu1 %v1691_v1  ;;  %v639_v0 = vcombine.high %v2493_v53, %v2493_v53  ;;  %v436_v1 = vld [vmem:[#allocation2 + $0xa48] sm:$0xff]  ;;  %v1711_v6 = vpack.c.bf16 %v246_v26, %v244_v63  ;;  %v453_v26 = vld [vmem:[#allocation2 + $0xad0] sm:$0xff] }
  0xe6   :  { %1884 = vmatprep.subr.bf16.mxu0 %v1883_v5  ;;  %v1901_v5 = vpack.c.bf16 %v433_v62, %v431_v59  ;;  %v1903_v10 = vpack.c.bf16 %v438_v2, %v436_v1  ;;  %v259_v59 = vld [vmem:[#allocation2 + $0x4c0] sm:$0xff]  ;;  %v266_v1 = vld [vmem:[#allocation2 + $0x4f8] sm:$0xff]  ;;  %v456_v2 = vld [vmem:[#allocation2 + $0xae8] sm:$0xff] }
  0xe7   :  { %v451_v62 = vld [vmem:[#allocation2 + $0xac0] sm:$0xff]  ;;  %v280_v54 = vld [vmem:[#allocation2 + $0x568] sm:$0xff] }
  0xe8   :  { %1694 = vmatpush1.bf16.msra.mxu1 %v1693_v12  ;;  %v437_v12 = vld [vmem:[#allocation2 + $0xa50] sm:$0xff] }
  0xe9   :  { %1886 = vmatpush1.bf16.msra.mxu0 %v1885_v13  ;;  %1696 = vmatprep.subr.bf16.mxu1 %v1695_v14  ;;  %v250_v13 = vld [vmem:[#allocation2 + $0x478] sm:$0xff]  ;;  %v440_v14 = vld [vmem:[#allocation2 + $0xa68] sm:$0xff] }
  0xea   :  { %1888 = vmatprep.subr.bf16.mxu0 %v1887_v18  ;;  %v247_v18 = vld [vmem:[#allocation2 + $0x460] sm:$0xff]  ;;  %v1907_v21 = vpack.c.bf16 %v442_v15, %v440_v14  ;;  %v460_v14 = vld [vmem:[#allocation2 + $0xb08] sm:$0xff]  ;;  %v462_v15 = vld [vmem:[#allocation2 + $0xb18] sm:$0xff] }
  0xeb   :  { %v1717_v30 = vpack.c.bf16 %v249_v19, %v247_v18  ;;  %v267_v18 = vld [vmem:[#allocation2 + $0x500] sm:$0xff]  ;;  %v269_v19 = vld [vmem:[#allocation2 + $0x510] sm:$0xff] }
  0xec   :  { %1698 = vmatpush1.bf16.msra.mxu1 %v1697_v27  ;;  %v254_v27 = vld [vmem:[#allocation2 + $0x498] sm:$0xff] }
  0xed   :  { %1890 = vmatpush1.bf16.msra.mxu0 %v1889_v28  ;;  %1700 = vmatprep.subr.bf16.mxu1 %v1699_v29  ;;  %v444_v28 = vld [vmem:[#allocation2 + $0xa88] sm:$0xff]  ;;  %v446_v29 = vld [vmem:[#allocation2 + $0xa98] sm:$0xff]  ;;  %v1719_v32 = vpack.c.bf16 %v254_v27, %v252_v24 }
  0xee   :  { %1892 = vmatprep.subr.bf16.mxu0 %v1891_v33  ;;  %v251_v33 = vld [vmem:[#allocation2 + $0x480] sm:$0xff]  ;;  %v1911_v36 = vpack.c.bf16 %v446_v29, %v444_v28  ;;  %v272_v24 = vld [vmem:[#allocation2 + $0x528] sm:$0xff]  ;;  %v274_v27 = vld [vmem:[#allocation2 + $0x538] sm:$0xff] }
  0xef   :  { %v464_v28 = vld [vmem:[#allocation2 + $0xb28] sm:$0xff]  ;;  %v466_v29 = vld [vmem:[#allocation2 + $0xb38] sm:$0xff] }
  0xf0   :  { %1702 = vmatpush1.bf16.msra.mxu1 %v1701_v41  ;;  %v448_v41 = vld [vmem:[#allocation2 + $0xaa8] sm:$0xff] }
  0xf1   :  { %1894 = vmatpush1.bf16.msra.mxu0 %v1893_v42  ;;  %1704 = vmatprep.subr.bf16.mxu1 %v1703_v43  ;;  %v450_v42 = vld [vmem:[#allocation2 + $0xab8] sm:$0xff]  ;;  %v1721_v43 = vpack.c.bf16 %v253_v34, %v251_v33  ;;  %v271_v33 = vld [vmem:[#allocation2 + $0x520] sm:$0xff]  ;;  %v273_v34 = vld [vmem:[#allocation2 + $0x530] sm:$0xff] }
  0xf2   :  { %1896 = vmatprep.subr.bf16.mxu0 %v1895_v49  ;;  %v257_v49 = vld [vmem:[#allocation2 + $0x4b0] sm:$0xff]  ;;  %v1915_v51 = vpack.c.bf16 %v450_v42, %v448_v41  ;;  %v468_v41 = vld [vmem:[#allocation2 + $0xb48] sm:$0xff]  ;;  %v470_v42 = vld [vmem:[#allocation2 + $0xb58] sm:$0xff] }
  0xf3   :  { %829 = vmatmul.mubr.f32.vlgmr.msra.gmra.mrb[0].mxu1 %v2472_v22  ;;  %v248_v22 = vld [vmem:[#allocation2 + $0x468] sm:$0xff] }
  0xf4   :  { %1706 = vmatpush1.bf16.msra.mxu1 %v1705_v56  ;;  %1042 = vmatmul.mubr.f32.vlgmr.msra.gmra.mrb[0].mxu0 %v2485_v48  ;;  %v1905_v48 = vpack.c.bf16 %v437_v12, %v435_v9  ;;  %v1715_v17 = vpack.c.bf16 %v250_v13, %v248_v22  ;;  %v452_v56 = vld [vmem:[#allocation2 + $0xac8] sm:$0xff]  ;;  %v455_v9 = vld [vmem:[#allocation2 + $0xae0] sm:$0xff]  ;;  %v457_v12 = vld [vmem:[#allocation2 + $0xaf0] sm:$0xff] }
  0xf5   :  { %1898 = vmatpush1.bf16.msra.mxu0 %v1897_v25  ;;  %1708 = vmatprep.subr.bf16.mxu1 %v1707_v57  ;;  %v454_v25 = vld [vmem:[#allocation2 + $0xad8] sm:$0xff]  ;;  %v1725_v57 = vpack.c.bf16 %v257_v49, %v255_v47  ;;  %v268_v22 = vld [vmem:[#allocation2 + $0x508] sm:$0xff]  ;;  %v275_v47 = vld [vmem:[#allocation2 + $0x540] sm:$0xff] }
  0xf6   :  { %1900 = vmatprep.subr.bf16.mxu0 %v1899_v60  ;;  %899 = vmatprep.mubr.f32.mxu1 %v639_v0  ;;  %v261_v60 = vld [vmem:[#allocation2 + $0x4d0] sm:$0xff]  ;;  %v1919_v63 = vpack.c.bf16 %v454_v25, %v452_v56  ;;  %v264_v0 = vld [vmem:[#allocation2 + $0x4e8] sm:$0xff]  ;;  %v270_v13 = vld [vmem:[#allocation2 + $0x518] sm:$0xff] }
  0xf7   :  { %1112 = vmatprep.mubr.f32.mxu0 %v657_v3  ;;  %v458_v3 = vld [vmem:[#allocation2 + $0xaf8] sm:$0xff]  ;;  %v277_v49 = vld [vmem:[#allocation2 + $0x550] sm:$0xff]  ;;  %v472_v56 = vld [vmem:[#allocation2 + $0xb68] sm:$0xff] }
  0xf8   :  { %1710 = vmatpush1.bf16.msra.mxu1 %v1709_v4  ;;  %v1729_v4 = vpack.c.bf16 %v261_v60, %v259_v59  ;;  %v474_v25 = vld [vmem:[#allocation2 + $0xb78] sm:$0xff]  ;;  %v279_v59 = vld [vmem:[#allocation2 + $0x560] sm:$0xff]  ;;  %v281_v60 = vld [vmem:[#allocation2 + $0x570] sm:$0xff] }
  0xf9   :  { %1902 = vmatpush1.bf16.msra.mxu0 %v1901_v5  ;;  %1712 = vmatprep.subr.bf16.mxu1 %v1711_v6  ;;  %v1921_v5 = vpack.c.bf16 %v453_v26, %v451_v62  ;;  %v1731_v6 = vpack.c.bf16 %v266_v1, %v264_v0  ;;  %v471_v62 = vld [vmem:[#allocation2 + $0xb60] sm:$0xff]  ;;  %v473_v26 = vld [vmem:[#allocation2 + $0xb70] sm:$0xff]  ;;  %v284_v0 = vld [vmem:[#allocation2 + $0x588] sm:$0xff] }
  0xfa   :  { %1904 = vmatprep.subr.bf16.mxu0 %v1903_v10  ;;  %v1923_v10 = vpack.c.bf16 %v458_v3, %v456_v2  ;;  %v286_v1 = vld [vmem:[#allocation2 + $0x598] sm:$0xff]  ;;  %v476_v2 = vld [vmem:[#allocation2 + $0xb88] sm:$0xff] }
  0xfb   :  { %v478_v3 = vld [vmem:[#allocation2 + $0xb98] sm:$0xff] }
  0xfc   :  { %1714 = vmatpush1.bf16.msra.mxu1 %v1713_v16  ;;  %v1733_v16 = vpack.c.bf16 %v265_v8, %v263_v7  ;;  %v283_v7 = vld [vmem:[#allocation2 + $0x580] sm:$0xff]  ;;  %v285_v8 = vld [vmem:[#allocation2 + $0x590] sm:$0xff] }
  0xfd   :  { %1906 = vmatpush1.bf16.msra.mxu0 %v1905_v48  ;;  %1716 = vmatprep.subr.bf16.mxu1 %v1715_v17  ;;  %v1925_v48 = vpack.c.bf16 %v457_v12, %v455_v9  ;;  %v1735_v17 = vpack.c.bf16 %v270_v13, %v268_v22  ;;  %v475_v9 = vld [vmem:[#allocation2 + $0xb80] sm:$0xff]  ;;  %v477_v12 = vld [vmem:[#allocation2 + $0xb90] sm:$0xff]  ;;  %v288_v22 = vld [vmem:[#allocation2 + $0x5a8] sm:$0xff] }
  0xfe   :  { %1908 = vmatprep.subr.bf16.mxu0 %v1907_v21  ;;  %v1927_v21 = vpack.c.bf16 %v462_v15, %v460_v14  ;;  %v290_v13 = vld [vmem:[#allocation2 + $0x5b8] sm:$0xff]  ;;  %v480_v14 = vld [vmem:[#allocation2 + $0xba8] sm:$0xff] }
  0xff   :  { %v482_v15 = vld [vmem:[#allocation2 + $0xbb8] sm:$0xff] }
 0x100   :  { %1718 = vmatpush1.bf16.msra.mxu1 %v1717_v30  ;;  %v1737_v30 = vpack.c.bf16 %v269_v19, %v267_v18  ;;  %v287_v18 = vld [vmem:[#allocation2 + $0x5a0] sm:$0xff]  ;;  %v289_v19 = vld [vmem:[#allocation2 + $0x5b0] sm:$0xff] }
 0x101   :  { %1910 = vmatpush1.bf16.msra.mxu0 %v1909_v31  ;;  %1720 = vmatprep.subr.bf16.mxu1 %v1719_v32  ;;  %v1929_v31 = vpack.c.bf16 %v461_v23, %v459_v20  ;;  %v1739_v32 = vpack.c.bf16 %v274_v27, %v272_v24  ;;  %v479_v20 = vld [vmem:[#allocation2 + $0xba0] sm:$0xff]  ;;  %v481_v23 = vld [vmem:[#allocation2 + $0xbb0] sm:$0xff]  ;;  %v292_v24 = vld [vmem:[#allocation2 + $0x5c8] sm:$0xff] }
 0x102   :  { %1912 = vmatprep.subr.bf16.mxu0 %v1911_v36  ;;  %v1931_v36 = vpack.c.bf16 %v466_v29, %v464_v28  ;;  %v294_v27 = vld [vmem:[#allocation2 + $0x5d8] sm:$0xff]  ;;  %v484_v28 = vld [vmem:[#allocation2 + $0xbc8] sm:$0xff] }
 0x103   :  { %v486_v29 = vld [vmem:[#allocation2 + $0xbd8] sm:$0xff] }
 0x104   :  { %1722 = vmatpush1.bf16.msra.mxu1 %v1721_v43  ;;  %v1741_v43 = vpack.c.bf16 %v273_v34, %v271_v33  ;;  %v291_v33 = vld [vmem:[#allocation2 + $0x5c0] sm:$0xff]  ;;  %v293_v34 = vld [vmem:[#allocation2 + $0x5d0] sm:$0xff] }
 0x105   :  { %1914 = vmatpush1.bf16.msra.mxu0 %v1913_v44  ;;  %1724 = vmatprep.subr.bf16.mxu1 %v1723_v46  ;;  %v1933_v44 = vpack.c.bf16 %v465_v37, %v463_v35  ;;  %v1743_v46 = vpack.c.bf16 %v278_v40, %v276_v38  ;;  %v483_v35 = vld [vmem:[#allocation2 + $0xbc0] sm:$0xff]  ;;  %v485_v37 = vld [vmem:[#allocation2 + $0xbd0] sm:$0xff]  ;;  %v296_v38 = vld [vmem:[#allocation2 + $0x5e8] sm:$0xff] }
 0x106   :  { %1916 = vmatprep.subr.bf16.mxu0 %v1915_v51  ;;  %v1935_v51 = vpack.c.bf16 %v470_v42, %v468_v41  ;;  %v298_v40 = vld [vmem:[#allocation2 + $0x5f8] sm:$0xff]  ;;  %v488_v41 = vld [vmem:[#allocation2 + $0xbe8] sm:$0xff] }
 0x107   :  { %v490_v42 = vld [vmem:[#allocation2 + $0xbf8] sm:$0xff] }
 0x108   :  { %1726 = vmatpush1.bf16.msra.mxu1 %v1725_v57  ;;  %v1745_v57 = vpack.c.bf16 %v277_v49, %v275_v47  ;;  %v295_v47 = vld [vmem:[#allocation2 + $0x5e0] sm:$0xff]  ;;  %v297_v49 = vld [vmem:[#allocation2 + $0x5f0] sm:$0xff] }
 0x109   :  { %1918 = vmatpush1.bf16.msra.mxu0 %v1917_v58  ;;  %1728 = vmatprep.subr.bf16.mxu1 %v1727_v39  ;;  %v1937_v58 = vpack.c.bf16 %v469_v52, %v467_v50  ;;  %v1747_v39 = vpack.c.bf16 %v282_v45, %v280_v54  ;;  %v1955_v50 = vpack.c.bf16 %v490_v42, %v488_v41  ;;  %v489_v52 = vld [vmem:[#allocation2 + $0xbf0] sm:$0xff]  ;;  %v2507_v54 = vld [vmem:[%s2540_s0 + $0x18] sm:$0xff]  ;;  %v492_v45 = vld [vmem:[#allocation2 + $0xc08] sm:$0xff]  ;;  %s2328_s0 = smov [#allocation13]  }
 0x10a   :  { %1920 = vmatprep.subr.bf16.mxu0 %v1919_v63  ;;  %v1939_v63 = vpack.c.bf16 %v474_v25, %v472_v56  ;;  %v494_v56 = vld [vmem:[#allocation2 + $0xc18] sm:$0xff]  ;;  %v1765_v25 = vpack.c.bf16 %v297_v49, %v295_v47  ;;  %v524_v41 = vld [vmem:[#allocation2 + $0xd08] sm:$0xff]  ;;  %v525_v47 = vld [vmem:[#allocation2 + $0xd10] sm:$0xff]  ;;  %s1473_s9 = sshll.u32 %s2328_s0, 4  ;;  %s1474_s9 = int_to_ptr.vmem [resolvable:$true] %s1473_s9 }
 0x10b   :  { %v526_v42 = vld [vmem:[#allocation2 + $0xd18] sm:$0xff]  ;;  %v528_v49 = vld [vmem:[#allocation2 + $0xd28] sm:$0xff]  ;;  %s2282_s10 = scalar_lea.vmem %s1474_s9, 32  ;;  %p2287_p7 = scmp.lt.s32.totalorder %s1474_s9, %s1474_s9 }
 0x10c   :  { %1730 = vmatpush1.bf16.msra.mxu1 %v1729_v4  ;;  %v1749_v4 = vpack.c.bf16 %v281_v60, %v279_v59  ;;  %v491_v59 = vld [vmem:[#allocation2 + $0xc00] sm:$0xff]  ;;  %v493_v60 = vld [vmem:[#allocation2 + $0xc10] sm:$0xff]  ;;  %p2283_p6 = scmp.ne.s32.totalorder %s1474_s9, %s2282_s10  ;;  %p2288_p8 = scmp.lt.s32.totalorder %s2282_s10, %s2282_s10 }
 0x10d   :  { %1922 = vmatpush1.bf16.msra.mxu0 %v1921_v5  ;;  %1732 = vmatprep.subr.bf16.mxu1 %v1731_v6  ;;  %v1941_v5 = vpack.c.bf16 %v473_v26, %v471_v62  ;;  %v1751_v6 = vpack.c.bf16 %v286_v1, %v284_v0  ;;  %v496_v62 = vld [vmem:[#allocation2 + $0xc28] sm:$0xff]  ;;  %v1961_v26 = vpack.c.bf16 %v493_v60, %v491_v59  ;;  %v531_v60 = vld [vmem:[#allocation2 + $0xd40] sm:$0xff] }
 0x10e   :  { %1924 = vmatprep.subr.bf16.mxu0 %v1923_v10  ;;  %v1943_v10 = vpack.c.bf16 %v478_v3, %v476_v2  ;;  %v495_v2 = vld [vmem:[#allocation2 + $0xc20] sm:$0xff]  ;;  %v497_v3 = vld [vmem:[#allocation2 + $0xc30] sm:$0xff]  ;;  %p2289_p9 = por %p2288_p8, %p2287_p7 }
 0x110   :  { %1734 = vmatpush1.bf16.msra.mxu1 %v1733_v16  ;;  %v1753_v16 = vpack.c.bf16 %v285_v8, %v283_v7  ;;  %v499_v8 = vld [vmem:[#allocation2 + $0xc40] sm:$0xff]  ;;  %p2290_p10 = pnand %p2289_p9, %p2283_p6 }
 0x111   :  { %1926 = vmatpush1.bf16.msra.mxu0 %v1925_v48  ;;  %1736 = vmatprep.subr.bf16.mxu1 %v1735_v17  ;;  %v1945_v48 = vpack.c.bf16 %v477_v12, %v475_v9  ;;  %v1755_v17 = vpack.c.bf16 %v290_v13, %v288_v22  ;;  %v501_v9 = vld [vmem:[#allocation2 + $0xc50] sm:$0xff]  ;;  %v506_v12 = vld [vmem:[#allocation2 + $0xc78] sm:$0xff] }
 0x112   :  { %1928 = vmatprep.subr.bf16.mxu0 %v1927_v21  ;;  %v1947_v21 = vpack.c.bf16 %v482_v15, %v480_v14  ;;  %v1969_v22 = vpack.c.bf16 %v501_v9, %v499_v8  ;;  %v503_v14 = vld [vmem:[#allocation2 + $0xc60] sm:$0xff]  ;;  %v505_v15 = vld [vmem:[#allocation2 + $0xc70] sm:$0xff] }
 0x113   :  { %v539_v8 = vld [vmem:[#allocation2 + $0xd80] sm:$0xff]  ;;  %v541_v9 = vld [vmem:[#allocation2 + $0xd90] sm:$0xff] }
 0x114   :  { %1738 = vmatpush1.bf16.msra.mxu1 %v1737_v30  ;;  %v1757_v30 = vpack.c.bf16 %v289_v19, %v287_v18  ;;  %v509_v18 = vld [vmem:[#allocation2 + $0xc90] sm:$0xff]  ;;  %v512_v19 = vld [vmem:[#allocation2 + $0xca8] sm:$0xff] }
 0x115   :  { %1930 = vmatpush1.bf16.msra.mxu0 %v1929_v31  ;;  %1740 = vmatprep.subr.bf16.mxu1 %v1739_v32  ;;  %v1949_v31 = vpack.c.bf16 %v481_v23, %v479_v20  ;;  %v1759_v32 = vpack.c.bf16 %v294_v27, %v292_v24  ;;  %v514_v20 = vld [vmem:[#allocation2 + $0xcb8] sm:$0xff]  ;;  %v511_v24 = vld [vmem:[#allocation2 + $0xca0] sm:$0xff]  ;;  %v513_v27 = vld [vmem:[#allocation2 + $0xcb0] sm:$0xff] }
 0x116   :  { %1932 = vmatprep.subr.bf16.mxu0 %v1931_v36  ;;  %v1951_v36 = vpack.c.bf16 %v486_v29, %v484_v28  ;;  %v1979_v23 = vpack.c.bf16 %v514_v20, %v512_v19  ;;  %v516_v28 = vld [vmem:[#allocation2 + $0xcc8] sm:$0xff]  ;;  %v518_v29 = vld [vmem:[#allocation2 + $0xcd8] sm:$0xff] }
 0x117   :  { %v552_v19 = vld [vmem:[#allocation2 + $0xde8] sm:$0xff]  ;;  %v554_v20 = vld [vmem:[#allocation2 + $0xdf8] sm:$0xff] }
 0x118   :  { %1742 = vmatpush1.bf16.msra.mxu1 %v1741_v43  ;;  %v1761_v43 = vpack.c.bf16 %v293_v34, %v291_v33  ;;  %v517_v33 = vld [vmem:[#allocation2 + $0xcd0] sm:$0xff]  ;;  %v520_v34 = vld [vmem:[#allocation2 + $0xce8] sm:$0xff] }
 0x119   :  { %1934 = vmatpush1.bf16.msra.mxu0 %v1933_v44  ;;  %1744 = vmatprep.subr.bf16.mxu1 %v1743_v46  ;;  %v1953_v44 = vpack.c.bf16 %v485_v37, %v483_v35  ;;  %v1763_v46 = vpack.c.bf16 %v298_v40, %v296_v38  ;;  %v522_v35 = vld [vmem:[#allocation2 + $0xcf8] sm:$0xff]  ;;  %v519_v38 = vld [vmem:[#allocation2 + $0xce0] sm:$0xff]  ;;  %v521_v40 = vld [vmem:[#allocation2 + $0xcf0] sm:$0xff] }
 0x11a   :  { %1936 = vmatprep.subr.bf16.mxu0 %v1935_v51  ;;  %v487_v51 = vld [vmem:[#allocation2 + $0xbe0] sm:$0xff]  ;;  %v1987_v37 = vpack.c.bf16 %v522_v35, %v520_v34  ;;  %v557_v35 = vld [vmem:[#allocation2 + $0xe10] sm:$0xff] }
 0x11b   :  { %v555_v34 = vld [vmem:[#allocation2 + $0xe00] sm:$0xff] }
 0x11c   :  { %1746 = vmatpush1.bf16.msra.mxu1 %v1745_v57  ;;  %v1957_v57 = vpack.c.bf16 %v489_v52, %v487_v51 }
 0x11d   :  { %1938 = vmatpush1.bf16.msra.mxu0 %v1937_v58  ;;  %1748 = vmatprep.subr.bf16.mxu1 %v1747_v39  ;;  %v2511_v58 = vrot.slane %v2507_v54, %v2444_v11  ;;  %v1959_v39 = vpack.c.bf16 %v494_v56, %v492_v45  ;;  %v527_v45 = vld [vmem:[#allocation2 + $0xd20] sm:$0xff]  ;;  %v529_v56 = vld [vmem:[#allocation2 + $0xd30] sm:$0xff] }
 0x11e   :  { %1940 = vmatprep.subr.bf16.mxu0 %v1939_v63  ;;  %v498_v63 = vld [vmem:[#allocation2 + $0xc38] sm:$0xff] }
 0x11f   :  { %v673_v0 = vcombine.high %v2511_v58, %v2511_v58  ;;  %v1963_v1 = vpack.c.bf16 %v498_v63, %v496_v62  ;;  %v533_v62 = vld [vmem:[#allocation2 + $0xd50] sm:$0xff]  ;;  %v536_v63 = vld [vmem:[#allocation2 + $0xd68] sm:$0xff] }
 0x120   :  { %1750 = vmatpush1.bf16.msra.mxu1 %v1749_v4  ;;  %v500_v4 = vld [vmem:[#allocation2 + $0xc48] sm:$0xff] }
 0x121   :  { %1942 = vmatpush1.bf16.msra.mxu0 %v1941_v5  ;;  %1752 = vmatprep.subr.bf16.mxu1 %v1751_v6  ;;  %v502_v5 = vld [vmem:[#allocation2 + $0xc58] sm:$0xff]  ;;  %v1965_v6 = vpack.c.bf16 %v497_v3, %v495_v2  ;;  %v535_v2 = vld [vmem:[#allocation2 + $0xd60] sm:$0xff]  ;;  %v537_v3 = vld [vmem:[#allocation2 + $0xd70] sm:$0xff] }
 0x122   :  { %1944 = vmatprep.subr.bf16.mxu0 %v1943_v10  ;;  %v1967_v7 = vpack.c.bf16 %v502_v5, %v500_v4  ;;  %v504_v10 = vld [vmem:[#allocation2 + $0xc68] sm:$0xff]  ;;  %v542_v5 = vld [vmem:[#allocation2 + $0xd98] sm:$0xff] }
 0x123   :  { %v1971_v13 = vpack.c.bf16 %v506_v12, %v504_v10  ;;  %v540_v4 = vld [vmem:[#allocation2 + $0xd88] sm:$0xff]  ;;  %v546_v12 = vld [vmem:[#allocation2 + $0xdb8] sm:$0xff] }
 0x124   :  { %1754 = vmatpush1.bf16.msra.mxu1 %v1753_v16  ;;  %v510_v16 = vld [vmem:[#allocation2 + $0xc98] sm:$0xff]  ;;  %v544_v10 = vld [vmem:[#allocation2 + $0xda8] sm:$0xff] }
 0x125   :  { %1946 = vmatpush1.bf16.msra.mxu0 %v1945_v48  ;;  %1756 = vmatprep.subr.bf16.mxu1 %v1755_v17  ;;  %v1973_v48 = vpack.c.bf16 %v505_v15, %v503_v14  ;;  %v507_v17 = vld [vmem:[#allocation2 + $0xc80] sm:$0xff]  ;;  %v545_v15 = vld [vmem:[#allocation2 + $0xdb0] sm:$0xff] }
 0x126   :  { %1948 = vmatprep.subr.bf16.mxu0 %v1947_v21  ;;  %v1977_v21 = vpack.c.bf16 %v509_v18, %v507_v17  ;;  %v543_v14 = vld [vmem:[#allocation2 + $0xda0] sm:$0xff]  ;;  %v549_v18 = vld [vmem:[#allocation2 + $0xdd0] sm:$0xff] }
 0x127   :  { %v547_v17 = vld [vmem:[#allocation2 + $0xdc0] sm:$0xff] }
 0x128   :  { %1758 = vmatpush1.bf16.msra.mxu1 %v1757_v30  ;;  %v1981_v30 = vpack.c.bf16 %v513_v27, %v511_v24  ;;  %v2019_v24 = vpack.c.bf16 %v554_v20, %v552_v19  ;;  %v551_v27 = vld [vmem:[#allocation2 + $0xde0] sm:$0xff] }
 0x129   :  { %1950 = vmatpush1.bf16.msra.mxu0 %v1949_v31  ;;  %1760 = vmatprep.subr.bf16.mxu1 %v1759_v32  ;;  %v1983_v31 = vpack.c.bf16 %v518_v29, %v516_v28  ;;  %v515_v32 = vld [vmem:[#allocation2 + $0xcc0] sm:$0xff]  ;;  %v553_v28 = vld [vmem:[#allocation2 + $0xdf0] sm:$0xff]  ;;  %v556_v29 = vld [vmem:[#allocation2 + $0xe08] sm:$0xff] }
 0x12a   :  { %1952 = vmatprep.subr.bf16.mxu0 %v1951_v36  ;;  %v1985_v36 = vpack.c.bf16 %v517_v33, %v515_v32 }
 0x12c   :  { %1762 = vmatpush1.bf16.msra.mxu1 %v1761_v43  ;;  %v1989_v43 = vpack.c.bf16 %v521_v40, %v519_v38  ;;  %v2025_v38 = vpack.c.bf16 %v557_v35, %v555_v34  ;;  %v587_v34 = vld [vmem:[#allocation2 + $0xf00] sm:$0xff] }
 0x12d   :  { %1954 = vmatpush1.bf16.msra.mxu0 %v1953_v44  ;;  %1764 = vmatprep.subr.bf16.mxu1 %v1763_v46  ;;  %v1991_v44 = vpack.c.bf16 %v526_v42, %v524_v41  ;;  %v523_v46 = vld [vmem:[#allocation2 + $0xd00] sm:$0xff]  ;;  %v561_v42 = vld [vmem:[#allocation2 + $0xe30] sm:$0xff] }
 0x12e   :  { %1956 = vmatprep.subr.bf16.mxu0 %v1955_v50  ;;  %v530_v50 = vld [vmem:[#allocation2 + $0xd38] sm:$0xff]  ;;  %v1993_v51 = vpack.c.bf16 %v525_v47, %v523_v46  ;;  %v559_v41 = vld [vmem:[#allocation2 + $0xe20] sm:$0xff] }
 0x12f   :  { %v1995_v52 = vpack.c.bf16 %v530_v50, %v528_v49  ;;  %v563_v47 = vld [vmem:[#allocation2 + $0xe40] sm:$0xff]  ;;  %v565_v49 = vld [vmem:[#allocation2 + $0xe50] sm:$0xff]  ;;  %v568_v50 = vld [vmem:[#allocation2 + $0xe68] sm:$0xff] }
 0x130   :  { %1766 = vmatpush1.bf16.msra.mxu1 %v1765_v25  ;;  %v532_v25 = vld [vmem:[#allocation2 + $0xd48] sm:$0xff] }
 0x131   :  { %1958 = vmatpush1.bf16.msra.mxu0 %v1957_v57  ;;  %v534_v57 = vld [vmem:[#allocation2 + $0xd58] sm:$0xff] }
 0x132   :  { %1960 = vmatprep.subr.bf16.mxu0 %v1959_v39  ;;  %v1997_v39 = vpack.c.bf16 %v529_v56, %v527_v45  ;;  %v1999_v59 = vpack.c.bf16 %v534_v57, %v532_v25  ;;  %v567_v56 = vld [vmem:[#allocation2 + $0xe60] sm:$0xff]  ;;  %v569_v25 = vld [vmem:[#allocation2 + $0xe70] sm:$0xff]  ;;  %v572_v57 = vld [vmem:[#allocation2 + $0xe88] sm:$0xff] }
 0x133   :  { %900 = vmatmul.mubr.f32.vlgmr.msra.gmra.mrb[0].mxu1 %v2493_v53  ;;  %v508_v53 = vld [vmem:[#allocation2 + $0xc88] sm:$0xff] }
 0x134   :  { %1113 = vmatmul.mubr.f32.vlgmr.msra.gmra.mrb[0].mxu0 %v2496_v55  ;;  %v1975_v55 = vpack.c.bf16 %v510_v16, %v508_v53  ;;  %v548_v53 = vld [vmem:[#allocation2 + $0xdc8] sm:$0xff]  ;;  %v550_v16 = vld [vmem:[#allocation2 + $0xdd8] sm:$0xff] }
 0x135   :  { %1962 = vmatpush1.bf16.msra.mxu0 %v1961_v26  ;;  %1183 = vmatprep.mubr.f32.mxu0 %v673_v0  ;;  %v538_v26 = vld [vmem:[#allocation2 + $0xd78] sm:$0xff]  ;;  %v2001_v0 = vpack.c.bf16 %v533_v62, %v531_v60  ;;  %v571_v60 = vld [vmem:[#allocation2 + $0xe80] sm:$0xff]  ;;  %v573_v62 = vld [vmem:[#allocation2 + $0xe90] sm:$0xff] }
 0x136   :  { %1964 = vmatprep.subr.bf16.mxu0 %v1963_v1  ;;  %v2003_v1 = vpack.c.bf16 %v538_v26, %v536_v63  ;;  %v576_v63 = vld [vmem:[#allocation2 + $0xea8] sm:$0xff]  ;;  %v578_v26 = vld [vmem:[#allocation2 + $0xeb8] sm:$0xff] }
 0x139   :  { %1966 = vmatpush1.bf16.msra.mxu0 %v1965_v6  ;;  %v2005_v6 = vpack.c.bf16 %v537_v3, %v535_v2  ;;  %v575_v2 = vld [vmem:[#allocation2 + $0xea0] sm:$0xff]  ;;  %v577_v3 = vld [vmem:[#allocation2 + $0xeb0] sm:$0xff] }
 0x13a   :  { %1968 = vmatprep.subr.bf16.mxu0 %v1967_v7  ;;  %v2007_v7 = vpack.c.bf16 %v542_v5, %v540_v4  ;;  %v580_v4 = vld [vmem:[#allocation2 + $0xec8] sm:$0xff]  ;;  %v582_v5 = vld [vmem:[#allocation2 + $0xed8] sm:$0xff] }
 0x13d   :  { %1970 = vmatpush1.bf16.msra.mxu0 %v1969_v22  ;;  %v2009_v22 = vpack.c.bf16 %v541_v9, %v539_v8  ;;  %v579_v8 = vld [vmem:[#allocation2 + $0xec0] sm:$0xff]  ;;  %v581_v9 = vld [vmem:[#allocation2 + $0xed0] sm:$0xff] }
 0x13e   :  { %1972 = vmatprep.subr.bf16.mxu0 %v1971_v13  ;;  %v2011_v13 = vpack.c.bf16 %v546_v12, %v544_v10  ;;  %v584_v10 = vld [vmem:[#allocation2 + $0xee8] sm:$0xff]  ;;  %v586_v12 = vld [vmem:[#allocation2 + $0xef8] sm:$0xff] }
 0x13f   :  { %v2051_v19 = vpack.c.bf16 %v586_v12, %v584_v10  ;;  %v595_v12 = vsub.s32 0, %v2441_v61 }
 0x141   :  { %1974 = vmatpush1.bf16.msra.mxu0 %v1973_v48  ;;  %v2013_v48 = vpack.c.bf16 %v545_v15, %v543_v14  ;;  %v1279_v14 = vld [vmem:[#allocation7 + $0x80] sm:$0xff]  ;;  %v1280_v15 = vld [vmem:[#allocation7 + $0x88] sm:$0xff] }
 0x142   :  { %1976 = vmatprep.subr.bf16.mxu0 %v1975_v55  ;;  %v2015_v55 = vpack.c.bf16 %v550_v16, %v548_v53  ;;  %v1263_v53 = vld [vmem:[#allocation7] sm:$0xff]  ;;  %v2049_v16 = vpack.c.bf16 %v581_v9, %v579_v8  ;;  %v2325_v8 = vmov 0.0|0.0  }
 0x145   :  { %1978 = vmatpush1.bf16.msra.mxu0 %v1977_v21  ;;  %v2017_v21 = vpack.c.bf16 %v549_v18, %v547_v17  ;;  %v1281_v17 = vld [vmem:[#allocation7 + $0x90] sm:$0xff]  ;;  %v1282_v18 = vld [vmem:[#allocation7 + $0x98] sm:$0xff] }
 0x146   :  { %1980 = vmatprep.subr.bf16.mxu0 %v1979_v23  ;;  %v658_v23 = vcombine.high %v2507_v54, %v2507_v54 }
 0x148   :  { %v2520_v32 = vrot.slane %v658_v23, %v2444_v11  ;;  %v2029_v11 = vpack.c.bf16 %v561_v42, %v559_v41  ;;  %v1265_v23 = vld [vmem:[#allocation7 + $0x10] sm:$0xff]  ;;  %v1286_v41 = vld [vmem:[#allocation7 + $0xb8] sm:$0xff] }
 0x149   :  { %1982 = vmatpush1.bf16.msra.mxu0 %v1981_v30  ;;  %v558_v30 = vld [vmem:[#allocation2 + $0xe18] sm:$0xff] }
 0x14a   :  { %1984 = vmatprep.subr.bf16.mxu0 %v1983_v31  ;;  %v2021_v31 = vpack.c.bf16 %v553_v28, %v551_v27  ;;  %v2023_v33 = vpack.c.bf16 %v558_v30, %v556_v29  ;;  %v674_v54 = vcombine.high %v2520_v32, %v2520_v32  ;;  %v1283_v27 = vld [vmem:[#allocation7 + $0xa0] sm:$0xff]  ;;  %v590_v29 = vld [vmem:[#allocation2 + $0xf18] sm:$0xff]  ;;  %v1284_v30 = vld [vmem:[#allocation7 + $0xa8] sm:$0xff] }
 0x14b   :  { %v588_v28 = vld [vmem:[#allocation2 + $0xf08] sm:$0xff]  ;;  %v2067_v35 = vpack.c.bf16 %v1284_v30, %v1283_v27  ;;  %v1375_v27 = vld [vmem:[#allocation10 + $0x10] sm:$0xff] }
 0x14c   :  { %v1378_v30 = vld [vmem:[#allocation10 + $0x28] sm:$0xff] }
 0x14d   :  { %1986 = vmatpush1.bf16.msra.mxu0 %v1985_v36  ;;  %v560_v36 = vld [vmem:[#allocation2 + $0xe28] sm:$0xff] }
 0x14e   :  { %1988 = vmatprep.subr.bf16.mxu0 %v1987_v37  ;;  %v562_v37 = vld [vmem:[#allocation2 + $0xe38] sm:$0xff] }
 0x14f   :  { %v2027_v40 = vpack.c.bf16 %v562_v37, %v560_v36  ;;  %v1267_v36 = vld [vmem:[#allocation7 + $0x20] sm:$0xff]  ;;  %v1268_v37 = vld [vmem:[#allocation7 + $0x28] sm:$0xff] }
 0x150   :  { %v2069_v42 = vpack.c.bf16 %v1268_v37, %v1267_v36  ;;  %v1381_v36 = vld [vmem:[#allocation10 + $0x40] sm:$0xff]  ;;  %v1382_v37 = vld [vmem:[#allocation10 + $0x48] sm:$0xff] }
 0x151   :  { %1990 = vmatpush1.bf16.msra.mxu0 %v1989_v43  ;;  %v564_v43 = vld [vmem:[#allocation2 + $0xe48] sm:$0xff] }
 0x152   :  { %1992 = vmatprep.subr.bf16.mxu0 %v1991_v44  ;;  %v566_v44 = vld [vmem:[#allocation2 + $0xe58] sm:$0xff] }
 0x153   :  { %v2031_v46 = vpack.c.bf16 %v566_v44, %v564_v43 }
 0x155   :  { %1994 = vmatpush1.bf16.msra.mxu0 %v1993_v51  ;;  %v570_v51 = vld [vmem:[#allocation2 + $0xe78] sm:$0xff] }
 0x156   :  { %1996 = vmatprep.subr.bf16.mxu0 %v1995_v52  ;;  %v2033_v52 = vpack.c.bf16 %v565_v49, %v563_v47  ;;  %v2035_v45 = vpack.c.bf16 %v570_v51, %v568_v50  ;;  %v1287_v47 = vld [vmem:[#allocation7 + $0xc0] sm:$0xff]  ;;  %v1288_v49 = vld [vmem:[#allocation7 + $0xc8] sm:$0xff] }
 0x157   :  { %v2075_v51 = vpack.c.bf16 %v1288_v49, %v1287_v47  ;;  %v2327_v49 = vmov 0.0  }
 0x159   :  { %1998 = vmatpush1.bf16.msra.mxu0 %v1997_v39  ;;  %v574_v39 = vld [vmem:[#allocation2 + $0xe98] sm:$0xff] }
 0x15a   :  { %2000 = vmatprep.subr.bf16.mxu0 %v1999_v59  ;;  %v2037_v59 = vpack.c.bf16 %v569_v25, %v567_v56  ;;  %v1289_v56 = vld [vmem:[#allocation7 + $0xd0] sm:$0xff]  ;;  %v1290_v25 = vld [vmem:[#allocation7 + $0xd8] sm:$0xff] }
 0x15d   :  { %2002 = vmatpush1.bf16.msra.mxu0 %v2001_v0  ;;  %v2041_v0 = vpack.c.bf16 %v573_v62, %v571_v60  ;;  %v1291_v60 = vld [vmem:[#allocation7 + $0xe0] sm:$0xff]  ;;  %v1292_v62 = vld [vmem:[#allocation7 + $0xe8] sm:$0xff] }
 0x15e   :  { %2004 = vmatprep.subr.bf16.mxu0 %v2003_v1  ;;  %v2043_v1 = vpack.c.bf16 %v578_v26, %v576_v63  ;;  %v2083_v26 = vpack.c.bf16 %v1292_v62, %v1291_v60 }
 0x161   :  { %2006 = vmatpush1.bf16.msra.mxu0 %v2005_v6  ;;  %v2045_v6 = vpack.c.bf16 %v577_v3, %v575_v2  ;;  %v1293_v3 = vld [vmem:[#allocation7 + $0xf0] sm:$0xff] }
 0x162   :  { %2008 = vmatprep.subr.bf16.mxu0 %v2007_v7  ;;  %v2047_v7 = vpack.c.bf16 %v582_v5, %v580_v4  ;;  %v1277_v5 = vld [vmem:[#allocation7 + $0x70] sm:$0xff] }
 0x165   :  { %2010 = vmatpush1.bf16.msra.mxu0 %v2009_v22  ;;  %v583_v22 = vld [vmem:[#allocation2 + $0xee0] sm:$0xff] }
 0x166   :  { %2012 = vmatprep.subr.bf16.mxu0 %v2011_v13  ;;  %v585_v13 = vld [vmem:[#allocation2 + $0xef0] sm:$0xff] }
 0x169   :  { %2014 = vmatpush1.bf16.msra.mxu0 %v2013_v48  ;;  %v2059_v48 = vpack.c.bf16 %v1280_v15, %v1279_v14 }
 0x16a   :  { %2016 = vmatprep.subr.bf16.mxu0 %v2015_v55  ;;  %v1264_v55 = vld [vmem:[#allocation7 + $0x8] sm:$0xff] }
 0x16b   :  { %v2061_v20 = vpack.c.bf16 %v1264_v55, %v1263_v53  ;;  %2060 = vmatprep.subr.bf16.mxu1 %v2059_v48 }
 0x16d   :  { %2018 = vmatpush1.bf16.msra.mxu0 %v2017_v21  ;;  %v2063_v21 = vpack.c.bf16 %v1282_v18, %v1281_v17  ;;  %2062 = vmatpush3.bf16.msra.mxu1 %v2061_v20  ;;  %v1373_v18 = vld [vmem:[#allocation10] sm:$0xff] }
 0x16e   :  { %2020 = vmatprep.subr.bf16.mxu0 %v2019_v24  ;;  %v1266_v24 = vld [vmem:[#allocation7 + $0x18] sm:$0xff] }
 0x16f   :  { %2064 = vmatprep.subr.bf16.mxu1 %v2063_v21 }
 0x171   :  { %2022 = vmatpush1.bf16.msra.mxu0 %v2021_v31  ;;  %v2065_v31 = vpack.c.bf16 %v1266_v24, %v1265_v23 }
 0x172   :  { %2024 = vmatprep.subr.bf16.mxu0 %v2023_v33  ;;  %v2053_v33 = vpack.c.bf16 %v585_v13, %v583_v22  ;;  %v591_v22 = vld [vmem:[#allocation5] sm:$0x3]  ;;  %v599_v13 = vsub.s32 1, %v2441_v61  ;;  %v1377_v61 = vld [vmem:[#allocation10 + $0x20] sm:$0xff] }
 0x173   :  { %2066 = vmatpush3.bf16.msra.mxu1 %v2065_v31  ;;  %v596_v14 = vrot.slane %v591_v22, %v595_v12  ;;  %v2098_v31 = vpack.c.bf16 %v1378_v30, %v1377_v61 }
 0x174   :  { %1184 = vmatmul.mubr.f32.vlgmr.msra.gmra.mrb[0].mxu0 %v2511_v58  ;;  %v2039_v58 = vpack.c.bf16 %v574_v39, %v572_v57  ;;  %2068 = vmatprep.subr.bf16.mxu1 %v2067_v35  ;;  %v2079_v39 = vpack.c.bf16 %v1290_v25, %v1289_v56  ;;  %v600_v15 = vrot.slane %v591_v22, %v599_v13 }
 0x175   :  { %2026 = vmatpush1.bf16.msra.mxu0 %v2025_v38  ;;  %1485 = vmatprep.mubr.msk.f32.mxu0 %vm690_vm0, %v674_v54  ;;  %v2055_v38 = vpack.c.bf16 %v590_v29, %v588_v28  ;;  %v589_v54 = vld [vmem:[#allocation2 + $0xf10] sm:$0xff]  ;;  %v1376_v28 = vld [vmem:[#allocation10 + $0x18] sm:$0xff] }
 0x176   :  { %2028 = vmatprep.subr.bf16.mxu0 %v2027_v40  ;;  %v1285_v40 = vld [vmem:[#allocation7 + $0xb0] sm:$0xff]  ;;  %v2057_v43 = vpack.c.bf16 %v589_v54, %v587_v34  ;;  %v2095_v29 = vpack.c.bf16 %v1376_v28, %v1375_v27  ;;  %v1380_v34 = vld [vmem:[#allocation10 + $0x38] sm:$0xff] }
 0x177   :  { %v2071_v44 = vpack.c.bf16 %v1286_v41, %v1285_v40  ;;  %2070 = vmatpush3.bf16.msra.mxu1 %v2069_v42  ;;  %v1383_v54 = vld [vmem:[#allocation10 + $0x50] sm:$0xff]  ;;  %v1384_v40 = vld [vmem:[#allocation10 + $0x58] sm:$0xff]  ;;  %v1385_v42 = vld [vmem:[#allocation10 + $0x60] sm:$0xff] }
 0x178   :  { %v2107_v41 = vpack.c.bf16 %v1384_v40, %v1383_v54 }
 0x179   :  { %2030 = vmatpush1.bf16.msra.mxu0 %v2029_v11  ;;  %v1269_v11 = vld [vmem:[#allocation7 + $0x30] sm:$0xff]  ;;  %2072 = vmatprep.subr.bf16.mxu1 %v2071_v44 }
 0x17a   :  { %2032 = vmatprep.subr.bf16.mxu0 %v2031_v46  ;;  %v1270_v46 = vld [vmem:[#allocation7 + $0x38] sm:$0xff] }
 0x17b   :  { %v2073_v50 = vpack.c.bf16 %v1270_v46, %v1269_v11  ;;  %v1387_v11 = vld [vmem:[#allocation10 + $0x70] sm:$0xff]  ;;  %v1388_v46 = vld [vmem:[#allocation10 + $0x78] sm:$0xff] }
 0x17c   :  { %v2113_v47 = vpack.c.bf16 %v1388_v46, %v1387_v11 }
 0x17d   :  { %2034 = vmatpush1.bf16.msra.mxu0 %v2033_v52  ;;  %v1271_v52 = vld [vmem:[#allocation7 + $0x40] sm:$0xff]  ;;  %2074 = vmatpush3.bf16.msra.mxu1 %v2073_v50 }
 0x17e   :  { %2036 = vmatprep.subr.bf16.mxu0 %v2035_v45  ;;  %v1272_v45 = vld [vmem:[#allocation7 + $0x48] sm:$0xff]  ;;  %2076 = vmatprep.subr.bf16.mxu1 %v2075_v51  ;;  %v1486_v51 = vld [vmem:[#allocation8] ss:$0 sm:$0xff] }
 0x17f   :  { %v2077_v57 = vpack.c.bf16 %v1272_v45, %v1271_v52 }
 0x181   :  { %2038 = vmatpush1.bf16.msra.mxu0 %v2037_v59  ;;  %v1273_v59 = vld [vmem:[#allocation7 + $0x50] sm:$0xff]  ;;  %2078 = vmatpush3.bf16.msra.mxu1 %v2077_v57  ;;  %v1487_v57 = vld [vmem:[#allocation11] ss:$0 sm:$0xff] }
 0x182   :  { %2040 = vmatprep.subr.bf16.mxu0 %v2039_v58  ;;  %v1274_v58 = vld [vmem:[#allocation7 + $0x58] sm:$0xff]  ;;  %2080 = vmatprep.subr.bf16.mxu1 %v2079_v39 }
 0x183   :  { %v2081_v63 = vpack.c.bf16 %v1274_v58, %v1273_v59 }
 0x185   :  { %2042 = vmatpush1.bf16.msra.mxu0 %v2041_v0  ;;  %2082 = vmatpush3.bf16.msra.mxu1 %v2081_v63  ;;  %v1275_v0 = vld [vmem:[#allocation7 + $0x60] sm:$0xff] }
 0x186   :  { %2044 = vmatprep.subr.bf16.mxu0 %v2043_v1  ;;  %2084 = vmatprep.subr.bf16.mxu1 %v2083_v26  ;;  %v1276_v1 = vld [vmem:[#allocation7 + $0x68] sm:$0xff] }
 0x187   :  { %v2085_v2 = vpack.c.bf16 %v1276_v1, %v1275_v0 }
 0x189   :  { %2046 = vmatpush1.bf16.msra.mxu0 %v2045_v6  ;;  %2086 = vmatpush3.bf16.msra.mxu1 %v2085_v2  ;;  %v1278_v6 = vld [vmem:[#allocation7 + $0x78] sm:$0xff] }
 0x18a   :  { %2048 = vmatprep.subr.bf16.mxu0 %v2047_v7  ;;  %v2089_v7 = vpack.c.bf16 %v1278_v6, %v1277_v5 }
 0x18d   :  { %2050 = vmatpush1.bf16.msra.mxu0 %v2049_v16 }
 0x18e   :  { %2052 = vmatprep.subr.bf16.mxu0 %v2051_v19  ;;  %v1374_v19 = vld [vmem:[#allocation10 + $0x8] sm:$0xff] }
 0x18f   :  { %v2092_v23 = vpack.c.bf16 %v1374_v19, %v1373_v18 }
 0x191   :  { %2054 = vmatpush1.bf16.msra.mxu0 %v2053_v33  ;;  %v1379_v33 = vld [vmem:[#allocation10 + $0x30] sm:$0xff] }
 0x192   :  { %2056 = vmatprep.subr.bf16.mxu0 %v2055_v38  ;;  %v2101_v35 = vpack.c.bf16 %v1380_v34, %v1379_v33  ;;  %v2104_v38 = vpack.c.bf16 %v1382_v37, %v1381_v36 }
 0x195   :  { %2058 = vmatpush1.bf16.msra.mxu0 %v2057_v43  ;;  %v1386_v43 = vld [vmem:[#allocation10 + $0x68] sm:$0xff] }
 0x196   :  { %v2110_v44 = vpack.c.bf16 %v1386_v43, %v1385_v42 }
 0x198   :  { %1255 = vmatmul.mubr.f32.vlgmr.msra.gmra.mrb[0].mxu0 %v2520_v32  ;;  %v1294_v32 = vld [vmem:[#allocation7 + $0xf8] sm:$0xff] }
 0x199   :  { %v2087_v4 = vpack.c.bf16 %v1294_v32, %v1293_v3 }
 0x19b   :  { %2088 = vmatprep.subr.bf16.mxu1 %v2087_v4 }
 0x19c   :  { %2090 = vmatpush3.bf16.msra.mxu1 %v2089_v7 }
 0x19d   :  { %2091 = vmatprep.subr.bf16.mxu1 %v2325_v8 }
 0x206   :  { %v901_v9 = vpop.f32.mrb[0].mxu1 }
 0x207   :  { %v903_v10 = vpop.f32.mrb[1].mxu1  ;;  %v2115_v53 = vadd.f32 %v901_v9, %v596_v14 }
 0x208   :  { %v2117_v16 = vadd.f32 %v903_v10, %v600_v15 }
 0x26b   :  { %v1256_v48 = vpop.f32.mrb[0].mxu0 }
 0x26c   :  { %v2116_v55 = vadd.f32 %v2115_v53, %v1256_v48  ;;  %v1258_v17 = vpop.f32.mrb[1].mxu0 }
 0x26d   :  { %v2118_v20 = vadd.f32 %v2117_v16, %v1258_v17 }
 0x26e   :  { %v1261_v24 = vmax.f32 %v2116_v55, 0.0 }
 0x26f   :  { %v1262_v21 = vmax.f32 %v2118_v20, 0.0 }
 0x271   :  { %1366 = vmatprep.mubr.f32.mxu1 %v1262_v21 }
 0x272   :  { %1367 = vmatmul.mubr.f32.vlgmr.msra.gmra.mrb[2].mxu1 %v1261_v24 }
 0x273   :  { %2093 = vmatpush3.bf16.msra.mxu1 %v2092_v23  ;;  %1572 = vmatprep.mubr.msk.f32.mxu1 %vm2326_vm1, %v2327_v49 }
 0x274   :  { %2094 = vmatprep.subr.bf16.mxu1 %v2325_v8 }
 0x277   :  { %2096 = vmatpush3.bf16.msra.mxu1 %v2095_v29 }
 0x278   :  { %2097 = vmatprep.subr.bf16.mxu1 %v2325_v8 }
 0x27b   :  { %2099 = vmatpush3.bf16.msra.mxu1 %v2098_v31 }
 0x27c   :  { %2100 = vmatprep.subr.bf16.mxu1 %v2325_v8 }
 0x27f   :  { %2102 = vmatpush3.bf16.msra.mxu1 %v2101_v35 }
 0x280   :  { %2103 = vmatprep.subr.bf16.mxu1 %v2325_v8 }
 0x283   :  { %2105 = vmatpush3.bf16.msra.mxu1 %v2104_v38 }
 0x284   :  { %2106 = vmatprep.subr.bf16.mxu1 %v2325_v8 }
 0x287   :  { %2108 = vmatpush3.bf16.msra.mxu1 %v2107_v41 }
 0x288   :  { %2109 = vmatprep.subr.bf16.mxu1 %v2325_v8 }
 0x28b   :  { %2111 = vmatpush3.bf16.msra.mxu1 %v2110_v44 }
 0x28c   :  { %2112 = vmatprep.subr.bf16.mxu1 %v2325_v8 }
 0x28f   :  { %2114 = vmatpush3.bf16.msra.mxu1 %v2113_v47 }
 0x345   :  { %v1520_v50 = vpop.f32.mrb[2].mxu1 }
 0x346   :  { %v1521_v52 = vpop.f32.mrb[3].mxu1 }
 0x347   :  { %v1522_v45 = vadd.f32 %v1521_v52, %v1520_v50 }
 0x349   :  { %v1369_v56 = vadd.f32 %v1522_v45, %v1486_v51 }
 0x34b   :  { %v1372_v25 = vmax.f32 %v1369_v56, 0.0 }
 0x34d   :  { %1573 = vmatmul.mubr.f32.vlgmr.msra.gmra.mrb[4].mxu1 %v1372_v25 }
 0x420   :  { %v1462_v39 = vpop.f32.mrb[4].mxu1 }
 0x421   :  { %v1463_v59 = vadd.f32 %v1487_v57, %v1462_v39  ;;  %v1574_v58 = vpop.f32.mrb[5].mxu1 }
 0x423   :  { %1466 = vst [vmem:[#allocation13] sm:$0x3] %v1463_v59 }
 0x424   :  { %2293 = shalt.err (!%p2290_p10)
}
 0x425   :  { %s2294_s4 = scalar_lea.hbm %s2547_s7, 32 }
 0x426   :  { %p2295_p11 = scmp.ne.s32.totalorder %s2547_s7, %s2294_s4  ;;  %p2298_p12 = scmp.lt.u32.totalorder %s2294_s4, %s2547_s7 }
 0x428   :  { %p2300_p13 = pnand %p2298_p12, %p2295_p11 }
 0x42a   :  { %2303 = shalt.err (!%p2300_p13)
}
 0x42b   :  { %1476 = dma.vmem_to_hbm [thread:$0]  %s1474_s9, 32, %s2547_s7, [#allocation4]  }
 0x42c   :  { %2312 = dma.done.wait [#allocation4], 32  }
 0x42d   :  { %2313 = vsyncadd [#allocation4], 4294967264 }
 0x42e   :  { %1480 = vsyncpa [#allocation3], 1 }
 0x42f   :  { %1481 = vsyncpa [#allocation6], 1 }
 0x430   :  { %1482 = vsyncpa [#allocation9], 1 }
 0x431   :  { %1483 = vsyncpa [#allocation12], 1 }
 0x432   :  { %1484 = vsyncpa [#allocation4], 1 }

// kernel: net_forward.2
= control target key start
LH: loop header
LB: loop body
LE: loop exit
PB: predicated region body
PF: predicated region fallthrough
CT: control target
= control target key end

     0   :  { %10 = vsyncpa [#allocation3], 0  ;;  %s19926_s0 = inlined_call_operand.vmem [shape: f32[2,50,8,50], index: 0, kind: input, shape index: {}]   ;;  %s19927_s1 = inlined_call_operand.hbm [shape: f32[8,72], index: 1, kind: input, shape index: {}]   ;;  %s19928_s2 = inlined_call_operand.vmem [shape: f32[8,1], index: 2, kind: input, shape index: {}]   ;;  %s19929_s3 = inlined_call_operand.hbm [shape: f32[16,72], index: 3, kind: input, shape index: {}]   ;;  %s19930_s4 = inlined_call_operand.vmem [shape: f32[16,1], index: 4, kind: input, shape index: {}]   ;;  %s19931_s5 = inlined_call_operand.vmem [shape: f32[2,11,16,11], index: 5, kind: output, shape index: {}]  }
   0x1   :  { %11 = vsyncpa [#allocation5], 0  ;;  %s17118_s18 = smov 0  }
   0x2 LB: > { %s17124_s19 = sadd.s32 4294967295, %s17075_s18   ;;  %p11352_p0 = scmp.ge.s32.totalorder %s17075_s18, 1  ;;  %s17075_s18 = sphi %s17118_s18, %s17_s18  }
   0x3   : > { %p158_p1 = scmp.lt.s32.totalorder %s17075_s18, 3  ;;  %p19932_p2 = scmp.eq.s32.totalorder %s17124_s19, 0 }
   0x4   : > { %s17077_s20 = smov [#allocation2]   ;;  %s17078_s23 = smov [#allocation4]  }
   0x5   : > { %s171_s21 = sshll.u32 %s17077_s20, 4  ;;  %p17129_p3 = pnand %p11352_p0, %p158_p1  ;;  %s172_s21 = int_to_ptr.vmem [resolvable:$true] %s171_s21 }
   0x6   : > { %s184_s24 = sshll.u32 %s17078_s23, 4  ;;  %s17005_s28 = scalar_lea.hbm %s19927_s1, 128  ;;  %s17141_s24 = int_to_ptr.vmem [resolvable:$true] %s184_s24 }
   0x7   : > { %s19934_s22 = scalar_select %p17129_p3, 1, 0 }
   0x8   : > { %p16927_p4 = pneg %p17129_p3  ;;  %p17006_p6 = scmp.ne.s32.totalorder %s19927_s1, %s17005_s28 }
   0x9   : > { %p17012_p10 = scmp.lt.u32.totalorder %s17005_s28, %s19927_s1 }
   0xa   : > { %p17137_p5 = pnand %p19932_p2, %p16927_p4 }
   0xc   : > { %p17007_p7 = pneg %p17137_p5 }
   0xe   : > { %p17008_p8 = pnand %p17007_p7, %p17006_p6 }
  0x10   : > { %p17009_p9 = pneg %p17008_p8 }
  0x12   : > { %p17014_p11 = pnand %p17012_p10, %p17009_p9 }
  0x14   : > { %17017 = shalt.err (!%p17014_p11)
}
  0x15   : > { %s17018_s8 = scalar_lea.vmem %s172_s21, 128  ;;  %p17026_p1 = scmp.lt.s32.totalorder %s172_s21, %s172_s21 }
  0x16   : > { %p17019_p12 = scmp.ne.s32.totalorder %s172_s21, %s17018_s8  ;;  %p17027_p4 = scmp.lt.s32.totalorder %s17018_s8, %s17018_s8 }
  0x18   : > { %p17021_p13 = pnand %p17019_p12, %p17007_p7  ;;  %p17028_p2 = por %p17027_p4, %p17026_p1 }
  0x1a   : > { %p17022_p0 = pneg %p17021_p13 }
  0x1c   : > { %p17029_p3 = pnand %p17028_p2, %p17022_p0 }
  0x1e   : > { %17032 = shalt.err (!%p17029_p3)
}
  0x1f   : > { %16930 = dma.hbm_to_vmem [thread:$0]  (!%p17137_p5), %s19927_s1, 128, %s172_s21, [#allocation3]  }
  0x20   : > { %s17033_s13 = scalar_lea.hbm %s19929_s3, 256 }
  0x21   : > { %p17034_p6 = scmp.ne.s32.totalorder %s19929_s3, %s17033_s13  ;;  %p17040_p3 = scmp.lt.u32.totalorder %s17033_s13, %s19929_s3 }
  0x23   : > { %p17036_p8 = pnand %p17034_p6, %p17007_p7 }
  0x25   : > { %p17037_p2 = pneg %p17036_p8 }
  0x27   : > { %p17042_p9 = pnand %p17040_p3, %p17037_p2 }
  0x29   : > { %17045 = shalt.err (!%p17042_p9)
}
  0x2a   : > { %s17046_s20 = scalar_lea.vmem %s17141_s24, 256  ;;  %p17054_p13 = scmp.lt.s32.totalorder %s17141_s24, %s17141_s24 }
  0x2b   : > { %p17047_p10 = scmp.ne.s32.totalorder %s17141_s24, %s17046_s20  ;;  %p17055_p0 = scmp.lt.s32.totalorder %s17046_s20, %s17046_s20 }
  0x2d   : > { %p17049_p11 = pnand %p17047_p10, %p17007_p7  ;;  %p17056_p1 = por %p17055_p0, %p17054_p13 }
  0x2f   : > { %p17050_p12 = pneg %p17049_p11 }
  0x31   : > { %p17057_p4 = pnand %p17056_p1, %p17050_p12 }
  0x33   : > { %17060 = shalt.err (!%p17057_p4)
}
  0x34   : > { %s17079_s21 = smov 128   ;;  %s17080_s23 = smov 8  }
  0x35   : > { %16933 = dma.hbm_to_vmem [thread:$0]  (!%p17137_p5), %s19929_s3, 256, %s17141_s24, [#allocation5], %s17079_s21, %s17079_s21, %s17080_s23  }
  0x36   : > { %p19936_p6 = scmp.ne.s32.totalorder %s19934_s22, 0 }
  0x37   : > { %p19937_p7 = scmp.eq.s32.totalorder (!%p19936_p6), %s17124_s19, 0 }
  0x38   : > { %211 = sbr.rel (%p19936_p6) target bundleno = 1891 (0x763), region = 40 }
  0x3f   : > { %17066 = dma.done.wait (%p19937_p7), [#allocation3], 128   ;;  %p19938_p8 = pmov %p19937_p7 }
  0x40   : > { %p19939_p2 = pmov %p19937_p7 }
  0x41   : > { %17068 = vsyncadd (%p19938_p8), [#allocation3], 4294967168 }
  0x42   : > { %17070 = dma.done.wait (%p19939_p2), [#allocation5], 256   ;;  %p19940_p3 = pmov %p19939_p2 }
  0x43   : > { %p243_p9 = scmp.lt.s32.totalorder %s17124_s19, 1  ;;  %v17081_v0 = vmov 0.0|0.0   ;;  %s17082_s29 = smov 127   ;;  %vm17084_vm0 = vmmov 0   ;;  %v17085_v7 = vmov 0.0   ;;  %v17086_v29 = vmov 0  }
  0x44   : > { %17072 = vsyncadd (%p19940_p3), [#allocation5], 4294967040  ;;  %15469 = vmatprep.subr.bf16.mxu0 %v17081_v0  ;;  %15481 = vmatprep.subr.bf16.mxu1 %v17081_v0  ;;  %s17083_s30 = smov 126   ;;  %v17436_v58 = vld [vmem:[#allocation2] sm:$0xff]  ;;  %vm660_vm1 = vcmask 588800   ;;  %vm4143_vm11 = vcmask 392192  }
  0x45   : > { %s19954_s19 = smov (!%p243_p9, %s17124_s19), 1  ;;  %13099 = vmatprep.mubr.msk.f32.mxu0 %vm17084_vm0, %v17085_v7  ;;  %13120 = vmatprep.mubr.msk.f32.mxu1 %vm17084_vm0, %v17085_v7 }
  0x46   : > { %s16917_s22 = smul.u32 400, %s19954_s19  ;;  %16967 = vset.pattern.permute.xlu0 %v17086_v29  ;;  %16978 = vset.pattern.permute.xlu1 %v17086_v29 }
  0x47   : > { %s16918_s12 = smul.u32 176, %s19954_s19 }
  0x48   : > { %s17210_s28 = scalar_lea.vmem %s19926_s0, %s16917_s22 }
  0x49   : > { %v17213_v1 = vld [vmem:[%s17210_s28] sm:$0xff]  ;;  %v17216_v2 = vld [vmem:[%s17210_s28 + $0x8] sm:$0xff]  ;;  %v17219_v3 = vld [vmem:[%s17210_s28 + $0x10] sm:$0xff]  ;;  %s19871_s15 = scalar_lea.vmem %s19931_s5, %s16918_s12 }
  0x4a   : > { %v16957_v4 = vpack.i.bf16 %v17216_v2, %v17213_v1  ;;  %355 = vrot.lane.b32.xlu1 %v17219_v3, %s17082_s29  ;;  %v17229_v5 = vld [vmem:[%s17210_s28 + $0x18] sm:$0xff]  ;;  %v17235_v6 = vld [vmem:[%s17210_s28 + $0x20] sm:$0xff]  ;;  %v17246_v8 = vld [vmem:[%s17210_s28 + $0x28] sm:$0xff] }
  0x4b   : > { %v17253_v9 = vld [vmem:[%s17210_s28 + $0x30] sm:$0xff]  ;;  %v17260_v10 = vld [vmem:[%s17210_s28 + $0x38] sm:$0xff]  ;;  %v17269_v11 = vld [vmem:[%s17210_s28 + $0x40] sm:$0xff] }
  0x4c   : > { %16958 = vrot.lane.b32.xlu0 %v16957_v4, %s17082_s29  ;;  %v17276_v12 = vld [vmem:[%s17210_s28 + $0x48] sm:$0xff]  ;;  %v17283_v13 = vld [vmem:[%s17210_s28 + $0x50] sm:$0xff]  ;;  %v17290_v14 = vld [vmem:[%s17210_s28 + $0x58] sm:$0xff] }
  0x4d   : > { %v17297_v15 = vld [vmem:[%s17210_s28 + $0x60] sm:$0xff]  ;;  %v17304_v16 = vld [vmem:[%s17210_s28 + $0x68] sm:$0xff]  ;;  %v17311_v17 = vld [vmem:[%s17210_s28 + $0x70] sm:$0xff] }
  0x4e   : > { %499 = vrot.lane.b32.xlu1 %v17219_v3, %s17083_s30  ;;  %v17318_v18 = vld [vmem:[%s17210_s28 + $0x78] sm:$0xff]  ;;  %v17325_v19 = vld [vmem:[%s17210_s28 + $0x80] sm:$0xff]  ;;  %v17332_v20 = vld [vmem:[%s17210_s28 + $0x88] sm:$0xff] }
  0x4f   : > { %v17339_v21 = vld [vmem:[%s17210_s28 + $0x90] sm:$0xff]  ;;  %v17346_v22 = vld [vmem:[%s17210_s28 + $0x98] sm:$0xff]  ;;  %v17353_v23 = vld [vmem:[%s17210_s28 + $0xa0] sm:$0xff] }
  0x50   : > { %16963 = vrot.lane.b32.xlu0 %v16957_v4, %s17083_s30  ;;  %v17360_v24 = vld [vmem:[%s17210_s28 + $0xa8] sm:$0xff]  ;;  %v17367_v25 = vld [vmem:[%s17210_s28 + $0xb0] sm:$0xff]  ;;  %v17374_v26 = vld [vmem:[%s17210_s28 + $0xb8] sm:$0xff] }
  0x51   : > { %v17381_v27 = vld [vmem:[%s17210_s28 + $0xc0] sm:$0xff]  ;;  %v17388_v28 = vld [vmem:[%s17210_s28 + $0xc8] sm:$0xff]  ;;  %v279_v30 = vld [vmem:[%s17210_s28 + $0xd0] sm:$0xff] }
  0x52   : > { %501 = vrot.lane.b32.xlu1 %v17229_v5, %s17083_s30  ;;  %v280_v31 = vld [vmem:[%s17210_s28 + $0xd8] sm:$0xff]  ;;  %v281_v32 = vld [vmem:[%s17210_s28 + $0xe0] sm:$0xff]  ;;  %v282_v33 = vld [vmem:[%s17210_s28 + $0xe8] sm:$0xff] }
  0x53   : > { %v283_v34 = vld [vmem:[%s17210_s28 + $0xf0] sm:$0xff]  ;;  %v284_v41 = vld [vmem:[%s17210_s28 + $0xf8] sm:$0xff]  ;;  %v285_v47 = vld [vmem:[%s17210_s28 + $0x100] sm:$0xff] }
  0x54   : > { %357 = vrot.lane.b32.xlu0 %v17229_v5, %s17082_s29  ;;  %v286_v52 = vld [vmem:[%s17210_s28 + $0x108] sm:$0xff]  ;;  %v287_v56 = vld [vmem:[%s17210_s28 + $0x110] sm:$0xff]  ;;  %v288_v59 = vld [vmem:[%s17210_s28 + $0x118] sm:$0xff] }
  0x56   : > { %503 = vrot.lane.b32.xlu1 %v17235_v6, %s17083_s30 }
  0x58   : > { %359 = vrot.lane.b32.xlu0 %v17235_v6, %s17082_s29 }
  0x5a   : > { %505 = vrot.lane.b32.xlu1 %v17246_v8, %s17083_s30 }
  0x5c   : > { %361 = vrot.lane.b32.xlu0 %v17246_v8, %s17082_s29 }
  0x5e   : > { %507 = vrot.lane.b32.xlu1 %v17253_v9, %s17083_s30 }
  0x60   : > { %363 = vrot.lane.b32.xlu0 %v17253_v9, %s17082_s29 }
  0x62   : > { %509 = vrot.lane.b32.xlu1 %v17260_v10, %s17083_s30 }
  0x64   : > { %365 = vrot.lane.b32.xlu0 %v17260_v10, %s17082_s29 }
  0x66   : > { %511 = vrot.lane.b32.xlu1 %v17269_v11, %s17083_s30 }
  0x68   : > { %367 = vrot.lane.b32.xlu0 %v17269_v11, %s17082_s29 }
  0x6a   : > { %513 = vrot.lane.b32.xlu1 %v17276_v12, %s17083_s30 }
  0x6c   : > { %369 = vrot.lane.b32.xlu0 %v17276_v12, %s17082_s29 }
  0x6e   : > { %515 = vrot.lane.b32.xlu1 %v17283_v13, %s17083_s30 }
  0x70   : > { %371 = vrot.lane.b32.xlu0 %v17283_v13, %s17082_s29 }
  0x72   : > { %517 = vrot.lane.b32.xlu1 %v17290_v14, %s17083_s30 }
  0x74   : > { %373 = vrot.lane.b32.xlu0 %v17290_v14, %s17082_s29 }
  0x76   : > { %519 = vrot.lane.b32.xlu1 %v17297_v15, %s17083_s30 }
  0x78   : > { %375 = vrot.lane.b32.xlu0 %v17297_v15, %s17082_s29 }
  0x7a   : > { %521 = vrot.lane.b32.xlu1 %v17304_v16, %s17083_s30 }
  0x7c   : > { %377 = vrot.lane.b32.xlu0 %v17304_v16, %s17082_s29 }
  0x7e   : > { %523 = vrot.lane.b32.xlu1 %v17311_v17, %s17083_s30 }
  0x80   : > { %379 = vrot.lane.b32.xlu0 %v17311_v17, %s17082_s29 }
  0x82   : > { %525 = vrot.lane.b32.xlu1 %v17318_v18, %s17083_s30 }
  0x84   : > { %381 = vrot.lane.b32.xlu0 %v17318_v18, %s17082_s29 }
  0x86   : > { %527 = vrot.lane.b32.xlu1 %v17325_v19, %s17083_s30 }
  0x88   : > { %383 = vrot.lane.b32.xlu0 %v17325_v19, %s17082_s29 }
  0x8a   : > { %529 = vrot.lane.b32.xlu1 %v17332_v20, %s17083_s30 }
  0x8c   : > { %385 = vrot.lane.b32.xlu0 %v17332_v20, %s17082_s29 }
  0x8e   : > { %531 = vrot.lane.b32.xlu1 %v17339_v21, %s17083_s30 }
  0x90   : > { %387 = vrot.lane.b32.xlu0 %v17339_v21, %s17082_s29 }
  0x92   : > { %533 = vrot.lane.b32.xlu1 %v17346_v22, %s17083_s30 }
  0x94   : > { %389 = vrot.lane.b32.xlu0 %v17346_v22, %s17082_s29 }
  0x96   : > { %535 = vrot.lane.b32.xlu1 %v17353_v23, %s17083_s30 }
  0x98   : > { %391 = vrot.lane.b32.xlu0 %v17353_v23, %s17082_s29 }
  0x9a   : > { %537 = vrot.lane.b32.xlu1 %v17360_v24, %s17083_s30 }
  0x9c   : > { %393 = vrot.lane.b32.xlu0 %v17360_v24, %s17082_s29 }
  0x9e   : > { %539 = vrot.lane.b32.xlu1 %v17367_v25, %s17083_s30 }
  0xa0   : > { %395 = vrot.lane.b32.xlu0 %v17367_v25, %s17082_s29 }
  0xa2   : > { %541 = vrot.lane.b32.xlu1 %v17374_v26, %s17083_s30 }
  0xa4   : > { %397 = vrot.lane.b32.xlu0 %v17374_v26, %s17082_s29 }
  0xa6   : > { %543 = vrot.lane.b32.xlu1 %v17381_v27, %s17083_s30 }
  0xa8   : > { %399 = vrot.lane.b32.xlu0 %v17381_v27, %s17082_s29 }
  0xaa   : > { %545 = vrot.lane.b32.xlu1 %v17388_v28, %s17083_s30 }
  0xac   : > { %401 = vrot.lane.b32.xlu0 %v17388_v28, %s17082_s29 }
  0xae   : > { %547 = vrot.lane.b32.xlu1 %v279_v30, %s17083_s30 }
  0xb0   : > { %403 = vrot.lane.b32.xlu0 %v279_v30, %s17082_s29  ;;  %v290_v30 = vld [vmem:[%s17210_s28 + $0x128] sm:$0xff] }
  0xb2   : > { %549 = vrot.lane.b32.xlu1 %v280_v31, %s17083_s30 }
  0xb4   : > { %405 = vrot.lane.b32.xlu0 %v280_v31, %s17082_s29 }
  0xb6   : > { %551 = vrot.lane.b32.xlu1 %v281_v32, %s17083_s30 }
  0xb8   : > { %407 = vrot.lane.b32.xlu0 %v281_v32, %s17082_s29 }
  0xba   : > { %553 = vrot.lane.b32.xlu1 %v282_v33, %s17083_s30 }
  0xbc   : > { %409 = vrot.lane.b32.xlu0 %v282_v33, %s17082_s29  ;;  %v356_v38 = vpop.permute.xlu1 %355 }
  0xbd   : > { %v15479_v55 = vpack.c.bf16 %v356_v38, %v17219_v3 }
  0xbe   : > { %v16959_v35 = vpop.permute.xlu0 %16958  ;;  %555 = vrot.lane.b32.xlu1 %v283_v34, %s17083_s30 }
  0xbf   : > { %v16960_v36 = vunpack.i.l.bf16 %v16959_v35  ;;  %v16961_v37 = vunpack.i.h.bf16 %v16959_v35 }
  0xc0   : > { %411 = vrot.lane.b32.xlu0 %v283_v34, %s17082_s29  ;;  %v500_v48 = vpop.permute.xlu1 %499  ;;  %v291_v34 = vld [vmem:[%s17210_s28 + $0x130] sm:$0xff] }
  0xc1   : > { %v15470_v39 = vpack.c.bf16 %v16960_v36, %v17213_v1  ;;  %v15482_v40 = vpack.c.bf16 %v16961_v37, %v17216_v2  ;;  %v15488_v51 = vpack.c.bf16 %v500_v48, %v356_v38  ;;  %v15497_v1 = vpack.c.bf16 %v17229_v5, %v500_v48  ;;  %v292_v36 = vld [vmem:[%s17210_s28 + $0x138] sm:$0xff] }
  0xc2   : > { %v16964_v42 = vpop.permute.xlu0 %16963  ;;  %557 = vrot.lane.b32.xlu1 %v284_v41, %s17083_s30 }
  0xc3   : > { %v16966_v43 = vunpack.i.h.bf16 %v16964_v42  ;;  %v16965_v44 = vunpack.i.l.bf16 %v16964_v42  ;;  %15471 = vmatpush3.bf16.msra.mxu0 %v15470_v39  ;;  %15483 = vmatpush3.bf16.msra.mxu1 %v15482_v40  ;;  %v293_v42 = vld [vmem:[%s17210_s28 + $0x140] sm:$0xff] }
  0xc4   : > { %15472 = vmatprep.subr.bf16.mxu0 %v17081_v0  ;;  %15484 = vmatprep.subr.bf16.mxu1 %v17081_v0  ;;  %v502_v60 = vpop.permute.xlu1 %501 }
  0xc5   : > { %v15473_v45 = vpack.c.bf16 %v17216_v2, %v16965_v44  ;;  %v15485_v46 = vpack.c.bf16 %v17219_v3, %v16966_v43  ;;  %413 = vrot.lane.b32.xlu0 %v284_v41, %s17082_s29  ;;  %v15476_v50 = vpack.c.bf16 %v16966_v43, %v16961_v37  ;;  %v15509_v2 = vpack.c.bf16 %v17235_v6, %v502_v60  ;;  %v289_v3 = vld [vmem:[%s17210_s28 + $0x120] sm:$0xff] }
  0xc6   : > { %v358_v49 = vpop.permute.xlu0 %357  ;;  %559 = vrot.lane.b32.xlu1 %v285_v47, %s17083_s30 }
  0xc7   : > { %15474 = vmatpush3.bf16.msra.mxu0 %v15473_v45  ;;  %15486 = vmatpush3.bf16.msra.mxu1 %v15485_v46  ;;  %v15491_v54 = vpack.c.bf16 %v358_v49, %v17229_v5  ;;  %v15500_v5 = vpack.c.bf16 %v502_v60, %v358_v49  ;;  %v294_v45 = vld [vmem:[%s17210_s28 + $0x148] sm:$0xff]  ;;  %v295_v49 = vld [vmem:[%s17210_s28 + $0x150] sm:$0xff] }
  0xc8   : > { %15475 = vmatprep.subr.bf16.mxu0 %v17081_v0  ;;  %15487 = vmatprep.subr.bf16.mxu1 %v17081_v0  ;;  %v504_v63 = vpop.permute.xlu1 %503 }
  0xc9   : > { %415 = vrot.lane.b32.xlu0 %v285_v47, %s17082_s29  ;;  %v15521_v40 = vpack.c.bf16 %v17246_v8, %v504_v63 }
  0xca   : > { %v360_v53 = vpop.permute.xlu0 %359  ;;  %561 = vrot.lane.b32.xlu1 %v286_v52, %s17083_s30 }
  0xcb   : > { %15477 = vmatpush3.bf16.msra.mxu0 %v15476_v50  ;;  %15489 = vmatpush3.bf16.msra.mxu1 %v15488_v51  ;;  %v15512_v4 = vpack.c.bf16 %v504_v63, %v360_v53  ;;  %v15503_v33 = vpack.c.bf16 %v360_v53, %v17235_v6  ;;  %v296_v51 = vld [vmem:[%s17210_s28 + $0x158] sm:$0xff] }
  0xcc   : > { %15478 = vmatprep.subr.bf16.mxu0 %v17081_v0  ;;  %15490 = vmatprep.subr.bf16.mxu1 %v17081_v0  ;;  %v506_v37 = vpop.permute.xlu1 %505 }
  0xcd   : > { %417 = vrot.lane.b32.xlu0 %v286_v52, %s17082_s29  ;;  %v15533_v41 = vpack.c.bf16 %v17253_v9, %v506_v37 }
  0xce   : > { %v17431_v57 = vpop.permute.xlu0 %361  ;;  %563 = vrot.lane.b32.xlu1 %v287_v56, %s17083_s30 }
  0xcf   : > { %15480 = vmatpush3.bf16.msra.mxu0 %v15479_v55  ;;  %15492 = vmatpush3.bf16.msra.mxu1 %v15491_v54  ;;  %v15515_v31 = vpack.c.bf16 %v17431_v57, %v17246_v8  ;;  %v15524_v44 = vpack.c.bf16 %v506_v37, %v17431_v57 }
  0xd0   : > { %13097 = vmatprep.subr.mxu0 %v17085_v7  ;;  %13118 = vmatprep.subr.mxu1 %v17085_v7  ;;  %v508_v38 = vpop.permute.xlu1 %507 }
  0xd1   : > { %419 = vrot.lane.b32.xlu0 %v287_v56, %s17082_s29  ;;  %v297_v56 = vld [vmem:[%s17210_s28 + $0x160] sm:$0xff] }
  0xd2   : > { %v17440_v61 = vpop.permute.xlu0 %363  ;;  %565 = vrot.lane.b32.xlu1 %v288_v59, %s17083_s30 }
  0xd3   : > { %13098 = vmatpush3.msra.mxu0 %v500_v48  ;;  %13119 = vmatpush3.msra.mxu1 %v502_v60  ;;  %v15536_v43 = vpack.c.bf16 %v508_v38, %v17440_v61  ;;  %v15527_v48 = vpack.c.bf16 %v17440_v61, %v17253_v9  ;;  %v298_v60 = vld [vmem:[%s17210_s28 + $0x168] sm:$0xff] }
  0xd4   : > { %13100 = vmatmul.mubr.msk.f32.vlgmr.msra.gmra.mrb[0].mxu0 %vm660_vm1, %v17436_v58  ;;  %13121 = vmatmul.mubr.msk.f32.vlgmr.msra.gmra.mrb[0].mxu1 %vm660_vm1, %v17436_v58  ;;  %v510_v52 = vpop.permute.xlu1 %509 }
  0xd5   : > { %15493 = vmatprep.subr.bf16.mxu0 %v17081_v0  ;;  %15505 = vmatprep.subr.bf16.mxu1 %v17081_v0 }
  0xd6   : > { %15495 = vmatpush3.bf16.msra.mxu0 %v15479_v55  ;;  %15507 = vmatpush3.bf16.msra.mxu1 %v15491_v54  ;;  %v17449_v62 = vpop.permute.xlu0 %365  ;;  %v15545_v54 = vpack.c.bf16 %v17260_v10, %v508_v38  ;;  %v15557_v55 = vpack.c.bf16 %v17269_v11, %v510_v52 }
  0xd7   : > { %15496 = vmatprep.subr.bf16.mxu0 %v17081_v0  ;;  %15508 = vmatprep.subr.bf16.mxu1 %v17081_v0  ;;  %v15539_v46 = vpack.c.bf16 %v17449_v62, %v17260_v10 }
  0xd8   : > { %13141 = vmatprep.mubr.msk.f32.mxu0 %vm17084_vm0, %v17085_v7  ;;  %13162 = vmatprep.mubr.msk.f32.mxu1 %vm17084_vm0, %v17085_v7  ;;  %v512_v53 = vpop.permute.xlu1 %511 }
  0xd9   : > { %421 = vrot.lane.b32.xlu0 %v288_v59, %s17082_s29  ;;  %567 = vrot.lane.b32.xlu1 %v289_v3, %s17083_s30  ;;  %v15548_v59 = vpack.c.bf16 %v510_v52, %v17449_v62 }
  0xda   : > { %15498 = vmatpush3.bf16.msra.mxu0 %v15497_v1  ;;  %15510 = vmatpush3.bf16.msra.mxu1 %v15509_v2  ;;  %v17462_v29 = vpop.permute.xlu0 %367  ;;  %v299_v1 = vld [vmem:[%s17210_s28 + $0x170] sm:$0xff] }
  0xdb   : > { %15499 = vmatprep.subr.bf16.mxu0 %v17081_v0  ;;  %15511 = vmatprep.subr.bf16.mxu1 %v17081_v0  ;;  %v15560_v10 = vpack.c.bf16 %v512_v53, %v17462_v29  ;;  %v15551_v62 = vpack.c.bf16 %v17462_v29, %v17269_v11 }
  0xdd   : > { %423 = vrot.lane.b32.xlu0 %v289_v3, %s17082_s29  ;;  %569 = vrot.lane.b32.xlu1 %v290_v30, %s17083_s30  ;;  %v300_v3 = vld [vmem:[%s17210_s28 + $0x178] sm:$0xff] }
  0xde   : > { %15501 = vmatpush3.bf16.msra.mxu0 %v15500_v5  ;;  %15513 = vmatpush3.bf16.msra.mxu1 %v15512_v4  ;;  %v17471_v32 = vpop.permute.xlu0 %369  ;;  %v514_v5 = vpop.permute.xlu1 %513 }
  0xdf   : > { %15502 = vmatprep.subr.bf16.mxu0 %v17081_v0  ;;  %15514 = vmatprep.subr.bf16.mxu1 %v17081_v0 }
  0xe1   : > { %425 = vrot.lane.b32.xlu0 %v290_v30, %s17082_s29  ;;  %571 = vrot.lane.b32.xlu1 %v291_v34, %s17083_s30  ;;  %v15569_v30 = vpack.c.bf16 %v17276_v12, %v512_v53 }
  0xe2   : > { %15504 = vmatpush3.bf16.msra.mxu0 %v15503_v33  ;;  %15516 = vmatpush3.bf16.msra.mxu1 %v15515_v31  ;;  %v17479_v35 = vpop.permute.xlu0 %371  ;;  %v516_v29 = vpop.permute.xlu1 %515 }
  0xe3   : > { %13139 = vmatprep.subr.mxu0 %v17085_v7  ;;  %13160 = vmatprep.subr.mxu1 %v17085_v7 }
  0xe5   : > { %427 = vrot.lane.b32.xlu0 %v291_v34, %s17082_s29  ;;  %573 = vrot.lane.b32.xlu1 %v292_v36, %s17083_s30 }
  0xe6   : > { %13140 = vmatpush3.msra.mxu0 %v504_v63  ;;  %13161 = vmatpush3.msra.mxu1 %v506_v37  ;;  %v17486_v6 = vpop.permute.xlu0 %373  ;;  %v15563_v63 = vpack.c.bf16 %v17471_v32, %v17276_v12  ;;  %v15572_v12 = vpack.c.bf16 %v514_v5, %v17471_v32  ;;  %v302_v37 = vld [vmem:[%s17210_s28 + $0x188] sm:$0xff] }
  0xe7   : > { %13142 = vmatmul.mubr.msk.f32.vlgmr.msra.gmra.mrb[2].mxu0 %vm660_vm1, %v17436_v58  ;;  %13163 = vmatmul.mubr.msk.f32.vlgmr.msra.gmra.mrb[2].mxu1 %vm660_vm1, %v17436_v58 }
  0xe8   : > { %15517 = vmatprep.subr.bf16.mxu0 %v17081_v0  ;;  %15529 = vmatprep.subr.bf16.mxu1 %v17081_v0 }
  0xe9   : > { %15519 = vmatpush3.bf16.msra.mxu0 %v15503_v33  ;;  %15531 = vmatpush3.bf16.msra.mxu1 %v15515_v31  ;;  %v15581_v31 = vpack.c.bf16 %v17283_v13, %v514_v5  ;;  %v301_v33 = vld [vmem:[%s17210_s28 + $0x180] sm:$0xff] }
  0xea   : > { %15520 = vmatprep.subr.bf16.mxu0 %v17081_v0  ;;  %15532 = vmatprep.subr.bf16.mxu1 %v17081_v0  ;;  %v17496_v39 = vpop.permute.xlu0 %375 }
  0xeb   : > { %13183 = vmatprep.mubr.msk.f32.mxu0 %vm17084_vm0, %v17085_v7  ;;  %13204 = vmatprep.mubr.msk.f32.mxu1 %vm17084_vm0, %v17085_v7 }
  0xec   : > { %429 = vrot.lane.b32.xlu0 %v292_v36, %s17082_s29  ;;  %575 = vrot.lane.b32.xlu1 %v293_v42, %s17083_s30  ;;  %v15584_v36 = vpack.c.bf16 %v516_v29, %v17479_v35 }
  0xed   : > { %15522 = vmatpush3.bf16.msra.mxu0 %v15521_v40  ;;  %15534 = vmatpush3.bf16.msra.mxu1 %v15533_v41  ;;  %v15587_v40 = vpack.c.bf16 %v17486_v6, %v17290_v14  ;;  %v15575_v41 = vpack.c.bf16 %v17479_v35, %v17283_v13 }
  0xee   : > { %15523 = vmatprep.subr.bf16.mxu0 %v17081_v0  ;;  %15535 = vmatprep.subr.bf16.mxu1 %v17081_v0  ;;  %v17510_v8 = vpop.permute.xlu0 %377 }
  0xf0   : > { %431 = vrot.lane.b32.xlu0 %v293_v42, %s17082_s29  ;;  %577 = vrot.lane.b32.xlu1 %v294_v45, %s17083_s30  ;;  %v654_v42 = vld [vmem:[%s19928_s2] sm:$0xff] }
  0xf1   : > { %15525 = vmatpush3.bf16.msra.mxu0 %v15524_v44  ;;  %15537 = vmatpush3.bf16.msra.mxu1 %v15536_v43  ;;  %v518_v43 = vpop.permute.xlu1 %517 }
  0xf2   : > { %15526 = vmatprep.subr.bf16.mxu0 %v17081_v0  ;;  %15538 = vmatprep.subr.bf16.mxu1 %v17081_v0  ;;  %v17520_v47 = vpop.permute.xlu0 %379 }
  0xf4   : > { %433 = vrot.lane.b32.xlu0 %v294_v45, %s17082_s29  ;;  %579 = vrot.lane.b32.xlu1 %v295_v49, %s17083_s30  ;;  %v15593_v45 = vpack.c.bf16 %v17290_v14, %v516_v29  ;;  %v15596_v14 = vpack.c.bf16 %v518_v43, %v17486_v6 }
  0xf5   : > { %15528 = vmatpush3.bf16.msra.mxu0 %v15527_v48  ;;  %15540 = vmatpush3.bf16.msra.mxu1 %v15539_v46  ;;  %v520_v35 = vpop.permute.xlu1 %519 }
  0xf6   : > { %13181 = vmatprep.subr.mxu0 %v17085_v7  ;;  %13202 = vmatprep.subr.mxu1 %v17085_v7  ;;  %v17529_v50 = vpop.permute.xlu0 %381 }
  0xf8   : > { %435 = vrot.lane.b32.xlu0 %v295_v49, %s17082_s29  ;;  %581 = vrot.lane.b32.xlu1 %v296_v51, %s17083_s30 }
  0xf9   : > { %13182 = vmatpush3.msra.mxu0 %v508_v38  ;;  %13203 = vmatpush3.msra.mxu1 %v510_v52  ;;  %v522_v6 = vpop.permute.xlu1 %521 }
  0xfa   : > { %13184 = vmatmul.mubr.msk.f32.vlgmr.msra.gmra.mrb[4].mxu0 %vm660_vm1, %v17436_v58  ;;  %13205 = vmatmul.mubr.msk.f32.vlgmr.msra.gmra.mrb[4].mxu1 %vm660_vm1, %v17436_v58  ;;  %v17538_v9 = vpop.permute.xlu0 %383 }
  0xfb   : > { %15541 = vmatprep.subr.bf16.mxu0 %v17081_v0  ;;  %15553 = vmatprep.subr.bf16.mxu1 %v17081_v0 }
  0xfc   : > { %15543 = vmatpush3.bf16.msra.mxu0 %v15527_v48  ;;  %15555 = vmatpush3.bf16.msra.mxu1 %v15539_v46  ;;  %v15605_v46 = vpack.c.bf16 %v17297_v15, %v518_v43  ;;  %v15608_v48 = vpack.c.bf16 %v520_v35, %v17496_v39 }
  0xfd   : > { %15544 = vmatprep.subr.bf16.mxu0 %v17081_v0  ;;  %15556 = vmatprep.subr.bf16.mxu1 %v17081_v0 }
  0xfe   : > { %13225 = vmatprep.mubr.msk.f32.mxu0 %vm17084_vm0, %v17085_v7  ;;  %13246 = vmatprep.mubr.msk.f32.mxu1 %vm17084_vm0, %v17085_v7  ;;  %v17551_v57 = vpop.permute.xlu0 %385 }
  0xff   : > { %437 = vrot.lane.b32.xlu0 %v296_v51, %s17082_s29  ;;  %583 = vrot.lane.b32.xlu1 %v297_v56, %s17083_s30  ;;  %v15611_v51 = vpack.c.bf16 %v17510_v8, %v17304_v16 }
 0x100   : > { %15546 = vmatpush3.bf16.msra.mxu0 %v15545_v54  ;;  %15558 = vmatpush3.bf16.msra.mxu1 %v15557_v55 }
 0x101   : > { %15547 = vmatprep.subr.bf16.mxu0 %v17081_v0  ;;  %15559 = vmatprep.subr.bf16.mxu1 %v17081_v0 }
 0x102   : > { %v17560_v61 = vpop.permute.xlu0 %387 }
 0x103   : > { %439 = vrot.lane.b32.xlu0 %v297_v56, %s17082_s29  ;;  %585 = vrot.lane.b32.xlu1 %v298_v60, %s17083_s30  ;;  %v15629_v56 = vpack.c.bf16 %v17311_v17, %v522_v6 }
 0x104   : > { %15549 = vmatpush3.bf16.msra.mxu0 %v15548_v59  ;;  %15561 = vmatpush3.bf16.msra.mxu1 %v15560_v10 }
 0x105   : > { %15550 = vmatprep.subr.bf16.mxu0 %v17081_v0  ;;  %15562 = vmatprep.subr.bf16.mxu1 %v17081_v0 }
 0x106   : > { %v17571_v2 = vpop.permute.xlu0 %389 }
 0x107   : > { %441 = vrot.lane.b32.xlu0 %v298_v60, %s17082_s29  ;;  %587 = vrot.lane.b32.xlu1 %v299_v1, %s17083_s30 }
 0x108   : > { %15552 = vmatpush3.bf16.msra.mxu0 %v15551_v62  ;;  %15564 = vmatpush3.bf16.msra.mxu1 %v15563_v63 }
 0x109   : > { %13223 = vmatprep.subr.mxu0 %v17085_v7  ;;  %13244 = vmatprep.subr.mxu1 %v17085_v7 }
 0x10a   : > { %v17578_v4 = vpop.permute.xlu0 %391 }
 0x10b   : > { %443 = vrot.lane.b32.xlu0 %v299_v1, %s17082_s29  ;;  %589 = vrot.lane.b32.xlu1 %v300_v3, %s17083_s30 }
 0x10c   : > { %13224 = vmatpush3.msra.mxu0 %v512_v53  ;;  %13245 = vmatpush3.msra.mxu1 %v514_v5  ;;  %v15599_v53 = vpack.c.bf16 %v17496_v39, %v17297_v15  ;;  %v524_v15 = vpop.permute.xlu1 %523  ;;  %v15617_v39 = vpack.c.bf16 %v17304_v16, %v520_v35  ;;  %v15620_v16 = vpack.c.bf16 %v522_v6, %v17510_v8 }
 0x10d   : > { %13226 = vmatmul.mubr.msk.f32.vlgmr.msra.gmra.mrb[6].mxu0 %vm660_vm1, %v17436_v58  ;;  %13247 = vmatmul.mubr.msk.f32.vlgmr.msra.gmra.mrb[6].mxu1 %vm660_vm1, %v17436_v58  ;;  %v15632_v59 = vpack.c.bf16 %v524_v15, %v17520_v47 }
 0x10e   : > { %15565 = vmatprep.subr.bf16.mxu0 %v17081_v0  ;;  %15577 = vmatprep.subr.bf16.mxu1 %v17081_v0  ;;  %v17588_v11 = vpop.permute.xlu0 %393 }
 0x10f   : > { %15567 = vmatpush3.bf16.msra.mxu0 %v15551_v62  ;;  %15579 = vmatpush3.bf16.msra.mxu1 %v15563_v63  ;;  %v15635_v63 = vpack.c.bf16 %v17529_v50, %v17318_v18  ;;  %v15623_v62 = vpack.c.bf16 %v17520_v47, %v17311_v17  ;;  %v15641_v47 = vpack.c.bf16 %v17318_v18, %v524_v15 }
 0x110   : > { %15568 = vmatprep.subr.bf16.mxu0 %v17081_v0  ;;  %15580 = vmatprep.subr.bf16.mxu1 %v17081_v0  ;;  %v526_v8 = vpop.permute.xlu1 %525 }
 0x111   : > { %13267 = vmatprep.mubr.msk.f32.mxu0 %vm17084_vm0, %v17085_v7  ;;  %13288 = vmatprep.mubr.msk.f32.mxu1 %vm17084_vm0, %v17085_v7  ;;  %v15653_v5 = vpack.c.bf16 %v17325_v19, %v526_v8  ;;  %v15644_v18 = vpack.c.bf16 %v526_v8, %v17529_v50 }
 0x112   : > { %445 = vrot.lane.b32.xlu0 %v300_v3, %s17082_s29  ;;  %v17600_v34 = vpop.permute.xlu0 %395  ;;  %643 = vrot.lane.b32.xlu1 %v301_v33, %s17083_s30 }
 0x113   : > { %15570 = vmatpush3.bf16.msra.mxu0 %v15569_v30  ;;  %15582 = vmatpush3.bf16.msra.mxu1 %v15581_v31  ;;  %v15659_v31 = vpack.c.bf16 %v17551_v57, %v17332_v20 }
 0x114   : > { %15571 = vmatprep.subr.bf16.mxu0 %v17081_v0  ;;  %15583 = vmatprep.subr.bf16.mxu1 %v17081_v0  ;;  %v528_v17 = vpop.permute.xlu1 %527 }
 0x115   : > { %v15656_v30 = vpack.c.bf16 %v528_v17, %v17538_v9 }
 0x116   : > { %640 = vrot.lane.b32.xlu0 %v301_v33, %s17082_s29  ;;  %v17609_v38 = vpop.permute.xlu0 %397  ;;  %650 = vrot.lane.b32.xlu1 %v302_v37, %s17083_s30 }
 0x117   : > { %15573 = vmatpush3.bf16.msra.mxu0 %v15572_v12  ;;  %15585 = vmatpush3.bf16.msra.mxu1 %v15584_v36  ;;  %v15647_v36 = vpack.c.bf16 %v17538_v9, %v17325_v19  ;;  %v15665_v9 = vpack.c.bf16 %v17332_v20, %v528_v17 }
 0x118   : > { %15574 = vmatprep.subr.bf16.mxu0 %v17081_v0  ;;  %15586 = vmatprep.subr.bf16.mxu1 %v17081_v0  ;;  %v530_v50 = vpop.permute.xlu1 %529 }
 0x119   : > { %v15668_v20 = vpack.c.bf16 %v530_v50, %v17551_v57 }
 0x11a   : > { %647 = vrot.lane.b32.xlu0 %v302_v37, %s17082_s29  ;;  %v17619_v32 = vpop.permute.xlu0 %399  ;;  %v15677_v37 = vpack.c.bf16 %v17339_v21, %v530_v50 }
 0x11b   : > { %15576 = vmatpush3.bf16.msra.mxu0 %v15575_v41  ;;  %15588 = vmatpush3.bf16.msra.mxu1 %v15587_v40 }
 0x11c   : > { %13265 = vmatprep.subr.mxu0 %v17085_v7  ;;  %13286 = vmatprep.subr.mxu1 %v17085_v7  ;;  %v532_v19 = vpop.permute.xlu1 %531 }
 0x11e   : > { %657 = vperm.xlu0 %16967, %v654_v42   ;;  %v17626_v44 = vpop.permute.xlu0 %401  ;;  %v15683_v42 = vpack.c.bf16 %v17571_v2, %v17346_v22 }
 0x11f   : > { %13266 = vmatpush3.msra.mxu0 %v516_v29  ;;  %13287 = vmatpush3.msra.mxu1 %v518_v43 }
 0x120   : > { %13268 = vmatmul.mubr.msk.f32.vlgmr.msra.gmra.mrb[8].mxu0 %vm660_vm1, %v17436_v58  ;;  %13289 = vmatmul.mubr.msk.f32.vlgmr.msra.gmra.mrb[8].mxu1 %vm660_vm1, %v17436_v58 }
 0x121   : > { %15589 = vmatprep.subr.bf16.mxu0 %v17081_v0  ;;  %15601 = vmatprep.subr.bf16.mxu1 %v17081_v0 }
 0x122   : > { %15591 = vmatpush3.bf16.msra.mxu0 %v15575_v41  ;;  %15603 = vmatpush3.bf16.msra.mxu1 %v15587_v40  ;;  %v17634_v13 = vpop.permute.xlu0 %403  ;;  %v15680_v41 = vpack.c.bf16 %v532_v19, %v17560_v61 }
 0x123   : > { %15592 = vmatprep.subr.bf16.mxu0 %v17081_v0  ;;  %15604 = vmatprep.subr.bf16.mxu1 %v17081_v0 }
 0x124   : > { %13309 = vmatprep.mubr.msk.f32.mxu0 %vm17084_vm0, %v17085_v7  ;;  %13330 = vmatprep.mubr.msk.f32.mxu1 %vm17084_vm0, %v17085_v7 }
 0x126   : > { %15594 = vmatpush3.bf16.msra.mxu0 %v15593_v45  ;;  %15606 = vmatpush3.bf16.msra.mxu1 %v15605_v46  ;;  %v17645_v49 = vpop.permute.xlu0 %405  ;;  %v534_v45 = vpop.permute.xlu1 %533  ;;  %v15689_v46 = vpack.c.bf16 %v17346_v22, %v532_v19  ;;  %v15707_v22 = vpack.c.bf16 %v17588_v11, %v17360_v24 }
 0x127   : > { %15595 = vmatprep.subr.bf16.mxu0 %v17081_v0  ;;  %15607 = vmatprep.subr.bf16.mxu1 %v17081_v0 }
 0x12a   : > { %15597 = vmatpush3.bf16.msra.mxu0 %v15596_v14  ;;  %15609 = vmatpush3.bf16.msra.mxu1 %v15608_v48  ;;  %v17652_v52 = vpop.permute.xlu0 %407  ;;  %v15701_v48 = vpack.c.bf16 %v17353_v23, %v534_v45 }
 0x12b   : > { %15598 = vmatprep.subr.bf16.mxu0 %v17081_v0  ;;  %15610 = vmatprep.subr.bf16.mxu1 %v17081_v0 }
 0x12e   : > { %15600 = vmatpush3.bf16.msra.mxu0 %v15599_v53  ;;  %15612 = vmatpush3.bf16.msra.mxu1 %v15611_v51  ;;  %v17658_v54 = vpop.permute.xlu0 %409 }
 0x12f   : > { %13307 = vmatprep.subr.mxu0 %v17085_v7  ;;  %13328 = vmatprep.subr.mxu1 %v17085_v7 }
 0x132   : > { %13308 = vmatpush3.msra.mxu0 %v520_v35  ;;  %13329 = vmatpush3.msra.mxu1 %v522_v6  ;;  %v17662_v55 = vpop.permute.xlu0 %411  ;;  %v15671_v35 = vpack.c.bf16 %v17560_v61, %v17339_v21  ;;  %v536_v21 = vpop.permute.xlu1 %535  ;;  %v15695_v6 = vpack.c.bf16 %v17578_v4, %v17353_v23 }
 0x133   : > { %13310 = vmatmul.mubr.msk.f32.vlgmr.msra.gmra.mrb[10].mxu0 %vm660_vm1, %v17436_v58  ;;  %13331 = vmatmul.mubr.msk.f32.vlgmr.msra.gmra.mrb[10].mxu1 %vm660_vm1, %v17436_v58  ;;  %v15704_v14 = vpack.c.bf16 %v536_v21, %v17578_v4 }
 0x134   : > { %15613 = vmatprep.subr.bf16.mxu0 %v17081_v0  ;;  %15625 = vmatprep.subr.bf16.mxu1 %v17081_v0 }
 0x135   : > { %15615 = vmatpush3.bf16.msra.mxu0 %v15599_v53  ;;  %15627 = vmatpush3.bf16.msra.mxu1 %v15611_v51  ;;  %v15692_v51 = vpack.c.bf16 %v534_v45, %v17571_v2 }
 0x136   : > { %15616 = vmatprep.subr.bf16.mxu0 %v17081_v0  ;;  %15628 = vmatprep.subr.bf16.mxu1 %v17081_v0 }
 0x137   : > { %13351 = vmatprep.mubr.msk.f32.mxu0 %vm17084_vm0, %v17085_v7  ;;  %13372 = vmatprep.mubr.msk.f32.mxu1 %vm17084_vm0, %v17085_v7  ;;  %v17678_v10 = vpop.permute.xlu0 %413 }
 0x139   : > { %15618 = vmatpush3.bf16.msra.mxu0 %v15617_v39  ;;  %15630 = vmatpush3.bf16.msra.mxu1 %v15629_v56  ;;  %v15713_v39 = vpack.c.bf16 %v17360_v24, %v536_v21  ;;  %v15731_v24 = vpack.c.bf16 %v17609_v38, %v17374_v26 }
 0x13a   : > { %15619 = vmatprep.subr.bf16.mxu0 %v17081_v0  ;;  %15631 = vmatprep.subr.bf16.mxu1 %v17081_v0 }
 0x13b   : > { %v17684_v60 = vpop.permute.xlu0 %415 }
 0x13d   : > { %15621 = vmatpush3.bf16.msra.mxu0 %v15620_v16  ;;  %15633 = vmatpush3.bf16.msra.mxu1 %v15632_v59 }
 0x13e   : > { %15622 = vmatprep.subr.bf16.mxu0 %v17081_v0  ;;  %15634 = vmatprep.subr.bf16.mxu1 %v17081_v0 }
 0x13f   : > { %v17692_v1 = vpop.permute.xlu0 %417 }
 0x141   : > { %15624 = vmatpush3.bf16.msra.mxu0 %v15623_v62  ;;  %15636 = vmatpush3.bf16.msra.mxu1 %v15635_v63 }
 0x142   : > { %13349 = vmatprep.subr.mxu0 %v17085_v7  ;;  %13370 = vmatprep.subr.mxu1 %v17085_v7 }
 0x143   : > { %v17696_v3 = vpop.permute.xlu0 %419 }
 0x145   : > { %13350 = vmatpush3.msra.mxu0 %v524_v15  ;;  %13371 = vmatpush3.msra.mxu1 %v526_v8  ;;  %v538_v15 = vpop.permute.xlu1 %537 }
 0x146   : > { %13352 = vmatmul.mubr.msk.f32.vlgmr.msra.gmra.mrb[12].mxu0 %vm660_vm1, %v17436_v58  ;;  %13373 = vmatmul.mubr.msk.f32.vlgmr.msra.gmra.mrb[12].mxu1 %vm660_vm1, %v17436_v58  ;;  %v15725_v56 = vpack.c.bf16 %v17367_v25, %v538_v15  ;;  %v15716_v16 = vpack.c.bf16 %v538_v15, %v17588_v11 }
 0x147   : > { %15637 = vmatprep.subr.bf16.mxu0 %v17081_v0  ;;  %15649 = vmatprep.subr.bf16.mxu1 %v17081_v0 }
 0x148   : > { %15639 = vmatpush3.bf16.msra.mxu0 %v15623_v62  ;;  %15651 = vmatpush3.bf16.msra.mxu1 %v15635_v63  ;;  %v15719_v62 = vpack.c.bf16 %v17600_v34, %v17367_v25 }
 0x149   : > { %15640 = vmatprep.subr.bf16.mxu0 %v17081_v0  ;;  %15652 = vmatprep.subr.bf16.mxu1 %v17081_v0  ;;  %v540_v4 = vpop.permute.xlu1 %539 }
 0x14a   : > { %13393 = vmatprep.mubr.msk.f32.mxu0 %vm17084_vm0, %v17085_v7  ;;  %13414 = vmatprep.mubr.msk.f32.mxu1 %vm17084_vm0, %v17085_v7  ;;  %v15728_v59 = vpack.c.bf16 %v540_v4, %v17600_v34 }
 0x14b   : > { %v17712_v29 = vpop.permute.xlu0 %421 }
 0x14c   : > { %15642 = vmatpush3.bf16.msra.mxu0 %v15641_v47  ;;  %15654 = vmatpush3.bf16.msra.mxu1 %v15653_v5 }
 0x14d   : > { %15643 = vmatprep.subr.bf16.mxu0 %v17081_v0  ;;  %15655 = vmatprep.subr.bf16.mxu1 %v17081_v0  ;;  %v542_v11 = vpop.permute.xlu1 %541 }
 0x14e   : > { %v15749_v47 = vpack.c.bf16 %v17381_v27, %v542_v11 }
 0x14f   : > { %v17722_v33 = vpop.permute.xlu0 %423 }
 0x150   : > { %15645 = vmatpush3.bf16.msra.mxu0 %v15644_v18  ;;  %15657 = vmatpush3.bf16.msra.mxu1 %v15656_v30  ;;  %v15755_v18 = vpack.c.bf16 %v17626_v44, %v17388_v28 }
 0x151   : > { %15646 = vmatprep.subr.bf16.mxu0 %v17081_v0  ;;  %15658 = vmatprep.subr.bf16.mxu1 %v17081_v0  ;;  %v544_v34 = vpop.permute.xlu1 %543 }
 0x152   : > { %v15752_v5 = vpack.c.bf16 %v544_v34, %v17619_v32 }
 0x153   : > { %v17728_v12 = vpop.permute.xlu0 %425 }
 0x154   : > { %15648 = vmatpush3.bf16.msra.mxu0 %v15647_v36  ;;  %15660 = vmatpush3.bf16.msra.mxu1 %v15659_v31 }
 0x155   : > { %13391 = vmatprep.subr.mxu0 %v17085_v7  ;;  %13412 = vmatprep.subr.mxu1 %v17085_v7 }
 0x157   : > { %v17744_v40 = vpop.permute.xlu0 %427 }
 0x158   : > { %13392 = vmatpush3.msra.mxu0 %v528_v17  ;;  %13413 = vmatpush3.msra.mxu1 %v530_v50  ;;  %v15737_v17 = vpack.c.bf16 %v17374_v26, %v540_v4  ;;  %v15740_v26 = vpack.c.bf16 %v542_v11, %v17609_v38  ;;  %v546_v38 = vpop.permute.xlu1 %545 }
 0x159   : > { %13394 = vmatmul.mubr.msk.f32.vlgmr.msra.gmra.mrb[14].mxu0 %vm660_vm1, %v17436_v58  ;;  %13415 = vmatmul.mubr.msk.f32.vlgmr.msra.gmra.mrb[14].mxu1 %vm660_vm1, %v17436_v58 }
 0x15a   : > { %15661 = vmatprep.subr.bf16.mxu0 %v17081_v0  ;;  %15673 = vmatprep.subr.bf16.mxu1 %v17081_v0 }
 0x15b   : > { %15663 = vmatpush3.bf16.msra.mxu0 %v15647_v36  ;;  %15675 = vmatpush3.bf16.msra.mxu1 %v15659_v31  ;;  %v15743_v31 = vpack.c.bf16 %v17619_v32, %v17381_v27 }
 0x15c   : > { %15664 = vmatprep.subr.bf16.mxu0 %v17081_v0  ;;  %15676 = vmatprep.subr.bf16.mxu1 %v17081_v0  ;;  %v548_v27 = vpop.permute.xlu1 %547 }
 0x15d   : > { %13435 = vmatprep.mubr.msk.f32.mxu0 %vm17084_vm0, %v17085_v7  ;;  %13456 = vmatprep.mubr.msk.f32.mxu1 %vm17084_vm0, %v17085_v7 }
 0x15e   : > { %v17752_v43 = vpop.permute.xlu0 %429 }
 0x15f   : > { %15666 = vmatpush3.bf16.msra.mxu0 %v15665_v9  ;;  %15678 = vmatpush3.bf16.msra.mxu1 %v15677_v37 }
 0x160   : > { %15667 = vmatprep.subr.bf16.mxu0 %v17081_v0  ;;  %15679 = vmatprep.subr.bf16.mxu1 %v17081_v0 }
 0x162   : > { %v17760_v57 = vpop.permute.xlu0 %431 }
 0x163   : > { %15669 = vmatpush3.bf16.msra.mxu0 %v15668_v20  ;;  %15681 = vmatpush3.bf16.msra.mxu1 %v15680_v41  ;;  %v16979_v20 = vld [vmem:[%s17210_s28 + $0xc8] sm:$0xff] }
 0x164   : > { %15670 = vmatprep.subr.bf16.mxu0 %v17081_v0  ;;  %15682 = vmatprep.subr.bf16.mxu1 %v17081_v0 }
 0x166   : > { %v17770_v61 = vpop.permute.xlu0 %433 }
 0x167   : > { %15672 = vmatpush3.bf16.msra.mxu0 %v15671_v35  ;;  %15684 = vmatpush3.bf16.msra.mxu1 %v15683_v42 }
 0x168   : > { %13433 = vmatprep.subr.mxu0 %v17085_v7  ;;  %13454 = vmatprep.subr.mxu1 %v17085_v7 }
 0x16a   : > { %v17782_v53 = vpop.permute.xlu0 %435 }
 0x16b   : > { %13434 = vmatpush3.msra.mxu0 %v532_v19  ;;  %13455 = vmatpush3.msra.mxu1 %v534_v45 }
 0x16c   : > { %13436 = vmatmul.mubr.msk.f32.vlgmr.msra.gmra.mrb[16].mxu0 %vm660_vm1, %v17436_v58  ;;  %13457 = vmatmul.mubr.msk.f32.vlgmr.msra.gmra.mrb[16].mxu1 %vm660_vm1, %v17436_v58 }
 0x16d   : > { %15685 = vmatprep.subr.bf16.mxu0 %v17081_v0  ;;  %15697 = vmatprep.subr.bf16.mxu1 %v17081_v0 }
 0x16e   : > { %15687 = vmatpush3.bf16.msra.mxu0 %v15671_v35  ;;  %15699 = vmatpush3.bf16.msra.mxu1 %v15683_v42  ;;  %v15761_v42 = vpack.c.bf16 %v16979_v20, %v544_v34  ;;  %v16980_v35 = vld [vmem:[%s17210_s28 + $0xd0] sm:$0xff] }
 0x16f   : > { %15688 = vmatprep.subr.bf16.mxu0 %v17081_v0  ;;  %15700 = vmatprep.subr.bf16.mxu1 %v17081_v0  ;;  %v15773_v45 = vpack.c.bf16 %v16980_v35, %v546_v38 }
 0x170   : > { %13477 = vmatprep.mubr.msk.f32.mxu0 %vm17084_vm0, %v17085_v7  ;;  %13498 = vmatprep.mubr.msk.f32.mxu1 %vm17084_vm0, %v17085_v7 }
 0x171   : > { %v17792_v2 = vpop.permute.xlu0 %437 }
 0x172   : > { %15690 = vmatpush3.bf16.msra.mxu0 %v15689_v46  ;;  %15702 = vmatpush3.bf16.msra.mxu1 %v15701_v48  ;;  %v15776_v48 = vpack.c.bf16 %v548_v27, %v17634_v13 }
 0x173   : > { %15691 = vmatprep.subr.bf16.mxu0 %v17081_v0  ;;  %15703 = vmatprep.subr.bf16.mxu1 %v17081_v0 }
 0x175   : > { %v17800_v23 = vpop.permute.xlu0 %439 }
 0x176   : > { %15693 = vmatpush3.bf16.msra.mxu0 %v15692_v51  ;;  %15705 = vmatpush3.bf16.msra.mxu1 %v15704_v14  ;;  %v15764_v51 = vpack.c.bf16 %v546_v38, %v17626_v44 }
 0x177   : > { %15694 = vmatprep.subr.bf16.mxu0 %v17081_v0  ;;  %15706 = vmatprep.subr.bf16.mxu1 %v17081_v0 }
 0x179   : > { %v17814_v63 = vpop.permute.xlu0 %441 }
 0x17a   : > { %15696 = vmatpush3.bf16.msra.mxu0 %v15695_v6  ;;  %15708 = vmatpush3.bf16.msra.mxu1 %v15707_v22 }
 0x17b   : > { %13475 = vmatprep.subr.mxu0 %v17085_v7  ;;  %13496 = vmatprep.subr.mxu1 %v17085_v7 }
 0x17d   : > { %v17822_v8 = vpop.permute.xlu0 %443 }
 0x17e   : > { %13476 = vmatpush3.msra.mxu0 %v536_v21  ;;  %13497 = vmatpush3.msra.mxu1 %v538_v15  ;;  %v15767_v15 = vpack.c.bf16 %v17634_v13, %v16980_v35 }
 0x17f   : > { %13478 = vmatmul.mubr.msk.f32.vlgmr.msra.gmra.mrb[18].mxu0 %vm660_vm1, %v17436_v58  ;;  %13499 = vmatmul.mubr.msk.f32.vlgmr.msra.gmra.mrb[18].mxu1 %vm660_vm1, %v17436_v58 }
 0x180   : > { %15709 = vmatprep.subr.bf16.mxu0 %v17081_v0  ;;  %15721 = vmatprep.subr.bf16.mxu1 %v17081_v0 }
 0x181   : > { %15711 = vmatpush3.bf16.msra.mxu0 %v15695_v6  ;;  %15723 = vmatpush3.bf16.msra.mxu1 %v15707_v22  ;;  %v16981_v22 = vld [vmem:[%s17210_s28 + $0xd8] sm:$0xff] }
 0x182   : > { %15712 = vmatprep.subr.bf16.mxu0 %v17081_v0  ;;  %15724 = vmatprep.subr.bf16.mxu1 %v17081_v0  ;;  %v15779_v6 = vpack.c.bf16 %v17645_v49, %v16981_v22 }
 0x183   : > { %13519 = vmatprep.mubr.msk.f32.mxu0 %vm17084_vm0, %v17085_v7  ;;  %13540 = vmatprep.mubr.msk.f32.mxu1 %vm17084_vm0, %v17085_v7 }
 0x184   : > { %v17832_v25 = vpop.permute.xlu0 %445 }
 0x185   : > { %15714 = vmatpush3.bf16.msra.mxu0 %v15713_v39  ;;  %15726 = vmatpush3.bf16.msra.mxu1 %v15725_v56 }
 0x186   : > { %15715 = vmatprep.subr.bf16.mxu0 %v17081_v0  ;;  %15727 = vmatprep.subr.bf16.mxu1 %v17081_v0 }
 0x188   : > { %v17845_v30 = vpop.permute.xlu0 %640 }
 0x189   : > { %15717 = vmatpush3.bf16.msra.mxu0 %v15716_v16  ;;  %15729 = vmatpush3.bf16.msra.mxu1 %v15728_v59 }
 0x18a   : > { %15718 = vmatprep.subr.bf16.mxu0 %v17081_v0  ;;  %15730 = vmatprep.subr.bf16.mxu1 %v17081_v0 }
 0x18c   : > { %v17854_v36 = vpop.permute.xlu0 %647 }
 0x18d   : > { %15720 = vmatpush3.bf16.msra.mxu0 %v15719_v62  ;;  %15732 = vmatpush3.bf16.msra.mxu1 %v15731_v24 }
 0x18e   : > { %13517 = vmatprep.subr.mxu0 %v17085_v7  ;;  %13538 = vmatprep.subr.mxu1 %v17085_v7 }
 0x191   : > { %13518 = vmatpush3.msra.mxu0 %v540_v4  ;;  %13539 = vmatpush3.msra.mxu1 %v542_v11  ;;  %v550_v4 = vpop.permute.xlu1 %549 }
 0x192   : > { %13520 = vmatmul.mubr.msk.f32.vlgmr.msra.gmra.mrb[20].mxu0 %vm660_vm1, %v17436_v58  ;;  %13541 = vmatmul.mubr.msk.f32.vlgmr.msra.gmra.mrb[20].mxu1 %vm660_vm1, %v17436_v58 }
 0x193   : > { %15733 = vmatprep.subr.bf16.mxu0 %v17081_v0  ;;  %15745 = vmatprep.subr.bf16.mxu1 %v17081_v0 }
 0x194   : > { %15735 = vmatpush3.bf16.msra.mxu0 %v15719_v62  ;;  %15747 = vmatpush3.bf16.msra.mxu1 %v15731_v24  ;;  %v15785_v24 = vpack.c.bf16 %v16981_v22, %v548_v27  ;;  %v16982_v62 = vld [vmem:[%s17210_s28 + $0xe0] sm:$0xff]  ;;  %v16986_v22 = vld [vmem:[%s17210_s28 + $0xf8] sm:$0xff] }
 0x195   : > { %15736 = vmatprep.subr.bf16.mxu0 %v17081_v0  ;;  %15748 = vmatprep.subr.bf16.mxu1 %v17081_v0  ;;  %v552_v44 = vpop.permute.xlu1 %551  ;;  %v15797_v11 = vpack.c.bf16 %v16982_v62, %v550_v4 }
 0x196   : > { %13561 = vmatprep.mubr.msk.f32.mxu0 %vm17084_vm0, %v17085_v7  ;;  %13582 = vmatprep.mubr.msk.f32.mxu1 %vm17084_vm0, %v17085_v7 }
 0x198   : > { %15738 = vmatpush3.bf16.msra.mxu0 %v15737_v17  ;;  %15750 = vmatpush3.bf16.msra.mxu1 %v15749_v47  ;;  %v15800_v47 = vpack.c.bf16 %v552_v44, %v17652_v52 }
 0x199   : > { %15739 = vmatprep.subr.bf16.mxu0 %v17081_v0  ;;  %15751 = vmatprep.subr.bf16.mxu1 %v17081_v0 }
 0x19c   : > { %15741 = vmatpush3.bf16.msra.mxu0 %v15740_v26  ;;  %15753 = vmatpush3.bf16.msra.mxu1 %v15752_v5  ;;  %v15788_v26 = vpack.c.bf16 %v550_v4, %v17645_v49  ;;  %v17917_v49 = vld [vmem:[#allocation2] sm:$0xff] }
 0x19d   : > { %15742 = vmatprep.subr.bf16.mxu0 %v17081_v0  ;;  %15754 = vmatprep.subr.bf16.mxu1 %v17081_v0  ;;  %v17862_v28 = vpop.permute.xlu0 %657 }
 0x1a0   : > { %15744 = vmatpush3.bf16.msra.mxu0 %v15743_v31  ;;  %15756 = vmatpush3.bf16.msra.mxu1 %v15755_v18 }
 0x1a1   : > { %13559 = vmatprep.subr.mxu0 %v17085_v7  ;;  %13580 = vmatprep.subr.mxu1 %v17085_v7 }
 0x1a4   : > { %13560 = vmatpush3.msra.mxu0 %v544_v34  ;;  %13581 = vmatpush3.msra.mxu1 %v546_v38  ;;  %v15791_v38 = vpack.c.bf16 %v17652_v52, %v16982_v62 }
 0x1a5   : > { %13562 = vmatmul.mubr.msk.f32.vlgmr.msra.gmra.mrb[22].mxu0 %vm660_vm1, %v17436_v58  ;;  %13583 = vmatmul.mubr.msk.f32.vlgmr.msra.gmra.mrb[22].mxu1 %vm660_vm1, %v17436_v58 }
 0x1a6   : > { %15757 = vmatprep.subr.bf16.mxu0 %v17081_v0  ;;  %15769 = vmatprep.subr.bf16.mxu1 %v17081_v0 }
 0x1a7   : > { %15759 = vmatpush3.bf16.msra.mxu0 %v15743_v31  ;;  %15771 = vmatpush3.bf16.msra.mxu1 %v15755_v18  ;;  %v730_v32 = vpop.f32.mrb[0].mxu0  ;;  %v800_v50 = vpop.f32.mrb[0].mxu1  ;;  %v16983_v18 = vld [vmem:[%s17210_s28 + $0xe8] sm:$0xff] }
 0x1a8   : > { %15760 = vmatprep.subr.bf16.mxu0 %v17081_v0  ;;  %15772 = vmatprep.subr.bf16.mxu1 %v17081_v0  ;;  %v13101_v19 = vpop.f32.mrb[1].mxu0  ;;  %v13122_v9 = vpop.f32.mrb[1].mxu1  ;;  %v731_v37 = vadd.f32 %v730_v32, %v17862_v28  ;;  %v801_v41 = vadd.f32 %v800_v50, %v17862_v28  ;;  %v15803_v31 = vpack.c.bf16 %v17658_v54, %v16983_v18 }
 0x1a9   : > { %13603 = vmatprep.mubr.msk.f32.mxu0 %vm17084_vm0, %v17085_v7  ;;  %13624 = vmatprep.mubr.msk.f32.mxu1 %vm17084_vm0, %v17085_v7  ;;  %v15809_v20 = vpack.c.bf16 %v16983_v18, %v552_v44 }
 0x1aa   : > { %v4024_v21 = vmax.f32 %v731_v37, 0.0  ;;  %v4025_v46 = vmax.f32 %v801_v41, 0.0 }
 0x1ab   : > { %15762 = vmatpush3.bf16.msra.mxu0 %v15761_v42  ;;  %15774 = vmatpush3.bf16.msra.mxu1 %v15773_v45  ;;  %v16985_v42 = vld [vmem:[%s17210_s28 + $0xf0] sm:$0xff] }
 0x1ac   : > { %15763 = vmatprep.subr.bf16.mxu0 %v17081_v0  ;;  %15775 = vmatprep.subr.bf16.mxu1 %v17081_v0  ;;  %v17879_v14 = vmax.f32 %v4024_v21, %v4025_v46 }
 0x1af   : > { %15765 = vmatpush3.bf16.msra.mxu0 %v15764_v51  ;;  %15777 = vmatpush3.bf16.msra.mxu1 %v15776_v48 }
 0x1b0   : > { %15766 = vmatprep.subr.bf16.mxu0 %v17081_v0  ;;  %15778 = vmatprep.subr.bf16.mxu1 %v17081_v0 }
 0x1b3   : > { %15768 = vmatpush3.bf16.msra.mxu0 %v15767_v15  ;;  %15780 = vmatpush3.bf16.msra.mxu1 %v15779_v6 }
 0x1b4   : > { %13601 = vmatprep.subr.mxu0 %v17085_v7  ;;  %13622 = vmatprep.subr.mxu1 %v17085_v7 }
 0x1b7   : > { %13602 = vmatpush3.msra.mxu0 %v548_v27  ;;  %13623 = vmatpush3.msra.mxu1 %v550_v4  ;;  %v554_v27 = vpop.permute.xlu1 %553 }
 0x1b8   : > { %13604 = vmatmul.mubr.msk.f32.vlgmr.msra.gmra.mrb[24].mxu0 %vm660_vm1, %v17436_v58  ;;  %13625 = vmatmul.mubr.msk.f32.vlgmr.msra.gmra.mrb[24].mxu1 %vm660_vm1, %v17436_v58  ;;  %v15821_v35 = vpack.c.bf16 %v16985_v42, %v554_v27  ;;  %v15812_v51 = vpack.c.bf16 %v554_v27, %v17658_v54 }
 0x1b9   : > { %15781 = vmatprep.subr.bf16.mxu0 %v17081_v0  ;;  %15793 = vmatprep.subr.bf16.mxu1 %v17081_v0 }
 0x1ba   : > { %15783 = vmatpush3.bf16.msra.mxu0 %v15767_v15  ;;  %15795 = vmatpush3.bf16.msra.mxu1 %v15779_v6  ;;  %v870_v13 = vpop.f32.mrb[2].mxu0  ;;  %v940_v39 = vpop.f32.mrb[2].mxu1  ;;  %v15827_v6 = vpack.c.bf16 %v17678_v10, %v16986_v22  ;;  %v15815_v15 = vpack.c.bf16 %v17662_v55, %v16985_v42 }
 0x1bb   : > { %15784 = vmatprep.subr.bf16.mxu0 %v17081_v0  ;;  %15796 = vmatprep.subr.bf16.mxu1 %v17081_v0  ;;  %v871_v56 = vadd.f32 %v870_v13, %v17862_v28  ;;  %v941_v59 = vadd.f32 %v940_v39, %v17862_v28  ;;  %v13143_v16 = vpop.f32.mrb[3].mxu0  ;;  %v13164_v58 = vpop.f32.mrb[3].mxu1 }
 0x1bc   : > { %13645 = vmatprep.mubr.msk.f32.mxu0 %vm17084_vm0, %v17085_v7  ;;  %13666 = vmatprep.mubr.msk.f32.mxu1 %vm17084_vm0, %v17085_v7  ;;  %v556_v52 = vpop.permute.xlu1 %555  ;;  %v16987_v58 = vld [vmem:[%s17210_s28 + $0x100] sm:$0xff] }
 0x1bd   : > { %v4026_v34 = vmax.f32 %v871_v56, 0.0  ;;  %v4027_v17 = vmax.f32 %v941_v59, 0.0  ;;  %v15824_v46 = vpack.c.bf16 %v556_v52, %v17662_v55  ;;  %v15833_v16 = vpack.c.bf16 %v16986_v22, %v556_v52 }
 0x1be   : > { %15786 = vmatpush3.bf16.msra.mxu0 %v15785_v24  ;;  %15798 = vmatpush3.bf16.msra.mxu1 %v15797_v11 }
 0x1bf   : > { %15787 = vmatprep.subr.bf16.mxu0 %v17081_v0  ;;  %15799 = vmatprep.subr.bf16.mxu1 %v17081_v0  ;;  %v17907_v5 = vmax.f32 %v4026_v34, %v4027_v17 }
 0x1c0   : > { %v558_v4 = vpop.permute.xlu1 %557 }
 0x1c1   : > { %v15845_v24 = vpack.c.bf16 %v16987_v58, %v558_v4 }
 0x1c2   : > { %15789 = vmatpush3.bf16.msra.mxu0 %v15788_v26  ;;  %15801 = vmatpush3.bf16.msra.mxu1 %v15800_v47  ;;  %v15836_v47 = vpack.c.bf16 %v558_v4, %v17678_v10  ;;  %v16988_v26 = vld [vmem:[%s17210_s28 + $0x108] sm:$0xff] }
 0x1c3   : > { %15790 = vmatprep.subr.bf16.mxu0 %v17081_v0  ;;  %15802 = vmatprep.subr.bf16.mxu1 %v17081_v0  ;;  %v15851_v18 = vpack.c.bf16 %v17692_v1, %v16988_v26 }
 0x1c4   : > { %v560_v54 = vpop.permute.xlu1 %559 }
 0x1c5   : > { %v15848_v34 = vpack.c.bf16 %v560_v54, %v17684_v60 }
 0x1c6   : > { %15792 = vmatpush3.bf16.msra.mxu0 %v15791_v38  ;;  %15804 = vmatpush3.bf16.msra.mxu1 %v15803_v31 }
 0x1c7   : > { %13643 = vmatprep.subr.mxu0 %v17085_v7  ;;  %13664 = vmatprep.subr.mxu1 %v17085_v7 }
 0x1ca   : > { %13644 = vmatpush3.msra.mxu0 %v552_v44  ;;  %13665 = vmatpush3.msra.mxu1 %v554_v27 }
 0x1cb   : > { %13646 = vmatmul.mubr.msk.f32.vlgmr.msra.gmra.mrb[26].mxu0 %vm660_vm1, %v17917_v49  ;;  %13667 = vmatmul.mubr.msk.f32.vlgmr.msra.gmra.mrb[26].mxu1 %vm660_vm1, %v17917_v49 }
 0x1cc   : > { %15805 = vmatprep.subr.bf16.mxu0 %v17081_v0  ;;  %15817 = vmatprep.subr.bf16.mxu1 %v17081_v0 }
 0x1cd   : > { %15807 = vmatpush3.bf16.msra.mxu0 %v15791_v38  ;;  %15819 = vmatpush3.bf16.msra.mxu1 %v15803_v31  ;;  %v1010_v32 = vpop.f32.mrb[4].mxu0  ;;  %v1080_v50 = vpop.f32.mrb[4].mxu1  ;;  %v15839_v31 = vpack.c.bf16 %v17684_v60, %v16987_v58 }
 0x1ce   : > { %15808 = vmatprep.subr.bf16.mxu0 %v17081_v0  ;;  %15820 = vmatprep.subr.bf16.mxu1 %v17081_v0  ;;  %v1011_v19 = vadd.f32 %v1010_v32, %v17862_v28  ;;  %v1081_v9 = vadd.f32 %v1080_v50, %v17862_v28  ;;  %v13185_v37 = vpop.f32.mrb[5].mxu0  ;;  %v13206_v41 = vpop.f32.mrb[5].mxu1 }
 0x1cf   : > { %13687 = vmatprep.mubr.msk.f32.mxu0 %vm17084_vm0, %v17085_v7  ;;  %13708 = vmatprep.mubr.msk.f32.mxu1 %vm17084_vm0, %v17085_v7  ;;  %v562_v38 = vpop.permute.xlu1 %561  ;;  %v16989_v37 = vld [vmem:[%s17210_s28 + $0x110] sm:$0xff] }
 0x1d0   : > { %v4028_v45 = vmax.f32 %v1011_v19, 0.0  ;;  %v4029_v21 = vmax.f32 %v1081_v9, 0.0  ;;  %v15857_v9 = vpack.c.bf16 %v16988_v26, %v560_v54  ;;  %v15869_v41 = vpack.c.bf16 %v16989_v37, %v562_v38 }
 0x1d1   : > { %15810 = vmatpush3.bf16.msra.mxu0 %v15809_v20  ;;  %15822 = vmatpush3.bf16.msra.mxu1 %v15821_v35  ;;  %v15863_v22 = vpack.c.bf16 %v17696_v3, %v16989_v37 }
 0x1d2   : > { %15811 = vmatprep.subr.bf16.mxu0 %v17081_v0  ;;  %15823 = vmatprep.subr.bf16.mxu1 %v17081_v0  ;;  %v17937_v48 = vmax.f32 %v4028_v45, %v4029_v21  ;;  %v15860_v21 = vpack.c.bf16 %v562_v38, %v17692_v1 }
 0x1d3   : > { %v564_v10 = vpop.permute.xlu1 %563 }
 0x1d4   : > { %v15872_v35 = vpack.c.bf16 %v564_v10, %v17696_v3 }
 0x1d5   : > { %15813 = vmatpush3.bf16.msra.mxu0 %v15812_v51  ;;  %15825 = vmatpush3.bf16.msra.mxu1 %v15824_v46  ;;  %v16990_v46 = vld [vmem:[%s17210_s28 + $0x118] sm:$0xff] }
 0x1d6   : > { %15814 = vmatprep.subr.bf16.mxu0 %v17081_v0  ;;  %15826 = vmatprep.subr.bf16.mxu1 %v17081_v0  ;;  %v15875_v51 = vpack.c.bf16 %v17712_v29, %v16990_v46 }
 0x1d9   : > { %15816 = vmatpush3.bf16.msra.mxu0 %v15815_v15  ;;  %15828 = vmatpush3.bf16.msra.mxu1 %v15827_v6 }
 0x1da   : > { %13685 = vmatprep.subr.mxu0 %v17085_v7  ;;  %13706 = vmatprep.subr.mxu1 %v17085_v7 }
 0x1dd   : > { %13686 = vmatpush3.msra.mxu0 %v556_v52  ;;  %13707 = vmatpush3.msra.mxu1 %v558_v4 }
 0x1de   : > { %13688 = vmatmul.mubr.msk.f32.vlgmr.msra.gmra.mrb[28].mxu0 %vm660_vm1, %v17917_v49  ;;  %13709 = vmatmul.mubr.msk.f32.vlgmr.msra.gmra.mrb[28].mxu1 %vm660_vm1, %v17917_v49 }
 0x1df   : > { %15829 = vmatprep.subr.bf16.mxu0 %v17081_v0  ;;  %15841 = vmatprep.subr.bf16.mxu1 %v17081_v0 }
 0x1e0   : > { %15831 = vmatpush3.bf16.msra.mxu0 %v15815_v15  ;;  %15843 = vmatpush3.bf16.msra.mxu1 %v15827_v6  ;;  %v1150_v55 = vpop.f32.mrb[6].mxu0  ;;  %v1220_v44 = vpop.f32.mrb[6].mxu1 }
 0x1e1   : > { %15832 = vmatprep.subr.bf16.mxu0 %v17081_v0  ;;  %15844 = vmatprep.subr.bf16.mxu1 %v17081_v0  ;;  %v1151_v13 = vadd.f32 %v1150_v55, %v17862_v28  ;;  %v1221_v39 = vadd.f32 %v1220_v44, %v17862_v28  ;;  %v13227_v56 = vpop.f32.mrb[7].mxu0  ;;  %v13248_v59 = vpop.f32.mrb[7].mxu1 }
 0x1e2   : > { %13729 = vmatprep.mubr.msk.f32.mxu0 %vm17084_vm0, %v17085_v7  ;;  %13750 = vmatprep.mubr.msk.f32.mxu1 %vm17084_vm0, %v17085_v7  ;;  %v566_v6 = vpop.permute.xlu1 %565 }
 0x1e3   : > { %v4030_v62 = vmax.f32 %v1151_v13, 0.0  ;;  %v4031_v11 = vmax.f32 %v1221_v39, 0.0  ;;  %v15881_v13 = vpack.c.bf16 %v16990_v46, %v564_v10  ;;  %v16991_v39 = vld [vmem:[%s17210_s28 + $0x120] sm:$0xff] }
 0x1e4   : > { %15834 = vmatpush3.bf16.msra.mxu0 %v15833_v16  ;;  %15846 = vmatpush3.bf16.msra.mxu1 %v15845_v24  ;;  %v15893_v56 = vpack.c.bf16 %v16991_v39, %v566_v6 }
 0x1e5   : > { %15835 = vmatprep.subr.bf16.mxu0 %v17081_v0  ;;  %15847 = vmatprep.subr.bf16.mxu1 %v17081_v0  ;;  %v17965_v17 = vmax.f32 %v4030_v62, %v4031_v11  ;;  %v15884_v62 = vpack.c.bf16 %v566_v6, %v17712_v29  ;;  %v16992_v11 = vld [vmem:[%s17210_s28 + $0x128] sm:$0xff] }
 0x1e6   : > { %v568_v1 = vpop.permute.xlu1 %567 }
 0x1e7   : > { %v15896_v58 = vpack.c.bf16 %v568_v1, %v17722_v33 }
 0x1e8   : > { %15837 = vmatpush3.bf16.msra.mxu0 %v15836_v47  ;;  %15849 = vmatpush3.bf16.msra.mxu1 %v15848_v34  ;;  %v15899_v34 = vpack.c.bf16 %v17728_v12, %v16992_v11  ;;  %v15887_v47 = vpack.c.bf16 %v17722_v33, %v16991_v39 }
 0x1e9   : > { %15838 = vmatprep.subr.bf16.mxu0 %v17081_v0  ;;  %15850 = vmatprep.subr.bf16.mxu1 %v17081_v0 }
 0x1ea   : > { %v570_v26 = vpop.permute.xlu1 %569 }
 0x1ec   : > { %15840 = vmatpush3.bf16.msra.mxu0 %v15839_v31  ;;  %15852 = vmatpush3.bf16.msra.mxu1 %v15851_v18 }
 0x1ed   : > { %13727 = vmatprep.subr.mxu0 %v17085_v7  ;;  %13748 = vmatprep.subr.mxu1 %v17085_v7 }
 0x1ee   : > { %v572_v29 = vpop.permute.xlu1 %571 }
 0x1f0   : > { %13728 = vmatpush3.msra.mxu0 %v560_v54  ;;  %13749 = vmatpush3.msra.mxu1 %v562_v38 }
 0x1f1   : > { %13730 = vmatmul.mubr.msk.f32.vlgmr.msra.gmra.mrb[30].mxu0 %vm660_vm1, %v17917_v49  ;;  %13751 = vmatmul.mubr.msk.f32.vlgmr.msra.gmra.mrb[30].mxu1 %vm660_vm1, %v17917_v49 }
 0x1f2   : > { %15853 = vmatprep.subr.bf16.mxu0 %v17081_v0  ;;  %15865 = vmatprep.subr.bf16.mxu1 %v17081_v0 }
 0x1f3   : > { %15855 = vmatpush3.bf16.msra.mxu0 %v15839_v31  ;;  %15867 = vmatpush3.bf16.msra.mxu1 %v15851_v18  ;;  %v1290_v60 = vpop.f32.mrb[8].mxu0  ;;  %v1360_v27 = vpop.f32.mrb[8].mxu1 }
 0x1f4   : > { %15856 = vmatprep.subr.bf16.mxu0 %v17081_v0  ;;  %15868 = vmatprep.subr.bf16.mxu1 %v17081_v0  ;;  %v1291_v52 = vadd.f32 %v1290_v60, %v17862_v28  ;;  %v1361_v32 = vadd.f32 %v1360_v27, %v17862_v28  ;;  %v13269_v50 = vpop.f32.mrb[9].mxu0  ;;  %v13290_v19 = vpop.f32.mrb[9].mxu1  ;;  %v15905_v27 = vpack.c.bf16 %v16992_v11, %v568_v1 }
 0x1f5   : > { %13771 = vmatprep.mubr.msk.f32.mxu0 %vm17084_vm0, %v17085_v7  ;;  %13792 = vmatprep.mubr.msk.f32.mxu1 %vm17084_vm0, %v17085_v7 }
 0x1f6   : > { %v4032_v20 = vmax.f32 %v1291_v52, 0.0  ;;  %v4033_v42 = vmax.f32 %v1361_v32, 0.0  ;;  %v16993_v52 = vld [vmem:[%s17210_s28 + $0x130] sm:$0xff] }
 0x1f7   : > { %15858 = vmatpush3.bf16.msra.mxu0 %v15857_v9  ;;  %15870 = vmatpush3.bf16.msra.mxu1 %v15869_v41  ;;  %v15917_v32 = vpack.c.bf16 %v16993_v52, %v570_v26  ;;  %v15920_v9 = vpack.c.bf16 %v572_v29, %v17744_v40  ;;  %v15908_v41 = vpack.c.bf16 %v570_v26, %v17728_v12 }
 0x1f8   : > { %15859 = vmatprep.subr.bf16.mxu0 %v17081_v0  ;;  %15871 = vmatprep.subr.bf16.mxu1 %v17081_v0  ;;  %v17993_v45 = vmax.f32 %v4032_v20, %v4033_v42  ;;  %v16994_v20 = vld [vmem:[%s17210_s28 + $0x138] sm:$0xff] }
 0x1f9   : > { %v15923_v42 = vpack.c.bf16 %v17752_v43, %v16994_v20 }
 0x1fb   : > { %15861 = vmatpush3.bf16.msra.mxu0 %v15860_v21  ;;  %15873 = vmatpush3.bf16.msra.mxu1 %v15872_v35  ;;  %v15911_v35 = vpack.c.bf16 %v17744_v40, %v16993_v52  ;;  %v574_v21 = vpop.permute.xlu1 %573  ;;  %v16998_v52 = vld [vmem:[%s17210_s28 + $0x158] sm:$0xff] }
 0x1fc   : > { %15862 = vmatprep.subr.bf16.mxu0 %v17081_v0  ;;  %15874 = vmatprep.subr.bf16.mxu1 %v17081_v0  ;;  %v15932_v39 = vpack.c.bf16 %v574_v21, %v17752_v43 }
 0x1ff   : > { %15864 = vmatpush3.bf16.msra.mxu0 %v15863_v22  ;;  %15876 = vmatpush3.bf16.msra.mxu1 %v15875_v51  ;;  %v576_v12 = vpop.permute.xlu1 %575 }
 0x200   : > { %13769 = vmatprep.subr.mxu0 %v17085_v7  ;;  %13790 = vmatprep.subr.mxu1 %v17085_v7 }
 0x203   : > { %13770 = vmatpush3.msra.mxu0 %v564_v10  ;;  %13791 = vmatpush3.msra.mxu1 %v566_v6 }
 0x204   : > { %13772 = vmatmul.mubr.msk.f32.vlgmr.msra.gmra.mrb[32].mxu0 %vm660_vm1, %v17917_v49  ;;  %13793 = vmatmul.mubr.msk.f32.vlgmr.msra.gmra.mrb[32].mxu1 %vm660_vm1, %v17917_v49 }
 0x205   : > { %15877 = vmatprep.subr.bf16.mxu0 %v17081_v0  ;;  %15889 = vmatprep.subr.bf16.mxu1 %v17081_v0 }
 0x206   : > { %15879 = vmatpush3.bf16.msra.mxu0 %v15863_v22  ;;  %15891 = vmatpush3.bf16.msra.mxu1 %v15875_v51  ;;  %v1430_v3 = vpop.f32.mrb[10].mxu0  ;;  %v1500_v15 = vpop.f32.mrb[10].mxu1 }
 0x207   : > { %15880 = vmatprep.subr.bf16.mxu0 %v17081_v0  ;;  %15892 = vmatprep.subr.bf16.mxu1 %v17081_v0  ;;  %v1431_v4 = vadd.f32 %v1430_v3, %v17862_v28  ;;  %v1501_v54 = vadd.f32 %v1500_v15, %v17862_v28  ;;  %v13311_v55 = vpop.f32.mrb[11].mxu0  ;;  %v13332_v44 = vpop.f32.mrb[11].mxu1  ;;  %v15929_v3 = vpack.c.bf16 %v16994_v20, %v572_v29  ;;  %v16995_v15 = vld [vmem:[%s17210_s28 + $0x140] sm:$0xff] }
 0x208   : > { %13813 = vmatprep.mubr.msk.f32.mxu0 %vm17084_vm0, %v17085_v7  ;;  %13834 = vmatprep.mubr.msk.f32.mxu1 %vm17084_vm0, %v17085_v7  ;;  %v15944_v44 = vpack.c.bf16 %v576_v12, %v17760_v57 }
 0x209   : > { %v4034_v59 = vmax.f32 %v1431_v4, 0.0  ;;  %v4035_v16 = vmax.f32 %v1501_v54, 0.0  ;;  %v15941_v4 = vpack.c.bf16 %v16995_v15, %v574_v21 }
 0x20a   : > { %15882 = vmatpush3.bf16.msra.mxu0 %v15881_v13  ;;  %15894 = vmatpush3.bf16.msra.mxu1 %v15893_v56  ;;  %v16996_v56 = vld [vmem:[%s17210_s28 + $0x148] sm:$0xff] }
 0x20b   : > { %15883 = vmatprep.subr.bf16.mxu0 %v17081_v0  ;;  %15895 = vmatprep.subr.bf16.mxu1 %v17081_v0  ;;  %v18021_v24 = vmax.f32 %v4034_v59, %v4035_v16  ;;  %v15947_v59 = vpack.c.bf16 %v17770_v61, %v16996_v56  ;;  %v15935_v16 = vpack.c.bf16 %v17760_v57, %v16995_v15 }
 0x20e   : > { %15885 = vmatpush3.bf16.msra.mxu0 %v15884_v62  ;;  %15897 = vmatpush3.bf16.msra.mxu1 %v15896_v58  ;;  %v578_v58 = vpop.permute.xlu1 %577 }
 0x20f   : > { %15886 = vmatprep.subr.bf16.mxu0 %v17081_v0  ;;  %15898 = vmatprep.subr.bf16.mxu1 %v17081_v0 }
 0x212   : > { %15888 = vmatpush3.bf16.msra.mxu0 %v15887_v47  ;;  %15900 = vmatpush3.bf16.msra.mxu1 %v15899_v34  ;;  %v580_v43 = vpop.permute.xlu1 %579 }
 0x213   : > { %13811 = vmatprep.subr.mxu0 %v17085_v7  ;;  %13832 = vmatprep.subr.mxu1 %v17085_v7 }
 0x216   : > { %13812 = vmatpush3.msra.mxu0 %v568_v1  ;;  %13833 = vmatpush3.msra.mxu1 %v570_v26 }
 0x217   : > { %13814 = vmatmul.mubr.msk.f32.vlgmr.msra.gmra.mrb[34].mxu0 %vm660_vm1, %v17917_v49  ;;  %13835 = vmatmul.mubr.msk.f32.vlgmr.msra.gmra.mrb[34].mxu1 %vm660_vm1, %v17917_v49 }
 0x218   : > { %15901 = vmatprep.subr.bf16.mxu0 %v17081_v0  ;;  %15913 = vmatprep.subr.bf16.mxu1 %v17081_v0 }
 0x219   : > { %15903 = vmatpush3.bf16.msra.mxu0 %v15887_v47  ;;  %15915 = vmatpush3.bf16.msra.mxu1 %v15899_v34  ;;  %v1570_v33 = vpop.f32.mrb[12].mxu0  ;;  %v1640_v18 = vpop.f32.mrb[12].mxu1 }
 0x21a   : > { %15904 = vmatprep.subr.bf16.mxu0 %v17081_v0  ;;  %15916 = vmatprep.subr.bf16.mxu1 %v17081_v0  ;;  %v1571_v31 = vadd.f32 %v1570_v33, %v17862_v28  ;;  %v1641_v38 = vadd.f32 %v1640_v18, %v17862_v28  ;;  %v13353_v10 = vpop.f32.mrb[13].mxu0  ;;  %v13374_v60 = vpop.f32.mrb[13].mxu1  ;;  %v16997_v33 = vld [vmem:[%s17210_s28 + $0x150] sm:$0xff] }
 0x21b   : > { %13855 = vmatprep.mubr.msk.f32.mxu0 %vm17084_vm0, %v17085_v7  ;;  %13876 = vmatprep.mubr.msk.f32.mxu1 %vm17084_vm0, %v17085_v7  ;;  %v15965_v18 = vpack.c.bf16 %v16997_v33, %v578_v58  ;;  %v15968_v10 = vpack.c.bf16 %v580_v43, %v17782_v53 }
 0x21c   : > { %v4036_v50 = vmax.f32 %v1571_v31, 0.0  ;;  %v4037_v19 = vmax.f32 %v1641_v38, 0.0 }
 0x21d   : > { %15906 = vmatpush3.bf16.msra.mxu0 %v15905_v27  ;;  %15918 = vmatpush3.bf16.msra.mxu1 %v15917_v32  ;;  %v15956_v27 = vpack.c.bf16 %v578_v58, %v17770_v61  ;;  %v15971_v32 = vpack.c.bf16 %v17792_v2, %v16998_v52 }
 0x21e   : > { %15907 = vmatprep.subr.bf16.mxu0 %v17081_v0  ;;  %15919 = vmatprep.subr.bf16.mxu1 %v17081_v0  ;;  %v18049_v37 = vmax.f32 %v4036_v50, %v4037_v19  ;;  %v15959_v50 = vpack.c.bf16 %v17782_v53, %v16997_v33  ;;  %v582_v19 = vpop.permute.xlu1 %581 }
 0x221   : > { %15909 = vmatpush3.bf16.msra.mxu0 %v15908_v41  ;;  %15921 = vmatpush3.bf16.msra.mxu1 %v15920_v9 }
 0x222   : > { %15910 = vmatprep.subr.bf16.mxu0 %v17081_v0  ;;  %15922 = vmatprep.subr.bf16.mxu1 %v17081_v0  ;;  %v584_v61 = vpop.permute.xlu1 %583 }
 0x225   : > { %15912 = vmatpush3.bf16.msra.mxu0 %v15911_v35  ;;  %15924 = vmatpush3.bf16.msra.mxu1 %v15923_v42 }
 0x226   : > { %13853 = vmatprep.subr.mxu0 %v17085_v7  ;;  %13874 = vmatprep.subr.mxu1 %v17085_v7 }
 0x229   : > { %13854 = vmatpush3.msra.mxu0 %v572_v29  ;;  %13875 = vmatpush3.msra.mxu1 %v574_v21  ;;  %v15953_v29 = vpack.c.bf16 %v16996_v56, %v576_v12  ;;  %v15977_v21 = vpack.c.bf16 %v16998_v52, %v580_v43 }
 0x22a   : > { %13856 = vmatmul.mubr.msk.f32.vlgmr.msra.gmra.mrb[36].mxu0 %vm660_vm1, %v17917_v49  ;;  %13877 = vmatmul.mubr.msk.f32.vlgmr.msra.gmra.mrb[36].mxu1 %vm660_vm1, %v17917_v49 }
 0x22b   : > { %15925 = vmatprep.subr.bf16.mxu0 %v17081_v0  ;;  %15937 = vmatprep.subr.bf16.mxu1 %v17081_v0 }
 0x22c   : > { %15927 = vmatpush3.bf16.msra.mxu0 %v15911_v35  ;;  %15939 = vmatpush3.bf16.msra.mxu1 %v15923_v42  ;;  %v1710_v40 = vpop.f32.mrb[14].mxu0  ;;  %v1780_v46 = vpop.f32.mrb[14].mxu1 }
 0x22d   : > { %15928 = vmatprep.subr.bf16.mxu0 %v17081_v0  ;;  %15940 = vmatprep.subr.bf16.mxu1 %v17081_v0  ;;  %v1711_v51 = vadd.f32 %v1710_v40, %v17862_v28  ;;  %v1781_v22 = vadd.f32 %v1780_v46, %v17862_v28  ;;  %v13395_v6 = vpop.f32.mrb[15].mxu0  ;;  %v13416_v1 = vpop.f32.mrb[15].mxu1 }
 0x22e   : > { %13897 = vmatprep.mubr.msk.f32.mxu0 %vm17084_vm0, %v17085_v7  ;;  %13918 = vmatprep.mubr.msk.f32.mxu1 %vm17084_vm0, %v17085_v7  ;;  %v15980_v1 = vpack.c.bf16 %v582_v19, %v17792_v2 }
 0x22f   : > { %v4038_v54 = vmax.f32 %v1711_v51, 0.0  ;;  %v4039_v55 = vmax.f32 %v1781_v22, 0.0  ;;  %v15992_v22 = vpack.c.bf16 %v584_v61, %v17800_v23 }
 0x230   : > { %15930 = vmatpush3.bf16.msra.mxu0 %v15929_v3  ;;  %15942 = vmatpush3.bf16.msra.mxu1 %v15941_v4  ;;  %v17000_v3 = vld [vmem:[%s17210_s28 + $0x168] sm:$0xff] }
 0x231   : > { %15931 = vmatprep.subr.bf16.mxu0 %v17081_v0  ;;  %15943 = vmatprep.subr.bf16.mxu1 %v17081_v0  ;;  %v18077_v13 = vmax.f32 %v4038_v54, %v4039_v55  ;;  %v15995_v15 = vpack.c.bf16 %v17814_v63, %v17000_v3  ;;  %v586_v54 = vpop.permute.xlu1 %585 }
 0x234   : > { %15933 = vmatpush3.bf16.msra.mxu0 %v15932_v39  ;;  %15945 = vmatpush3.bf16.msra.mxu1 %v15944_v44 }
 0x235   : > { %15934 = vmatprep.subr.bf16.mxu0 %v17081_v0  ;;  %15946 = vmatprep.subr.bf16.mxu1 %v17081_v0  ;;  %v588_v2 = vpop.permute.xlu1 %587 }
 0x238   : > { %15936 = vmatpush3.bf16.msra.mxu0 %v15935_v16  ;;  %15948 = vmatpush3.bf16.msra.mxu1 %v15947_v59 }
 0x239   : > { %13895 = vmatprep.subr.mxu0 %v17085_v7  ;;  %13916 = vmatprep.subr.mxu1 %v17085_v7 }
 0x23c   : > { %13896 = vmatpush3.msra.mxu0 %v576_v12  ;;  %13917 = vmatpush3.msra.mxu1 %v578_v58  ;;  %v16999_v12 = vld [vmem:[%s17210_s28 + $0x160] sm:$0xff]  ;;  %v17001_v58 = vld [vmem:[%s17210_s28 + $0x170] sm:$0xff] }
 0x23d   : > { %13898 = vmatmul.mubr.msk.f32.vlgmr.msra.gmra.mrb[38].mxu0 %vm660_vm1, %v17917_v49  ;;  %13919 = vmatmul.mubr.msk.f32.vlgmr.msra.gmra.mrb[38].mxu1 %vm660_vm1, %v17917_v49  ;;  %v15989_v40 = vpack.c.bf16 %v16999_v12, %v582_v19  ;;  %v15983_v4 = vpack.c.bf16 %v17800_v23, %v16999_v12  ;;  %v16007_v33 = vpack.c.bf16 %v17822_v8, %v17001_v58  ;;  %v17004_v12 = vld [vmem:[%s17210_s28 + $0x188] sm:$0xff] }
 0x23e   : > { %15949 = vmatprep.subr.bf16.mxu0 %v17081_v0  ;;  %15961 = vmatprep.subr.bf16.mxu1 %v17081_v0 }
 0x23f   : > { %15951 = vmatpush3.bf16.msra.mxu0 %v15935_v16  ;;  %15963 = vmatpush3.bf16.msra.mxu1 %v15947_v59  ;;  %v1850_v57 = vpop.f32.mrb[16].mxu0  ;;  %v1920_v62 = vpop.f32.mrb[16].mxu1  ;;  %v16001_v16 = vpack.c.bf16 %v17000_v3, %v584_v61 }
 0x240   : > { %15952 = vmatprep.subr.bf16.mxu0 %v17081_v0  ;;  %15964 = vmatprep.subr.bf16.mxu1 %v17081_v0  ;;  %v1851_v11 = vadd.f32 %v1850_v57, %v17862_v28  ;;  %v1921_v34 = vadd.f32 %v1920_v62, %v17862_v28  ;;  %v13437_v47 = vpop.f32.mrb[17].mxu0  ;;  %v13458_v26 = vpop.f32.mrb[17].mxu1 }
 0x241   : > { %13939 = vmatprep.mubr.msk.f32.mxu0 %vm17084_vm0, %v17085_v7  ;;  %13960 = vmatprep.mubr.msk.f32.mxu1 %vm17084_vm0, %v17085_v7  ;;  %v16004_v47 = vpack.c.bf16 %v586_v54, %v17814_v63  ;;  %v17002_v26 = vld [vmem:[%s17210_s28 + $0x178] sm:$0xff] }
 0x242   : > { %v4040_v31 = vmax.f32 %v1851_v11, 0.0  ;;  %v4041_v38 = vmax.f32 %v1921_v34, 0.0  ;;  %v16016_v11 = vpack.c.bf16 %v588_v2, %v17822_v8 }
 0x243   : > { %15954 = vmatpush3.bf16.msra.mxu0 %v15953_v29  ;;  %15966 = vmatpush3.bf16.msra.mxu1 %v15965_v18  ;;  %v16019_v29 = vpack.c.bf16 %v17832_v25, %v17002_v26  ;;  %v590_v18 = vpop.permute.xlu1 %589 }
 0x244   : > { %15955 = vmatprep.subr.bf16.mxu0 %v17081_v0  ;;  %15967 = vmatprep.subr.bf16.mxu1 %v17081_v0  ;;  %v18105_v60 = vmax.f32 %v4040_v31, %v4041_v38 }
 0x247   : > { %15957 = vmatpush3.bf16.msra.mxu0 %v15956_v27  ;;  %15969 = vmatpush3.bf16.msra.mxu1 %v15968_v10  ;;  %v644_v63 = vpop.permute.xlu1 %643 }
 0x248   : > { %15958 = vmatprep.subr.bf16.mxu0 %v17081_v0  ;;  %15970 = vmatprep.subr.bf16.mxu1 %v17081_v0 }
 0x24b   : > { %15960 = vmatpush3.bf16.msra.mxu0 %v15959_v50  ;;  %15972 = vmatpush3.bf16.msra.mxu1 %v15971_v32 }
 0x24c   : > { %13937 = vmatprep.subr.mxu0 %v17085_v7  ;;  %13958 = vmatprep.subr.mxu1 %v17085_v7 }
 0x24f   : > { %13938 = vmatpush3.msra.mxu0 %v580_v43  ;;  %13959 = vmatpush3.msra.mxu1 %v582_v19  ;;  %v16013_v43 = vpack.c.bf16 %v17001_v58, %v586_v54  ;;  %v17003_v19 = vld [vmem:[%s17210_s28 + $0x180] sm:$0xff] }
 0x250   : > { %13940 = vmatmul.mubr.msk.f32.vlgmr.msra.gmra.mrb[40].mxu0 %vm660_vm1, %v17917_v49  ;;  %13961 = vmatmul.mubr.msk.f32.vlgmr.msra.gmra.mrb[40].mxu1 %vm660_vm1, %v17917_v49 }
 0x251   : > { %15973 = vmatprep.subr.bf16.mxu0 %v17081_v0  ;;  %15985 = vmatprep.subr.bf16.mxu1 %v17081_v0 }
 0x252   : > { %15975 = vmatpush3.bf16.msra.mxu0 %v15959_v50  ;;  %15987 = vmatpush3.bf16.msra.mxu1 %v15971_v32  ;;  %v1990_v53 = vpop.f32.mrb[18].mxu0  ;;  %v2060_v9 = vpop.f32.mrb[18].mxu1  ;;  %v4096_v32 = vlaneseq  ;;  %v16025_v50 = vpack.c.bf16 %v17002_v26, %v588_v2 }
 0x253   : > { %15976 = vmatprep.subr.bf16.mxu0 %v17081_v0  ;;  %15988 = vmatprep.subr.bf16.mxu1 %v17081_v0  ;;  %v1991_v41 = vadd.f32 %v1990_v53, %v17862_v28  ;;  %v2061_v20 = vadd.f32 %v2060_v9, %v17862_v28  ;;  %v13479_v42 = vpop.f32.mrb[19].mxu0  ;;  %v13500_v35 = vpop.f32.mrb[19].mxu1 }
 0x254   : > { %13981 = vmatprep.mubr.msk.f32.mxu0 %vm17084_vm0, %v17085_v7  ;;  %14002 = vmatprep.mubr.msk.f32.mxu1 %vm17084_vm0, %v17085_v7  ;;  %v18191_v42 = vshrl.u32 %v4096_v32, 7  ;;  %v4104_v35 = vand.u32 127, %v4096_v32 }
 0x255   : > { %v4042_v46 = vmax.f32 %v1991_v41, 0.0  ;;  %v4043_v51 = vmax.f32 %v2061_v20, 0.0  ;;  %v16040_v41 = vpack.c.bf16 %v644_v63, %v17845_v30 }
 0x256   : > { %15978 = vmatpush3.bf16.msra.mxu0 %v15977_v21  ;;  %15990 = vmatpush3.bf16.msra.mxu1 %v15989_v40  ;;  %v16028_v21 = vpack.c.bf16 %v590_v18, %v17832_v25  ;;  %v16043_v40 = vpack.c.bf16 %v17854_v36, %v17004_v12  ;;  %v18211_v25 = vadd.s32 16, %v18191_v42  ;;  %v18214_v36 = vadd.s32 24, %v18191_v42 }
 0x257   : > { %15979 = vmatprep.subr.bf16.mxu0 %v17081_v0  ;;  %15991 = vmatprep.subr.bf16.mxu1 %v17081_v0  ;;  %v18133_v6 = vmax.f32 %v4042_v46, %v4043_v51  ;;  %v18199_v46 = vadd.s32 8, %v18191_v42  ;;  %v18201_v51 = vmul.u32 2, %v4104_v35  ;;  %v18229_v3 = vadd.s32 32, %v18191_v42 }
 0x259   : > { %vm4106_vm2 = vcmp.eq.s32.totalorder %v18191_v42, %v18201_v51  ;;  %vm4107_vm3 = vcmp.eq.s32.totalorder %v18199_v46, %v18201_v51  ;;  %vm4108_vm5 = vcmp.eq.s32.totalorder %v18211_v25, %v18201_v51  ;;  %vm4109_vm6 = vcmp.eq.s32.totalorder %v18214_v36, %v18201_v51 }
 0x25a   : > { %15981 = vmatpush3.bf16.msra.mxu0 %v15980_v1  ;;  %15993 = vmatpush3.bf16.msra.mxu1 %v15992_v22  ;;  %v16031_v22 = vpack.c.bf16 %v17845_v30, %v17003_v19  ;;  %v651_v1 = vpop.permute.xlu1 %650  ;;  %vm18216_vm4 = vmpackc.low %vm4107_vm3, %vm4106_vm2  ;;  %vm4110_vm8 = vcmp.eq.s32.totalorder %v18229_v3, %v18201_v51 }
 0x25b   : > { %15982 = vmatprep.subr.bf16.mxu0 %v17081_v0  ;;  %15994 = vmatprep.subr.bf16.mxu1 %v17081_v0  ;;  %vm18247_vm7 = vmpackc.low %vm4109_vm6, %vm4108_vm5 }
 0x25e   : > { %15984 = vmatpush3.bf16.msra.mxu0 %v15983_v4  ;;  %15996 = vmatpush3.bf16.msra.mxu1 %v15995_v15 }
 0x25f   : > { %13979 = vmatprep.subr.mxu0 %v17085_v7  ;;  %14000 = vmatprep.subr.mxu1 %v17085_v7 }
 0x262   : > { %13980 = vmatpush3.msra.mxu0 %v584_v61  ;;  %14001 = vmatpush3.msra.mxu1 %v586_v54  ;;  %v16037_v61 = vpack.c.bf16 %v17003_v19, %v590_v18 }
 0x263   : > { %13982 = vmatmul.mubr.msk.f32.vlgmr.msra.gmra.mrb[42].mxu0 %vm660_vm1, %v17917_v49  ;;  %14003 = vmatmul.mubr.msk.f32.vlgmr.msra.gmra.mrb[42].mxu1 %vm660_vm1, %v17917_v49 }
 0x264   : > { %15997 = vmatprep.subr.bf16.mxu0 %v17081_v0  ;;  %16009 = vmatprep.subr.bf16.mxu1 %v17081_v0 }
 0x265   : > { %15999 = vmatpush3.bf16.msra.mxu0 %v15983_v4  ;;  %16011 = vmatpush3.bf16.msra.mxu1 %v15995_v15  ;;  %v2130_v23 = vpop.f32.mrb[20].mxu0  ;;  %v2200_v55 = vpop.f32.mrb[20].mxu1  ;;  %v18232_v15 = vadd.s32 40, %v18191_v42  ;;  %v17087_v4 = vmov 1.0|1.0  }
 0x266   : > { %16000 = vmatprep.subr.bf16.mxu0 %v17081_v0  ;;  %16012 = vmatprep.subr.bf16.mxu1 %v17081_v0  ;;  %v2131_v44 = vadd.f32 %v2130_v23, %v17862_v28  ;;  %v2201_v39 = vadd.f32 %v2200_v55, %v17862_v28  ;;  %v13521_v56 = vpop.f32.mrb[21].mxu0  ;;  %v13542_v59 = vpop.f32.mrb[21].mxu1 }
 0x267   : > { %14023 = vmatprep.mubr.msk.f32.mxu0 %vm17084_vm0, %v17085_v7  ;;  %14044 = vmatprep.mubr.msk.f32.mxu1 %vm17084_vm0, %v17085_v7  ;;  %vm4111_vm9 = vcmp.eq.s32.totalorder %v18232_v15, %v18201_v51 }
 0x268   : > { %v4044_v57 = vmax.f32 %v2131_v44, 0.0  ;;  %v4045_v62 = vmax.f32 %v2201_v39, 0.0  ;;  %vm18269_vm10 = vmpackc.low %vm4111_vm9, %vm4110_vm8 }
 0x269   : > { %16002 = vmatpush3.bf16.msra.mxu0 %v16001_v16  ;;  %16014 = vmatpush3.bf16.msra.mxu1 %v16013_v43 }
 0x26a   : > { %16003 = vmatprep.subr.bf16.mxu0 %v17081_v0  ;;  %16015 = vmatprep.subr.bf16.mxu1 %v17081_v0  ;;  %v18161_v34 = vmax.f32 %v4044_v57, %v4045_v62 }
 0x26d   : > { %16005 = vmatpush3.bf16.msra.mxu0 %v16004_v47  ;;  %16017 = vmatpush3.bf16.msra.mxu1 %v16016_v11 }
 0x26e   : > { %16006 = vmatprep.subr.bf16.mxu0 %v17081_v0  ;;  %16018 = vmatprep.subr.bf16.mxu1 %v17081_v0 }
 0x271   : > { %16008 = vmatpush3.bf16.msra.mxu0 %v16007_v33  ;;  %16020 = vmatpush3.bf16.msra.mxu1 %v16019_v29 }
 0x272   : > { %14021 = vmatprep.subr.mxu0 %v17085_v7  ;;  %14042 = vmatprep.subr.mxu1 %v17085_v7 }
 0x275   : > { %14022 = vmatpush3.msra.mxu0 %v588_v2  ;;  %14043 = vmatpush3.msra.mxu1 %v590_v18 }
 0x276   : > { %14024 = vmatmul.mubr.msk.f32.vlgmr.msra.gmra.mrb[44].mxu0 %vm660_vm1, %v17917_v49  ;;  %14045 = vmatmul.mubr.msk.f32.vlgmr.msra.gmra.mrb[44].mxu1 %vm660_vm1, %v17917_v49 }
 0x277   : > { %16021 = vmatprep.subr.bf16.mxu0 %v17081_v0  ;;  %16033 = vmatprep.subr.bf16.mxu1 %v17081_v0 }
 0x278   : > { %16023 = vmatpush3.bf16.msra.mxu0 %v16007_v33  ;;  %16035 = vmatpush3.bf16.msra.mxu1 %v16019_v29  ;;  %v2270_v8 = vpop.f32.mrb[22].mxu0  ;;  %v2340_v31 = vpop.f32.mrb[22].mxu1 }
 0x279   : > { %16024 = vmatprep.subr.bf16.mxu0 %v17081_v0  ;;  %16036 = vmatprep.subr.bf16.mxu1 %v17081_v0  ;;  %v2271_v38 = vadd.f32 %v2270_v8, %v17862_v28  ;;  %v2341_v10 = vadd.f32 %v2340_v31, %v17862_v28  ;;  %v13563_v27 = vpop.f32.mrb[23].mxu0  ;;  %v13584_v52 = vpop.f32.mrb[23].mxu1 }
 0x27a   : > { %14065 = vmatprep.mubr.msk.f32.mxu0 %vm17084_vm0, %v17085_v7  ;;  %14086 = vmatprep.mubr.msk.f32.mxu1 %vm17084_vm0, %v17085_v7 }
 0x27b   : > { %v4046_v53 = vmax.f32 %v2271_v38, 0.0  ;;  %v4047_v9 = vmax.f32 %v2341_v10, 0.0 }
 0x27c   : > { %16026 = vmatpush3.bf16.msra.mxu0 %v16025_v50  ;;  %16038 = vmatpush3.bf16.msra.mxu1 %v16037_v61 }
 0x27d   : > { %16027 = vmatprep.subr.bf16.mxu0 %v17081_v0  ;;  %16039 = vmatprep.subr.bf16.mxu1 %v17081_v0  ;;  %v18189_v20 = vmax.f32 %v4046_v53, %v4047_v9 }
 0x280   : > { %16029 = vmatpush3.bf16.msra.mxu0 %v16028_v21  ;;  %16041 = vmatpush3.bf16.msra.mxu1 %v16040_v41 }
 0x281   : > { %16030 = vmatprep.subr.bf16.mxu0 %v17081_v0  ;;  %16042 = vmatprep.subr.bf16.mxu1 %v17081_v0 }
 0x284   : > { %16032 = vmatpush3.bf16.msra.mxu0 %v16031_v22  ;;  %16044 = vmatpush3.bf16.msra.mxu1 %v16043_v40 }
 0x285   : > { %14063 = vmatprep.subr.mxu0 %v17085_v7  ;;  %14084 = vmatprep.subr.mxu1 %v17085_v7 }
 0x288   : > { %14064 = vmatpush3.msra.mxu0 %v644_v63  ;;  %14085 = vmatpush3.msra.mxu1 %v651_v1 }
 0x289   : > { %14066 = vmatmul.mubr.msk.f32.vlgmr.msra.gmra.mrb[46].mxu0 %vm660_vm1, %v17917_v49  ;;  %14087 = vmatmul.mubr.msk.f32.vlgmr.msra.gmra.mrb[46].mxu1 %vm660_vm1, %v17917_v49 }
 0x28a   : > { %16045 = vmatprep.subr.bf16.mxu0 %v17081_v0  ;;  %16054 = vmatprep.subr.bf16.mxu1 %v17081_v0 }
 0x28b   : > { %16047 = vmatpush3.bf16.msk.msra.mxu0 %vm18216_vm4, %v17087_v4  ;;  %16056 = vmatpush3.bf16.msk.msra.mxu1 %vm18216_vm4, %v17087_v4  ;;  %v2410_v49 = vpop.f32.mrb[24].mxu0  ;;  %v2480_v54 = vpop.f32.mrb[24].mxu1 }
 0x28c   : > { %16048 = vmatprep.subr.bf16.mxu0 %v17081_v0  ;;  %16057 = vmatprep.subr.bf16.mxu1 %v17081_v0  ;;  %v2411_v23 = vadd.f32 %v2410_v49, %v17862_v28  ;;  %v2481_v55 = vadd.f32 %v2480_v54, %v17862_v28  ;;  %v13605_v44 = vpop.f32.mrb[25].mxu0  ;;  %v13626_v39 = vpop.f32.mrb[25].mxu1 }
 0x28d   : > { %14101 = vmatprep.mubr.msk.f32.mxu0 %vm17084_vm0, %v17085_v7  ;;  %14116 = vmatprep.mubr.msk.f32.mxu1 %vm17084_vm0, %v17085_v7 }
 0x28e   : > { %v4048_v56 = vmax.f32 %v2411_v23, 0.0  ;;  %v4049_v59 = vmax.f32 %v2481_v55, 0.0 }
 0x28f   : > { %16050 = vmatpush3.bf16.msk.msra.mxu0 %vm18247_vm7, %v17087_v4  ;;  %16059 = vmatpush3.bf16.msk.msra.mxu1 %vm18247_vm7, %v17087_v4 }
 0x290   : > { %16051 = vmatprep.subr.bf16.mxu0 %v17081_v0  ;;  %16060 = vmatprep.subr.bf16.mxu1 %v17081_v0  ;;  %v18273_v58 = vmax.f32 %v4048_v56, %v4049_v59 }
 0x293   : > { %16053 = vmatpush3.bf16.msk.msra.mxu0 %vm18269_vm10, %v17087_v4  ;;  %16062 = vmatpush3.bf16.msk.msra.mxu1 %vm18269_vm10, %v17087_v4 }
 0x294   : > { %16063 = vmatprep.subr.bf16.mxu0 %v17081_v0  ;;  %16072 = vmatprep.subr.bf16.mxu1 %v17081_v0 }
 0x296   : > { %14102 = vmatmul.mubr.msk.f32.vlgmr.msra.gmra.mrb[48].mxu0 %vm4143_vm11, %v17879_v14  ;;  %14117 = vmatmul.mubr.msk.f32.vlgmr.msra.gmra.mrb[48].mxu1 %vm4143_vm11, %v17907_v5 }
 0x297   : > { %16065 = vmatpush3.bf16.msk.msra.mxu0 %vm18216_vm4, %v17087_v4  ;;  %16074 = vmatpush3.bf16.msk.msra.mxu1 %vm18216_vm4, %v17087_v4 }
 0x298   : > { %16066 = vmatprep.subr.bf16.mxu0 %v17081_v0  ;;  %16075 = vmatprep.subr.bf16.mxu1 %v17081_v0 }
 0x299   : > { %14131 = vmatprep.mubr.msk.f32.mxu0 %vm17084_vm0, %v17085_v7  ;;  %14146 = vmatprep.mubr.msk.f32.mxu1 %vm17084_vm0, %v17085_v7 }
 0x29b   : > { %16068 = vmatpush3.bf16.msk.msra.mxu0 %vm18247_vm7, %v17087_v4  ;;  %16077 = vmatpush3.bf16.msk.msra.mxu1 %vm18247_vm7, %v17087_v4 }
 0x29c   : > { %16069 = vmatprep.subr.bf16.mxu0 %v17081_v0  ;;  %16078 = vmatprep.subr.bf16.mxu1 %v17081_v0 }
 0x29e   : > { %v2550_v43 = vpop.f32.mrb[26].mxu0  ;;  %v2620_v57 = vpop.f32.mrb[26].mxu1 }
 0x29f   : > { %16071 = vmatpush3.bf16.msk.msra.mxu0 %vm18269_vm10, %v17087_v4  ;;  %16080 = vmatpush3.bf16.msk.msra.mxu1 %vm18269_vm10, %v17087_v4  ;;  %v2551_v62 = vadd.f32 %v2550_v43, %v17862_v28  ;;  %v2621_v11 = vadd.f32 %v2620_v57, %v17862_v28  ;;  %v13647_v47 = vpop.f32.mrb[27].mxu0  ;;  %v13668_v26 = vpop.f32.mrb[27].mxu1 }
 0x2a0   : > { %16081 = vmatprep.subr.bf16.mxu0 %v17081_v0  ;;  %16090 = vmatprep.subr.bf16.mxu1 %v17081_v0 }
 0x2a1   : > { %v4050_v29 = vmax.f32 %v2551_v62, 0.0  ;;  %v4051_v33 = vmax.f32 %v2621_v11, 0.0 }
 0x2a2   : > { %14132 = vmatmul.mubr.msk.f32.vlgmr.msra.gmra.mrb[50].mxu0 %vm4143_vm11, %v17937_v48  ;;  %14147 = vmatmul.mubr.msk.f32.vlgmr.msra.gmra.mrb[50].mxu1 %vm4143_vm11, %v17965_v17 }
 0x2a3   : > { %16083 = vmatpush3.bf16.msk.msra.mxu0 %vm18216_vm4, %v17087_v4  ;;  %16092 = vmatpush3.bf16.msk.msra.mxu1 %vm18216_vm4, %v17087_v4  ;;  %v18327_v18 = vmax.f32 %v4050_v29, %v4051_v33 }
 0x2a4   : > { %16084 = vmatprep.subr.bf16.mxu0 %v17081_v0  ;;  %16093 = vmatprep.subr.bf16.mxu1 %v17081_v0 }
 0x2a5   : > { %14161 = vmatprep.mubr.msk.f32.mxu0 %vm17084_vm0, %v17085_v7  ;;  %14176 = vmatprep.mubr.msk.f32.mxu1 %vm17084_vm0, %v17085_v7 }
 0x2a7   : > { %16086 = vmatpush3.bf16.msk.msra.mxu0 %vm18247_vm7, %v17087_v4  ;;  %16095 = vmatpush3.bf16.msk.msra.mxu1 %vm18247_vm7, %v17087_v4 }
 0x2a8   : > { %16087 = vmatprep.subr.bf16.mxu0 %v17081_v0  ;;  %16096 = vmatprep.subr.bf16.mxu1 %v17081_v0 }
 0x2ab   : > { %16089 = vmatpush3.bf16.msk.msra.mxu0 %vm18269_vm10, %v17087_v4  ;;  %16098 = vmatpush3.bf16.msk.msra.mxu1 %vm18269_vm10, %v17087_v4 }
 0x2ac   : > { %16099 = vmatprep.subr.bf16.mxu0 %v17081_v0  ;;  %16108 = vmatprep.subr.bf16.mxu1 %v17081_v0 }
 0x2ae   : > { %14162 = vmatmul.mubr.msk.f32.vlgmr.msra.gmra.mrb[52].mxu0 %vm4143_vm11, %v17993_v45  ;;  %14177 = vmatmul.mubr.msk.f32.vlgmr.msra.gmra.mrb[52].mxu1 %vm4143_vm11, %v18021_v24 }
 0x2af   : > { %16101 = vmatpush3.bf16.msk.msra.mxu0 %vm18216_vm4, %v17087_v4  ;;  %16110 = vmatpush3.bf16.msk.msra.mxu1 %vm18216_vm4, %v17087_v4 }
 0x2b0   : > { %16102 = vmatprep.subr.bf16.mxu0 %v17081_v0  ;;  %16111 = vmatprep.subr.bf16.mxu1 %v17081_v0 }
 0x2b1   : > { %14191 = vmatprep.mubr.msk.f32.mxu0 %vm17084_vm0, %v17085_v7  ;;  %14206 = vmatprep.mubr.msk.f32.mxu1 %vm17084_vm0, %v17085_v7  ;;  %v2690_v63 = vpop.f32.mrb[28].mxu0  ;;  %v2760_v8 = vpop.f32.mrb[28].mxu1 }
 0x2b2   : > { %v2691_v31 = vadd.f32 %v2690_v63, %v17862_v28  ;;  %v2761_v38 = vadd.f32 %v2760_v8, %v17862_v28  ;;  %v13689_v10 = vpop.f32.mrb[29].mxu0  ;;  %v13710_v27 = vpop.f32.mrb[29].mxu1 }
 0x2b3   : > { %16104 = vmatpush3.bf16.msk.msra.mxu0 %vm18247_vm7, %v17087_v4  ;;  %16113 = vmatpush3.bf16.msk.msra.mxu1 %vm18247_vm7, %v17087_v4 }
 0x2b4   : > { %16105 = vmatprep.subr.bf16.mxu0 %v17081_v0  ;;  %16114 = vmatprep.subr.bf16.mxu1 %v17081_v0  ;;  %v4052_v52 = vmax.f32 %v2691_v31, 0.0  ;;  %v4053_v32 = vmax.f32 %v2761_v38, 0.0 }
 0x2b6   : > { %v18377_v50 = vmax.f32 %v4052_v52, %v4053_v32 }
 0x2b7   : > { %16107 = vmatpush3.bf16.msk.msra.mxu0 %vm18269_vm10, %v17087_v4  ;;  %16116 = vmatpush3.bf16.msk.msra.mxu1 %vm18269_vm10, %v17087_v4 }
 0x2b8   : > { %16117 = vmatprep.subr.bf16.mxu0 %v17081_v0  ;;  %16126 = vmatprep.subr.bf16.mxu1 %v17081_v0 }
 0x2ba   : > { %14192 = vmatmul.mubr.msk.f32.vlgmr.msra.gmra.mrb[54].mxu0 %vm4143_vm11, %v18049_v37  ;;  %14207 = vmatmul.mubr.msk.f32.vlgmr.msra.gmra.mrb[54].mxu1 %vm4143_vm11, %v18077_v13 }
 0x2bb   : > { %16119 = vmatpush3.bf16.msk.msra.mxu0 %vm18216_vm4, %v17087_v4  ;;  %16128 = vmatpush3.bf16.msk.msra.mxu1 %vm18216_vm4, %v17087_v4 }
 0x2bc   : > { %16120 = vmatprep.subr.bf16.mxu0 %v17081_v0  ;;  %16129 = vmatprep.subr.bf16.mxu1 %v17081_v0 }
 0x2bd   : > { %14221 = vmatprep.mubr.msk.f32.mxu0 %vm17084_vm0, %v17085_v7  ;;  %14236 = vmatprep.mubr.msk.f32.mxu1 %vm17084_vm0, %v17085_v7 }
 0x2bf   : > { %16122 = vmatpush3.bf16.msk.msra.mxu0 %vm18247_vm7, %v17087_v4  ;;  %16131 = vmatpush3.bf16.msk.msra.mxu1 %vm18247_vm7, %v17087_v4 }
 0x2c0   : > { %16123 = vmatprep.subr.bf16.mxu0 %v17081_v0  ;;  %16132 = vmatprep.subr.bf16.mxu1 %v17081_v0 }
 0x2c3   : > { %16125 = vmatpush3.bf16.msk.msra.mxu0 %vm18269_vm10, %v17087_v4  ;;  %16134 = vmatpush3.bf16.msk.msra.mxu1 %vm18269_vm10, %v17087_v4 }
 0x2c4   : > { %16135 = vmatprep.subr.bf16.mxu0 %v17081_v0  ;;  %16144 = vmatprep.subr.bf16.mxu1 %v17081_v0  ;;  %v2830_v19 = vpop.f32.mrb[30].mxu0  ;;  %v2900_v61 = vpop.f32.mrb[30].mxu1 }
 0x2c5   : > { %v2831_v53 = vadd.f32 %v2830_v19, %v17862_v28  ;;  %v2901_v9 = vadd.f32 %v2900_v61, %v17862_v28  ;;  %v13731_v41 = vpop.f32.mrb[31].mxu0  ;;  %v13752_v35 = vpop.f32.mrb[31].mxu1 }
 0x2c6   : > { %14222 = vmatmul.mubr.msk.f32.vlgmr.msra.gmra.mrb[56].mxu0 %vm4143_vm11, %v18105_v60  ;;  %14237 = vmatmul.mubr.msk.f32.vlgmr.msra.gmra.mrb[56].mxu1 %vm4143_vm11, %v18133_v6 }
 0x2c7   : > { %16137 = vmatpush3.bf16.msk.msra.mxu0 %vm18216_vm4, %v17087_v4  ;;  %16146 = vmatpush3.bf16.msk.msra.mxu1 %vm18216_vm4, %v17087_v4  ;;  %v4054_v21 = vmax.f32 %v2831_v53, 0.0  ;;  %v4055_v12 = vmax.f32 %v2901_v9, 0.0 }
 0x2c8   : > { %16138 = vmatprep.subr.bf16.mxu0 %v17081_v0  ;;  %16147 = vmatprep.subr.bf16.mxu1 %v17081_v0 }
 0x2c9   : > { %v18433_v40 = vmax.f32 %v4054_v21, %v4055_v12  ;;  %14251 = vmatprep.mubr.msk.f32.mxu0 %vm17084_vm0, %v17085_v7  ;;  %14266 = vmatprep.mubr.msk.f32.mxu1 %vm17084_vm0, %v17085_v7 }
 0x2cb   : > { %16140 = vmatpush3.bf16.msk.msra.mxu0 %vm18247_vm7, %v17087_v4  ;;  %16149 = vmatpush3.bf16.msk.msra.mxu1 %vm18247_vm7, %v17087_v4 }
 0x2cc   : > { %16141 = vmatprep.subr.bf16.mxu0 %v17081_v0  ;;  %16150 = vmatprep.subr.bf16.mxu1 %v17081_v0 }
 0x2cf   : > { %16143 = vmatpush3.bf16.msk.msra.mxu0 %vm18269_vm10, %v17087_v4  ;;  %16152 = vmatpush3.bf16.msk.msra.mxu1 %vm18269_vm10, %v17087_v4 }
 0x2d0   : > { %16153 = vmatprep.subr.bf16.mxu0 %v17081_v0  ;;  %16162 = vmatprep.subr.bf16.mxu1 %v17081_v0 }
 0x2d2   : > { %14252 = vmatmul.mubr.msk.f32.vlgmr.msra.gmra.mrb[58].mxu0 %vm4143_vm11, %v18161_v34  ;;  %14267 = vmatmul.mubr.msk.f32.vlgmr.msra.gmra.mrb[58].mxu1 %vm4143_vm11, %v18189_v20 }
 0x2d3   : > { %16155 = vmatpush3.bf16.msk.msra.mxu0 %vm18216_vm4, %v17087_v4  ;;  %16164 = vmatpush3.bf16.msk.msra.mxu1 %vm18216_vm4, %v17087_v4 }
 0x2d4   : > { %16156 = vmatprep.subr.bf16.mxu0 %v17081_v0  ;;  %16165 = vmatprep.subr.bf16.mxu1 %v17081_v0 }
 0x2d5   : > { %14281 = vmatprep.mubr.msk.f32.mxu0 %vm17084_vm0, %v17085_v7  ;;  %14296 = vmatprep.mubr.msk.f32.mxu1 %vm17084_vm0, %v17085_v7 }
 0x2d7   : > { %16158 = vmatpush3.bf16.msk.msra.mxu0 %vm18247_vm7, %v17087_v4  ;;  %16167 = vmatpush3.bf16.msk.msra.mxu1 %vm18247_vm7, %v17087_v4  ;;  %v2970_v22 = vpop.f32.mrb[32].mxu0  ;;  %v3040_v1 = vpop.f32.mrb[32].mxu1 }
 0x2d8   : > { %16159 = vmatprep.subr.bf16.mxu0 %v17081_v0  ;;  %16168 = vmatprep.subr.bf16.mxu1 %v17081_v0  ;;  %v2971_v49 = vadd.f32 %v2970_v22, %v17862_v28  ;;  %v3041_v54 = vadd.f32 %v3040_v1, %v17862_v28  ;;  %v13773_v23 = vpop.f32.mrb[33].mxu0  ;;  %v13794_v55 = vpop.f32.mrb[33].mxu1 }
 0x2da   : > { %v4056_v44 = vmax.f32 %v2971_v49, 0.0  ;;  %v4057_v39 = vmax.f32 %v3041_v54, 0.0 }
 0x2db   : > { %16161 = vmatpush3.bf16.msk.msra.mxu0 %vm18269_vm10, %v17087_v4  ;;  %16170 = vmatpush3.bf16.msk.msra.mxu1 %vm18269_vm10, %v17087_v4 }
 0x2dc   : > { %16171 = vmatprep.subr.bf16.mxu0 %v17081_v0  ;;  %16180 = vmatprep.subr.bf16.mxu1 %v17081_v0  ;;  %v18489_v56 = vmax.f32 %v4056_v44, %v4057_v39 }
 0x2de   : > { %14282 = vmatmul.mubr.msk.f32.vlgmr.msra.gmra.mrb[60].mxu0 %vm4143_vm11, %v18273_v58  ;;  %14297 = vmatmul.mubr.msk.f32.vlgmr.msra.gmra.mrb[60].mxu1 %vm4143_vm11, %v18327_v18 }
 0x2df   : > { %16173 = vmatpush3.bf16.msk.msra.mxu0 %vm18216_vm4, %v17087_v4  ;;  %16182 = vmatpush3.bf16.msk.msra.mxu1 %vm18216_vm4, %v17087_v4 }
 0x2e0   : > { %16174 = vmatprep.subr.bf16.mxu0 %v17081_v0  ;;  %16183 = vmatprep.subr.bf16.mxu1 %v17081_v0 }
 0x2e1   : > { %14311 = vmatprep.mubr.msk.f32.mxu0 %vm17084_vm0, %v17085_v7  ;;  %14326 = vmatprep.mubr.msk.f32.mxu1 %vm17084_vm0, %v17085_v7 }
 0x2e3   : > { %16176 = vmatpush3.bf16.msk.msra.mxu0 %vm18247_vm7, %v17087_v4  ;;  %16185 = vmatpush3.bf16.msk.msra.mxu1 %vm18247_vm7, %v17087_v4 }
 0x2e4   : > { %16177 = vmatprep.subr.bf16.mxu0 %v17081_v0  ;;  %16186 = vmatprep.subr.bf16.mxu1 %v17081_v0 }
 0x2e7   : > { %16179 = vmatpush3.bf16.msk.msra.mxu0 %vm18269_vm10, %v17087_v4  ;;  %16188 = vmatpush3.bf16.msk.msra.mxu1 %vm18269_vm10, %v17087_v4 }
 0x2e8   : > { %16189 = vmatprep.subr.bf16.mxu0 %v17081_v0  ;;  %16198 = vmatprep.subr.bf16.mxu1 %v17081_v0 }
 0x2ea   : > { %14312 = vmatmul.mubr.msk.f32.vlgmr.msra.gmra.mrb[62].mxu0 %vm4143_vm11, %v18377_v50  ;;  %14327 = vmatmul.mubr.msk.f32.vlgmr.msra.gmra.mrb[62].mxu1 %vm4143_vm11, %v18433_v40  ;;  %v3110_v59 = vpop.f32.mrb[34].mxu0  ;;  %v3180_v43 = vpop.f32.mrb[34].mxu1 }
 0x2eb   : > { %16191 = vmatpush3.bf16.msk.msra.mxu0 %vm18216_vm4, %v17087_v4  ;;  %16200 = vmatpush3.bf16.msk.msra.mxu1 %vm18216_vm4, %v17087_v4  ;;  %v3111_v57 = vadd.f32 %v3110_v59, %v17862_v28  ;;  %v3181_v62 = vadd.f32 %v3180_v43, %v17862_v28  ;;  %v13815_v11 = vpop.f32.mrb[35].mxu0  ;;  %v13836_v47 = vpop.f32.mrb[35].mxu1 }
 0x2ec   : > { %16192 = vmatprep.subr.bf16.mxu0 %v17081_v0  ;;  %16201 = vmatprep.subr.bf16.mxu1 %v17081_v0 }
 0x2ed   : > { %v4058_v26 = vmax.f32 %v3111_v57, 0.0  ;;  %v4059_v29 = vmax.f32 %v3181_v62, 0.0  ;;  %14341 = vmatprep.mubr.msk.f32.mxu0 %vm17084_vm0, %v17085_v7  ;;  %14356 = vmatprep.mubr.msk.f32.mxu1 %vm17084_vm0, %v17085_v7 }
 0x2ef   : > { %16194 = vmatpush3.bf16.msk.msra.mxu0 %vm18247_vm7, %v17087_v4  ;;  %v18544_v33 = vmax.f32 %v4058_v26, %v4059_v29  ;;  %16203 = vmatpush3.bf16.msk.msra.mxu1 %vm18247_vm7, %v17087_v4 }
 0x2f0   : > { %16195 = vmatprep.subr.bf16.mxu0 %v17081_v0  ;;  %16204 = vmatprep.subr.bf16.mxu1 %v17081_v0 }
 0x2f3   : > { %16197 = vmatpush3.bf16.msk.msra.mxu0 %vm18269_vm10, %v17087_v4  ;;  %16206 = vmatpush3.bf16.msk.msra.mxu1 %vm18269_vm10, %v17087_v4 }
 0x2f4   : > { %16207 = vmatprep.subr.bf16.mxu0 %v17081_v0  ;;  %16216 = vmatprep.subr.bf16.mxu1 %v17081_v0 }
 0x2f6   : > { %14342 = vmatmul.mubr.msk.f32.vlgmr.msra.gmra.mrb[64].mxu0 %vm4143_vm11, %v18489_v56  ;;  %14357 = vmatmul.mubr.msk.f32.vlgmr.msra.gmra.mrb[64].mxu1 %vm4143_vm11, %v18544_v33 }
 0x2f7   : > { %16209 = vmatpush3.bf16.msk.msra.mxu0 %vm18216_vm4, %v17087_v4  ;;  %14371 = vmatprep.mubr.msk.f32.mxu0 %vm17084_vm0, %v17085_v7 }
 0x2f8   : > { %16210 = vmatprep.subr.bf16.mxu0 %v17081_v0  ;;  %16218 = vmatpush3.bf16.msk.msra.mxu1 %vm18216_vm4, %v17087_v4 }
 0x2f9   : > { %16219 = vmatprep.subr.bf16.mxu1 %v17081_v0  ;;  %14386 = vmatprep.mubr.msk.f32.mxu1 %vm17084_vm0, %v17085_v7 }
 0x2fb   : > { %16212 = vmatpush3.bf16.msk.msra.mxu0 %vm18247_vm7, %v17087_v4 }
 0x2fc   : > { %16213 = vmatprep.subr.bf16.mxu0 %v17081_v0  ;;  %16221 = vmatpush3.bf16.msk.msra.mxu1 %vm18247_vm7, %v17087_v4 }
 0x2fd   : > { %v3250_v63 = vpop.f32.mrb[36].mxu0  ;;  %v3320_v8 = vpop.f32.mrb[36].mxu1  ;;  %16222 = vmatprep.subr.bf16.mxu1 %v17081_v0 }
 0x2fe   : > { %v3251_v31 = vadd.f32 %v3250_v63, %v17862_v28  ;;  %v3321_v38 = vadd.f32 %v3320_v8, %v17862_v28  ;;  %v13857_v10 = vpop.f32.mrb[37].mxu0  ;;  %v13878_v27 = vpop.f32.mrb[37].mxu1 }
 0x2ff   : > { %16215 = vmatpush3.bf16.msk.msra.mxu0 %vm18269_vm10, %v17087_v4  ;;  %v18671_v10 = vadd.s32 1, %v18201_v51 }
 0x300   : > { %v4060_v52 = vmax.f32 %v3251_v31, 0.0  ;;  %v4061_v32 = vmax.f32 %v3321_v38, 0.0  ;;  %16224 = vmatpush3.bf16.msk.msra.mxu1 %vm18269_vm10, %v17087_v4  ;;  %16225 = vmatprep.subr.bf16.mxu0 %v17081_v0 }
 0x301   : > { %16234 = vmatprep.subr.bf16.mxu1 %v17081_v0  ;;  %vm4125_vm12 = vcmp.eq.s32.totalorder %v18191_v42, %v18671_v10  ;;  %vm4126_vm13 = vcmp.eq.s32.totalorder %v18199_v46, %v18671_v10  ;;  %vm4127_vm15 = vcmp.eq.s32.totalorder %v18211_v25, %v18671_v10  ;;  %vm4128_vm2 = vcmp.eq.s32.totalorder %v18214_v36, %v18671_v10 }
 0x302   : > { %v18593_v19 = vmax.f32 %v4060_v52, %v4061_v32  ;;  %vm18682_vm14 = vmpackc.low %vm4126_vm13, %vm4125_vm12  ;;  %vm4129_vm6 = vcmp.eq.s32.totalorder %v18229_v3, %v18671_v10 }
 0x303   : > { %vm18701_vm3 = vmpackc.low %vm4128_vm2, %vm4127_vm15 }
 0x304   : > { %14372 = vmatmul.mubr.msk.f32.vlgmr.msra.gmra.mrb[66].mxu0 %vm4143_vm11, %v18593_v19 }
 0x305   : > { %16227 = vmatpush3.bf16.msk.msra.mxu0 %vm18216_vm4, %v17087_v4  ;;  %14401 = vmatprep.mubr.msk.f32.mxu0 %vm17084_vm0, %v17085_v7 }
 0x306   : > { %16228 = vmatprep.subr.bf16.mxu0 %v17081_v0 }
 0x309   : > { %16230 = vmatpush3.bf16.msk.msra.mxu0 %vm18247_vm7, %v17087_v4 }
 0x30a   : > { %16231 = vmatprep.subr.bf16.mxu0 %v17081_v0 }
 0x30d   : > { %16233 = vmatpush3.bf16.msk.msra.mxu0 %vm18269_vm10, %v17087_v4 }
 0x30e   : > { %16243 = vmatprep.subr.bf16.mxu0 %v17081_v0 }
 0x310   : > { %v3390_v61 = vpop.f32.mrb[38].mxu0  ;;  %v3460_v53 = vpop.f32.mrb[38].mxu1 }
 0x311   : > { %v3391_v9 = vadd.f32 %v3390_v61, %v17862_v28  ;;  %v3461_v41 = vadd.f32 %v3460_v53, %v17862_v28  ;;  %v13899_v35 = vpop.f32.mrb[39].mxu0  ;;  %v13920_v21 = vpop.f32.mrb[39].mxu1 }
 0x313   : > { %v4062_v12 = vmax.f32 %v3391_v9, 0.0  ;;  %v4063_v22 = vmax.f32 %v3461_v41, 0.0 }
 0x315   : > { %v18613_v1 = vmax.f32 %v4062_v12, %v4063_v22 }
 0x317   : > { %14387 = vmatmul.mubr.msk.f32.vlgmr.msra.gmra.mrb[66].mxu1 %vm4143_vm11, %v18613_v1 }
 0x318   : > { %16236 = vmatpush3.bf16.msk.msra.mxu1 %vm18216_vm4, %v17087_v4  ;;  %14416 = vmatprep.mubr.msk.f32.mxu1 %vm17084_vm0, %v17085_v7 }
 0x319   : > { %16237 = vmatprep.subr.bf16.mxu1 %v17081_v0 }
 0x31c   : > { %16239 = vmatpush3.bf16.msk.msra.mxu1 %vm18247_vm7, %v17087_v4 }
 0x31d   : > { %16240 = vmatprep.subr.bf16.mxu1 %v17081_v0 }
 0x320   : > { %16242 = vmatpush3.bf16.msk.msra.mxu1 %vm18269_vm10, %v17087_v4 }
 0x321   : > { %16252 = vmatprep.subr.bf16.mxu1 %v17081_v0 }
 0x323   : > { %v3530_v49 = vpop.f32.mrb[40].mxu0  ;;  %v3600_v54 = vpop.f32.mrb[40].mxu1 }
 0x324   : > { %v3531_v23 = vadd.f32 %v3530_v49, %v17862_v28  ;;  %v3601_v55 = vadd.f32 %v3600_v54, %v17862_v28  ;;  %v13941_v44 = vpop.f32.mrb[41].mxu0  ;;  %v13962_v39 = vpop.f32.mrb[41].mxu1 }
 0x326   : > { %v4064_v59 = vmax.f32 %v3531_v23, 0.0  ;;  %v4065_v43 = vmax.f32 %v3601_v55, 0.0 }
 0x328   : > { %v18633_v57 = vmax.f32 %v4064_v59, %v4065_v43 }
 0x32a   : > { %14402 = vmatmul.mubr.msk.f32.vlgmr.msra.gmra.mrb[68].mxu0 %vm4143_vm11, %v18633_v57 }
 0x32b   : > { %16245 = vmatpush3.bf16.msk.msra.mxu0 %vm18216_vm4, %v17087_v4  ;;  %14431 = vmatprep.mubr.msk.f32.mxu0 %vm17084_vm0, %v17085_v7 }
 0x32c   : > { %16246 = vmatprep.subr.bf16.mxu0 %v17081_v0 }
 0x32f   : > { %16248 = vmatpush3.bf16.msk.msra.mxu0 %vm18247_vm7, %v17087_v4 }
 0x330   : > { %16249 = vmatprep.subr.bf16.mxu0 %v17081_v0 }
 0x333   : > { %16251 = vmatpush3.bf16.msk.msra.mxu0 %vm18269_vm10, %v17087_v4 }
 0x334   : > { %16261 = vmatprep.subr.bf16.mxu0 %v17081_v0 }
 0x336   : > { %v3670_v62 = vpop.f32.mrb[42].mxu0  ;;  %v3740_v11 = vpop.f32.mrb[42].mxu1 }
 0x337   : > { %v3671_v47 = vadd.f32 %v3670_v62, %v17862_v28  ;;  %v3741_v26 = vadd.f32 %v3740_v11, %v17862_v28  ;;  %v13983_v29 = vpop.f32.mrb[43].mxu0  ;;  %v14004_v63 = vpop.f32.mrb[43].mxu1 }
 0x339   : > { %v4066_v8 = vmax.f32 %v3671_v47, 0.0  ;;  %v4067_v31 = vmax.f32 %v3741_v26, 0.0 }
 0x33b   : > { %v18653_v38 = vmax.f32 %v4066_v8, %v4067_v31 }
 0x33d   : > { %14417 = vmatmul.mubr.msk.f32.vlgmr.msra.gmra.mrb[68].mxu1 %vm4143_vm11, %v18653_v38 }
 0x33e   : > { %16254 = vmatpush3.bf16.msk.msra.mxu1 %vm18216_vm4, %v17087_v4  ;;  %14446 = vmatprep.mubr.msk.f32.mxu1 %vm17084_vm0, %v17085_v7 }
 0x33f   : > { %16255 = vmatprep.subr.bf16.mxu1 %v17081_v0 }
 0x342   : > { %16257 = vmatpush3.bf16.msk.msra.mxu1 %vm18247_vm7, %v17087_v4  ;;  %vm4130_vm7 = vcmp.eq.s32.totalorder %v18232_v15, %v18671_v10 }
 0x343   : > { %16258 = vmatprep.subr.bf16.mxu1 %v17081_v0  ;;  %vm18713_vm8 = vmpackc.low %vm4130_vm7, %vm4129_vm6 }
 0x346   : > { %16260 = vmatpush3.bf16.msk.msra.mxu1 %vm18269_vm10, %v17087_v4 }
 0x347   : > { %16270 = vmatprep.subr.bf16.mxu1 %v17081_v0 }
 0x349   : > { %v3810_v27 = vpop.f32.mrb[44].mxu0  ;;  %v3880_v52 = vpop.f32.mrb[44].mxu1 }
 0x34a   : > { %v3811_v32 = vadd.f32 %v3810_v27, %v17862_v28  ;;  %v3881_v61 = vadd.f32 %v3880_v52, %v17862_v28  ;;  %v14025_v53 = vpop.f32.mrb[45].mxu0  ;;  %v14046_v2 = vpop.f32.mrb[45].mxu1 }
 0x34c   : > { %v4068_v16 = vmax.f32 %v3811_v32, 0.0  ;;  %v4069_v9 = vmax.f32 %v3881_v61, 0.0 }
 0x34e   : > { %v18680_v41 = vmax.f32 %v4068_v16, %v4069_v9 }
 0x350   : > { %14432 = vmatmul.mubr.msk.f32.vlgmr.msra.gmra.mrb[70].mxu0 %vm4143_vm11, %v18680_v41 }
 0x351   : > { %16263 = vmatpush3.bf16.msk.msra.mxu0 %vm18682_vm14, %v17087_v4  ;;  %14461 = vmatprep.mubr.msk.f32.mxu0 %vm17084_vm0, %v17085_v7 }
 0x352   : > { %16264 = vmatprep.subr.bf16.mxu0 %v17081_v0 }
 0x355   : > { %16266 = vmatpush3.bf16.msk.msra.mxu0 %vm18701_vm3, %v17087_v4 }
 0x356   : > { %16267 = vmatprep.subr.bf16.mxu0 %v17081_v0 }
 0x359   : > { %16269 = vmatpush3.bf16.msk.msra.mxu0 %vm18713_vm8, %v17087_v4 }
 0x35a   : > { %16279 = vmatprep.subr.bf16.mxu0 %v17081_v0 }
 0x35c   : > { %v3950_v36 = vpop.f32.mrb[46].mxu0  ;;  %v4020_v3 = vpop.f32.mrb[46].mxu1  ;;  %14462 = vmatmul.mubr.msk.f32.vlgmr.msra.gmra.mrb[72].mxu0 %vm4143_vm11, %v17879_v14 }
 0x35d   : > { %v3951_v15 = vadd.f32 %v3950_v36, %v17862_v28  ;;  %v4021_v21 = vadd.f32 %v4020_v3, %v17862_v28  ;;  %v14067_v12 = vpop.f32.mrb[47].mxu0  ;;  %v14088_v22 = vpop.f32.mrb[47].mxu1  ;;  %16281 = vmatpush3.bf16.msk.msra.mxu0 %vm18682_vm14, %v17087_v4  ;;  %14491 = vmatprep.mubr.msk.f32.mxu0 %vm17084_vm0, %v17085_v7 }
 0x35e   : > { %16282 = vmatprep.subr.bf16.mxu0 %v17081_v0 }
 0x35f   : > { %v4070_v49 = vmax.f32 %v3951_v15, 0.0  ;;  %v4071_v54 = vmax.f32 %v4021_v21, 0.0 }
 0x361   : > { %v18731_v23 = vmax.f32 %v4070_v49, %v4071_v54  ;;  %16284 = vmatpush3.bf16.msk.msra.mxu0 %vm18701_vm3, %v17087_v4 }
 0x362   : > { %16285 = vmatprep.subr.bf16.mxu0 %v17081_v0 }
 0x363   : > { %14447 = vmatmul.mubr.msk.f32.vlgmr.msra.gmra.mrb[70].mxu1 %vm4143_vm11, %v18731_v23 }
 0x364   : > { %16272 = vmatpush3.bf16.msk.msra.mxu1 %vm18682_vm14, %v17087_v4  ;;  %14476 = vmatprep.mubr.msk.f32.mxu1 %vm17084_vm0, %v17085_v7 }
 0x365   : > { %16287 = vmatpush3.bf16.msk.msra.mxu0 %vm18713_vm8, %v17087_v4  ;;  %16273 = vmatprep.subr.bf16.mxu1 %v17081_v0 }
 0x366   : > { %16297 = vmatprep.subr.bf16.mxu0 %v17081_v0 }
 0x368   : > { %16275 = vmatpush3.bf16.msk.msra.mxu1 %vm18701_vm3, %v17087_v4  ;;  %14492 = vmatmul.mubr.msk.f32.vlgmr.msra.gmra.mrb[74].mxu0 %vm4143_vm11, %v17937_v48 }
 0x369   : > { %v18754_v28 = vpop.f32.mrb[48].mxu0  ;;  %v18756_v14 = vpop.f32.mrb[48].mxu1  ;;  %16299 = vmatpush3.bf16.msk.msra.mxu0 %vm18682_vm14, %v17087_v4  ;;  %16276 = vmatprep.subr.bf16.mxu1 %v17081_v0 }
 0x36a   : > { %v14103_v55 = vpop.f32.mrb[49].mxu0  ;;  %v14118_v44 = vpop.f32.mrb[49].mxu1  ;;  %16300 = vmatprep.subr.bf16.mxu0 %v17081_v0  ;;  %14521 = vmatprep.mubr.msk.f32.mxu0 %vm17084_vm0, %v17085_v7 }
 0x36c   : > { %16278 = vmatpush3.bf16.msk.msra.mxu1 %vm18713_vm8, %v17087_v4 }
 0x36d   : > { %16302 = vmatpush3.bf16.msk.msra.mxu0 %vm18701_vm3, %v17087_v4  ;;  %16288 = vmatprep.subr.bf16.mxu1 %v17081_v0 }
 0x36e   : > { %16303 = vmatprep.subr.bf16.mxu0 %v17081_v0 }
 0x36f   : > { %14477 = vmatmul.mubr.msk.f32.vlgmr.msra.gmra.mrb[72].mxu1 %vm4143_vm11, %v17907_v5 }
 0x370   : > { %16290 = vmatpush3.bf16.msk.msra.mxu1 %vm18682_vm14, %v17087_v4  ;;  %14506 = vmatprep.mubr.msk.f32.mxu1 %vm17084_vm0, %v17085_v7 }
 0x371   : > { %16305 = vmatpush3.bf16.msk.msra.mxu0 %vm18713_vm8, %v17087_v4  ;;  %16291 = vmatprep.subr.bf16.mxu1 %v17081_v0 }
 0x372   : > { %16315 = vmatprep.subr.bf16.mxu0 %v17081_v0 }
 0x374   : > { %16293 = vmatpush3.bf16.msk.msra.mxu1 %vm18701_vm3, %v17087_v4  ;;  %14522 = vmatmul.mubr.msk.f32.vlgmr.msra.gmra.mrb[76].mxu0 %vm4143_vm11, %v17993_v45 }
 0x375   : > { %v18790_v5 = vpop.f32.mrb[50].mxu0  ;;  %v18792_v48 = vpop.f32.mrb[50].mxu1  ;;  %16317 = vmatpush3.bf16.msk.msra.mxu0 %vm18682_vm14, %v17087_v4  ;;  %16294 = vmatprep.subr.bf16.mxu1 %v17081_v0 }
 0x376   : > { %v14133_v39 = vpop.f32.mrb[51].mxu0  ;;  %v14148_v59 = vpop.f32.mrb[51].mxu1  ;;  %16318 = vmatprep.subr.bf16.mxu0 %v17081_v0  ;;  %14551 = vmatprep.mubr.msk.f32.mxu0 %vm17084_vm0, %v17085_v7 }
 0x377   : > { %v19161_v59 = vld [vmem:[#allocation4] sm:$0xff] }
 0x378   : > { %16296 = vmatpush3.bf16.msk.msra.mxu1 %vm18713_vm8, %v17087_v4 }
 0x379   : > { %16320 = vmatpush3.bf16.msk.msra.mxu0 %vm18701_vm3, %v17087_v4  ;;  %16306 = vmatprep.subr.bf16.mxu1 %v17081_v0 }
 0x37a   : > { %16321 = vmatprep.subr.bf16.mxu0 %v17081_v0 }
 0x37b   : > { %14507 = vmatmul.mubr.msk.f32.vlgmr.msra.gmra.mrb[74].mxu1 %vm4143_vm11, %v17965_v17 }
 0x37c   : > { %16308 = vmatpush3.bf16.msk.msra.mxu1 %vm18682_vm14, %v17087_v4  ;;  %14536 = vmatprep.mubr.msk.f32.mxu1 %vm17084_vm0, %v17085_v7 }
 0x37d   : > { %16323 = vmatpush3.bf16.msk.msra.mxu0 %vm18713_vm8, %v17087_v4  ;;  %16309 = vmatprep.subr.bf16.mxu1 %v17081_v0 }
 0x37e   : > { %16333 = vmatprep.subr.bf16.mxu0 %v17081_v0 }
 0x380   : > { %16311 = vmatpush3.bf16.msk.msra.mxu1 %vm18701_vm3, %v17087_v4  ;;  %14552 = vmatmul.mubr.msk.f32.vlgmr.msra.gmra.mrb[78].mxu0 %vm4143_vm11, %v18049_v37 }
 0x381   : > { %v18826_v17 = vpop.f32.mrb[52].mxu0  ;;  %v18828_v45 = vpop.f32.mrb[52].mxu1  ;;  %16335 = vmatpush3.bf16.msk.msra.mxu0 %vm18682_vm14, %v17087_v4  ;;  %16312 = vmatprep.subr.bf16.mxu1 %v17081_v0 }
 0x382   : > { %v14163_v43 = vpop.f32.mrb[53].mxu0  ;;  %v14178_v62 = vpop.f32.mrb[53].mxu1  ;;  %16336 = vmatprep.subr.bf16.mxu0 %v17081_v0  ;;  %14581 = vmatprep.mubr.msk.f32.mxu0 %vm17084_vm0, %v17085_v7 }
 0x384   : > { %16314 = vmatpush3.bf16.msk.msra.mxu1 %vm18713_vm8, %v17087_v4 }
 0x385   : > { %16338 = vmatpush3.bf16.msk.msra.mxu0 %vm18701_vm3, %v17087_v4  ;;  %16324 = vmatprep.subr.bf16.mxu1 %v17081_v0 }
 0x386   : > { %16339 = vmatprep.subr.bf16.mxu0 %v17081_v0 }
 0x387   : > { %14537 = vmatmul.mubr.msk.f32.vlgmr.msra.gmra.mrb[76].mxu1 %vm4143_vm11, %v18021_v24 }
 0x388   : > { %16326 = vmatpush3.bf16.msk.msra.mxu1 %vm18682_vm14, %v17087_v4  ;;  %14566 = vmatprep.mubr.msk.f32.mxu1 %vm17084_vm0, %v17085_v7 }
 0x389   : > { %16341 = vmatpush3.bf16.msk.msra.mxu0 %vm18713_vm8, %v17087_v4  ;;  %16327 = vmatprep.subr.bf16.mxu1 %v17081_v0 }
 0x38a   : > { %16351 = vmatprep.subr.bf16.mxu0 %v17081_v0 }
 0x38c   : > { %16329 = vmatpush3.bf16.msk.msra.mxu1 %vm18701_vm3, %v17087_v4  ;;  %14582 = vmatmul.mubr.msk.f32.vlgmr.msra.gmra.mrb[80].mxu0 %vm4143_vm11, %v18105_v60 }
 0x38d   : > { %v18862_v24 = vpop.f32.mrb[54].mxu0  ;;  %v18864_v37 = vpop.f32.mrb[54].mxu1  ;;  %16353 = vmatpush3.bf16.msk.msra.mxu0 %vm18682_vm14, %v17087_v4  ;;  %16330 = vmatprep.subr.bf16.mxu1 %v17081_v0 }
 0x38e   : > { %v14193_v11 = vpop.f32.mrb[55].mxu0  ;;  %v14208_v47 = vpop.f32.mrb[55].mxu1  ;;  %16354 = vmatprep.subr.bf16.mxu0 %v17081_v0  ;;  %14611 = vmatprep.mubr.msk.f32.mxu0 %vm17084_vm0, %v17085_v7 }
 0x390   : > { %16332 = vmatpush3.bf16.msk.msra.mxu1 %vm18713_vm8, %v17087_v4 }
 0x391   : > { %16356 = vmatpush3.bf16.msk.msra.mxu0 %vm18701_vm3, %v17087_v4  ;;  %16342 = vmatprep.subr.bf16.mxu1 %v17081_v0 }
 0x392   : > { %16357 = vmatprep.subr.bf16.mxu0 %v17081_v0 }
 0x393   : > { %14567 = vmatmul.mubr.msk.f32.vlgmr.msra.gmra.mrb[78].mxu1 %vm4143_vm11, %v18077_v13 }
 0x394   : > { %16344 = vmatpush3.bf16.msk.msra.mxu1 %vm18682_vm14, %v17087_v4  ;;  %14596 = vmatprep.mubr.msk.f32.mxu1 %vm17084_vm0, %v17085_v7 }
 0x395   : > { %16359 = vmatpush3.bf16.msk.msra.mxu0 %vm18713_vm8, %v17087_v4  ;;  %16345 = vmatprep.subr.bf16.mxu1 %v17081_v0 }
 0x396   : > { %16369 = vmatprep.subr.bf16.mxu0 %v17081_v0 }
 0x398   : > { %16347 = vmatpush3.bf16.msk.msra.mxu1 %vm18701_vm3, %v17087_v4  ;;  %14612 = vmatmul.mubr.msk.f32.vlgmr.msra.gmra.mrb[82].mxu0 %vm4143_vm11, %v18161_v34 }
 0x399   : > { %v18898_v13 = vpop.f32.mrb[56].mxu0  ;;  %v18900_v60 = vpop.f32.mrb[56].mxu1  ;;  %16371 = vmatpush3.bf16.msk.msra.mxu0 %vm18682_vm14, %v17087_v4  ;;  %16348 = vmatprep.subr.bf16.mxu1 %v17081_v0 }
 0x39a   : > { %v14223_v26 = vpop.f32.mrb[57].mxu0  ;;  %v14238_v29 = vpop.f32.mrb[57].mxu1  ;;  %16372 = vmatprep.subr.bf16.mxu0 %v17081_v0  ;;  %14641 = vmatprep.mubr.msk.f32.mxu0 %vm17084_vm0, %v17085_v7 }
 0x39c   : > { %16350 = vmatpush3.bf16.msk.msra.mxu1 %vm18713_vm8, %v17087_v4 }
 0x39d   : > { %16374 = vmatpush3.bf16.msk.msra.mxu0 %vm18701_vm3, %v17087_v4  ;;  %16360 = vmatprep.subr.bf16.mxu1 %v17081_v0 }
 0x39e   : > { %16375 = vmatprep.subr.bf16.mxu0 %v17081_v0 }
 0x39f   : > { %14597 = vmatmul.mubr.msk.f32.vlgmr.msra.gmra.mrb[80].mxu1 %vm4143_vm11, %v18133_v6 }
 0x3a0   : > { %16362 = vmatpush3.bf16.msk.msra.mxu1 %vm18682_vm14, %v17087_v4  ;;  %14626 = vmatprep.mubr.msk.f32.mxu1 %vm17084_vm0, %v17085_v7 }
 0x3a1   : > { %16377 = vmatpush3.bf16.msk.msra.mxu0 %vm18713_vm8, %v17087_v4  ;;  %16363 = vmatprep.subr.bf16.mxu1 %v17081_v0 }
 0x3a2   : > { %16387 = vmatprep.subr.bf16.mxu0 %v17081_v0 }
 0x3a4   : > { %16365 = vmatpush3.bf16.msk.msra.mxu1 %vm18701_vm3, %v17087_v4  ;;  %14642 = vmatmul.mubr.msk.f32.vlgmr.msra.gmra.mrb[84].mxu0 %vm4143_vm11, %v18273_v58 }
 0x3a5   : > { %v18934_v6 = vpop.f32.mrb[58].mxu0  ;;  %v18936_v34 = vpop.f32.mrb[58].mxu1  ;;  %16389 = vmatpush3.bf16.msk.msra.mxu0 %vm18682_vm14, %v17087_v4  ;;  %16366 = vmatprep.subr.bf16.mxu1 %v17081_v0 }
 0x3a6   : > { %v14253_v63 = vpop.f32.mrb[59].mxu0  ;;  %v14268_v8 = vpop.f32.mrb[59].mxu1  ;;  %16390 = vmatprep.subr.bf16.mxu0 %v17081_v0  ;;  %14671 = vmatprep.mubr.msk.f32.mxu0 %vm17084_vm0, %v17085_v7 }
 0x3a8   : > { %16368 = vmatpush3.bf16.msk.msra.mxu1 %vm18713_vm8, %v17087_v4 }
 0x3a9   : > { %16392 = vmatpush3.bf16.msk.msra.mxu0 %vm18701_vm3, %v17087_v4  ;;  %16378 = vmatprep.subr.bf16.mxu1 %v17081_v0 }
 0x3aa   : > { %16393 = vmatprep.subr.bf16.mxu0 %v17081_v0 }
 0x3ab   : > { %14627 = vmatmul.mubr.msk.f32.vlgmr.msra.gmra.mrb[82].mxu1 %vm4143_vm11, %v18189_v20 }
 0x3ac   : > { %16380 = vmatpush3.bf16.msk.msra.mxu1 %vm18682_vm14, %v17087_v4  ;;  %14656 = vmatprep.mubr.msk.f32.mxu1 %vm17084_vm0, %v17085_v7 }
 0x3ad   : > { %16395 = vmatpush3.bf16.msk.msra.mxu0 %vm18713_vm8, %v17087_v4  ;;  %16381 = vmatprep.subr.bf16.mxu1 %v17081_v0 }
 0x3ae   : > { %16405 = vmatprep.subr.bf16.mxu0 %v17081_v0 }
 0x3b0   : > { %16383 = vmatpush3.bf16.msk.msra.mxu1 %vm18701_vm3, %v17087_v4  ;;  %14672 = vmatmul.mubr.msk.f32.vlgmr.msra.gmra.mrb[86].mxu0 %vm4143_vm11, %v18377_v50 }
 0x3b1   : > { %v18970_v20 = vpop.f32.mrb[60].mxu0  ;;  %v18972_v58 = vpop.f32.mrb[60].mxu1  ;;  %16407 = vmatpush3.bf16.msk.msra.mxu0 %vm18682_vm14, %v17087_v4  ;;  %16384 = vmatprep.subr.bf16.mxu1 %v17081_v0 }
 0x3b2   : > { %v14283_v31 = vpop.f32.mrb[61].mxu0  ;;  %v14298_v27 = vpop.f32.mrb[61].mxu1  ;;  %16408 = vmatprep.subr.bf16.mxu0 %v17081_v0  ;;  %14701 = vmatprep.mubr.msk.f32.mxu0 %vm17084_vm0, %v17085_v7 }
 0x3b4   : > { %16386 = vmatpush3.bf16.msk.msra.mxu1 %vm18713_vm8, %v17087_v4 }
 0x3b5   : > { %16410 = vmatpush3.bf16.msk.msra.mxu0 %vm18701_vm3, %v17087_v4  ;;  %16396 = vmatprep.subr.bf16.mxu1 %v17081_v0 }
 0x3b6   : > { %16411 = vmatprep.subr.bf16.mxu0 %v17081_v0 }
 0x3b7   : > { %14657 = vmatmul.mubr.msk.f32.vlgmr.msra.gmra.mrb[84].mxu1 %vm4143_vm11, %v18327_v18 }
 0x3b8   : > { %16398 = vmatpush3.bf16.msk.msra.mxu1 %vm18682_vm14, %v17087_v4  ;;  %14686 = vmatprep.mubr.msk.f32.mxu1 %vm17084_vm0, %v17085_v7 }
 0x3b9   : > { %16413 = vmatpush3.bf16.msk.msra.mxu0 %vm18713_vm8, %v17087_v4  ;;  %16399 = vmatprep.subr.bf16.mxu1 %v17081_v0 }
 0x3ba   : > { %16423 = vmatprep.subr.bf16.mxu0 %v17081_v0 }
 0x3bc   : > { %16401 = vmatpush3.bf16.msk.msra.mxu1 %vm18701_vm3, %v17087_v4  ;;  %14702 = vmatmul.mubr.msk.f32.vlgmr.msra.gmra.mrb[88].mxu0 %vm4143_vm11, %v18489_v56 }
 0x3bd   : > { %v19006_v18 = vpop.f32.mrb[62].mxu0  ;;  %v19008_v50 = vpop.f32.mrb[62].mxu1  ;;  %16425 = vmatpush3.bf16.msk.msra.mxu0 %vm18682_vm14, %v17087_v4  ;;  %16402 = vmatprep.subr.bf16.mxu1 %v17081_v0 }
 0x3be   : > { %v14313_v52 = vpop.f32.mrb[63].mxu0  ;;  %v14328_v32 = vpop.f32.mrb[63].mxu1  ;;  %16426 = vmatprep.subr.bf16.mxu0 %v17081_v0  ;;  %14731 = vmatprep.mubr.msk.f32.mxu0 %vm17084_vm0, %v17085_v7 }
 0x3c0   : > { %16404 = vmatpush3.bf16.msk.msra.mxu1 %vm18713_vm8, %v17087_v4 }
 0x3c1   : > { %16428 = vmatpush3.bf16.msk.msra.mxu0 %vm18701_vm3, %v17087_v4  ;;  %16414 = vmatprep.subr.bf16.mxu1 %v17081_v0 }
 0x3c2   : > { %16429 = vmatprep.subr.bf16.mxu0 %v17081_v0 }
 0x3c3   : > { %14687 = vmatmul.mubr.msk.f32.vlgmr.msra.gmra.mrb[86].mxu1 %vm4143_vm11, %v18433_v40 }
 0x3c4   : > { %16416 = vmatpush3.bf16.msk.msra.mxu1 %vm18682_vm14, %v17087_v4  ;;  %14716 = vmatprep.mubr.msk.f32.mxu1 %vm17084_vm0, %v17085_v7 }
 0x3c5   : > { %16431 = vmatpush3.bf16.msk.msra.mxu0 %vm18713_vm8, %v17087_v4  ;;  %16417 = vmatprep.subr.bf16.mxu1 %v17081_v0 }
 0x3c6   : > { %16441 = vmatprep.subr.bf16.mxu0 %v17081_v0 }
 0x3c8   : > { %16419 = vmatpush3.bf16.msk.msra.mxu1 %vm18701_vm3, %v17087_v4  ;;  %14732 = vmatmul.mubr.msk.f32.vlgmr.msra.gmra.mrb[90].mxu0 %vm4143_vm11, %v18593_v19 }
 0x3c9   : > { %v19042_v40 = vpop.f32.mrb[64].mxu0  ;;  %16443 = vmatpush3.bf16.msk.msra.mxu0 %vm18682_vm14, %v17087_v4  ;;  %v19047_v56 = vpop.f32.mrb[64].mxu1  ;;  %16420 = vmatprep.subr.bf16.mxu1 %v17081_v0 }
 0x3ca   : > { %v14343_v61 = vpop.f32.mrb[65].mxu0  ;;  %v14358_v53 = vpop.f32.mrb[65].mxu1  ;;  %16444 = vmatprep.subr.bf16.mxu0 %v17081_v0  ;;  %14761 = vmatprep.mubr.msk.f32.mxu0 %vm17084_vm0, %v17085_v7 }
 0x3cc   : > { %16422 = vmatpush3.bf16.msk.msra.mxu1 %vm18713_vm8, %v17087_v4 }
 0x3cd   : > { %16446 = vmatpush3.bf16.msk.msra.mxu0 %vm18701_vm3, %v17087_v4  ;;  %16432 = vmatprep.subr.bf16.mxu1 %v17081_v0 }
 0x3ce   : > { %16447 = vmatprep.subr.bf16.mxu0 %v17081_v0 }
 0x3cf   : > { %14717 = vmatmul.mubr.msk.f32.vlgmr.msra.gmra.mrb[88].mxu1 %vm4143_vm11, %v18544_v33 }
 0x3d0   : > { %16434 = vmatpush3.bf16.msk.msra.mxu1 %vm18682_vm14, %v17087_v4  ;;  %14746 = vmatprep.mubr.msk.f32.mxu1 %vm17084_vm0, %v17085_v7 }
 0x3d1   : > { %16449 = vmatpush3.bf16.msk.msra.mxu0 %vm18713_vm8, %v17087_v4  ;;  %16435 = vmatprep.subr.bf16.mxu1 %v17081_v0 }
 0x3d2   : > { %16459 = vmatprep.subr.bf16.mxu0 %v17081_v0 }
 0x3d4   : > { %16437 = vmatpush3.bf16.msk.msra.mxu1 %vm18701_vm3, %v17087_v4  ;;  %14762 = vmatmul.mubr.msk.f32.vlgmr.msra.gmra.mrb[92].mxu0 %vm4143_vm11, %v18633_v57 }
 0x3d5   : > { %16461 = vmatpush3.bf16.msk.msra.mxu0 %vm18682_vm14, %v17087_v4  ;;  %16438 = vmatprep.subr.bf16.mxu1 %v17081_v0 }
 0x3d6   : > { %16462 = vmatprep.subr.bf16.mxu0 %v17081_v0  ;;  %14791 = vmatprep.mubr.msk.f32.mxu0 %vm17084_vm0, %v17085_v7 }
 0x3d7   : > { %v19085_v33 = vpop.f32.mrb[66].mxu0 }
 0x3d8   : > { %16440 = vmatpush3.bf16.msk.msra.mxu1 %vm18713_vm8, %v17087_v4  ;;  %v14373_v19 = vpop.f32.mrb[67].mxu0 }
 0x3d9   : > { %16464 = vmatpush3.bf16.msk.msra.mxu0 %vm18701_vm3, %v17087_v4  ;;  %16450 = vmatprep.subr.bf16.mxu1 %v17081_v0 }
 0x3da   : > { %16465 = vmatprep.subr.bf16.mxu0 %v17081_v0 }
 0x3db   : > { %14747 = vmatmul.mubr.msk.f32.vlgmr.msra.gmra.mrb[90].mxu1 %vm4143_vm11, %v18613_v1 }
 0x3dc   : > { %16452 = vmatpush3.bf16.msk.msra.mxu1 %vm18682_vm14, %v17087_v4  ;;  %14776 = vmatprep.mubr.msk.f32.mxu1 %vm17084_vm0, %v17085_v7 }
 0x3dd   : > { %16467 = vmatpush3.bf16.msk.msra.mxu0 %vm18713_vm8, %v17087_v4  ;;  %16453 = vmatprep.subr.bf16.mxu1 %v17081_v0 }
 0x3e0   : > { %16455 = vmatpush3.bf16.msk.msra.mxu1 %vm18701_vm3, %v17087_v4  ;;  %14792 = vmatmul.mubr.msk.f32.vlgmr.msra.gmra.mrb[94].mxu0 %vm4143_vm11, %v18680_v41 }
 0x3e1   : > { %16456 = vmatprep.subr.bf16.mxu1 %v17081_v0  ;;  %14827 = vmatprep.mubr.msk.f32.mxu0 %vm660_vm1, %v19161_v59 }
 0x3e4   : > { %16458 = vmatpush3.bf16.msk.msra.mxu1 %vm18713_vm8, %v17087_v4 }
 0x3e5   : > { %16468 = vmatprep.subr.bf16.mxu1 %v17081_v0 }
 0x3e7   : > { %14777 = vmatmul.mubr.msk.f32.vlgmr.msra.gmra.mrb[92].mxu1 %vm4143_vm11, %v18653_v38 }
 0x3e8   : > { %16470 = vmatpush3.bf16.msk.msra.mxu1 %vm18682_vm14, %v17087_v4  ;;  %14806 = vmatprep.mubr.msk.f32.mxu1 %vm17084_vm0, %v17085_v7  ;;  %vm9511_vm0 = vcmask 1045504  }
 0x3e9   : > { %16471 = vmatprep.subr.bf16.mxu1 %v17081_v0 }
 0x3ea   : > { %v19124_v1 = vpop.f32.mrb[66].mxu1 }
 0x3eb   : > { %v14388_v57 = vpop.f32.mrb[67].mxu1 }
 0x3ec   : > { %16473 = vmatpush3.bf16.msk.msra.mxu1 %vm18701_vm3, %v17087_v4 }
 0x3ed   : > { %16474 = vmatprep.subr.bf16.mxu1 %v17081_v0 }
 0x3f0   : > { %16476 = vmatpush3.bf16.msk.msra.mxu1 %vm18713_vm8, %v17087_v4 }
 0x3f3   : > { %14807 = vmatmul.mubr.msk.f32.vlgmr.msra.gmra.mrb[94].mxu1 %vm4143_vm11, %v18731_v23 }
 0x3f4   : > { %14848 = vmatprep.mubr.msk.f32.mxu1 %vm660_vm1, %v19161_v59 }
 0x3fd   : > { %v19135_v38 = vpop.f32.mrb[68].mxu0 }
 0x3fe   : > { %v14403_v2 = vpop.f32.mrb[69].mxu0 }
 0x410   : > { %v19137_v16 = vpop.f32.mrb[68].mxu1 }
 0x411   : > { %v14418_v9 = vpop.f32.mrb[69].mxu1 }
 0x423   : > { %v19139_v41 = vpop.f32.mrb[70].mxu0 }
 0x424   : > { %v14433_v36 = vpop.f32.mrb[71].mxu0 }
 0x42f   : > { %v5962_v42 = vpop.f32.mrb[72].mxu0 }
 0x430   : > { %v19142_v3 = vmax.f32 %v18754_v28, %v5962_v42  ;;  %v14463_v0 = vpop.f32.mrb[73].mxu0 }
 0x436   : > { %v19144_v15 = vpop.f32.mrb[70].mxu1 }
 0x437   : > { %v14448_v46 = vpop.f32.mrb[71].mxu1 }
 0x43b   : > { %v6102_v21 = vpop.f32.mrb[74].mxu0 }
 0x43c   : > { %v19147_v12 = vmax.f32 %v18790_v5, %v6102_v21  ;;  %v14493_v22 = vpop.f32.mrb[75].mxu0 }
 0x43e   : > { %7626 = vrot.lane.b32.xlu0 %v19147_v12, %s17082_s29 }
 0x442   : > { %v6032_v49 = vpop.f32.mrb[72].mxu1 }
 0x443   : > { %v19152_v54 = vmax.f32 %v18756_v14, %v6032_v49  ;;  %v14478_v23 = vpop.f32.mrb[73].mxu1 }
 0x445   : > { %v16968_v28 = vpack.i.bf16 %v19152_v54, %v19142_v3 }
 0x447   : > { %16969 = vrot.lane.b32.xlu1 %v16968_v28, %s17082_s29  ;;  %v6242_v55 = vpop.f32.mrb[76].mxu0 }
 0x448   : > { %v19158_v44 = vmax.f32 %v18826_v17, %v6242_v55  ;;  %v14523_v5 = vpop.f32.mrb[77].mxu0 }
 0x44b   : > { %16974 = vrot.lane.b32.xlu1 %v16968_v28, %s17083_s30 }
 0x44e   : > { %v6172_v39 = vpop.f32.mrb[74].mxu1 }
 0x44f   : > { %v19164_v43 = vmax.f32 %v18792_v48, %v6172_v39  ;;  %v14508_v14 = vpop.f32.mrb[75].mxu1  ;;  %7692 = vrot.lane.b32.xlu1 %v19147_v12, %s17083_s30 }
 0x451   : > { %7628 = vrot.lane.b32.xlu0 %v19164_v43, %s17082_s29 }
 0x453   : > { %7694 = vrot.lane.b32.xlu1 %v19164_v43, %s17083_s30  ;;  %v6382_v17 = vpop.f32.mrb[78].mxu0 }
 0x454   : > { %v19177_v48 = vmax.f32 %v18862_v24, %v6382_v17  ;;  %v14553_v62 = vpop.f32.mrb[79].mxu0 }
 0x455   : > { %7630 = vrot.lane.b32.xlu0 %v19158_v44, %s17082_s29 }
 0x457   : > { %7696 = vrot.lane.b32.xlu1 %v19158_v44, %s17083_s30 }
 0x45a   : > { %v6312_v11 = vpop.f32.mrb[76].mxu1 }
 0x45b   : > { %v19184_v47 = vmax.f32 %v18828_v45, %v6312_v11  ;;  %v14538_v26 = vpop.f32.mrb[77].mxu1 }
 0x45d   : > { %7698 = vrot.lane.b32.xlu1 %v19184_v47, %s17083_s30  ;;  %7632 = vrot.lane.b32.xlu0 %v19184_v47, %s17082_s29 }
 0x45f   : > { %v6522_v24 = vpop.f32.mrb[80].mxu0 }
 0x460   : > { %v19191_v29 = vmax.f32 %v18898_v13, %v6522_v24  ;;  %v14583_v63 = vpop.f32.mrb[81].mxu0 }
 0x461   : > { %7700 = vrot.lane.b32.xlu1 %v19177_v48, %s17083_s30  ;;  %7634 = vrot.lane.b32.xlu0 %v19177_v48, %s17082_s29 }
 0x466   : > { %v6452_v45 = vpop.f32.mrb[78].mxu1 }
 0x467   : > { %v19198_v8 = vmax.f32 %v18864_v37, %v6452_v45  ;;  %v14568_v31 = vpop.f32.mrb[79].mxu1 }
 0x469   : > { %7702 = vrot.lane.b32.xlu1 %v19198_v8, %s17083_s30  ;;  %7636 = vrot.lane.b32.xlu0 %v19198_v8, %s17082_s29 }
 0x46b   : > { %v6662_v13 = vpop.f32.mrb[82].mxu0 }
 0x46c   : > { %v19205_v27 = vmax.f32 %v18934_v6, %v6662_v13  ;;  %v14613_v52 = vpop.f32.mrb[83].mxu0 }
 0x46d   : > { %7704 = vrot.lane.b32.xlu1 %v19191_v29, %s17083_s30  ;;  %7638 = vrot.lane.b32.xlu0 %v19191_v29, %s17082_s29 }
 0x472   : > { %v6592_v37 = vpop.f32.mrb[80].mxu1 }
 0x473   : > { %v19212_v32 = vmax.f32 %v18900_v60, %v6592_v37  ;;  %v14598_v61 = vpop.f32.mrb[81].mxu1 }
 0x475   : > { %7706 = vrot.lane.b32.xlu1 %v19212_v32, %s17083_s30  ;;  %7640 = vrot.lane.b32.xlu0 %v19212_v32, %s17082_s29 }
 0x477   : > { %v6802_v6 = vpop.f32.mrb[84].mxu0 }
 0x478   : > { %v19219_v53 = vmax.f32 %v18970_v20, %v6802_v6  ;;  %v14643_v19 = vpop.f32.mrb[85].mxu0 }
 0x479   : > { %7708 = vrot.lane.b32.xlu1 %v19205_v27, %s17083_s30  ;;  %7642 = vrot.lane.b32.xlu0 %v19205_v27, %s17082_s29 }
 0x47e   : > { %v6732_v60 = vpop.f32.mrb[82].mxu1 }
 0x47f   : > { %v19226_v57 = vmax.f32 %v18936_v34, %v6732_v60  ;;  %v14628_v2 = vpop.f32.mrb[83].mxu1 }
 0x481   : > { %7710 = vrot.lane.b32.xlu1 %v19226_v57, %s17083_s30  ;;  %7644 = vrot.lane.b32.xlu0 %v19226_v57, %s17082_s29 }
 0x483   : > { %v6942_v20 = vpop.f32.mrb[86].mxu0 }
 0x484   : > { %v19233_v9 = vmax.f32 %v19006_v18, %v6942_v20  ;;  %v14673_v36 = vpop.f32.mrb[87].mxu0 }
 0x485   : > { %7712 = vrot.lane.b32.xlu1 %v19219_v53, %s17083_s30  ;;  %7646 = vrot.lane.b32.xlu0 %v19219_v53, %s17082_s29 }
 0x48a   : > { %v6872_v34 = vpop.f32.mrb[84].mxu1 }
 0x48b   : > { %v19240_v42 = vmax.f32 %v18972_v58, %v6872_v34  ;;  %v14658_v0 = vpop.f32.mrb[85].mxu1 }
 0x48d   : > { %7714 = vrot.lane.b32.xlu1 %v19240_v42, %s17083_s30  ;;  %7648 = vrot.lane.b32.xlu0 %v19240_v42, %s17082_s29 }
 0x48f   : > { %v7082_v18 = vpop.f32.mrb[88].mxu0 }
 0x490   : > { %v19247_v46 = vmax.f32 %v19042_v40, %v7082_v18  ;;  %v14703_v21 = vpop.f32.mrb[89].mxu0 }
 0x491   : > { %7716 = vrot.lane.b32.xlu1 %v19233_v9, %s17083_s30  ;;  %7650 = vrot.lane.b32.xlu0 %v19233_v9, %s17082_s29 }
 0x496   : > { %v7012_v58 = vpop.f32.mrb[86].mxu1 }
 0x497   : > { %v19254_v22 = vmax.f32 %v19008_v50, %v7012_v58  ;;  %v14688_v49 = vpop.f32.mrb[87].mxu1 }
 0x498   : > { %v19325_v49 = vld [vmem:[#allocation4 + $0x8] sm:$0xff] }
 0x499   : > { %7718 = vrot.lane.b32.xlu1 %v19254_v22, %s17083_s30  ;;  %7652 = vrot.lane.b32.xlu0 %v19254_v22, %s17082_s29 }
 0x49b   : > { %v7222_v40 = vpop.f32.mrb[90].mxu0 }
 0x49c   : > { %v19261_v23 = vmax.f32 %v19085_v33, %v7222_v40  ;;  %v14733_v28 = vpop.f32.mrb[91].mxu0 }
 0x49d   : > { %7720 = vrot.lane.b32.xlu1 %v19247_v46, %s17083_s30  ;;  %7654 = vrot.lane.b32.xlu0 %v19247_v46, %s17082_s29 }
 0x4a2   : > { %v7152_v50 = vpop.f32.mrb[88].mxu1 }
 0x4a3   : > { %v19268_v55 = vmax.f32 %v19047_v56, %v7152_v50  ;;  %v14718_v5 = vpop.f32.mrb[89].mxu1 }
 0x4a5   : > { %7722 = vrot.lane.b32.xlu1 %v19268_v55, %s17083_s30  ;;  %7656 = vrot.lane.b32.xlu0 %v19268_v55, %s17082_s29 }
 0x4a7   : > { %v7362_v33 = vpop.f32.mrb[92].mxu0 }
 0x4a8   : > { %v19275_v39 = vmax.f32 %v19135_v38, %v7362_v33  ;;  %v14763_v14 = vpop.f32.mrb[93].mxu0 }
 0x4a9   : > { %7724 = vrot.lane.b32.xlu1 %v19261_v23, %s17083_s30  ;;  %7658 = vrot.lane.b32.xlu0 %v19261_v23, %s17082_s29 }
 0x4ae   : > { %v7292_v56 = vpop.f32.mrb[90].mxu1 }
 0x4af   : > { %v19282_v17 = vmax.f32 %v19124_v1, %v7292_v56  ;;  %v14748_v62 = vpop.f32.mrb[91].mxu1 }
 0x4b0   : > { %v7627_v19 = vpop.permute.xlu0 %7626 }
 0x4b1   : > { %7726 = vrot.lane.b32.xlu1 %v19282_v17, %s17083_s30  ;;  %7660 = vrot.lane.b32.xlu0 %v19282_v17, %s17082_s29 }
 0x4b3   : > { %v7502_v38 = vpop.f32.mrb[94].mxu0 }
 0x4b4   : > { %v19289_v11 = vmax.f32 %v19139_v41, %v7502_v38  ;;  %v14793_v26 = vpop.f32.mrb[95].mxu0 }
 0x4b5   : > { %7728 = vrot.lane.b32.xlu1 %v19275_v39, %s17083_s30  ;;  %7662 = vrot.lane.b32.xlu0 %v19275_v39, %s17082_s29 }
 0x4b9   : > { %v16970_v1 = vpop.permute.xlu1 %16969 }
 0x4ba   : > { %v16972_v24 = vunpack.i.h.bf16 %v16970_v1  ;;  %v16971_v63 = vunpack.i.l.bf16 %v16970_v1  ;;  %v7432_v45 = vpop.f32.mrb[92].mxu1 }
 0x4bb   : > { %v19296_v31 = vmax.f32 %v19137_v16, %v7432_v45  ;;  %v14778_v13 = vpop.f32.mrb[93].mxu1 }
 0x4bc   : > { %v16493_v52 = vpack.c.bf16 %v16972_v24, %v19152_v54  ;;  %v16477_v41 = vpack.c.bf16 %v16971_v63, %v19142_v3 }
 0x4bd   : > { %v16975_v37 = vpop.permute.xlu1 %16974  ;;  %7730 = vrot.lane.b32.xlu1 %v19296_v31, %s17083_s30  ;;  %7664 = vrot.lane.b32.xlu0 %v19296_v31, %s17082_s29 }
 0x4be   : > { %v16977_v61 = vunpack.i.h.bf16 %v16975_v37  ;;  %v16976_v6 = vunpack.i.l.bf16 %v16975_v37  ;;  %16478 = vmatprep.subr.bf16.mxu0 %v16477_v41  ;;  %16494 = vmatprep.subr.bf16.mxu1 %v16493_v52 }
 0x4bf   : > { %16480 = vmatpush3.bf16.msra.mxu0 %v16477_v41  ;;  %16496 = vmatpush3.bf16.msra.mxu1 %v16493_v52 }
 0x4c0   : > { %v16481_v16 = vpack.c.bf16 %v19152_v54, %v16976_v6  ;;  %v16497_v60 = vpack.c.bf16 %v19147_v12, %v16977_v61  ;;  %v16485_v3 = vpack.c.bf16 %v16977_v61, %v16972_v24  ;;  %v16489_v54 = vpack.c.bf16 %v7627_v19, %v19147_v12  ;;  %v7770_v12 = vld [vmem:[%s19930_s4] sm:$0xff] }
 0x4c1   : > { %v7693_v2 = vpop.permute.xlu1 %7692  ;;  %7758 = vrot.lane.b32.xlu1 %v19289_v11, %s17083_s30  ;;  %7755 = vrot.lane.b32.xlu0 %v19289_v11, %s17082_s29 }
 0x4c2   : > { %16482 = vmatprep.subr.bf16.mxu0 %v16481_v16  ;;  %16498 = vmatprep.subr.bf16.mxu1 %v16497_v60  ;;  %v16501_v20 = vpack.c.bf16 %v7693_v2, %v7627_v19  ;;  %v16513_v40 = vpack.c.bf16 %v19164_v43, %v7693_v2 }
 0x4c3   : > { %16484 = vmatpush3.bf16.msra.mxu0 %v16481_v16  ;;  %v7629_v36 = vpop.permute.xlu0 %7628  ;;  %16500 = vmatpush3.bf16.msra.mxu1 %v16497_v60 }
 0x4c4   : > { %16486 = vmatprep.subr.bf16.mxu0 %v16485_v3  ;;  %16502 = vmatprep.subr.bf16.mxu1 %v16501_v20  ;;  %v16505_v34 = vpack.c.bf16 %v7629_v36, %v19164_v43 }
 0x4c5   : > { %v7695_v58 = vpop.permute.xlu1 %7694 }
 0x4c6   : > { %v7572_v0 = vpop.f32.mrb[94].mxu1  ;;  %v16529_v28 = vpack.c.bf16 %v19158_v44, %v7695_v58  ;;  %v16517_v33 = vpack.c.bf16 %v7695_v58, %v7629_v36 }
 0x4c7   : > { %v19313_v18 = vmax.f32 %v19144_v15, %v7572_v0  ;;  %v14808_v21 = vpop.f32.mrb[95].mxu1  ;;  %16488 = vmatpush3.bf16.msra.mxu0 %v16485_v3  ;;  %16504 = vmatpush3.bf16.msra.mxu1 %v16501_v20  ;;  %v7771_v15 = vld [vmem:[%s19930_s4 + $0x8] sm:$0xff]  ;;  %v7631_v50 = vpop.permute.xlu0 %7630 }
 0x4c8   : > { %16490 = vmatprep.subr.bf16.mxu0 %v16489_v54  ;;  %16506 = vmatprep.subr.bf16.mxu1 %v16505_v34  ;;  %v16521_v43 = vpack.c.bf16 %v7631_v50, %v19158_v44 }
 0x4c9   : > { %7765 = vrot.lane.b32.xlu1 %v19313_v18, %s17083_s30  ;;  %7762 = vrot.lane.b32.xlu0 %v19313_v18, %s17082_s29  ;;  %v7697_v5 = vpop.permute.xlu1 %7696 }
 0x4ca   : > { %v16533_v14 = vpack.c.bf16 %v7697_v5, %v7631_v50  ;;  %v16545_v44 = vpack.c.bf16 %v19184_v47, %v7697_v5 }
 0x4cb   : > { %16492 = vmatpush3.bf16.msra.mxu0 %v16489_v54  ;;  %16508 = vmatpush3.bf16.msra.mxu1 %v16505_v34 }
 0x4cc   : > { %14825 = vmatprep.subr.mxu0 %v7693_v2  ;;  %14846 = vmatprep.subr.mxu1 %v7695_v58 }
 0x4cd   : > { %7774 = vperm.xlu0 %16967, %v7770_v12   ;;  %7779 = vperm.xlu1 %16978, %v7771_v15  }
 0x4cf   : > { %14826 = vmatpush3.msra.mxu0 %v7693_v2  ;;  %14847 = vmatpush3.msra.mxu1 %v7695_v58  ;;  %v7633_v56 = vpop.permute.xlu0 %7632  ;;  %v7699_v38 = vpop.permute.xlu1 %7698 }
 0x4d0   : > { %14828 = vmatmul.mubr.msk.f32.vlgmr.msra.gmra.mrb[96].mxu0 %vm660_vm1, %v19325_v49  ;;  %14849 = vmatmul.mubr.msk.f32.vlgmr.msra.gmra.mrb[96].mxu1 %vm660_vm1, %v19325_v49  ;;  %v16537_v62 = vpack.c.bf16 %v7633_v56, %v19184_v47  ;;  %v16561_v26 = vpack.c.bf16 %v19177_v48, %v7699_v38  ;;  %v16549_v63 = vpack.c.bf16 %v7699_v38, %v7633_v56 }
 0x4d1   : > { %16510 = vmatprep.subr.bf16.mxu0 %v16489_v54  ;;  %16526 = vmatprep.subr.bf16.mxu1 %v16505_v34 }
 0x4d2   : > { %16512 = vmatpush3.bf16.msra.mxu0 %v16489_v54  ;;  %16528 = vmatpush3.bf16.msra.mxu1 %v16505_v34 }
 0x4d3   : > { %16514 = vmatprep.subr.bf16.mxu0 %v16513_v40  ;;  %16530 = vmatprep.subr.bf16.mxu1 %v16529_v28  ;;  %v7701_v1 = vpop.permute.xlu1 %7700  ;;  %v7635_v24 = vpop.permute.xlu0 %7634 }
 0x4d4   : > { %14869 = vmatprep.mubr.msk.f32.mxu0 %vm660_vm1, %v19161_v59  ;;  %14890 = vmatprep.mubr.msk.f32.mxu1 %vm660_vm1, %v19161_v59  ;;  %v16565_v45 = vpack.c.bf16 %v7701_v1, %v7635_v24  ;;  %v16553_v47 = vpack.c.bf16 %v7635_v24, %v19177_v48  ;;  %v16577_v48 = vpack.c.bf16 %v19198_v8, %v7701_v1 }
 0x4d6   : > { %16516 = vmatpush3.bf16.msra.mxu0 %v16513_v40  ;;  %16532 = vmatpush3.bf16.msra.mxu1 %v16529_v28 }
 0x4d7   : > { %16518 = vmatprep.subr.bf16.mxu0 %v16517_v33  ;;  %16534 = vmatprep.subr.bf16.mxu1 %v16533_v14 }
 0x4da   : > { %16520 = vmatpush3.bf16.msra.mxu0 %v16517_v33  ;;  %16536 = vmatpush3.bf16.msra.mxu1 %v16533_v14 }
 0x4db   : > { %16522 = vmatprep.subr.bf16.mxu0 %v16521_v43  ;;  %16538 = vmatprep.subr.bf16.mxu1 %v16537_v62  ;;  %v7637_v13 = vpop.permute.xlu0 %7636  ;;  %v7703_v41 = vpop.permute.xlu1 %7702 }
 0x4dc   : > { %v16569_v52 = vpack.c.bf16 %v7637_v13, %v19198_v8  ;;  %v16593_v37 = vpack.c.bf16 %v19191_v29, %v7703_v41  ;;  %v16581_v19 = vpack.c.bf16 %v7703_v41, %v7637_v13 }
 0x4de   : > { %16524 = vmatpush3.bf16.msra.mxu0 %v16521_v43  ;;  %16540 = vmatpush3.bf16.msra.mxu1 %v16537_v62 }
 0x4df   : > { %14867 = vmatprep.subr.mxu0 %v7697_v5  ;;  %14888 = vmatprep.subr.mxu1 %v7699_v38  ;;  %v7705_v61 = vpop.permute.xlu1 %7704  ;;  %v7639_v6 = vpop.permute.xlu0 %7638 }
 0x4e0   : > { %v16597_v16 = vpack.c.bf16 %v7705_v61, %v7639_v6  ;;  %v16585_v8 = vpack.c.bf16 %v7639_v6, %v19191_v29  ;;  %v16609_v29 = vpack.c.bf16 %v19212_v32, %v7705_v61 }
 0x4e2   : > { %14868 = vmatpush3.msra.mxu0 %v7697_v5  ;;  %14889 = vmatpush3.msra.mxu1 %v7699_v38 }
 0x4e3   : > { %14870 = vmatmul.mubr.msk.f32.vlgmr.msra.gmra.mrb[98].mxu0 %vm660_vm1, %v19325_v49  ;;  %14891 = vmatmul.mubr.msk.f32.vlgmr.msra.gmra.mrb[98].mxu1 %vm660_vm1, %v19325_v49 }
 0x4e4   : > { %16542 = vmatprep.subr.bf16.mxu0 %v16521_v43  ;;  %16558 = vmatprep.subr.bf16.mxu1 %v16537_v62 }
 0x4e5   : > { %16544 = vmatpush3.bf16.msra.mxu0 %v16521_v43  ;;  %16560 = vmatpush3.bf16.msra.mxu1 %v16537_v62 }
 0x4e6   : > { %16546 = vmatprep.subr.bf16.mxu0 %v16545_v44  ;;  %16562 = vmatprep.subr.bf16.mxu1 %v16561_v26 }
 0x4e7   : > { %14911 = vmatprep.mubr.msk.f32.mxu0 %vm660_vm1, %v19161_v59  ;;  %14932 = vmatprep.mubr.msk.f32.mxu1 %vm660_vm1, %v19161_v59  ;;  %v7641_v60 = vpop.permute.xlu0 %7640  ;;  %v7707_v3 = vpop.permute.xlu1 %7706 }
 0x4e8   : > { %v16601_v2 = vpack.c.bf16 %v7641_v60, %v19212_v32  ;;  %v16625_v20 = vpack.c.bf16 %v19205_v27, %v7707_v3  ;;  %v16613_v34 = vpack.c.bf16 %v7707_v3, %v7641_v60 }
 0x4e9   : > { %16548 = vmatpush3.bf16.msra.mxu0 %v16545_v44  ;;  %16564 = vmatpush3.bf16.msra.mxu1 %v16561_v26 }
 0x4ea   : > { %16550 = vmatprep.subr.bf16.mxu0 %v16549_v63  ;;  %16566 = vmatprep.subr.bf16.mxu1 %v16565_v45 }
 0x4eb   : > { %v7709_v36 = vpop.permute.xlu1 %7708  ;;  %v7643_v54 = vpop.permute.xlu0 %7642 }
 0x4ec   : > { %v16629_v0 = vpack.c.bf16 %v7709_v36, %v7643_v54  ;;  %v16617_v32 = vpack.c.bf16 %v7643_v54, %v19205_v27  ;;  %v16641_v27 = vpack.c.bf16 %v19226_v57, %v7709_v36 }
 0x4ed   : > { %16552 = vmatpush3.bf16.msra.mxu0 %v16549_v63  ;;  %16568 = vmatpush3.bf16.msra.mxu1 %v16565_v45 }
 0x4ee   : > { %16554 = vmatprep.subr.bf16.mxu0 %v16553_v47  ;;  %16570 = vmatprep.subr.bf16.mxu1 %v16569_v52 }
 0x4f1   : > { %16556 = vmatpush3.bf16.msra.mxu0 %v16553_v47  ;;  %16572 = vmatpush3.bf16.msra.mxu1 %v16569_v52 }
 0x4f2   : > { %14909 = vmatprep.subr.mxu0 %v7701_v1  ;;  %14930 = vmatprep.subr.mxu1 %v7703_v41 }
 0x4f3   : > { %v7645_v21 = vpop.permute.xlu0 %7644  ;;  %v7711_v15 = vpop.permute.xlu1 %7710 }
 0x4f4   : > { %v16633_v12 = vpack.c.bf16 %v7645_v21, %v19226_v57  ;;  %v16657_v58 = vpack.c.bf16 %v19219_v53, %v7711_v15  ;;  %v16645_v50 = vpack.c.bf16 %v7711_v15, %v7645_v21 }
 0x4f5   : > { %14910 = vmatpush3.msra.mxu0 %v7701_v1  ;;  %14931 = vmatpush3.msra.mxu1 %v7703_v41 }
 0x4f6   : > { %14912 = vmatmul.mubr.msk.f32.vlgmr.msra.gmra.mrb[100].mxu0 %vm660_vm1, %v19325_v49  ;;  %14933 = vmatmul.mubr.msk.f32.vlgmr.msra.gmra.mrb[100].mxu1 %vm660_vm1, %v19325_v49 }
 0x4f7   : > { %16574 = vmatprep.subr.bf16.mxu0 %v16553_v47  ;;  %16590 = vmatprep.subr.bf16.mxu1 %v16569_v52  ;;  %v7713_v40 = vpop.permute.xlu1 %7712  ;;  %v7647_v28 = vpop.permute.xlu0 %7646 }
 0x4f8   : > { %16576 = vmatpush3.bf16.msra.mxu0 %v16553_v47  ;;  %16592 = vmatpush3.bf16.msra.mxu1 %v16569_v52  ;;  %v16661_v5 = vpack.c.bf16 %v7713_v40, %v7647_v28  ;;  %v16649_v57 = vpack.c.bf16 %v7647_v28, %v19219_v53  ;;  %v16673_v53 = vpack.c.bf16 %v19240_v42, %v7713_v40 }
 0x4f9   : > { %16578 = vmatprep.subr.bf16.mxu0 %v16577_v48  ;;  %16594 = vmatprep.subr.bf16.mxu1 %v16593_v37 }
 0x4fa   : > { %14953 = vmatprep.mubr.msk.f32.mxu0 %vm660_vm1, %v19161_v59  ;;  %14974 = vmatprep.mubr.msk.f32.mxu1 %vm660_vm1, %v19161_v59 }
 0x4fc   : > { %16580 = vmatpush3.bf16.msra.mxu0 %v16577_v48  ;;  %16596 = vmatpush3.bf16.msra.mxu1 %v16593_v37 }
 0x4fd   : > { %16582 = vmatprep.subr.bf16.mxu0 %v16581_v19  ;;  %16598 = vmatprep.subr.bf16.mxu1 %v16597_v16 }
 0x4ff   : > { %v7649_v33 = vpop.permute.xlu0 %7648  ;;  %v7715_v56 = vpop.permute.xlu1 %7714 }
 0x500   : > { %16584 = vmatpush3.bf16.msra.mxu0 %v16581_v19  ;;  %16600 = vmatpush3.bf16.msra.mxu1 %v16597_v16  ;;  %v16665_v14 = vpack.c.bf16 %v7649_v33, %v19240_v42  ;;  %v16689_v43 = vpack.c.bf16 %v19233_v9, %v7715_v56  ;;  %v16677_v44 = vpack.c.bf16 %v7715_v56, %v7649_v33 }
 0x501   : > { %16586 = vmatprep.subr.bf16.mxu0 %v16585_v8  ;;  %16602 = vmatprep.subr.bf16.mxu1 %v16601_v2 }
 0x503   : > { %v7717_v62 = vpop.permute.xlu1 %7716  ;;  %v7651_v38 = vpop.permute.xlu0 %7650 }
 0x504   : > { %16588 = vmatpush3.bf16.msra.mxu0 %v16585_v8  ;;  %16604 = vmatpush3.bf16.msra.mxu1 %v16601_v2  ;;  %v16693_v26 = vpack.c.bf16 %v7717_v62, %v7651_v38  ;;  %v16681_v42 = vpack.c.bf16 %v7651_v38, %v19233_v9  ;;  %v16705_v9 = vpack.c.bf16 %v19254_v22, %v7717_v62 }
 0x505   : > { %14951 = vmatprep.subr.mxu0 %v7705_v61  ;;  %14972 = vmatprep.subr.mxu1 %v7707_v3 }
 0x508   : > { %14952 = vmatpush3.msra.mxu0 %v7705_v61  ;;  %14973 = vmatpush3.msra.mxu1 %v7707_v3 }
 0x509   : > { %14954 = vmatmul.mubr.msk.f32.vlgmr.msra.gmra.mrb[102].mxu0 %vm660_vm1, %v19325_v49  ;;  %14975 = vmatmul.mubr.msk.f32.vlgmr.msra.gmra.mrb[102].mxu1 %vm660_vm1, %v19325_v49 }
 0x50a   : > { %16606 = vmatprep.subr.bf16.mxu0 %v16585_v8  ;;  %16622 = vmatprep.subr.bf16.mxu1 %v16601_v2 }
 0x50b   : > { %16608 = vmatpush3.bf16.msra.mxu0 %v16585_v8  ;;  %16624 = vmatpush3.bf16.msra.mxu1 %v16601_v2  ;;  %v7653_v1 = vpop.permute.xlu0 %7652  ;;  %v7719_v63 = vpop.permute.xlu1 %7718 }
 0x50c   : > { %16610 = vmatprep.subr.bf16.mxu0 %v16609_v29  ;;  %16626 = vmatprep.subr.bf16.mxu1 %v16625_v20  ;;  %v16697_v24 = vpack.c.bf16 %v7653_v1, %v19254_v22  ;;  %v16721_v45 = vpack.c.bf16 %v19247_v46, %v7719_v63  ;;  %v16709_v52 = vpack.c.bf16 %v7719_v63, %v7653_v1 }
 0x50d   : > { %14995 = vmatprep.mubr.msk.f32.mxu0 %vm660_vm1, %v19161_v59  ;;  %15016 = vmatprep.mubr.msk.f32.mxu1 %vm660_vm1, %v19161_v59 }
 0x50f   : > { %16612 = vmatpush3.bf16.msra.mxu0 %v16609_v29  ;;  %16628 = vmatpush3.bf16.msra.mxu1 %v16625_v20  ;;  %v7721_v13 = vpop.permute.xlu1 %7720  ;;  %v7655_v47 = vpop.permute.xlu0 %7654 }
 0x510   : > { %16614 = vmatprep.subr.bf16.mxu0 %v16613_v34  ;;  %16630 = vmatprep.subr.bf16.mxu1 %v16629_v0  ;;  %v16725_v41 = vpack.c.bf16 %v7721_v13, %v7655_v47  ;;  %v16713_v22 = vpack.c.bf16 %v7655_v47, %v19247_v46  ;;  %v16737_v46 = vpack.c.bf16 %v19268_v55, %v7721_v13 }
 0x513   : > { %16616 = vmatpush3.bf16.msra.mxu0 %v16613_v34  ;;  %16632 = vmatpush3.bf16.msra.mxu1 %v16629_v0 }
 0x514   : > { %16618 = vmatprep.subr.bf16.mxu0 %v16617_v32  ;;  %16634 = vmatprep.subr.bf16.mxu1 %v16633_v12 }
 0x517   : > { %16620 = vmatpush3.bf16.msra.mxu0 %v16617_v32  ;;  %16636 = vmatpush3.bf16.msra.mxu1 %v16633_v12  ;;  %v7657_v48 = vpop.permute.xlu0 %7656  ;;  %v7723_v61 = vpop.permute.xlu1 %7722 }
 0x518   : > { %14993 = vmatprep.subr.mxu0 %v7709_v36  ;;  %15014 = vmatprep.subr.mxu1 %v7711_v15  ;;  %v16729_v37 = vpack.c.bf16 %v7657_v48, %v19268_v55  ;;  %v16753_v6 = vpack.c.bf16 %v19261_v23, %v7723_v61  ;;  %v16741_v60 = vpack.c.bf16 %v7723_v61, %v7657_v48 }
 0x51b   : > { %14994 = vmatpush3.msra.mxu0 %v7709_v36  ;;  %15015 = vmatpush3.msra.mxu1 %v7711_v15  ;;  %v7725_v19 = vpop.permute.xlu1 %7724  ;;  %v7659_v16 = vpop.permute.xlu0 %7658 }
 0x51c   : > { %14996 = vmatmul.mubr.msk.f32.vlgmr.msra.gmra.mrb[104].mxu0 %vm660_vm1, %v19325_v49  ;;  %15017 = vmatmul.mubr.msk.f32.vlgmr.msra.gmra.mrb[104].mxu1 %vm660_vm1, %v19325_v49  ;;  %v16757_v8 = vpack.c.bf16 %v7725_v19, %v7659_v16  ;;  %v16745_v55 = vpack.c.bf16 %v7659_v16, %v19261_v23  ;;  %v16769_v23 = vpack.c.bf16 %v19282_v17, %v7725_v19 }
 0x51d   : > { %16638 = vmatprep.subr.bf16.mxu0 %v16617_v32  ;;  %16654 = vmatprep.subr.bf16.mxu1 %v16633_v12 }
 0x51e   : > { %16640 = vmatpush3.bf16.msra.mxu0 %v16617_v32  ;;  %16656 = vmatpush3.bf16.msra.mxu1 %v16633_v12 }
 0x51f   : > { %16642 = vmatprep.subr.bf16.mxu0 %v16641_v27  ;;  %16658 = vmatprep.subr.bf16.mxu1 %v16657_v58 }
 0x520   : > { %15037 = vmatprep.mubr.msk.f32.mxu0 %vm660_vm1, %v19161_v59  ;;  %15058 = vmatprep.mubr.msk.f32.mxu1 %vm660_vm1, %v19161_v59 }
 0x522   : > { %16644 = vmatpush3.bf16.msra.mxu0 %v16641_v27  ;;  %16660 = vmatpush3.bf16.msra.mxu1 %v16657_v58 }
 0x523   : > { %16646 = vmatprep.subr.bf16.mxu0 %v16645_v50  ;;  %16662 = vmatprep.subr.bf16.mxu1 %v16661_v5  ;;  %v7661_v2 = vpop.permute.xlu0 %7660  ;;  %v7727_v29 = vpop.permute.xlu1 %7726 }
 0x524   : > { %v16761_v3 = vpack.c.bf16 %v7661_v2, %v19282_v17  ;;  %v16785_v20 = vpack.c.bf16 %v19275_v39, %v7727_v29  ;;  %v16773_v34 = vpack.c.bf16 %v7727_v29, %v7661_v2 }
 0x526   : > { %16648 = vmatpush3.bf16.msra.mxu0 %v16645_v50  ;;  %16664 = vmatpush3.bf16.msra.mxu1 %v16661_v5 }
 0x527   : > { %16650 = vmatprep.subr.bf16.mxu0 %v16649_v57  ;;  %16666 = vmatprep.subr.bf16.mxu1 %v16665_v14  ;;  %v7729_v36 = vpop.permute.xlu1 %7728  ;;  %v7663_v54 = vpop.permute.xlu0 %7662 }
 0x528   : > { %v16789_v0 = vpack.c.bf16 %v7729_v36, %v7663_v54  ;;  %v16777_v17 = vpack.c.bf16 %v7663_v54, %v19275_v39  ;;  %v16801_v39 = vpack.c.bf16 %v19296_v31, %v7729_v36 }
 0x52a   : > { %16652 = vmatpush3.bf16.msra.mxu0 %v16649_v57  ;;  %16668 = vmatpush3.bf16.msra.mxu1 %v16665_v14 }
 0x52b   : > { %15035 = vmatprep.subr.mxu0 %v7713_v40  ;;  %15056 = vmatprep.subr.mxu1 %v7715_v56 }
 0x52e   : > { %15036 = vmatpush3.msra.mxu0 %v7713_v40  ;;  %15057 = vmatpush3.msra.mxu1 %v7715_v56 }
 0x52f   : > { %15038 = vmatmul.mubr.msk.f32.vlgmr.msra.gmra.mrb[106].mxu0 %vm660_vm1, %v19325_v49  ;;  %15059 = vmatmul.mubr.msk.f32.vlgmr.msra.gmra.mrb[106].mxu1 %vm660_vm1, %v19325_v49  ;;  %v7665_v21 = vpop.permute.xlu0 %7664  ;;  %v7731_v12 = vpop.permute.xlu1 %7730 }
 0x530   : > { %16670 = vmatprep.subr.bf16.mxu0 %v16649_v57  ;;  %16686 = vmatprep.subr.bf16.mxu1 %v16665_v14  ;;  %v16793_v32 = vpack.c.bf16 %v7665_v21, %v19296_v31  ;;  %v16817_v15 = vpack.c.bf16 %v19289_v11, %v7731_v12  ;;  %v16805_v40 = vpack.c.bf16 %v7731_v12, %v7665_v21 }
 0x531   : > { %16672 = vmatpush3.bf16.msra.mxu0 %v16649_v57  ;;  %16688 = vmatpush3.bf16.msra.mxu1 %v16665_v14 }
 0x532   : > { %16674 = vmatprep.subr.bf16.mxu0 %v16673_v53  ;;  %16690 = vmatprep.subr.bf16.mxu1 %v16689_v43 }
 0x533   : > { %15079 = vmatprep.mubr.msk.f32.mxu0 %vm660_vm1, %v19161_v59  ;;  %15100 = vmatprep.mubr.msk.f32.mxu1 %vm660_vm1, %v19161_v59  ;;  %v7759_v27 = vpop.permute.xlu1 %7758  ;;  %v7756_v58 = vpop.permute.xlu0 %7755 }
 0x534   : > { %v16821_v28 = vpack.c.bf16 %v7759_v27, %v7756_v58  ;;  %v16809_v31 = vpack.c.bf16 %v7756_v58, %v19289_v11 }
 0x535   : > { %16676 = vmatpush3.bf16.msra.mxu0 %v16673_v53  ;;  %16692 = vmatpush3.bf16.msra.mxu1 %v16689_v43 }
 0x536   : > { %16678 = vmatprep.subr.bf16.mxu0 %v16677_v44  ;;  %16694 = vmatprep.subr.bf16.mxu1 %v16693_v26 }
 0x539   : > { %16680 = vmatpush3.bf16.msra.mxu0 %v16677_v44  ;;  %16696 = vmatpush3.bf16.msra.mxu1 %v16693_v26 }
 0x53a   : > { %16682 = vmatprep.subr.bf16.mxu0 %v16681_v42  ;;  %16698 = vmatprep.subr.bf16.mxu1 %v16697_v24 }
 0x53b   : > { %v7763_v50 = vpop.permute.xlu0 %7762  ;;  %v7766_v33 = vpop.permute.xlu1 %7765 }
 0x53c   : > { %v16825_v5 = vpack.c.bf16 %v7763_v50, %v19313_v18 }
 0x53d   : > { %16684 = vmatpush3.bf16.msra.mxu0 %v16681_v42  ;;  %16700 = vmatpush3.bf16.msra.mxu1 %v16697_v24 }
 0x53e   : > { %15077 = vmatprep.subr.mxu0 %v7717_v62  ;;  %15098 = vmatprep.subr.mxu1 %v7719_v63 }
 0x541   : > { %15078 = vmatpush3.msra.mxu0 %v7717_v62  ;;  %15099 = vmatpush3.msra.mxu1 %v7719_v63 }
 0x542   : > { %15080 = vmatmul.mubr.msk.f32.vlgmr.msra.gmra.mrb[108].mxu0 %vm660_vm1, %v19325_v49  ;;  %15101 = vmatmul.mubr.msk.f32.vlgmr.msra.gmra.mrb[108].mxu1 %vm660_vm1, %v19325_v49 }
 0x543   : > { %16702 = vmatprep.subr.bf16.mxu0 %v16681_v42  ;;  %16718 = vmatprep.subr.bf16.mxu1 %v16697_v24 }
 0x544   : > { %16704 = vmatpush3.bf16.msra.mxu0 %v16681_v42  ;;  %16720 = vmatpush3.bf16.msra.mxu1 %v16697_v24 }
 0x545   : > { %16706 = vmatprep.subr.bf16.mxu0 %v16705_v9  ;;  %16722 = vmatprep.subr.bf16.mxu1 %v16721_v45 }
 0x546   : > { %15121 = vmatprep.mubr.msk.f32.mxu0 %vm660_vm1, %v19161_v59  ;;  %15142 = vmatprep.mubr.msk.f32.mxu1 %vm660_vm1, %v19161_v59 }
 0x548   : > { %16708 = vmatpush3.bf16.msra.mxu0 %v16705_v9  ;;  %16724 = vmatpush3.bf16.msra.mxu1 %v16721_v45 }
 0x549   : > { %16710 = vmatprep.subr.bf16.mxu0 %v16709_v52  ;;  %16726 = vmatprep.subr.bf16.mxu1 %v16725_v41 }
 0x54c   : > { %16712 = vmatpush3.bf16.msra.mxu0 %v16709_v52  ;;  %16728 = vmatpush3.bf16.msra.mxu1 %v16725_v41  ;;  %v19483_v51 = vpop.permute.xlu1 %7779  ;;  %v19485_v11 = vpop.permute.xlu0 %7774 }
 0x54d   : > { %16714 = vmatprep.subr.bf16.mxu0 %v16713_v22  ;;  %16730 = vmatprep.subr.bf16.mxu1 %v16729_v37 }
 0x550   : > { %16716 = vmatpush3.bf16.msra.mxu0 %v16713_v22  ;;  %16732 = vmatpush3.bf16.msra.mxu1 %v16729_v37 }
 0x551   : > { %15119 = vmatprep.subr.mxu0 %v7721_v13  ;;  %15140 = vmatprep.subr.mxu1 %v7723_v61 }
 0x554   : > { %15120 = vmatpush3.msra.mxu0 %v7721_v13  ;;  %15141 = vmatpush3.msra.mxu1 %v7723_v61 }
 0x555   : > { %15122 = vmatmul.mubr.msk.f32.vlgmr.msra.gmra.mrb[110].mxu0 %vm660_vm1, %v19325_v49  ;;  %15143 = vmatmul.mubr.msk.f32.vlgmr.msra.gmra.mrb[110].mxu1 %vm660_vm1, %v19325_v49 }
 0x556   : > { %16734 = vmatprep.subr.bf16.mxu0 %v16713_v22  ;;  %16750 = vmatprep.subr.bf16.mxu1 %v16729_v37 }
 0x557   : > { %16736 = vmatpush3.bf16.msra.mxu0 %v16713_v22  ;;  %16752 = vmatpush3.bf16.msra.mxu1 %v16729_v37 }
 0x558   : > { %16738 = vmatprep.subr.bf16.mxu0 %v16737_v46  ;;  %16754 = vmatprep.subr.bf16.mxu1 %v16753_v6 }
 0x559   : > { %15163 = vmatprep.mubr.msk.f32.mxu0 %vm660_vm1, %v19161_v59  ;;  %15184 = vmatprep.mubr.msk.f32.mxu1 %vm660_vm1, %v19161_v59 }
 0x55b   : > { %16740 = vmatpush3.bf16.msra.mxu0 %v16737_v46  ;;  %16756 = vmatpush3.bf16.msra.mxu1 %v16753_v6 }
 0x55c   : > { %16742 = vmatprep.subr.bf16.mxu0 %v16741_v60  ;;  %16758 = vmatprep.subr.bf16.mxu1 %v16757_v8 }
 0x55f   : > { %16744 = vmatpush3.bf16.msra.mxu0 %v16741_v60  ;;  %16760 = vmatpush3.bf16.msra.mxu1 %v16757_v8 }
 0x560   : > { %16746 = vmatprep.subr.bf16.mxu0 %v16745_v55  ;;  %16762 = vmatprep.subr.bf16.mxu1 %v16761_v3 }
 0x563   : > { %16748 = vmatpush3.bf16.msra.mxu0 %v16745_v55  ;;  %16764 = vmatpush3.bf16.msra.mxu1 %v16761_v3 }
 0x564   : > { %15161 = vmatprep.subr.mxu0 %v7725_v19  ;;  %15182 = vmatprep.subr.mxu1 %v7727_v29 }
 0x567   : > { %15162 = vmatpush3.msra.mxu0 %v7725_v19  ;;  %15183 = vmatpush3.msra.mxu1 %v7727_v29 }
 0x568   : > { %15164 = vmatmul.mubr.msk.f32.vlgmr.msra.gmra.mrb[112].mxu0 %vm660_vm1, %v19325_v49  ;;  %15185 = vmatmul.mubr.msk.f32.vlgmr.msra.gmra.mrb[112].mxu1 %vm660_vm1, %v19325_v49 }
 0x569   : > { %16766 = vmatprep.subr.bf16.mxu0 %v16745_v55  ;;  %16782 = vmatprep.subr.bf16.mxu1 %v16761_v3 }
 0x56a   : > { %16768 = vmatpush3.bf16.msra.mxu0 %v16745_v55  ;;  %16784 = vmatpush3.bf16.msra.mxu1 %v16761_v3 }
 0x56b   : > { %16770 = vmatprep.subr.bf16.mxu0 %v16769_v23  ;;  %16786 = vmatprep.subr.bf16.mxu1 %v16785_v20 }
 0x56c   : > { %15205 = vmatprep.mubr.msk.f32.mxu0 %vm660_vm1, %v19161_v59  ;;  %15226 = vmatprep.mubr.msk.f32.mxu1 %vm660_vm1, %v19161_v59 }
 0x56e   : > { %16772 = vmatpush3.bf16.msra.mxu0 %v16769_v23  ;;  %16788 = vmatpush3.bf16.msra.mxu1 %v16785_v20 }
 0x56f   : > { %16774 = vmatprep.subr.bf16.mxu0 %v16773_v34  ;;  %16790 = vmatprep.subr.bf16.mxu1 %v16789_v0 }
 0x572   : > { %16776 = vmatpush3.bf16.msra.mxu0 %v16773_v34  ;;  %16792 = vmatpush3.bf16.msra.mxu1 %v16789_v0 }
 0x573   : > { %16778 = vmatprep.subr.bf16.mxu0 %v16777_v17  ;;  %16794 = vmatprep.subr.bf16.mxu1 %v16793_v32 }
 0x576   : > { %16780 = vmatpush3.bf16.msra.mxu0 %v16777_v17  ;;  %16796 = vmatpush3.bf16.msra.mxu1 %v16793_v32 }
 0x577   : > { %15203 = vmatprep.subr.mxu0 %v7729_v36  ;;  %15224 = vmatprep.subr.mxu1 %v7731_v12 }
 0x57a   : > { %15204 = vmatpush3.msra.mxu0 %v7729_v36  ;;  %15225 = vmatpush3.msra.mxu1 %v7731_v12 }
 0x57b   : > { %15206 = vmatmul.mubr.msk.f32.vlgmr.msra.gmra.mrb[114].mxu0 %vm660_vm1, %v19325_v49  ;;  %15227 = vmatmul.mubr.msk.f32.vlgmr.msra.gmra.mrb[114].mxu1 %vm660_vm1, %v19325_v49 }
 0x57c   : > { %16798 = vmatprep.subr.bf16.mxu0 %v16777_v17  ;;  %16814 = vmatprep.subr.bf16.mxu1 %v16793_v32 }
 0x57d   : > { %16800 = vmatpush3.bf16.msra.mxu0 %v16777_v17  ;;  %16816 = vmatpush3.bf16.msra.mxu1 %v16793_v32 }
 0x57e   : > { %16802 = vmatprep.subr.bf16.mxu0 %v16801_v39  ;;  %16818 = vmatprep.subr.bf16.mxu1 %v16817_v15 }
 0x57f   : > { %15247 = vmatprep.mubr.msk.f32.mxu0 %vm660_vm1, %v19161_v59  ;;  %15268 = vmatprep.mubr.msk.f32.mxu1 %vm660_vm1, %v19161_v59  ;;  %v19455_v59 = vsel %vm4108_vm5, 1.0, %v17085_v7 }
 0x581   : > { %16804 = vmatpush3.bf16.msra.mxu0 %v16801_v39  ;;  %16820 = vmatpush3.bf16.msra.mxu1 %v16817_v15 }
 0x582   : > { %16806 = vmatprep.subr.bf16.mxu0 %v16805_v40  ;;  %16822 = vmatprep.subr.bf16.mxu1 %v16821_v28 }
 0x585   : > { %16808 = vmatpush3.bf16.msra.mxu0 %v16805_v40  ;;  %16824 = vmatpush3.bf16.msra.mxu1 %v16821_v28 }
 0x586   : > { %16810 = vmatprep.subr.bf16.mxu0 %v16809_v31  ;;  %16826 = vmatprep.subr.bf16.mxu1 %v16825_v5 }
 0x589   : > { %16812 = vmatpush3.bf16.msra.mxu0 %v16809_v31  ;;  %16828 = vmatpush3.bf16.msra.mxu1 %v16825_v5 }
 0x58a   : > { %15245 = vmatprep.subr.mxu0 %v7759_v27  ;;  %15266 = vmatprep.subr.mxu1 %v7766_v33 }
 0x58d   : > { %15246 = vmatpush3.msra.mxu0 %v7759_v27  ;;  %15267 = vmatpush3.msra.mxu1 %v7766_v33 }
 0x58e   : > { %15248 = vmatmul.mubr.msk.f32.vlgmr.msra.gmra.mrb[116].mxu0 %vm660_vm1, %v19325_v49  ;;  %15269 = vmatmul.mubr.msk.f32.vlgmr.msra.gmra.mrb[116].mxu1 %vm660_vm1, %v19325_v49  ;;  %vm9504_vm1 = vcmask 179200  }
 0x58f   : > { %16830 = vmatprep.subr.msk.bf16.mxu0 %vm18216_vm4, %v17087_v4  ;;  %16834 = vmatprep.subr.msk.bf16.mxu1 %vm18216_vm4, %v17087_v4 }
 0x590   : > { %16832 = vmatpush3.bf16.msk.msra.mxu0 %vm18216_vm4, %v17087_v4  ;;  %16836 = vmatpush3.bf16.msk.msra.mxu1 %vm18216_vm4, %v17087_v4 }
 0x591   : > { %15275 = vmatprep.subr.msk.mxu0 %vm9511_vm0, %v19455_v59  ;;  %15284 = vmatprep.subr.msk.mxu1 %vm9511_vm0, %v19455_v59 }
 0x594   : > { %15276 = vmatpush3.msk.msra.mxu0 %vm9511_vm0, %v19455_v59  ;;  %15285 = vmatpush3.msk.msra.mxu1 %vm9511_vm0, %v19455_v59 }
 0x595   : > { %16838 = vmatprep.subr.msk.bf16.mxu0 %vm18216_vm4, %v17087_v4  ;;  %16842 = vmatprep.subr.msk.bf16.mxu1 %vm18216_vm4, %v17087_v4 }
 0x5a3   : > { %v14829_v18 = vpop.f32.mrb[96].mxu0  ;;  %v14850_v49 = vpop.f32.mrb[96].mxu1 }
 0x5a4   : > { %v7929_v57 = vpop.f32.mrb[97].mxu1  ;;  %v7854_v14 = vpop.f32.mrb[97].mxu0  ;;  %v7860_v56 = vadd.f32 %v14829_v18, %v19483_v51  ;;  %v7935_v53 = vadd.f32 %v14850_v49, %v19483_v51 }
 0x5a5   : > { %v7930_v43 = vadd.f32 %v7929_v57, %v19485_v11  ;;  %v7855_v62 = vadd.f32 %v7854_v14, %v19485_v11 }
 0x5a6   : > { %v9439_v38 = vmax.f32 %v7860_v56, 0.0  ;;  %v9441_v44 = vmax.f32 %v7935_v53, 0.0 }
 0x5a7   : > { %v9440_v26 = vmax.f32 %v7930_v43, 0.0  ;;  %v9438_v1 = vmax.f32 %v7855_v62, 0.0 }
 0x5a8   : > { %v19491_v42 = vmax.f32 %v9439_v38, %v9441_v44 }
 0x5a9   : > { %v19493_v24 = vmax.f32 %v9438_v1, %v9440_v26 }
 0x5ab   : > { %15277 = vmatprep.mubr.msk.f32.mxu0 %vm9504_vm1, %v19493_v24 }
 0x5ac   : > { %15278 = vmatmul.mubr.msk.f32.vlgmr.msra.gmra.mrb[118].mxu0 %vm9504_vm1, %v19491_v42 }
 0x5ad   : > { %16840 = vmatpush3.bf16.msk.msra.mxu0 %vm18216_vm4, %v17087_v4 }
 0x5ae   : > { %15293 = vmatprep.subr.msk.mxu0 %vm9511_vm0, %v19455_v59 }
 0x5b1   : > { %15294 = vmatpush3.msk.msra.mxu0 %vm9511_vm0, %v19455_v59 }
 0x5b2   : > { %16846 = vmatprep.subr.msk.bf16.mxu0 %vm18216_vm4, %v17087_v4 }
 0x5b6   : > { %v14871_v63 = vpop.f32.mrb[98].mxu0  ;;  %v14892_v9 = vpop.f32.mrb[98].mxu1 }
 0x5b7   : > { %v8010_v45 = vadd.f32 %v14871_v63, %v19483_v51  ;;  %v8085_v13 = vadd.f32 %v14892_v9, %v19483_v51  ;;  %v8004_v47 = vpop.f32.mrb[99].mxu0  ;;  %v8079_v52 = vpop.f32.mrb[99].mxu1 }
 0x5b8   : > { %v8005_v41 = vadd.f32 %v8004_v47, %v19485_v11  ;;  %v8080_v48 = vadd.f32 %v8079_v52, %v19485_v11 }
 0x5b9   : > { %v9443_v22 = vmax.f32 %v8010_v45, 0.0  ;;  %v9445_v37 = vmax.f32 %v8085_v13, 0.0 }
 0x5ba   : > { %v9442_v61 = vmax.f32 %v8005_v41, 0.0  ;;  %v9444_v46 = vmax.f32 %v8080_v48, 0.0 }
 0x5bb   : > { %v19513_v6 = vmax.f32 %v9443_v22, %v9445_v37 }
 0x5bc   : > { %v19515_v19 = vmax.f32 %v9442_v61, %v9444_v46 }
 0x5be   : > { %15286 = vmatprep.mubr.msk.f32.mxu1 %vm9504_vm1, %v19515_v19 }
 0x5bf   : > { %15287 = vmatmul.mubr.msk.f32.vlgmr.msra.gmra.mrb[118].mxu1 %vm9504_vm1, %v19513_v6 }
 0x5c0   : > { %16844 = vmatpush3.bf16.msk.msra.mxu1 %vm18216_vm4, %v17087_v4 }
 0x5c1   : > { %15302 = vmatprep.subr.msk.mxu1 %vm9511_vm0, %v19455_v59 }
 0x5c4   : > { %15303 = vmatpush3.msk.msra.mxu1 %vm9511_vm0, %v19455_v59 }
 0x5c5   : > { %16850 = vmatprep.subr.msk.bf16.mxu1 %vm18216_vm4, %v17087_v4 }
 0x5c9   : > { %v14913_v16 = vpop.f32.mrb[100].mxu0  ;;  %v14934_v60 = vpop.f32.mrb[100].mxu1 }
 0x5ca   : > { %v8160_v8 = vadd.f32 %v14913_v16, %v19483_v51  ;;  %v8235_v2 = vadd.f32 %v14934_v60, %v19483_v51  ;;  %v8154_v55 = vpop.f32.mrb[101].mxu0  ;;  %v8229_v3 = vpop.f32.mrb[101].mxu1 }
 0x5cb   : > { %v8155_v29 = vadd.f32 %v8154_v55, %v19485_v11  ;;  %v8230_v23 = vadd.f32 %v8229_v3, %v19485_v11 }
 0x5cc   : > { %v9447_v20 = vmax.f32 %v8160_v8, 0.0  ;;  %v9449_v36 = vmax.f32 %v8235_v2, 0.0 }
 0x5cd   : > { %v9446_v54 = vmax.f32 %v8155_v29, 0.0  ;;  %v9448_v34 = vmax.f32 %v8230_v23, 0.0 }
 0x5ce   : > { %v19535_v0 = vmax.f32 %v9447_v20, %v9449_v36 }
 0x5cf   : > { %v19537_v21 = vmax.f32 %v9446_v54, %v9448_v34 }
 0x5d1   : > { %15295 = vmatprep.mubr.msk.f32.mxu0 %vm9504_vm1, %v19537_v21 }
 0x5d2   : > { %15296 = vmatmul.mubr.msk.f32.vlgmr.msra.gmra.mrb[120].mxu0 %vm9504_vm1, %v19535_v0 }
 0x5d3   : > { %16848 = vmatpush3.bf16.msk.msra.mxu0 %vm18216_vm4, %v17087_v4 }
 0x5d4   : > { %15311 = vmatprep.subr.msk.mxu0 %vm9511_vm0, %v19455_v59 }
 0x5d7   : > { %15312 = vmatpush3.msk.msra.mxu0 %vm9511_vm0, %v19455_v59 }
 0x5d8   : > { %16854 = vmatprep.subr.msk.bf16.mxu0 %vm18216_vm4, %v17087_v4 }
 0x5dc   : > { %v14955_v17 = vpop.f32.mrb[102].mxu0  ;;  %v14976_v32 = vpop.f32.mrb[102].mxu1 }
 0x5dd   : > { %v8310_v12 = vadd.f32 %v14955_v17, %v19483_v51  ;;  %v8385_v39 = vadd.f32 %v14976_v32, %v19483_v51  ;;  %v8304_v15 = vpop.f32.mrb[103].mxu0  ;;  %v8379_v27 = vpop.f32.mrb[103].mxu1 }
 0x5de   : > { %v8305_v58 = vadd.f32 %v8304_v15, %v19485_v11  ;;  %v8380_v40 = vadd.f32 %v8379_v27, %v19485_v11 }
 0x5df   : > { %v9451_v28 = vmax.f32 %v8310_v12, 0.0  ;;  %v9453_v50 = vmax.f32 %v8385_v39, 0.0 }
 0x5e0   : > { %v9450_v31 = vmax.f32 %v8305_v58, 0.0  ;;  %v9452_v5 = vmax.f32 %v8380_v40, 0.0 }
 0x5e1   : > { %v19557_v33 = vmax.f32 %v9451_v28, %v9453_v50 }
 0x5e2   : > { %v19559_v18 = vmax.f32 %v9450_v31, %v9452_v5 }
 0x5e4   : > { %15304 = vmatprep.mubr.msk.f32.mxu1 %vm9504_vm1, %v19559_v18 }
 0x5e5   : > { %15305 = vmatmul.mubr.msk.f32.vlgmr.msra.gmra.mrb[120].mxu1 %vm9504_vm1, %v19557_v33 }
 0x5e6   : > { %16852 = vmatpush3.bf16.msk.msra.mxu1 %vm18216_vm4, %v17087_v4 }
 0x5e7   : > { %15320 = vmatprep.subr.msk.mxu1 %vm9511_vm0, %v19455_v59 }
 0x5ea   : > { %15321 = vmatpush3.msk.msra.mxu1 %vm9511_vm0, %v19455_v59 }
 0x5eb   : > { %16858 = vmatprep.subr.msk.bf16.mxu1 %vm18216_vm4, %v17087_v4 }
 0x5ef   : > { %v14997_v49 = vpop.f32.mrb[104].mxu0  ;;  %v15018_v57 = vpop.f32.mrb[104].mxu1 }
 0x5f0   : > { %v8460_v14 = vadd.f32 %v14997_v49, %v19483_v51  ;;  %v8535_v56 = vadd.f32 %v15018_v57, %v19483_v51  ;;  %v8454_v53 = vpop.f32.mrb[105].mxu0  ;;  %v8529_v43 = vpop.f32.mrb[105].mxu1 }
 0x5f1   : > { %v8455_v62 = vadd.f32 %v8454_v53, %v19485_v11  ;;  %v8530_v38 = vadd.f32 %v8529_v43, %v19485_v11 }
 0x5f2   : > { %v9455_v44 = vmax.f32 %v8460_v14, 0.0  ;;  %v9457_v26 = vmax.f32 %v8535_v56, 0.0 }
 0x5f3   : > { %v9454_v1 = vmax.f32 %v8455_v62, 0.0  ;;  %v9456_v63 = vmax.f32 %v8530_v38, 0.0 }
 0x5f4   : > { %v19579_v9 = vmax.f32 %v9455_v44, %v9457_v26 }
 0x5f5   : > { %v19581_v45 = vmax.f32 %v9454_v1, %v9456_v63 }
 0x5f7   : > { %15313 = vmatprep.mubr.msk.f32.mxu0 %vm9504_vm1, %v19581_v45 }
 0x5f8   : > { %15314 = vmatmul.mubr.msk.f32.vlgmr.msra.gmra.mrb[122].mxu0 %vm9504_vm1, %v19579_v9 }
 0x5f9   : > { %16856 = vmatpush3.bf16.msk.msra.mxu0 %vm18216_vm4, %v17087_v4 }
 0x5fa   : > { %15329 = vmatprep.subr.msk.mxu0 %vm9511_vm0, %v19455_v59 }
 0x5fd   : > { %15330 = vmatpush3.msk.msra.mxu0 %vm9511_vm0, %v19455_v59 }
 0x5fe   : > { %16862 = vmatprep.subr.msk.bf16.mxu0 %vm18216_vm4, %v17087_v4 }
 0x602   : > { %v15039_v13 = vpop.f32.mrb[106].mxu0  ;;  %v15060_v47 = vpop.f32.mrb[106].mxu1 }
 0x603   : > { %v8610_v52 = vadd.f32 %v15039_v13, %v19483_v51  ;;  %v8685_v41 = vadd.f32 %v15060_v47, %v19483_v51  ;;  %v8604_v48 = vpop.f32.mrb[107].mxu0  ;;  %v8679_v22 = vpop.f32.mrb[107].mxu1 }
 0x604   : > { %v8605_v37 = vadd.f32 %v8604_v48, %v19485_v11  ;;  %v8680_v61 = vadd.f32 %v8679_v22, %v19485_v11 }
 0x605   : > { %v9459_v46 = vmax.f32 %v8610_v52, 0.0  ;;  %v9461_v16 = vmax.f32 %v8685_v41, 0.0 }
 0x606   : > { %v9458_v60 = vmax.f32 %v8605_v37, 0.0  ;;  %v9460_v8 = vmax.f32 %v8680_v61, 0.0 }
 0x607   : > { %v19601_v2 = vmax.f32 %v9459_v46, %v9461_v16 }
 0x608   : > { %v19603_v55 = vmax.f32 %v9458_v60, %v9460_v8 }
 0x60a   : > { %15322 = vmatprep.mubr.msk.f32.mxu1 %vm9504_vm1, %v19603_v55 }
 0x60b   : > { %15323 = vmatmul.mubr.msk.f32.vlgmr.msra.gmra.mrb[122].mxu1 %vm9504_vm1, %v19601_v2 }
 0x60c   : > { %16860 = vmatpush3.bf16.msk.msra.mxu1 %vm18216_vm4, %v17087_v4 }
 0x60d   : > { %15338 = vmatprep.subr.msk.mxu1 %vm9511_vm0, %v19455_v59 }
 0x610   : > { %15339 = vmatpush3.msk.msra.mxu1 %vm9511_vm0, %v19455_v59 }
 0x611   : > { %16866 = vmatprep.subr.msk.bf16.mxu1 %vm18216_vm4, %v17087_v4 }
 0x615   : > { %v15081_v3 = vpop.f32.mrb[108].mxu0  ;;  %v15102_v29 = vpop.f32.mrb[108].mxu1 }
 0x616   : > { %v8760_v23 = vadd.f32 %v15081_v3, %v19483_v51  ;;  %v8835_v20 = vadd.f32 %v15102_v29, %v19483_v51  ;;  %v8754_v36 = vpop.f32.mrb[109].mxu0  ;;  %v8829_v54 = vpop.f32.mrb[109].mxu1 }
 0x617   : > { %v8755_v34 = vadd.f32 %v8754_v36, %v19485_v11  ;;  %v8830_v17 = vadd.f32 %v8829_v54, %v19485_v11 }
 0x618   : > { %v9463_v32 = vmax.f32 %v8760_v23, 0.0  ;;  %v9465_v12 = vmax.f32 %v8835_v20, 0.0 }
 0x619   : > { %v9462_v39 = vmax.f32 %v8755_v34, 0.0  ;;  %v9464_v15 = vmax.f32 %v8830_v17, 0.0 }
 0x61a   : > { %v19623_v27 = vmax.f32 %v9463_v32, %v9465_v12 }
 0x61b   : > { %v19625_v58 = vmax.f32 %v9462_v39, %v9464_v15  ;;  %v19699_v15 = vsel %vm4127_vm15, 1.0, %v17085_v7 }
 0x61d   : > { %15331 = vmatprep.mubr.msk.f32.mxu0 %vm9504_vm1, %v19625_v58 }
 0x61e   : > { %15332 = vmatmul.mubr.msk.f32.vlgmr.msra.gmra.mrb[124].mxu0 %vm9504_vm1, %v19623_v27 }
 0x61f   : > { %16864 = vmatpush3.bf16.msk.msra.mxu0 %vm18216_vm4, %v17087_v4 }
 0x620   : > { %15347 = vmatprep.subr.msk.mxu0 %vm9511_vm0, %v19455_v59 }
 0x623   : > { %15348 = vmatpush3.msk.msra.mxu0 %vm9511_vm0, %v19455_v59 }
 0x624   : > { %16870 = vmatprep.subr.msk.bf16.mxu0 %vm18216_vm4, %v17087_v4 }
 0x628   : > { %v15123_v40 = vpop.f32.mrb[110].mxu0  ;;  %v15144_v28 = vpop.f32.mrb[110].mxu1 }
 0x629   : > { %v8910_v50 = vadd.f32 %v15123_v40, %v19483_v51  ;;  %v8985_v31 = vadd.f32 %v15144_v28, %v19483_v51  ;;  %v8904_v5 = vpop.f32.mrb[111].mxu0  ;;  %v8979_v49 = vpop.f32.mrb[111].mxu1 }
 0x62a   : > { %v8905_v57 = vadd.f32 %v8904_v5, %v19485_v11  ;;  %v8980_v14 = vadd.f32 %v8979_v49, %v19485_v11 }
 0x62b   : > { %v9467_v56 = vmax.f32 %v8910_v50, 0.0  ;;  %v9469_v53 = vmax.f32 %v8985_v31, 0.0 }
 0x62c   : > { %v9466_v43 = vmax.f32 %v8905_v57, 0.0  ;;  %v9468_v62 = vmax.f32 %v8980_v14, 0.0 }
 0x62d   : > { %v19645_v38 = vmax.f32 %v9467_v56, %v9469_v53 }
 0x62e   : > { %v19647_v44 = vmax.f32 %v9466_v43, %v9468_v62 }
 0x630   : > { %15340 = vmatprep.mubr.msk.f32.mxu1 %vm9504_vm1, %v19647_v44 }
 0x631   : > { %15341 = vmatmul.mubr.msk.f32.vlgmr.msra.gmra.mrb[124].mxu1 %vm9504_vm1, %v19645_v38 }
 0x632   : > { %16868 = vmatpush3.bf16.msk.msra.mxu1 %vm18216_vm4, %v17087_v4 }
 0x633   : > { %15356 = vmatprep.subr.msk.mxu1 %vm9511_vm0, %v19455_v59 }
 0x636   : > { %15357 = vmatpush3.msk.msra.mxu1 %vm9511_vm0, %v19455_v59 }
 0x637   : > { %16874 = vmatprep.subr.msk.bf16.mxu1 %vm18682_vm14, %v17087_v4 }
 0x63b   : > { %v15165_v26 = vpop.f32.mrb[112].mxu0  ;;  %v15186_v1 = vpop.f32.mrb[112].mxu1 }
 0x63c   : > { %v9060_v63 = vadd.f32 %v15165_v26, %v19483_v51  ;;  %v9135_v13 = vadd.f32 %v15186_v1, %v19483_v51  ;;  %v9054_v47 = vpop.f32.mrb[113].mxu0  ;;  %v9129_v52 = vpop.f32.mrb[113].mxu1 }
 0x63d   : > { %v9055_v41 = vadd.f32 %v9054_v47, %v19485_v11  ;;  %v9130_v48 = vadd.f32 %v9129_v52, %v19485_v11 }
 0x63e   : > { %v9471_v22 = vmax.f32 %v9060_v63, 0.0  ;;  %v9473_v37 = vmax.f32 %v9135_v13, 0.0 }
 0x63f   : > { %v9470_v61 = vmax.f32 %v9055_v41, 0.0  ;;  %v9472_v46 = vmax.f32 %v9130_v48, 0.0 }
 0x640   : > { %v19667_v16 = vmax.f32 %v9471_v22, %v9473_v37 }
 0x641   : > { %v19669_v60 = vmax.f32 %v9470_v61, %v9472_v46 }
 0x643   : > { %15349 = vmatprep.mubr.msk.f32.mxu0 %vm9504_vm1, %v19669_v60 }
 0x644   : > { %15350 = vmatmul.mubr.msk.f32.vlgmr.msra.gmra.mrb[126].mxu0 %vm9504_vm1, %v19667_v16 }
 0x645   : > { %16872 = vmatpush3.bf16.msk.msra.mxu0 %vm18216_vm4, %v17087_v4  ;;  %vm11250_vm4 = vcmask 89088  }
 0x646   : > { %15365 = vmatprep.subr.msk.mxu0 %vm9511_vm0, %v19455_v59 }
 0x649   : > { %15366 = vmatpush3.msk.msra.mxu0 %vm9511_vm0, %v19455_v59 }
 0x64a   : > { %16878 = vmatprep.subr.msk.bf16.mxu0 %vm18682_vm14, %v17087_v4 }
 0x64e   : > { %v15207_v8 = vpop.f32.mrb[114].mxu0  ;;  %v15228_v3 = vpop.f32.mrb[114].mxu1 }
 0x64f   : > { %v9210_v29 = vadd.f32 %v15207_v8, %v19483_v51  ;;  %v9285_v23 = vadd.f32 %v15228_v3, %v19483_v51  ;;  %v9204_v20 = vpop.f32.mrb[115].mxu0  ;;  %v9279_v36 = vpop.f32.mrb[115].mxu1 }
 0x650   : > { %v9205_v30 = vadd.f32 %v9204_v20, %v19485_v11  ;;  %v9280_v54 = vadd.f32 %v9279_v36, %v19485_v11 }
 0x651   : > { %v9475_v34 = vmax.f32 %v9210_v29, 0.0  ;;  %v9477_v17 = vmax.f32 %v9285_v23, 0.0 }
 0x652   : > { %v9474_v32 = vmax.f32 %v9205_v30, 0.0  ;;  %v9476_v59 = vmax.f32 %v9280_v54, 0.0 }
 0x653   : > { %v19689_v12 = vmax.f32 %v9475_v34, %v9477_v17 }
 0x654   : > { %v19691_v39 = vmax.f32 %v9474_v32, %v9476_v59 }
 0x656   : > { %15358 = vmatprep.mubr.msk.f32.mxu1 %vm9504_vm1, %v19691_v39 }
 0x657   : > { %15359 = vmatmul.mubr.msk.f32.vlgmr.msra.gmra.mrb[126].mxu1 %vm9504_vm1, %v19689_v12 }
 0x658   : > { %16876 = vmatpush3.bf16.msk.msra.mxu1 %vm18682_vm14, %v17087_v4  ;;  %15376 = vmatprep.mubr.msk.f32.mxu1 %vm9504_vm1, %v19493_v24 }
 0x659   : > { %15374 = vmatprep.subr.msk.mxu1 %vm9511_vm0, %v19699_v15 }
 0x65c   : > { %15375 = vmatpush3.msk.msra.mxu1 %vm9511_vm0, %v19699_v15 }
 0x65d   : > { %15377 = vmatmul.mubr.msk.f32.vlgmr.msra.gmra.mrb[128].mxu1 %vm9504_vm1, %v19491_v42  ;;  %16882 = vmatprep.subr.msk.bf16.mxu1 %vm18682_vm14, %v17087_v4 }
 0x65e   : > { %16884 = vmatpush3.bf16.msk.msra.mxu1 %vm18682_vm14, %v17087_v4  ;;  %15394 = vmatprep.mubr.msk.f32.mxu1 %vm9504_vm1, %v19537_v21 }
 0x65f   : > { %15392 = vmatprep.subr.msk.mxu1 %vm9511_vm0, %v19699_v15 }
 0x661   : > { %v15249_v7 = vpop.f32.mrb[116].mxu0  ;;  %v15270_v25 = vpop.f32.mrb[116].mxu1 }
 0x662   : > { %v9360_v10 = vadd.f32 %v15249_v7, %v19483_v51  ;;  %v9435_v42 = vadd.f32 %v15270_v25, %v19483_v51  ;;  %v9354_v24 = vpop.f32.mrb[117].mxu0  ;;  %v9429_v40 = vpop.f32.mrb[117].mxu1  ;;  %15393 = vmatpush3.msk.msra.mxu1 %vm9511_vm0, %v19699_v15 }
 0x663   : > { %v9355_v28 = vadd.f32 %v9354_v24, %v19485_v11  ;;  %v9430_v50 = vadd.f32 %v9429_v40, %v19485_v11  ;;  %15395 = vmatmul.mubr.msk.f32.vlgmr.msra.gmra.mrb[130].mxu1 %vm9504_vm1, %v19535_v0  ;;  %16890 = vmatprep.subr.msk.bf16.mxu1 %vm18682_vm14, %v17087_v4 }
 0x664   : > { %v9479_v21 = vmax.f32 %v9360_v10, 0.0  ;;  %v9481_v31 = vmax.f32 %v9435_v42, 0.0  ;;  %16892 = vmatpush3.bf16.msk.msra.mxu1 %vm18682_vm14, %v17087_v4  ;;  %15412 = vmatprep.mubr.msk.f32.mxu1 %vm9504_vm1, %v19581_v45 }
 0x665   : > { %v9478_v51 = vmax.f32 %v9355_v28, 0.0  ;;  %v9480_v5 = vmax.f32 %v9430_v50, 0.0  ;;  %15410 = vmatprep.subr.msk.mxu1 %vm9511_vm0, %v19699_v15 }
 0x666   : > { %v9503_v11 = vmax.f32 %v9479_v21, %v9481_v31 }
 0x667   : > { %v9502_v0 = vmax.f32 %v9478_v51, %v9480_v5 }
 0x668   : > { %15411 = vmatpush3.msk.msra.mxu1 %vm9511_vm0, %v19699_v15 }
 0x669   : > { %15367 = vmatprep.mubr.msk.f32.mxu0 %vm9504_vm1, %v9502_v0  ;;  %15413 = vmatmul.mubr.msk.f32.vlgmr.msra.gmra.mrb[132].mxu1 %vm9504_vm1, %v19579_v9 }
 0x66a   : > { %16898 = vmatprep.subr.msk.bf16.mxu1 %vm18682_vm14, %v17087_v4  ;;  %15368 = vmatmul.mubr.msk.f32.vlgmr.msra.gmra.mrb[128].mxu0 %vm9504_vm1, %v9503_v11 }
 0x66b   : > { %16880 = vmatpush3.bf16.msk.msra.mxu0 %vm18682_vm14, %v17087_v4  ;;  %16900 = vmatpush3.bf16.msk.msra.mxu1 %vm18682_vm14, %v17087_v4 }
 0x66c   : > { %15430 = vmatprep.mubr.msk.f32.mxu1 %vm9504_vm1, %v19625_v58  ;;  %15385 = vmatprep.mubr.msk.f32.mxu0 %vm9504_vm1, %v19515_v19 }
 0x66d   : > { %15383 = vmatprep.subr.msk.mxu0 %vm9511_vm0, %v19699_v15  ;;  %15428 = vmatprep.subr.msk.mxu1 %vm9511_vm0, %v19699_v15 }
 0x66f   : > { %15384 = vmatpush3.msk.msra.mxu0 %vm9511_vm0, %v19699_v15  ;;  %15429 = vmatpush3.msk.msra.mxu1 %vm9511_vm0, %v19699_v15 }
 0x670   : > { %15386 = vmatmul.mubr.msk.f32.vlgmr.msra.gmra.mrb[130].mxu0 %vm9504_vm1, %v19513_v6  ;;  %16886 = vmatprep.subr.msk.bf16.mxu0 %vm18682_vm14, %v17087_v4 }
 0x671   : > { %15431 = vmatmul.mubr.msk.f32.vlgmr.msra.gmra.mrb[134].mxu1 %vm9504_vm1, %v19623_v27  ;;  %16906 = vmatprep.subr.msk.bf16.mxu1 %vm18682_vm14, %v17087_v4 }
 0x672   : > { %16888 = vmatpush3.bf16.msk.msra.mxu0 %vm18682_vm14, %v17087_v4  ;;  %15403 = vmatprep.mubr.msk.f32.mxu0 %vm9504_vm1, %v19559_v18 }
 0x673   : > { %16908 = vmatpush3.bf16.msk.msra.mxu1 %vm18682_vm14, %v17087_v4  ;;  %15448 = vmatprep.mubr.msk.f32.mxu1 %vm9504_vm1, %v19669_v60 }
 0x674   : > { %15401 = vmatprep.subr.msk.mxu0 %vm9511_vm0, %v19699_v15  ;;  %15446 = vmatprep.subr.msk.mxu1 %vm9511_vm0, %v19699_v15 }
 0x676   : > { %15402 = vmatpush3.msk.msra.mxu0 %vm9511_vm0, %v19699_v15 }
 0x677   : > { %15447 = vmatpush3.msk.msra.mxu1 %vm9511_vm0, %v19699_v15  ;;  %15404 = vmatmul.mubr.msk.f32.vlgmr.msra.gmra.mrb[132].mxu0 %vm9504_vm1, %v19557_v33 }
 0x678   : > { %16894 = vmatprep.subr.msk.bf16.mxu0 %vm18682_vm14, %v17087_v4  ;;  %15449 = vmatmul.mubr.msk.f32.vlgmr.msra.gmra.mrb[136].mxu1 %vm9504_vm1, %v19667_v16 }
 0x679   : > { %16914 = vmatprep.subr.msk.bf16.mxu1 %vm18682_vm14, %v17087_v4  ;;  %16896 = vmatpush3.bf16.msk.msra.mxu0 %vm18682_vm14, %v17087_v4 }
 0x67a   : > { %15421 = vmatprep.mubr.msk.f32.mxu0 %vm9504_vm1, %v19603_v55  ;;  %16916 = vmatpush3.bf16.msk.msra.mxu1 %vm18682_vm14, %v17087_v4 }
 0x67b   : > { %15466 = vmatprep.mubr.msk.f32.mxu1 %vm9504_vm1, %v9502_v0  ;;  %15419 = vmatprep.subr.msk.mxu0 %vm9511_vm0, %v19699_v15 }
 0x67c   : > { %15464 = vmatprep.subr.msk.mxu1 %vm9511_vm0, %v19699_v15 }
 0x67d   : > { %15420 = vmatpush3.msk.msra.mxu0 %vm9511_vm0, %v19699_v15 }
 0x67e   : > { %15465 = vmatpush3.msk.msra.mxu1 %vm9511_vm0, %v19699_v15  ;;  %15422 = vmatmul.mubr.msk.f32.vlgmr.msra.gmra.mrb[134].mxu0 %vm9504_vm1, %v19601_v2 }
 0x67f   : > { %16902 = vmatprep.subr.msk.bf16.mxu0 %vm18682_vm14, %v17087_v4  ;;  %15467 = vmatmul.mubr.msk.f32.vlgmr.msra.gmra.mrb[138].mxu1 %vm9504_vm1, %v9503_v11  ;;  %v15279_v6 = vpop.f32.mrb[118].mxu0 }
 0x680   : > { %16904 = vmatpush3.bf16.msk.msra.mxu0 %vm18682_vm14, %v17087_v4  ;;  %15439 = vmatprep.mubr.msk.f32.mxu0 %vm9504_vm1, %v19647_v44  ;;  %v9581_v19 = vpop.f32.mrb[119].mxu0 }
 0x681   : > { %15437 = vmatprep.subr.msk.mxu0 %vm9511_vm0, %v19699_v15 }
 0x684   : > { %15438 = vmatpush3.msk.msra.mxu0 %vm9511_vm0, %v19699_v15 }
 0x685   : > { %15440 = vmatmul.mubr.msk.f32.vlgmr.msra.gmra.mrb[136].mxu0 %vm9504_vm1, %v19645_v38  ;;  %16910 = vmatprep.subr.msk.bf16.mxu0 %vm18682_vm14, %v17087_v4 }
 0x686   : > { %16912 = vmatpush3.bf16.msk.msra.mxu0 %vm18682_vm14, %v17087_v4  ;;  %15457 = vmatprep.mubr.msk.f32.mxu0 %vm9504_vm1, %v19691_v39 }
 0x687   : > { %15455 = vmatprep.subr.msk.mxu0 %vm9511_vm0, %v19699_v15 }
 0x68a   : > { %15456 = vmatpush3.msk.msra.mxu0 %vm9511_vm0, %v19699_v15 }
 0x68b   : > { %15458 = vmatmul.mubr.msk.f32.vlgmr.msra.gmra.mrb[138].mxu0 %vm9504_vm1, %v19689_v12 }
 0x692   : > { %v15288_v33 = vpop.f32.mrb[118].mxu1 }
 0x693   : > { %v9662_v18 = vpop.f32.mrb[119].mxu1 }
 0x6a5   : > { %v15297_v9 = vpop.f32.mrb[120].mxu0 }
 0x6a6   : > { %v9743_v45 = vpop.f32.mrb[121].mxu0 }
 0x6b8   : > { %v15306_v2 = vpop.f32.mrb[120].mxu1 }
 0x6b9   : > { %v9824_v35 = vpop.f32.mrb[121].mxu1 }
 0x6cb   : > { %v15315_v4 = vpop.f32.mrb[122].mxu0 }
 0x6cc   : > { %v9905_v55 = vpop.f32.mrb[123].mxu0 }
 0x6de   : > { %v19855_v27 = vpop.f32.mrb[122].mxu1 }
 0x6df   : > { %v19857_v58 = vpop.f32.mrb[123].mxu1 }
 0x6f1   : > { %v15333_v49 = vpop.f32.mrb[124].mxu0 }
 0x6f2   : > { %v10067_v57 = vpop.f32.mrb[125].mxu0 }
 0x704   : > { %v19859_v14 = vpop.f32.mrb[124].mxu1 }
 0x705   : > { %v19861_v56 = vpop.f32.mrb[125].mxu1 }
 0x717   : > { %v15351_v53 = vpop.f32.mrb[126].mxu0 }
 0x718   : > { %v10229_v43 = vpop.f32.mrb[127].mxu0 }
 0x72a   : > { %v19863_v62 = vpop.f32.mrb[126].mxu1 }
 0x72b   : > { %v19865_v38 = vpop.f32.mrb[127].mxu1 }
 0x730   : > { %v15378_v44 = vpop.f32.mrb[128].mxu1 }
 0x731   : > { %v11229_v26 = vmax.f32 %v15279_v6, %v15378_v44  ;;  %v10469_v1 = vpop.f32.mrb[129].mxu1 }
 0x732   : > { %v11228_v63 = vmax.f32 %v9581_v19, %v10469_v1 }
 0x733   : > { %11252 = vst.msk [vmem:[%s19871_s15 + $0x8] sm:$0xff] %vm11250_vm4, %v11229_v26 }
 0x734   : > { %11251 = vst.msk [vmem:[%s19871_s15] sm:$0xff] %vm11250_vm4, %v11228_v63 }
 0x736   : > { %v15396_v13 = vpop.f32.mrb[130].mxu1 }
 0x737   : > { %v11233_v47 = vmax.f32 %v15297_v9, %v15396_v13  ;;  %v10619_v52 = vpop.f32.mrb[131].mxu1 }
 0x738   : > { %v11232_v41 = vmax.f32 %v9743_v45, %v10619_v52 }
 0x739   : > { %11256 = vst.msk [vmem:[%s19871_s15 + $0x28] sm:$0xff] %vm11250_vm4, %v11233_v47 }
 0x73a   : > { %11255 = vst.msk [vmem:[%s19871_s15 + $0x20] sm:$0xff] %vm11250_vm4, %v11232_v41 }
 0x73c   : > { %v15414_v48 = vpop.f32.mrb[132].mxu1 }
 0x73d   : > { %v11237_v22 = vmax.f32 %v15315_v4, %v15414_v48  ;;  %v15369_v37 = vpop.f32.mrb[128].mxu0  ;;  %v10769_v61 = vpop.f32.mrb[133].mxu1 }
 0x73e   : > { %v11236_v46 = vmax.f32 %v9905_v55, %v10769_v61  ;;  %v10391_v16 = vpop.f32.mrb[129].mxu0 }
 0x73f   : > { %11260 = vst.msk [vmem:[%s19871_s15 + $0x48] sm:$0xff] %vm11250_vm4, %v11237_v22 }
 0x740   : > { %11259 = vst.msk [vmem:[%s19871_s15 + $0x40] sm:$0xff] %vm11250_vm4, %v11236_v46 }
 0x743   : > { %v15387_v60 = vpop.f32.mrb[130].mxu0 }
 0x744   : > { %v11231_v8 = vmax.f32 %v15288_v33, %v15387_v60  ;;  %v15432_v3 = vpop.f32.mrb[134].mxu1  ;;  %v10544_v29 = vpop.f32.mrb[131].mxu0 }
 0x745   : > { %v11241_v23 = vmax.f32 %v15333_v49, %v15432_v3  ;;  %v11230_v20 = vmax.f32 %v9662_v18, %v10544_v29  ;;  %v10919_v36 = vpop.f32.mrb[135].mxu1 }
 0x746   : > { %11254 = vst.msk [vmem:[%s19871_s15 + $0x18] sm:$0xff] %vm11250_vm4, %v11231_v8  ;;  %v11240_v30 = vmax.f32 %v10067_v57, %v10919_v36 }
 0x747   : > { %11264 = vst.msk [vmem:[%s19871_s15 + $0x68] sm:$0xff] %vm11250_vm4, %v11241_v23  ;;  %11253 = vst.msk [vmem:[%s19871_s15 + $0x10] sm:$0xff] %vm11250_vm4, %v11230_v20 }
 0x748   : > { %11263 = vst.msk [vmem:[%s19871_s15 + $0x60] sm:$0xff] %vm11250_vm4, %v11240_v30 }
 0x74a   : > { %v15405_v54 = vpop.f32.mrb[132].mxu0 }
 0x74b   : > { %v11235_v34 = vmax.f32 %v15306_v2, %v15405_v54  ;;  %v15450_v17 = vpop.f32.mrb[136].mxu1  ;;  %v10694_v32 = vpop.f32.mrb[133].mxu0 }
 0x74c   : > { %v11245_v59 = vmax.f32 %v15351_v53, %v15450_v17  ;;  %v11234_v12 = vmax.f32 %v9824_v35, %v10694_v32  ;;  %v11069_v39 = vpop.f32.mrb[137].mxu1 }
 0x74d   : > { %11258 = vst.msk [vmem:[%s19871_s15 + $0x38] sm:$0xff] %vm11250_vm4, %v11235_v34  ;;  %v11244_v15 = vmax.f32 %v10229_v43, %v11069_v39 }
 0x74e   : > { %11268 = vst.msk [vmem:[%s19871_s15 + $0x88] sm:$0xff] %vm11250_vm4, %v11245_v59  ;;  %11257 = vst.msk [vmem:[%s19871_s15 + $0x30] sm:$0xff] %vm11250_vm4, %v11234_v12 }
 0x74f   : > { %11267 = vst.msk [vmem:[%s19871_s15 + $0x80] sm:$0xff] %vm11250_vm4, %v11244_v15 }
 0x751   : > { %v15423_v7 = vpop.f32.mrb[134].mxu0 }
 0x752   : > { %v11239_v25 = vmax.f32 %v19855_v27, %v15423_v7  ;;  %v15468_v10 = vpop.f32.mrb[138].mxu1  ;;  %v10844_v42 = vpop.f32.mrb[135].mxu0 }
 0x753   : > { %v11249_v24 = vmax.f32 %v15369_v37, %v15468_v10  ;;  %v11238_v40 = vmax.f32 %v19857_v58, %v10844_v42  ;;  %v11219_v28 = vpop.f32.mrb[139].mxu1 }
 0x754   : > { %11262 = vst.msk [vmem:[%s19871_s15 + $0x58] sm:$0xff] %vm11250_vm4, %v11239_v25  ;;  %v11248_v50 = vmax.f32 %v10391_v16, %v11219_v28 }
 0x755   : > { %11272 = vst.msk [vmem:[%s19871_s15 + $0xa8] sm:$0xff] %vm11250_vm4, %v11249_v24  ;;  %11261 = vst.msk [vmem:[%s19871_s15 + $0x50] sm:$0xff] %vm11250_vm4, %v11238_v40 }
 0x756   : > { %11271 = vst.msk [vmem:[%s19871_s15 + $0xa0] sm:$0xff] %vm11250_vm4, %v11248_v50 }
 0x758   : > { %v15441_v21 = vpop.f32.mrb[136].mxu0 }
 0x759   : > { %v11243_v31 = vmax.f32 %v19859_v14, %v15441_v21  ;;  %v10994_v51 = vpop.f32.mrb[137].mxu0 }
 0x75a   : > { %v11242_v5 = vmax.f32 %v19861_v56, %v10994_v51 }
 0x75b   : > { %11266 = vst.msk [vmem:[%s19871_s15 + $0x78] sm:$0xff] %vm11250_vm4, %v11243_v31 }
 0x75c   : > { %11265 = vst.msk [vmem:[%s19871_s15 + $0x70] sm:$0xff] %vm11250_vm4, %v11242_v5 }
 0x75e   : > { %v15459_v11 = vpop.f32.mrb[138].mxu0 }
 0x75f   : > { %v11247_v0 = vmax.f32 %v19863_v62, %v15459_v11  ;;  %v11144_v6 = vpop.f32.mrb[139].mxu0 }
 0x760   : > { %v11246_v19 = vmax.f32 %v19865_v38, %v11144_v6 }
 0x761   : > { %11270 = vst.msk [vmem:[%s19871_s15 + $0x98] sm:$0xff] %vm11250_vm4, %v11247_v0 }
 0x762   : > { %11269 = vst.msk [vmem:[%s19871_s15 + $0x90] sm:$0xff] %vm11250_vm4, %v11246_v19 }
 0x763 PF: > { %s17_s18 = sadd.s32 1, %s17075_s18  }
 0x764   : > { %p14_p5 = scmp.ge.s32.totalorder %s17_s18, 4  }
 0x766   :  { %16 = sbr.rel (!%p14_p5) target bundleno = 2 (0x2), region = 79 }
 0x76d   :  { %11294 = vsyncpa [#allocation3], 1 }
 0x76e   :  { %11296 = vsyncpa [#allocation3 + $0x1], 1 }
 0x76f   :  { %11297 = vsyncpa [#allocation5], 1 }

</bundles_post_ra>
